<compile_context>
chip_gen: v6e
topology: v6e:2x2x1
jax: 0.10.0
libtpu: 0.0.40
codegen_flags: <defaults>
</compile_context>

<pallas_src>
import jax
import jax.numpy as jnp
from jax.experimental import pallas as pl
from jax.experimental.pallas import tpu as pltpu

LANE = 512                  # lane-dense width (multiple of 128)
TILE_ROWS = 2048            # 2048 * 512 * 4 B = 4 MiB per f32 block
_MIN_PALLAS_N = 128 * 1024  # below this, plain fused XLA wins (launch overhead)


def _scale_shift_kernel(w_ref, b_ref, x_ref, out_ref):
    # w_ref: SMEM (1, 1); b_ref: SMEM (1,); x_ref/out_ref: VMEM (tile_rows, LANE).
    # in_features == out_features == 1 -> the linear layer is a VPU scale + shift.
    out_ref[...] = x_ref[...] * w_ref[0, 0] + b_ref[0]


def _dimension_semantics():
    # Only CORE_PARALLEL actually shards grid steps across v7x's 2 TensorCores;
    # plain "parallel" is the safe default on single-TC chips (v5e / v6e).
    try:
        kind = jax.devices()[0].device_kind.lower()
    except Exception:
        kind = ""
    if "v7" in kind and hasattr(pltpu, "CORE_PARALLEL"):
        return (pltpu.CORE_PARALLEL,)
    return ("parallel",)


def _scale_shift_pallas(x2d, weight, bias):
    rows, lane = x2d.shape
    # Full-extent block when rows < TILE_ROWS (relies on the "block equals full
    # array dim" exemption from the (8, 128) divisibility rule for the sublane dim).
    tile_rows = min(TILE_ROWS, rows)
    grid = (pl.cdiv(rows, tile_rows),)   # last block may be partial -> Pallas masks it
    n_elems = rows * lane
    return pl.pallas_call(
        _scale_shift_kernel,
        out_shape=jax.ShapeDtypeStruct((rows, lane), x2d.dtype),
        grid=grid,
        in_specs=[
            pl.BlockSpec(memory_space=pltpu.SMEM),              # weight (resident scalar)
            pl.BlockSpec(memory_space=pltpu.SMEM),              # bias   (resident scalar)
            pl.BlockSpec((tile_rows, lane), lambda i: (i, 0)),  # x tile
        ],
        out_specs=pl.BlockSpec((tile_rows, lane), lambda i: (i, 0)),
        compiler_params=pltpu.CompilerParams(
            dimension_semantics=_dimension_semantics(),
            vmem_limit_bytes=32 * 1024 * 1024,
        ),
        cost_estimate=pl.CostEstimate(
            flops=2 * n_elems, transcendentals=0, bytes_accessed=8 * n_elems),
    )(weight, bias, x2d)


def linear_regression_forward(x, weight, bias):
    """Forward pass of LinearRegression: x @ weight.T + bias (specialized to 1x1)."""
    n, in_f = x.shape
    out_f, w_in = weight.shape
    assert in_f == 1 and out_f == 1 and w_in == 1, "specialized for nn.Linear(1, 1)"

    w = weight[0, 0]
    b = bias[0]

    if n < _MIN_PALLAS_N:
        # Tiny batch: skip the kernel, let XLA fuse the scale+shift.
        return x * w + b

    rows = n // LANE
    main_n = rows * LANE

    if main_n == n:
        # Zero-copy fast path: (N, 1) -> (rows, LANE) is a pure row-major reshape.
        out2d = _scale_shift_pallas(x.reshape(rows, LANE), weight, bias)
        return out2d.reshape(n, out_f)

    # Ragged N: Pallas on the LANE-aligned prefix, tiny XLA epilogue on the
    # (< LANE)-element tail.
    x_flat = x.reshape(-1)
    out_main = _scale_shift_pallas(
        x_flat[:main_n].reshape(rows, LANE), weight, bias).reshape(main_n, out_f)
    out_tail = (x_flat[main_n:] * w + b).reshape(n - main_n, out_f)
    return jnp.concatenate([out_main, out_tail], axis=0)


if __name__ == "__main__":
    key = jax.random.PRNGKey(0)
    kw, kb, k1, k2, k3 = jax.random.split(key, 5)

    # nn.Linear(1, 1) default init: U(-1/sqrt(in), 1/sqrt(in)) with in=1 -> U(-1, 1).
    weight = jax.random.uniform(kw, (1, 1), jnp.float32, minval=-1.0, maxval=1.0)
    bias = jax.random.uniform(kb, (1,), jnp.float32, minval=-1.0, maxval=1.0)

    fwd = jax.jit(linear_regression_forward)

    def check(x):
        out = jax.block_until_ready(fwd(x, weight, bias))
        ref = x @ weight.T + bias
        assert out.shape == x.shape
        assert jnp.allclose(out, ref, atol=1e-6), f"mismatch vs reference at N={x.shape[0]}"

    # 1) Divisible N: zero-copy reshape path, single full (2048, 512) block, grid=(1,).
    check(jax.random.normal(k1, (TILE_ROWS * LANE, 1), jnp.float32))

    # 2) Ragged N: multi-step grid (3 blocks, last one partially masked) + tail epilogue.
    check(jax.random.normal(k2, (2 * TILE_ROWS * LANE + 513 + 265, 1), jnp.float32))

    # 3) Tiny batch (original demo scale): XLA fallback path.
    check(jax.random.normal(k3, (8, 1), jnp.float32))

    print("KERNEL_OK")
</pallas_src>

<mosaic_0001>
module attributes {stable_mosaic.version = 11 : i64} {
  func.func @_scale_shift_kernel(%arg0: i32, %arg1: memref<1x1xf32, #tpu.memory_space<smem>>, %arg2: memref<1xf32, #tpu.memory_space<smem>>, %arg3: memref<2048x512xf32, #tpu.memory_space<vmem>>, %arg4: memref<2048x512xf32, #tpu.memory_space<vmem>>) attributes {dimension_semantics = [#tpu.dimension_semantics<parallel>], iteration_bounds = array<i64: 1>, scalar_prefetch = 0 : i64, scratch_operands = 0 : i64, tpu.core_type = #tpu.core_type<tc>, window_params = [{transform_indices = @transform_0, window_bounds = array<i64: 1, 1>}, {transform_indices = @transform_1, window_bounds = array<i64: 1>}, {transform_indices = @transform_2, window_bounds = array<i64: 2048, 512>}, {transform_indices = @transform_3, window_bounds = array<i64: 2048, 512>}]} {
    %c0 = arith.constant 0 : index
    %c0_0 = arith.constant 0 : index
    %0 = vector.load %arg3[%c0, %c0_0] : memref<2048x512xf32, #tpu.memory_space<vmem>>, vector<2048x512xf32>
    %c0_1 = arith.constant 0 : index
    %c0_2 = arith.constant 0 : index
    %1 = memref.load %arg1[%c0_1, %c0_2] : memref<1x1xf32, #tpu.memory_space<smem>>
    %2 = vector.broadcast %1 : f32 to vector<2048x512xf32>
    %3 = arith.mulf %0, %2 : vector<2048x512xf32>
    %c0_3 = arith.constant 0 : index
    %4 = memref.load %arg2[%c0_3] : memref<1xf32, #tpu.memory_space<smem>>
    %5 = vector.broadcast %4 : f32 to vector<2048x512xf32>
    %6 = arith.addf %3, %5 : vector<2048x512xf32>
    %c0_4 = arith.constant 0 : index
    %c0_5 = arith.constant 0 : index
    %7 = vector.load %arg4[%c0_4, %c0_5] : memref<2048x512xf32, #tpu.memory_space<vmem>>, vector<2048x512xf32>
    tpu.vector_store %arg4[%c0_4, %c0_5], %6 {strides = array<i32>} : memref<2048x512xf32, #tpu.memory_space<vmem>>, vector<2048x512xf32>,
    return
  }
  func.func @transform_0(%arg0: i32) -> (i32, i32) {
    %c0_i32 = arith.constant 0 : i32
    %c0_i32_0 = arith.constant 0 : i32
    %c0_i32_1 = arith.constant 0 : i32
    return %c0_i32, %c0_i32_0 : i32, i32
  }
  func.func @transform_1(%arg0: i32) -> i32 {
    %c0_i32 = arith.constant 0 : i32
    %c0_i32_0 = arith.constant 0 : i32
    return %c0_i32 : i32
  }
  func.func @transform_2(%arg0: i32) -> (i32, i32) {
    %c0_i32 = arith.constant 0 : i32
    %c0_i32_0 = arith.constant 0 : i32
    return %arg0, %c0_i32 : i32, i32
  }
  func.func @transform_3(%arg0: i32) -> (i32, i32) {
    %c0_i32 = arith.constant 0 : i32
    %c0_i32_0 = arith.constant 0 : i32
    return %arg0, %c0_i32 : i32, i32
  }
}

</mosaic_0001>

<bundles_post_ra>
// kernel: linear_regression_forward.1
= control target key start
LH: loop header
LB: loop body
LE: loop exit
PB: predicated region body
PF: predicated region fallthrough
CT: control target
= control target key end

     0   :  { %s12342_s0 = inlined_call_operand.<no memory space> [shape: f32[1,1], index: 0, kind: input, shape index: {}]   ;;  %s12343_s1 = inlined_call_operand.<no memory space> [shape: f32[1], index: 1, kind: input, shape index: {}]   ;;  %s12344_s2 = inlined_call_operand.vmem [shape: f32[2048,512], index: 2, kind: input, shape index: {}]   ;;  %s12345_s3 = inlined_call_operand.vmem [shape: f32[2048,512], index: 3, kind: output, shape index: {}]  }
   0x1   :  { %v16_v0 = vld [vmem:[%s12344_s2] sm:$0xff]  ;;  %v4146_v1 = vstv %s12342_s0  ;;  %v4151_v2 = vstv %s12343_s1  ;;  %v17_v3 = vld [vmem:[%s12344_s2 + $0x8] sm:$0xff] }
   0x2   :  { %v1042_v4 = vmul.f32 %v4146_v1, %v16_v0  ;;  %v1043_v5 = vmul.f32 %v4146_v1, %v17_v3  ;;  %v18_v6 = vld [vmem:[%s12344_s2 + $0x10] sm:$0xff]  ;;  %v19_v7 = vld [vmem:[%s12344_s2 + $0x18] sm:$0xff]  ;;  %v20_v8 = vld [vmem:[%s12344_s2 + $0x20] sm:$0xff] }
   0x3   :  { %v1044_v9 = vmul.f32 %v4146_v1, %v18_v6  ;;  %v1045_v10 = vmul.f32 %v4146_v1, %v19_v7  ;;  %v1046_v11 = vmul.f32 %v4146_v1, %v20_v8  ;;  %v21_v12 = vld [vmem:[%s12344_s2 + $0x28] sm:$0xff]  ;;  %v22_v13 = vld [vmem:[%s12344_s2 + $0x30] sm:$0xff]  ;;  %v23_v14 = vld [vmem:[%s12344_s2 + $0x38] sm:$0xff] }
   0x4   :  { %v2068_v15 = vadd.f32 %v4151_v2, %v1042_v4  ;;  %v2069_v16 = vadd.f32 %v4151_v2, %v1043_v5  ;;  %v1047_v17 = vmul.f32 %v4146_v1, %v21_v12  ;;  %v1048_v18 = vmul.f32 %v4146_v1, %v22_v13  ;;  %v24_v19 = vld [vmem:[%s12344_s2 + $0x40] sm:$0xff]  ;;  %v25_v20 = vld [vmem:[%s12344_s2 + $0x48] sm:$0xff]  ;;  %v26_v21 = vld [vmem:[%s12344_s2 + $0x50] sm:$0xff] }
   0x5   :  { %v2070_v22 = vadd.f32 %v4151_v2, %v1044_v9  ;;  %v2071_v23 = vadd.f32 %v4151_v2, %v1045_v10  ;;  %v2072_v24 = vadd.f32 %v4151_v2, %v1046_v11  ;;  %v1049_v25 = vmul.f32 %v4146_v1, %v23_v14  ;;  %v27_v26 = vld [vmem:[%s12344_s2 + $0x58] sm:$0xff]  ;;  %v28_v27 = vld [vmem:[%s12344_s2 + $0x60] sm:$0xff]  ;;  %v29_v28 = vld [vmem:[%s12344_s2 + $0x68] sm:$0xff] }
   0x6   :  { %3092 = vst [vmem:[%s12345_s3] sm:$0xff] %v2068_v15  ;;  %3093 = vst [vmem:[%s12345_s3 + $0x8] sm:$0xff] %v2069_v16  ;;  %v2073_v29 = vadd.f32 %v4151_v2, %v1047_v17  ;;  %v2074_v30 = vadd.f32 %v4151_v2, %v1048_v18  ;;  %v1050_v31 = vmul.f32 %v4146_v1, %v24_v19  ;;  %v30_v33 = vld [vmem:[%s12344_s2 + $0x70] sm:$0xff]  ;;  %v31_v34 = vld [vmem:[%s12344_s2 + $0x78] sm:$0xff] }
   0x7   :  { %v1051_v32 = vmul.f32 %v4146_v1, %v25_v20  ;;  %3094 = vst [vmem:[%s12345_s3 + $0x10] sm:$0xff] %v2070_v22  ;;  %3095 = vst [vmem:[%s12345_s3 + $0x18] sm:$0xff] %v2071_v23  ;;  %v2075_v35 = vadd.f32 %v4151_v2, %v1049_v25  ;;  %v1052_v36 = vmul.f32 %v4146_v1, %v26_v21  ;;  %v32_v39 = vld [vmem:[%s12344_s2 + $0x80] sm:$0xff]  ;;  %v33_v40 = vld [vmem:[%s12344_s2 + $0x88] sm:$0xff] }
   0x8   :  { %3096 = vst [vmem:[%s12345_s3 + $0x20] sm:$0xff] %v2072_v24  ;;  %v1053_v37 = vmul.f32 %v4146_v1, %v27_v26  ;;  %v1054_v38 = vmul.f32 %v4146_v1, %v28_v27  ;;  %3097 = vst [vmem:[%s12345_s3 + $0x28] sm:$0xff] %v2073_v29  ;;  %v2076_v41 = vadd.f32 %v4151_v2, %v1050_v31  ;;  %v34_v45 = vld [vmem:[%s12344_s2 + $0x90] sm:$0xff]  ;;  %v35_v46 = vld [vmem:[%s12344_s2 + $0x98] sm:$0xff] }
   0x9   :  { %3098 = vst [vmem:[%s12345_s3 + $0x30] sm:$0xff] %v2074_v30  ;;  %v2077_v42 = vadd.f32 %v4151_v2, %v1051_v32  ;;  %v1055_v43 = vmul.f32 %v4146_v1, %v29_v28  ;;  %v1056_v44 = vmul.f32 %v4146_v1, %v30_v33  ;;  %v36_v47 = vld [vmem:[%s12344_s2 + $0xa0] sm:$0xff]  ;;  %3099 = vst [vmem:[%s12345_s3 + $0x38] sm:$0xff] %v2075_v35  ;;  %v37_v52 = vld [vmem:[%s12344_s2 + $0xa8] sm:$0xff] }
   0xa   :  { %v2078_v48 = vadd.f32 %v4151_v2, %v1052_v36  ;;  %v2079_v49 = vadd.f32 %v4151_v2, %v1053_v37  ;;  %v2080_v50 = vadd.f32 %v4151_v2, %v1054_v38  ;;  %v1057_v51 = vmul.f32 %v4146_v1, %v31_v34  ;;  %v38_v53 = vld [vmem:[%s12344_s2 + $0xb0] sm:$0xff]  ;;  %3100 = vst [vmem:[%s12345_s3 + $0x40] sm:$0xff] %v2076_v41  ;;  %v39_v58 = vld [vmem:[%s12344_s2 + $0xb8] sm:$0xff]  ;;  %v40_v63 = vld [vmem:[%s12344_s2 + $0xc0] sm:$0xff] }
   0xb   :  { %3101 = vst [vmem:[%s12345_s3 + $0x48] sm:$0xff] %v2077_v42  ;;  %v2081_v54 = vadd.f32 %v4151_v2, %v1055_v43  ;;  %v2082_v55 = vadd.f32 %v4151_v2, %v1056_v44  ;;  %v1058_v56 = vmul.f32 %v4146_v1, %v32_v39  ;;  %v1059_v57 = vmul.f32 %v4146_v1, %v33_v40  ;;  %v41_v0 = vld [vmem:[%s12344_s2 + $0xc8] sm:$0xff]  ;;  %v42_v7 = vld [vmem:[%s12344_s2 + $0xd0] sm:$0xff]  ;;  %v43_v8 = vld [vmem:[%s12344_s2 + $0xd8] sm:$0xff] }
   0xc   :  { %3102 = vst [vmem:[%s12345_s3 + $0x50] sm:$0xff] %v2078_v48  ;;  %3103 = vst [vmem:[%s12345_s3 + $0x58] sm:$0xff] %v2079_v49  ;;  %v2083_v59 = vadd.f32 %v4151_v2, %v1057_v51  ;;  %v1060_v60 = vmul.f32 %v4146_v1, %v34_v45  ;;  %v1061_v61 = vmul.f32 %v4146_v1, %v35_v46  ;;  %v44_v9 = vld [vmem:[%s12344_s2 + $0xe0] sm:$0xff]  ;;  %v45_v14 = vld [vmem:[%s12344_s2 + $0xe8] sm:$0xff] }
   0xd   :  { %3104 = vst [vmem:[%s12345_s3 + $0x60] sm:$0xff] %v2080_v50  ;;  %v1062_v62 = vmul.f32 %v4146_v1, %v36_v47  ;;  %3105 = vst [vmem:[%s12345_s3 + $0x68] sm:$0xff] %v2081_v54  ;;  %v2084_v3 = vadd.f32 %v4151_v2, %v1058_v56  ;;  %v2085_v4 = vadd.f32 %v4151_v2, %v1059_v57  ;;  %v46_v15 = vld [vmem:[%s12344_s2 + $0xf0] sm:$0xff]  ;;  %v47_v20 = vld [vmem:[%s12344_s2 + $0xf8] sm:$0xff] }
   0xe   :  { %3106 = vst [vmem:[%s12345_s3 + $0x70] sm:$0xff] %v2082_v55  ;;  %v1063_v5 = vmul.f32 %v4146_v1, %v37_v52  ;;  %v1064_v6 = vmul.f32 %v4146_v1, %v38_v53  ;;  %3107 = vst [vmem:[%s12345_s3 + $0x78] sm:$0xff] %v2083_v59  ;;  %v2086_v10 = vadd.f32 %v4151_v2, %v1060_v60  ;;  %v48_v25 = vld [vmem:[%s12344_s2 + $0x100] sm:$0xff]  ;;  %v49_v26 = vld [vmem:[%s12344_s2 + $0x108] sm:$0xff] }
   0xf   :  { %v2087_v11 = vadd.f32 %v4151_v2, %v1061_v61  ;;  %v2088_v12 = vadd.f32 %v4151_v2, %v1062_v62  ;;  %v1065_v13 = vmul.f32 %v4146_v1, %v39_v58  ;;  %3108 = vst [vmem:[%s12345_s3 + $0x80] sm:$0xff] %v2084_v3  ;;  %3109 = vst [vmem:[%s12345_s3 + $0x88] sm:$0xff] %v2085_v4  ;;  %v50_v31 = vld [vmem:[%s12344_s2 + $0x110] sm:$0xff]  ;;  %v51_v32 = vld [vmem:[%s12344_s2 + $0x118] sm:$0xff] }
  0x10   :  { %v2089_v16 = vadd.f32 %v4151_v2, %v1063_v5  ;;  %v2090_v17 = vadd.f32 %v4151_v2, %v1064_v6  ;;  %v1066_v18 = vmul.f32 %v4146_v1, %v40_v63  ;;  %v1067_v19 = vmul.f32 %v4146_v1, %v41_v0  ;;  %3110 = vst [vmem:[%s12345_s3 + $0x90] sm:$0xff] %v2086_v10  ;;  %v52_v33 = vld [vmem:[%s12344_s2 + $0x120] sm:$0xff]  ;;  %v53_v38 = vld [vmem:[%s12344_s2 + $0x128] sm:$0xff]  ;;  %v54_v39 = vld [vmem:[%s12344_s2 + $0x130] sm:$0xff] }
  0x11   :  { %3111 = vst [vmem:[%s12345_s3 + $0x98] sm:$0xff] %v2087_v11  ;;  %3112 = vst [vmem:[%s12345_s3 + $0xa0] sm:$0xff] %v2088_v12  ;;  %v2091_v21 = vadd.f32 %v4151_v2, %v1065_v13  ;;  %v1068_v22 = vmul.f32 %v4146_v1, %v42_v7  ;;  %v1069_v23 = vmul.f32 %v4146_v1, %v43_v8  ;;  %v55_v44 = vld [vmem:[%s12344_s2 + $0x138] sm:$0xff]  ;;  %v56_v49 = vld [vmem:[%s12344_s2 + $0x140] sm:$0xff] }
  0x12   :  { %v1070_v24 = vmul.f32 %v4146_v1, %v44_v9  ;;  %3113 = vst [vmem:[%s12345_s3 + $0xa8] sm:$0xff] %v2089_v16  ;;  %3114 = vst [vmem:[%s12345_s3 + $0xb0] sm:$0xff] %v2090_v17  ;;  %v2092_v27 = vadd.f32 %v4151_v2, %v1066_v18  ;;  %v2093_v28 = vadd.f32 %v4151_v2, %v1067_v19  ;;  %v57_v50 = vld [vmem:[%s12344_s2 + $0x148] sm:$0xff]  ;;  %v58_v55 = vld [vmem:[%s12344_s2 + $0x150] sm:$0xff] }
  0x13   :  { %v1071_v29 = vmul.f32 %v4146_v1, %v45_v14  ;;  %v1072_v30 = vmul.f32 %v4146_v1, %v46_v15  ;;  %3115 = vst [vmem:[%s12345_s3 + $0xb8] sm:$0xff] %v2091_v21  ;;  %v2094_v34 = vadd.f32 %v4151_v2, %v1068_v22  ;;  %v2095_v35 = vadd.f32 %v4151_v2, %v1069_v23  ;;  %v59_v56 = vld [vmem:[%s12344_s2 + $0x158] sm:$0xff]  ;;  %v60_v57 = vld [vmem:[%s12344_s2 + $0x160] sm:$0xff]  ;;  %v61_v62 = vld [vmem:[%s12344_s2 + $0x168] sm:$0xff] }
  0x14   :  { %v2096_v36 = vadd.f32 %v4151_v2, %v1070_v24  ;;  %v1073_v37 = vmul.f32 %v4146_v1, %v47_v20  ;;  %3116 = vst [vmem:[%s12345_s3 + $0xc0] sm:$0xff] %v2092_v27  ;;  %3117 = vst [vmem:[%s12345_s3 + $0xc8] sm:$0xff] %v2093_v28  ;;  %v1074_v42 = vmul.f32 %v4146_v1, %v48_v25  ;;  %v62_v63 = vld [vmem:[%s12344_s2 + $0x170] sm:$0xff]  ;;  %v63_v6 = vld [vmem:[%s12344_s2 + $0x178] sm:$0xff] }
  0x15   :  { %v2097_v40 = vadd.f32 %v4151_v2, %v1071_v29  ;;  %v2098_v41 = vadd.f32 %v4151_v2, %v1072_v30  ;;  %v1075_v43 = vmul.f32 %v4146_v1, %v49_v26  ;;  %3118 = vst [vmem:[%s12345_s3 + $0xd0] sm:$0xff] %v2094_v34  ;;  %3119 = vst [vmem:[%s12345_s3 + $0xd8] sm:$0xff] %v2095_v35  ;;  %v64_v11 = vld [vmem:[%s12344_s2 + $0x180] sm:$0xff]  ;;  %v65_v12 = vld [vmem:[%s12344_s2 + $0x188] sm:$0xff] }
  0x16   :  { %3120 = vst [vmem:[%s12345_s3 + $0xe0] sm:$0xff] %v2096_v36  ;;  %v2099_v45 = vadd.f32 %v4151_v2, %v1073_v37  ;;  %v1076_v46 = vmul.f32 %v4146_v1, %v50_v31  ;;  %v1077_v47 = vmul.f32 %v4146_v1, %v51_v32  ;;  %v1078_v48 = vmul.f32 %v4146_v1, %v52_v33  ;;  %v66_v17 = vld [vmem:[%s12344_s2 + $0x190] sm:$0xff]  ;;  %v67_v18 = vld [vmem:[%s12344_s2 + $0x198] sm:$0xff]  ;;  %v68_v19 = vld [vmem:[%s12344_s2 + $0x1a0] sm:$0xff] }
  0x17   :  { %3121 = vst [vmem:[%s12345_s3 + $0xe8] sm:$0xff] %v2097_v40  ;;  %3122 = vst [vmem:[%s12345_s3 + $0xf0] sm:$0xff] %v2098_v41  ;;  %v2100_v51 = vadd.f32 %v4151_v2, %v1074_v42  ;;  %v2101_v52 = vadd.f32 %v4151_v2, %v1075_v43  ;;  %v1079_v53 = vmul.f32 %v4146_v1, %v53_v38  ;;  %v69_v24 = vld [vmem:[%s12344_s2 + $0x1a8] sm:$0xff]  ;;  %v70_v25 = vld [vmem:[%s12344_s2 + $0x1b0] sm:$0xff] }
  0x18   :  { %v1080_v54 = vmul.f32 %v4146_v1, %v54_v39  ;;  %3123 = vst [vmem:[%s12345_s3 + $0xf8] sm:$0xff] %v2099_v45  ;;  %v2102_v58 = vadd.f32 %v4151_v2, %v1076_v46  ;;  %v2103_v59 = vadd.f32 %v4151_v2, %v1077_v47  ;;  %v2104_v60 = vadd.f32 %v4151_v2, %v1078_v48  ;;  %v71_v30 = vld [vmem:[%s12344_s2 + $0x1b8] sm:$0xff]  ;;  %v72_v35 = vld [vmem:[%s12344_s2 + $0x1c0] sm:$0xff]  ;;  %v73_v36 = vld [vmem:[%s12344_s2 + $0x1c8] sm:$0xff] }
  0x19   :  { %v1081_v61 = vmul.f32 %v4146_v1, %v55_v44  ;;  %3124 = vst [vmem:[%s12345_s3 + $0x100] sm:$0xff] %v2100_v51  ;;  %3125 = vst [vmem:[%s12345_s3 + $0x108] sm:$0xff] %v2101_v52  ;;  %v2105_v0 = vadd.f32 %v4151_v2, %v1079_v53  ;;  %v1082_v4 = vmul.f32 %v4146_v1, %v56_v49  ;;  %v74_v41 = vld [vmem:[%s12344_s2 + $0x1d0] sm:$0xff]  ;;  %v75_v42 = vld [vmem:[%s12344_s2 + $0x1d8] sm:$0xff] }
  0x1a   :  { %v2106_v3 = vadd.f32 %v4151_v2, %v1080_v54  ;;  %v1083_v5 = vmul.f32 %v4146_v1, %v57_v50  ;;  %3126 = vst [vmem:[%s12345_s3 + $0x110] sm:$0xff] %v2102_v58  ;;  %3127 = vst [vmem:[%s12345_s3 + $0x118] sm:$0xff] %v2103_v59  ;;  %v1084_v8 = vmul.f32 %v4146_v1, %v58_v55  ;;  %v76_v43 = vld [vmem:[%s12344_s2 + $0x1e0] sm:$0xff]  ;;  %v77_v48 = vld [vmem:[%s12344_s2 + $0x1e8] sm:$0xff] }
  0x1b   :  { %3128 = vst [vmem:[%s12345_s3 + $0x120] sm:$0xff] %v2104_v60  ;;  %v2107_v7 = vadd.f32 %v4151_v2, %v1081_v61  ;;  %v1085_v9 = vmul.f32 %v4146_v1, %v59_v56  ;;  %v1086_v10 = vmul.f32 %v4146_v1, %v60_v57  ;;  %3129 = vst [vmem:[%s12345_s3 + $0x128] sm:$0xff] %v2105_v0  ;;  %v78_v49 = vld [vmem:[%s12344_s2 + $0x1f0] sm:$0xff]  ;;  %v79_v54 = vld [vmem:[%s12344_s2 + $0x1f8] sm:$0xff] }
  0x1c   :  { %3130 = vst [vmem:[%s12345_s3 + $0x130] sm:$0xff] %v2106_v3  ;;  %v2108_v13 = vadd.f32 %v4151_v2, %v1082_v4  ;;  %v2109_v14 = vadd.f32 %v4151_v2, %v1083_v5  ;;  %v1087_v15 = vmul.f32 %v4146_v1, %v61_v62  ;;  %v1088_v16 = vmul.f32 %v4146_v1, %v62_v63  ;;  %v80_v59 = vld [vmem:[%s12344_s2 + $0x200] sm:$0xff]  ;;  %v81_v60 = vld [vmem:[%s12344_s2 + $0x208] sm:$0xff]  ;;  %v82_v3 = vld [vmem:[%s12344_s2 + $0x210] sm:$0xff] }
  0x1d   :  { %3131 = vst [vmem:[%s12345_s3 + $0x138] sm:$0xff] %v2107_v7  ;;  %v2110_v20 = vadd.f32 %v4151_v2, %v1084_v8  ;;  %v2111_v21 = vadd.f32 %v4151_v2, %v1085_v9  ;;  %v2112_v22 = vadd.f32 %v4151_v2, %v1086_v10  ;;  %v1089_v23 = vmul.f32 %v4146_v1, %v63_v6  ;;  %v83_v4 = vld [vmem:[%s12344_s2 + $0x218] sm:$0xff]  ;;  %v84_v5 = vld [vmem:[%s12344_s2 + $0x220] sm:$0xff]  ;;  %v85_v10 = vld [vmem:[%s12344_s2 + $0x228] sm:$0xff] }
  0x1e   :  { %3132 = vst [vmem:[%s12345_s3 + $0x140] sm:$0xff] %v2108_v13  ;;  %3133 = vst [vmem:[%s12345_s3 + $0x148] sm:$0xff] %v2109_v14  ;;  %v2113_v26 = vadd.f32 %v4151_v2, %v1087_v15  ;;  %v2114_v27 = vadd.f32 %v4151_v2, %v1088_v16  ;;  %v1090_v28 = vmul.f32 %v4146_v1, %v64_v11  ;;  %v86_v11 = vld [vmem:[%s12344_s2 + $0x230] sm:$0xff]  ;;  %v87_v16 = vld [vmem:[%s12344_s2 + $0x238] sm:$0xff] }
  0x1f   :  { %v1091_v29 = vmul.f32 %v4146_v1, %v65_v12  ;;  %3134 = vst [vmem:[%s12345_s3 + $0x150] sm:$0xff] %v2110_v20  ;;  %3135 = vst [vmem:[%s12345_s3 + $0x158] sm:$0xff] %v2111_v21  ;;  %v2115_v31 = vadd.f32 %v4151_v2, %v1089_v23  ;;  %v1092_v32 = vmul.f32 %v4146_v1, %v66_v17  ;;  %v88_v21 = vld [vmem:[%s12344_s2 + $0x240] sm:$0xff] }
  0x20   :  { %3136 = vst [vmem:[%s12345_s3 + $0x160] sm:$0xff] %v2112_v22  ;;  %v1093_v33 = vmul.f32 %v4146_v1, %v67_v18  ;;  %v1094_v34 = vmul.f32 %v4146_v1, %v68_v19  ;;  %3137 = vst [vmem:[%s12345_s3 + $0x168] sm:$0xff] %v2113_v26  ;;  %v2116_v37 = vadd.f32 %v4151_v2, %v1090_v28  ;;  %v89_v22 = vld [vmem:[%s12344_s2 + $0x248] sm:$0xff]  ;;  %v91_v28 = vld [vmem:[%s12344_s2 + $0x258] sm:$0xff] }
  0x21   :  { %3138 = vst [vmem:[%s12345_s3 + $0x170] sm:$0xff] %v2114_v27  ;;  %v2117_v38 = vadd.f32 %v4151_v2, %v1091_v29  ;;  %v1095_v39 = vmul.f32 %v4146_v1, %v69_v24  ;;  %v1096_v40 = vmul.f32 %v4146_v1, %v70_v25  ;;  %3139 = vst [vmem:[%s12345_s3 + $0x178] sm:$0xff] %v2115_v31  ;;  %v90_v27 = vld [vmem:[%s12344_s2 + $0x250] sm:$0xff]  ;;  %v92_v29 = vld [vmem:[%s12344_s2 + $0x260] sm:$0xff] }
  0x22   :  { %v2118_v44 = vadd.f32 %v4151_v2, %v1092_v32  ;;  %v2119_v45 = vadd.f32 %v4151_v2, %v1093_v33  ;;  %v2120_v46 = vadd.f32 %v4151_v2, %v1094_v34  ;;  %v1097_v47 = vmul.f32 %v4146_v1, %v71_v30  ;;  %3140 = vst [vmem:[%s12345_s3 + $0x180] sm:$0xff] %v2116_v37  ;;  %v93_v34 = vld [vmem:[%s12344_s2 + $0x268] sm:$0xff] }
  0x23   :  { %3141 = vst [vmem:[%s12345_s3 + $0x188] sm:$0xff] %v2117_v38  ;;  %v2121_v50 = vadd.f32 %v4151_v2, %v1095_v39  ;;  %v2122_v51 = vadd.f32 %v4151_v2, %v1096_v40  ;;  %v1098_v52 = vmul.f32 %v4146_v1, %v72_v35  ;;  %v1099_v53 = vmul.f32 %v4146_v1, %v73_v36  ;;  %v94_v35 = vld [vmem:[%s12344_s2 + $0x270] sm:$0xff]  ;;  %v95_v40 = vld [vmem:[%s12344_s2 + $0x278] sm:$0xff] }
  0x24   :  { %3142 = vst [vmem:[%s12345_s3 + $0x190] sm:$0xff] %v2118_v44  ;;  %3143 = vst [vmem:[%s12345_s3 + $0x198] sm:$0xff] %v2119_v45  ;;  %v2123_v55 = vadd.f32 %v4151_v2, %v1097_v47  ;;  %v1100_v56 = vmul.f32 %v4146_v1, %v74_v41  ;;  %v1101_v57 = vmul.f32 %v4146_v1, %v75_v42  ;;  %v96_v45 = vld [vmem:[%s12344_s2 + $0x280] sm:$0xff] }
  0x25   :  { %3144 = vst [vmem:[%s12345_s3 + $0x1a0] sm:$0xff] %v2120_v46  ;;  %v1102_v58 = vmul.f32 %v4146_v1, %v76_v43  ;;  %3145 = vst [vmem:[%s12345_s3 + $0x1a8] sm:$0xff] %v2121_v50  ;;  %v2124_v61 = vadd.f32 %v4151_v2, %v1098_v52  ;;  %v2125_v62 = vadd.f32 %v4151_v2, %v1099_v53  ;;  %v97_v46 = vld [vmem:[%s12344_s2 + $0x288] sm:$0xff]  ;;  %v99_v52 = vld [vmem:[%s12344_s2 + $0x298] sm:$0xff] }
  0x26   :  { %3146 = vst [vmem:[%s12345_s3 + $0x1b0] sm:$0xff] %v2122_v51  ;;  %v1103_v63 = vmul.f32 %v4146_v1, %v77_v48  ;;  %v1104_v0 = vmul.f32 %v4146_v1, %v78_v49  ;;  %3147 = vst [vmem:[%s12345_s3 + $0x1b8] sm:$0xff] %v2123_v55  ;;  %v2126_v6 = vadd.f32 %v4151_v2, %v1100_v56  ;;  %v98_v51 = vld [vmem:[%s12344_s2 + $0x290] sm:$0xff]  ;;  %v100_v53 = vld [vmem:[%s12344_s2 + $0x2a0] sm:$0xff] }
  0x27   :  { %v2127_v7 = vadd.f32 %v4151_v2, %v1101_v57  ;;  %v2128_v8 = vadd.f32 %v4151_v2, %v1102_v58  ;;  %v1105_v9 = vmul.f32 %v4146_v1, %v79_v54  ;;  %3148 = vst [vmem:[%s12345_s3 + $0x1c0] sm:$0xff] %v2124_v61  ;;  %3149 = vst [vmem:[%s12345_s3 + $0x1c8] sm:$0xff] %v2125_v62  ;;  %v101_v58 = vld [vmem:[%s12344_s2 + $0x2a8] sm:$0xff] }
  0x28   :  { %v2129_v12 = vadd.f32 %v4151_v2, %v1103_v63  ;;  %v2130_v13 = vadd.f32 %v4151_v2, %v1104_v0  ;;  %v1106_v14 = vmul.f32 %v4146_v1, %v80_v59  ;;  %v1107_v15 = vmul.f32 %v4146_v1, %v81_v60  ;;  %3150 = vst [vmem:[%s12345_s3 + $0x1d0] sm:$0xff] %v2126_v6  ;;  %v102_v59 = vld [vmem:[%s12344_s2 + $0x2b0] sm:$0xff]  ;;  %v103_v0 = vld [vmem:[%s12344_s2 + $0x2b8] sm:$0xff] }
  0x29   :  { %3151 = vst [vmem:[%s12345_s3 + $0x1d8] sm:$0xff] %v2127_v7  ;;  %3152 = vst [vmem:[%s12345_s3 + $0x1e0] sm:$0xff] %v2128_v8  ;;  %v2131_v17 = vadd.f32 %v4151_v2, %v1105_v9  ;;  %v1108_v18 = vmul.f32 %v4146_v1, %v82_v3  ;;  %v1109_v19 = vmul.f32 %v4146_v1, %v83_v4  ;;  %v104_v7 = vld [vmem:[%s12344_s2 + $0x2c0] sm:$0xff]  ;;  %v105_v8 = vld [vmem:[%s12344_s2 + $0x2c8] sm:$0xff] }
  0x2a   :  { %v1110_v20 = vmul.f32 %v4146_v1, %v84_v5  ;;  %3153 = vst [vmem:[%s12345_s3 + $0x1e8] sm:$0xff] %v2129_v12  ;;  %3154 = vst [vmem:[%s12345_s3 + $0x1f0] sm:$0xff] %v2130_v13  ;;  %v2132_v23 = vadd.f32 %v4151_v2, %v1106_v14  ;;  %v2133_v24 = vadd.f32 %v4151_v2, %v1107_v15  ;;  %v106_v13 = vld [vmem:[%s12344_s2 + $0x2d0] sm:$0xff]  ;;  %v107_v14 = vld [vmem:[%s12344_s2 + $0x2d8] sm:$0xff] }
  0x2b   :  { %v1111_v25 = vmul.f32 %v4146_v1, %v85_v10  ;;  %v1112_v26 = vmul.f32 %v4146_v1, %v86_v11  ;;  %3155 = vst [vmem:[%s12345_s3 + $0x1f8] sm:$0xff] %v2131_v17  ;;  %v2134_v30 = vadd.f32 %v4151_v2, %v1108_v18  ;;  %v2135_v31 = vadd.f32 %v4151_v2, %v1109_v19  ;;  %v108_v15 = vld [vmem:[%s12344_s2 + $0x2e0] sm:$0xff] }
  0x2c   :  { %v2136_v32 = vadd.f32 %v4151_v2, %v1110_v20  ;;  %v1113_v33 = vmul.f32 %v4146_v1, %v87_v16  ;;  %3156 = vst [vmem:[%s12345_s3 + $0x200] sm:$0xff] %v2132_v23  ;;  %3157 = vst [vmem:[%s12345_s3 + $0x208] sm:$0xff] %v2133_v24  ;;  %v1114_v38 = vmul.f32 %v4146_v1, %v88_v21  ;;  %v109_v20 = vld [vmem:[%s12344_s2 + $0x2e8] sm:$0xff]  ;;  %v110_v21 = vld [vmem:[%s12344_s2 + $0x2f0] sm:$0xff] }
  0x2d   :  { %v2137_v36 = vadd.f32 %v4151_v2, %v1111_v25  ;;  %v2138_v37 = vadd.f32 %v4151_v2, %v1112_v26  ;;  %v1115_v39 = vmul.f32 %v4146_v1, %v89_v22  ;;  %3158 = vst [vmem:[%s12345_s3 + $0x210] sm:$0xff] %v2134_v30  ;;  %3159 = vst [vmem:[%s12345_s3 + $0x218] sm:$0xff] %v2135_v31  ;;  %v111_v26 = vld [vmem:[%s12344_s2 + $0x2f8] sm:$0xff]  ;;  %v112_v31 = vld [vmem:[%s12344_s2 + $0x300] sm:$0xff] }
  0x2e   :  { %3160 = vst [vmem:[%s12345_s3 + $0x220] sm:$0xff] %v2136_v32  ;;  %v2139_v41 = vadd.f32 %v4151_v2, %v1113_v33  ;;  %v1116_v42 = vmul.f32 %v4146_v1, %v90_v27  ;;  %v1117_v43 = vmul.f32 %v4146_v1, %v91_v28  ;;  %v1118_v44 = vmul.f32 %v4146_v1, %v92_v29  ;;  %v113_v32 = vld [vmem:[%s12344_s2 + $0x308] sm:$0xff] }
  0x2f   :  { %3161 = vst [vmem:[%s12345_s3 + $0x228] sm:$0xff] %v2137_v36  ;;  %3162 = vst [vmem:[%s12345_s3 + $0x230] sm:$0xff] %v2138_v37  ;;  %v2140_v47 = vadd.f32 %v4151_v2, %v1114_v38  ;;  %v2141_v48 = vadd.f32 %v4151_v2, %v1115_v39  ;;  %v1119_v49 = vmul.f32 %v4146_v1, %v93_v34  ;;  %v114_v37 = vld [vmem:[%s12344_s2 + $0x310] sm:$0xff]  ;;  %v115_v38 = vld [vmem:[%s12344_s2 + $0x318] sm:$0xff] }
  0x30   :  { %v1120_v50 = vmul.f32 %v4146_v1, %v94_v35  ;;  %3163 = vst [vmem:[%s12345_s3 + $0x238] sm:$0xff] %v2139_v41  ;;  %v2142_v54 = vadd.f32 %v4151_v2, %v1116_v42  ;;  %v2143_v55 = vadd.f32 %v4151_v2, %v1117_v43  ;;  %v2144_v56 = vadd.f32 %v4151_v2, %v1118_v44  ;;  %v116_v39 = vld [vmem:[%s12344_s2 + $0x320] sm:$0xff]  ;;  %v117_v44 = vld [vmem:[%s12344_s2 + $0x328] sm:$0xff] }
  0x31   :  { %v1121_v57 = vmul.f32 %v4146_v1, %v95_v40  ;;  %3164 = vst [vmem:[%s12345_s3 + $0x240] sm:$0xff] %v2140_v47  ;;  %3165 = vst [vmem:[%s12345_s3 + $0x248] sm:$0xff] %v2141_v48  ;;  %v2145_v60 = vadd.f32 %v4151_v2, %v1119_v49  ;;  %v1122_v62 = vmul.f32 %v4146_v1, %v96_v45  ;;  %v118_v45 = vld [vmem:[%s12344_s2 + $0x330] sm:$0xff] }
  0x32   :  { %v2146_v61 = vadd.f32 %v4151_v2, %v1120_v50  ;;  %v1123_v63 = vmul.f32 %v4146_v1, %v97_v46  ;;  %3166 = vst [vmem:[%s12345_s3 + $0x250] sm:$0xff] %v2142_v54  ;;  %3167 = vst [vmem:[%s12345_s3 + $0x258] sm:$0xff] %v2143_v55  ;;  %v1124_v4 = vmul.f32 %v4146_v1, %v98_v51  ;;  %v119_v50 = vld [vmem:[%s12344_s2 + $0x338] sm:$0xff]  ;;  %v120_v55 = vld [vmem:[%s12344_s2 + $0x340] sm:$0xff] }
  0x33   :  { %3168 = vst [vmem:[%s12345_s3 + $0x260] sm:$0xff] %v2144_v56  ;;  %v2147_v3 = vadd.f32 %v4151_v2, %v1121_v57  ;;  %v1125_v5 = vmul.f32 %v4146_v1, %v99_v52  ;;  %v1126_v6 = vmul.f32 %v4146_v1, %v100_v53  ;;  %3169 = vst [vmem:[%s12345_s3 + $0x268] sm:$0xff] %v2145_v60  ;;  %v121_v56 = vld [vmem:[%s12344_s2 + $0x348] sm:$0xff] }
  0x34   :  { %3170 = vst [vmem:[%s12345_s3 + $0x270] sm:$0xff] %v2146_v61  ;;  %v2148_v9 = vadd.f32 %v4151_v2, %v1122_v62  ;;  %v2149_v10 = vadd.f32 %v4151_v2, %v1123_v63  ;;  %v1127_v11 = vmul.f32 %v4146_v1, %v101_v58  ;;  %v1128_v12 = vmul.f32 %v4146_v1, %v102_v59  ;;  %v122_v61 = vld [vmem:[%s12344_s2 + $0x350] sm:$0xff]  ;;  %v123_v62 = vld [vmem:[%s12344_s2 + $0x358] sm:$0xff]  ;;  %v124_v63 = vld [vmem:[%s12344_s2 + $0x360] sm:$0xff] }
  0x35   :  { %3171 = vst [vmem:[%s12345_s3 + $0x278] sm:$0xff] %v2147_v3  ;;  %v2150_v16 = vadd.f32 %v4151_v2, %v1124_v4  ;;  %v2151_v17 = vadd.f32 %v4151_v2, %v1125_v5  ;;  %v2152_v18 = vadd.f32 %v4151_v2, %v1126_v6  ;;  %v1129_v19 = vmul.f32 %v4146_v1, %v103_v0  ;;  %v125_v6 = vld [vmem:[%s12344_s2 + $0x368] sm:$0xff] }
  0x36   :  { %3172 = vst [vmem:[%s12345_s3 + $0x280] sm:$0xff] %v2148_v9  ;;  %3173 = vst [vmem:[%s12345_s3 + $0x288] sm:$0xff] %v2149_v10  ;;  %v2153_v22 = vadd.f32 %v4151_v2, %v1127_v11  ;;  %v2154_v23 = vadd.f32 %v4151_v2, %v1128_v12  ;;  %v1130_v24 = vmul.f32 %v4146_v1, %v104_v7  ;;  %v126_v7 = vld [vmem:[%s12344_s2 + $0x370] sm:$0xff]  ;;  %v127_v12 = vld [vmem:[%s12344_s2 + $0x378] sm:$0xff] }
  0x37   :  { %v1131_v25 = vmul.f32 %v4146_v1, %v105_v8  ;;  %3174 = vst [vmem:[%s12345_s3 + $0x290] sm:$0xff] %v2150_v16  ;;  %3175 = vst [vmem:[%s12345_s3 + $0x298] sm:$0xff] %v2151_v17  ;;  %v2155_v27 = vadd.f32 %v4151_v2, %v1129_v19  ;;  %v1132_v28 = vmul.f32 %v4146_v1, %v106_v13  ;;  %v128_v17 = vld [vmem:[%s12344_s2 + $0x380] sm:$0xff] }
  0x38   :  { %3176 = vst [vmem:[%s12345_s3 + $0x2a0] sm:$0xff] %v2152_v18  ;;  %v1133_v29 = vmul.f32 %v4146_v1, %v107_v14  ;;  %v1134_v30 = vmul.f32 %v4146_v1, %v108_v15  ;;  %3177 = vst [vmem:[%s12345_s3 + $0x2a8] sm:$0xff] %v2153_v22  ;;  %v2156_v33 = vadd.f32 %v4151_v2, %v1130_v24  ;;  %v129_v18 = vld [vmem:[%s12344_s2 + $0x388] sm:$0xff]  ;;  %v131_v24 = vld [vmem:[%s12344_s2 + $0x398] sm:$0xff] }
  0x39   :  { %3178 = vst [vmem:[%s12345_s3 + $0x2b0] sm:$0xff] %v2154_v23  ;;  %v2157_v34 = vadd.f32 %v4151_v2, %v1131_v25  ;;  %v1135_v35 = vmul.f32 %v4146_v1, %v109_v20  ;;  %v1136_v36 = vmul.f32 %v4146_v1, %v110_v21  ;;  %3179 = vst [vmem:[%s12345_s3 + $0x2b8] sm:$0xff] %v2155_v27  ;;  %v130_v23 = vld [vmem:[%s12344_s2 + $0x390] sm:$0xff]  ;;  %v132_v25 = vld [vmem:[%s12344_s2 + $0x3a0] sm:$0xff] }
  0x3a   :  { %v2158_v40 = vadd.f32 %v4151_v2, %v1132_v28  ;;  %v2159_v41 = vadd.f32 %v4151_v2, %v1133_v29  ;;  %v2160_v42 = vadd.f32 %v4151_v2, %v1134_v30  ;;  %v1137_v43 = vmul.f32 %v4146_v1, %v111_v26  ;;  %3180 = vst [vmem:[%s12345_s3 + $0x2c0] sm:$0xff] %v2156_v33  ;;  %v133_v30 = vld [vmem:[%s12344_s2 + $0x3a8] sm:$0xff] }
  0x3b   :  { %3181 = vst [vmem:[%s12345_s3 + $0x2c8] sm:$0xff] %v2157_v34  ;;  %v2161_v46 = vadd.f32 %v4151_v2, %v1135_v35  ;;  %v2162_v47 = vadd.f32 %v4151_v2, %v1136_v36  ;;  %v1138_v48 = vmul.f32 %v4146_v1, %v112_v31  ;;  %v1139_v49 = vmul.f32 %v4146_v1, %v113_v32  ;;  %v134_v31 = vld [vmem:[%s12344_s2 + $0x3b0] sm:$0xff]  ;;  %v135_v36 = vld [vmem:[%s12344_s2 + $0x3b8] sm:$0xff] }
  0x3c   :  { %3182 = vst [vmem:[%s12345_s3 + $0x2d0] sm:$0xff] %v2158_v40  ;;  %3183 = vst [vmem:[%s12345_s3 + $0x2d8] sm:$0xff] %v2159_v41  ;;  %v2163_v51 = vadd.f32 %v4151_v2, %v1137_v43  ;;  %v1140_v52 = vmul.f32 %v4146_v1, %v114_v37  ;;  %v1141_v53 = vmul.f32 %v4146_v1, %v115_v38  ;;  %v136_v41 = vld [vmem:[%s12344_s2 + $0x3c0] sm:$0xff] }
  0x3d   :  { %3184 = vst [vmem:[%s12345_s3 + $0x2e0] sm:$0xff] %v2160_v42  ;;  %v1142_v54 = vmul.f32 %v4146_v1, %v116_v39  ;;  %3185 = vst [vmem:[%s12345_s3 + $0x2e8] sm:$0xff] %v2161_v46  ;;  %v2164_v57 = vadd.f32 %v4151_v2, %v1138_v48  ;;  %v2165_v58 = vadd.f32 %v4151_v2, %v1139_v49  ;;  %v137_v42 = vld [vmem:[%s12344_s2 + $0x3c8] sm:$0xff]  ;;  %v139_v48 = vld [vmem:[%s12344_s2 + $0x3d8] sm:$0xff] }
  0x3e   :  { %3186 = vst [vmem:[%s12345_s3 + $0x2f0] sm:$0xff] %v2162_v47  ;;  %v1143_v59 = vmul.f32 %v4146_v1, %v117_v44  ;;  %v1144_v60 = vmul.f32 %v4146_v1, %v118_v45  ;;  %3187 = vst [vmem:[%s12345_s3 + $0x2f8] sm:$0xff] %v2163_v51  ;;  %v2166_v0 = vadd.f32 %v4151_v2, %v1140_v52  ;;  %v138_v47 = vld [vmem:[%s12344_s2 + $0x3d0] sm:$0xff]  ;;  %v140_v49 = vld [vmem:[%s12344_s2 + $0x3e0] sm:$0xff] }
  0x3f   :  { %v2167_v3 = vadd.f32 %v4151_v2, %v1141_v53  ;;  %v2168_v4 = vadd.f32 %v4151_v2, %v1142_v54  ;;  %v1145_v5 = vmul.f32 %v4146_v1, %v119_v50  ;;  %3188 = vst [vmem:[%s12345_s3 + $0x300] sm:$0xff] %v2164_v57  ;;  %3189 = vst [vmem:[%s12345_s3 + $0x308] sm:$0xff] %v2165_v58  ;;  %v141_v54 = vld [vmem:[%s12344_s2 + $0x3e8] sm:$0xff] }
  0x40   :  { %v2169_v8 = vadd.f32 %v4151_v2, %v1143_v59  ;;  %v2170_v9 = vadd.f32 %v4151_v2, %v1144_v60  ;;  %v1146_v10 = vmul.f32 %v4146_v1, %v120_v55  ;;  %v1147_v11 = vmul.f32 %v4146_v1, %v121_v56  ;;  %3190 = vst [vmem:[%s12345_s3 + $0x310] sm:$0xff] %v2166_v0  ;;  %v142_v55 = vld [vmem:[%s12344_s2 + $0x3f0] sm:$0xff]  ;;  %v143_v60 = vld [vmem:[%s12344_s2 + $0x3f8] sm:$0xff] }
  0x41   :  { %3191 = vst [vmem:[%s12345_s3 + $0x318] sm:$0xff] %v2167_v3  ;;  %3192 = vst [vmem:[%s12345_s3 + $0x320] sm:$0xff] %v2168_v4  ;;  %v2171_v13 = vadd.f32 %v4151_v2, %v1145_v5  ;;  %v1148_v14 = vmul.f32 %v4146_v1, %v122_v61  ;;  %v1149_v15 = vmul.f32 %v4146_v1, %v123_v62  ;;  %v144_v3 = vld [vmem:[%s12344_s2 + $0x400] sm:$0xff]  ;;  %v145_v4 = vld [vmem:[%s12344_s2 + $0x408] sm:$0xff] }
  0x42   :  { %v1150_v16 = vmul.f32 %v4146_v1, %v124_v63  ;;  %3193 = vst [vmem:[%s12345_s3 + $0x328] sm:$0xff] %v2169_v8  ;;  %3194 = vst [vmem:[%s12345_s3 + $0x330] sm:$0xff] %v2170_v9  ;;  %v2172_v19 = vadd.f32 %v4151_v2, %v1146_v10  ;;  %v2173_v20 = vadd.f32 %v4151_v2, %v1147_v11  ;;  %v146_v9 = vld [vmem:[%s12344_s2 + $0x410] sm:$0xff]  ;;  %v147_v10 = vld [vmem:[%s12344_s2 + $0x418] sm:$0xff] }
  0x43   :  { %v1151_v21 = vmul.f32 %v4146_v1, %v125_v6  ;;  %v1152_v22 = vmul.f32 %v4146_v1, %v126_v7  ;;  %3195 = vst [vmem:[%s12345_s3 + $0x338] sm:$0xff] %v2171_v13  ;;  %v2174_v26 = vadd.f32 %v4151_v2, %v1148_v14  ;;  %v2175_v27 = vadd.f32 %v4151_v2, %v1149_v15  ;;  %v148_v11 = vld [vmem:[%s12344_s2 + $0x420] sm:$0xff] }
  0x44   :  { %v2176_v28 = vadd.f32 %v4151_v2, %v1150_v16  ;;  %v1153_v29 = vmul.f32 %v4146_v1, %v127_v12  ;;  %3196 = vst [vmem:[%s12345_s3 + $0x340] sm:$0xff] %v2172_v19  ;;  %3197 = vst [vmem:[%s12345_s3 + $0x348] sm:$0xff] %v2173_v20  ;;  %v1154_v34 = vmul.f32 %v4146_v1, %v128_v17  ;;  %v149_v16 = vld [vmem:[%s12344_s2 + $0x428] sm:$0xff]  ;;  %v150_v17 = vld [vmem:[%s12344_s2 + $0x430] sm:$0xff] }
  0x45   :  { %v2177_v32 = vadd.f32 %v4151_v2, %v1151_v21  ;;  %v2178_v33 = vadd.f32 %v4151_v2, %v1152_v22  ;;  %v1155_v35 = vmul.f32 %v4146_v1, %v129_v18  ;;  %3198 = vst [vmem:[%s12345_s3 + $0x350] sm:$0xff] %v2174_v26  ;;  %3199 = vst [vmem:[%s12345_s3 + $0x358] sm:$0xff] %v2175_v27  ;;  %v151_v22 = vld [vmem:[%s12344_s2 + $0x438] sm:$0xff]  ;;  %v152_v27 = vld [vmem:[%s12344_s2 + $0x440] sm:$0xff] }
  0x46   :  { %3200 = vst [vmem:[%s12345_s3 + $0x360] sm:$0xff] %v2176_v28  ;;  %v2179_v37 = vadd.f32 %v4151_v2, %v1153_v29  ;;  %v1156_v38 = vmul.f32 %v4146_v1, %v130_v23  ;;  %v1157_v39 = vmul.f32 %v4146_v1, %v131_v24  ;;  %v1158_v40 = vmul.f32 %v4146_v1, %v132_v25  ;;  %v153_v28 = vld [vmem:[%s12344_s2 + $0x448] sm:$0xff] }
  0x47   :  { %3201 = vst [vmem:[%s12345_s3 + $0x368] sm:$0xff] %v2177_v32  ;;  %3202 = vst [vmem:[%s12345_s3 + $0x370] sm:$0xff] %v2178_v33  ;;  %v2180_v43 = vadd.f32 %v4151_v2, %v1154_v34  ;;  %v2181_v44 = vadd.f32 %v4151_v2, %v1155_v35  ;;  %v1159_v45 = vmul.f32 %v4146_v1, %v133_v30  ;;  %v154_v33 = vld [vmem:[%s12344_s2 + $0x450] sm:$0xff]  ;;  %v155_v34 = vld [vmem:[%s12344_s2 + $0x458] sm:$0xff] }
  0x48   :  { %v1160_v46 = vmul.f32 %v4146_v1, %v134_v31  ;;  %3203 = vst [vmem:[%s12345_s3 + $0x378] sm:$0xff] %v2179_v37  ;;  %v2182_v50 = vadd.f32 %v4151_v2, %v1156_v38  ;;  %v2183_v51 = vadd.f32 %v4151_v2, %v1157_v39  ;;  %v2184_v52 = vadd.f32 %v4151_v2, %v1158_v40  ;;  %v156_v35 = vld [vmem:[%s12344_s2 + $0x460] sm:$0xff]  ;;  %v157_v40 = vld [vmem:[%s12344_s2 + $0x468] sm:$0xff] }
  0x49   :  { %v1161_v53 = vmul.f32 %v4146_v1, %v135_v36  ;;  %3204 = vst [vmem:[%s12345_s3 + $0x380] sm:$0xff] %v2180_v43  ;;  %3205 = vst [vmem:[%s12345_s3 + $0x388] sm:$0xff] %v2181_v44  ;;  %v2185_v56 = vadd.f32 %v4151_v2, %v1159_v45  ;;  %v1162_v58 = vmul.f32 %v4146_v1, %v136_v41  ;;  %v158_v41 = vld [vmem:[%s12344_s2 + $0x470] sm:$0xff] }
  0x4a   :  { %v2186_v57 = vadd.f32 %v4151_v2, %v1160_v46  ;;  %v1163_v59 = vmul.f32 %v4146_v1, %v137_v42  ;;  %3206 = vst [vmem:[%s12345_s3 + $0x390] sm:$0xff] %v2182_v50  ;;  %3207 = vst [vmem:[%s12345_s3 + $0x398] sm:$0xff] %v2183_v51  ;;  %v1164_v62 = vmul.f32 %v4146_v1, %v138_v47  ;;  %v159_v46 = vld [vmem:[%s12344_s2 + $0x478] sm:$0xff]  ;;  %v160_v51 = vld [vmem:[%s12344_s2 + $0x480] sm:$0xff] }
  0x4b   :  { %3208 = vst [vmem:[%s12345_s3 + $0x3a0] sm:$0xff] %v2184_v52  ;;  %v2187_v61 = vadd.f32 %v4151_v2, %v1161_v53  ;;  %v1165_v63 = vmul.f32 %v4146_v1, %v139_v48  ;;  %v1166_v0 = vmul.f32 %v4146_v1, %v140_v49  ;;  %3209 = vst [vmem:[%s12345_s3 + $0x3a8] sm:$0xff] %v2185_v56  ;;  %v161_v52 = vld [vmem:[%s12344_s2 + $0x488] sm:$0xff] }
  0x4c   :  { %3210 = vst [vmem:[%s12345_s3 + $0x3b0] sm:$0xff] %v2186_v57  ;;  %v2188_v5 = vadd.f32 %v4151_v2, %v1162_v58  ;;  %v2189_v6 = vadd.f32 %v4151_v2, %v1163_v59  ;;  %v1167_v7 = vmul.f32 %v4146_v1, %v141_v54  ;;  %v1168_v8 = vmul.f32 %v4146_v1, %v142_v55  ;;  %v162_v57 = vld [vmem:[%s12344_s2 + $0x490] sm:$0xff]  ;;  %v163_v58 = vld [vmem:[%s12344_s2 + $0x498] sm:$0xff]  ;;  %v164_v59 = vld [vmem:[%s12344_s2 + $0x4a0] sm:$0xff] }
  0x4d   :  { %3211 = vst [vmem:[%s12345_s3 + $0x3b8] sm:$0xff] %v2187_v61  ;;  %v2190_v12 = vadd.f32 %v4151_v2, %v1164_v62  ;;  %v2191_v13 = vadd.f32 %v4151_v2, %v1165_v63  ;;  %v2192_v14 = vadd.f32 %v4151_v2, %v1166_v0  ;;  %v1169_v15 = vmul.f32 %v4146_v1, %v143_v60  ;;  %v165_v0 = vld [vmem:[%s12344_s2 + $0x4a8] sm:$0xff] }
  0x4e   :  { %3212 = vst [vmem:[%s12345_s3 + $0x3c0] sm:$0xff] %v2188_v5  ;;  %3213 = vst [vmem:[%s12345_s3 + $0x3c8] sm:$0xff] %v2189_v6  ;;  %v2193_v18 = vadd.f32 %v4151_v2, %v1167_v7  ;;  %v2194_v19 = vadd.f32 %v4151_v2, %v1168_v8  ;;  %v1170_v20 = vmul.f32 %v4146_v1, %v144_v3  ;;  %v166_v3 = vld [vmem:[%s12344_s2 + $0x4b0] sm:$0xff]  ;;  %v167_v8 = vld [vmem:[%s12344_s2 + $0x4b8] sm:$0xff] }
  0x4f   :  { %v1171_v21 = vmul.f32 %v4146_v1, %v145_v4  ;;  %3214 = vst [vmem:[%s12345_s3 + $0x3d0] sm:$0xff] %v2190_v12  ;;  %3215 = vst [vmem:[%s12345_s3 + $0x3d8] sm:$0xff] %v2191_v13  ;;  %v2195_v23 = vadd.f32 %v4151_v2, %v1169_v15  ;;  %v1172_v24 = vmul.f32 %v4146_v1, %v146_v9  ;;  %v168_v13 = vld [vmem:[%s12344_s2 + $0x4c0] sm:$0xff] }
  0x50   :  { %3216 = vst [vmem:[%s12345_s3 + $0x3e0] sm:$0xff] %v2192_v14  ;;  %v1173_v25 = vmul.f32 %v4146_v1, %v147_v10  ;;  %v1174_v26 = vmul.f32 %v4146_v1, %v148_v11  ;;  %3217 = vst [vmem:[%s12345_s3 + $0x3e8] sm:$0xff] %v2193_v18  ;;  %v2196_v29 = vadd.f32 %v4151_v2, %v1170_v20  ;;  %v169_v14 = vld [vmem:[%s12344_s2 + $0x4c8] sm:$0xff]  ;;  %v171_v20 = vld [vmem:[%s12344_s2 + $0x4d8] sm:$0xff] }
  0x51   :  { %3218 = vst [vmem:[%s12345_s3 + $0x3f0] sm:$0xff] %v2194_v19  ;;  %v2197_v30 = vadd.f32 %v4151_v2, %v1171_v21  ;;  %v1175_v31 = vmul.f32 %v4146_v1, %v149_v16  ;;  %v1176_v32 = vmul.f32 %v4146_v1, %v150_v17  ;;  %3219 = vst [vmem:[%s12345_s3 + $0x3f8] sm:$0xff] %v2195_v23  ;;  %v170_v19 = vld [vmem:[%s12344_s2 + $0x4d0] sm:$0xff]  ;;  %v172_v21 = vld [vmem:[%s12344_s2 + $0x4e0] sm:$0xff] }
  0x52   :  { %v2198_v36 = vadd.f32 %v4151_v2, %v1172_v24  ;;  %v2199_v37 = vadd.f32 %v4151_v2, %v1173_v25  ;;  %v2200_v38 = vadd.f32 %v4151_v2, %v1174_v26  ;;  %v1177_v39 = vmul.f32 %v4146_v1, %v151_v22  ;;  %3220 = vst [vmem:[%s12345_s3 + $0x400] sm:$0xff] %v2196_v29  ;;  %v173_v26 = vld [vmem:[%s12344_s2 + $0x4e8] sm:$0xff] }
  0x53   :  { %3221 = vst [vmem:[%s12345_s3 + $0x408] sm:$0xff] %v2197_v30  ;;  %v2201_v42 = vadd.f32 %v4151_v2, %v1175_v31  ;;  %v2202_v43 = vadd.f32 %v4151_v2, %v1176_v32  ;;  %v1178_v44 = vmul.f32 %v4146_v1, %v152_v27  ;;  %v1179_v45 = vmul.f32 %v4146_v1, %v153_v28  ;;  %v174_v27 = vld [vmem:[%s12344_s2 + $0x4f0] sm:$0xff]  ;;  %v175_v32 = vld [vmem:[%s12344_s2 + $0x4f8] sm:$0xff] }
  0x54   :  { %3222 = vst [vmem:[%s12345_s3 + $0x410] sm:$0xff] %v2198_v36  ;;  %3223 = vst [vmem:[%s12345_s3 + $0x418] sm:$0xff] %v2199_v37  ;;  %v2203_v47 = vadd.f32 %v4151_v2, %v1177_v39  ;;  %v1180_v48 = vmul.f32 %v4146_v1, %v154_v33  ;;  %v1181_v49 = vmul.f32 %v4146_v1, %v155_v34  ;;  %v176_v37 = vld [vmem:[%s12344_s2 + $0x500] sm:$0xff] }
  0x55   :  { %3224 = vst [vmem:[%s12345_s3 + $0x420] sm:$0xff] %v2200_v38  ;;  %v1182_v50 = vmul.f32 %v4146_v1, %v156_v35  ;;  %3225 = vst [vmem:[%s12345_s3 + $0x428] sm:$0xff] %v2201_v42  ;;  %v2204_v53 = vadd.f32 %v4151_v2, %v1178_v44  ;;  %v2205_v54 = vadd.f32 %v4151_v2, %v1179_v45  ;;  %v177_v38 = vld [vmem:[%s12344_s2 + $0x508] sm:$0xff]  ;;  %v179_v44 = vld [vmem:[%s12344_s2 + $0x518] sm:$0xff] }
  0x56   :  { %3226 = vst [vmem:[%s12345_s3 + $0x430] sm:$0xff] %v2202_v43  ;;  %v1183_v55 = vmul.f32 %v4146_v1, %v157_v40  ;;  %v1184_v56 = vmul.f32 %v4146_v1, %v158_v41  ;;  %3227 = vst [vmem:[%s12345_s3 + $0x438] sm:$0xff] %v2203_v47  ;;  %v2206_v60 = vadd.f32 %v4151_v2, %v1180_v48  ;;  %v178_v43 = vld [vmem:[%s12344_s2 + $0x510] sm:$0xff]  ;;  %v180_v45 = vld [vmem:[%s12344_s2 + $0x520] sm:$0xff] }
  0x57   :  { %v2207_v61 = vadd.f32 %v4151_v2, %v1181_v49  ;;  %v2208_v62 = vadd.f32 %v4151_v2, %v1182_v50  ;;  %v1185_v63 = vmul.f32 %v4146_v1, %v159_v46  ;;  %3228 = vst [vmem:[%s12345_s3 + $0x440] sm:$0xff] %v2204_v53  ;;  %3229 = vst [vmem:[%s12345_s3 + $0x448] sm:$0xff] %v2205_v54  ;;  %v181_v50 = vld [vmem:[%s12344_s2 + $0x528] sm:$0xff] }
  0x58   :  { %v2209_v4 = vadd.f32 %v4151_v2, %v1183_v55  ;;  %v2210_v5 = vadd.f32 %v4151_v2, %v1184_v56  ;;  %v1186_v6 = vmul.f32 %v4146_v1, %v160_v51  ;;  %v1187_v7 = vmul.f32 %v4146_v1, %v161_v52  ;;  %3230 = vst [vmem:[%s12345_s3 + $0x450] sm:$0xff] %v2206_v60  ;;  %v182_v51 = vld [vmem:[%s12344_s2 + $0x530] sm:$0xff]  ;;  %v183_v56 = vld [vmem:[%s12344_s2 + $0x538] sm:$0xff] }
  0x59   :  { %3231 = vst [vmem:[%s12345_s3 + $0x458] sm:$0xff] %v2207_v61  ;;  %3232 = vst [vmem:[%s12345_s3 + $0x460] sm:$0xff] %v2208_v62  ;;  %v2211_v9 = vadd.f32 %v4151_v2, %v1185_v63  ;;  %v1188_v10 = vmul.f32 %v4146_v1, %v162_v57  ;;  %v1189_v11 = vmul.f32 %v4146_v1, %v163_v58  ;;  %v184_v61 = vld [vmem:[%s12344_s2 + $0x540] sm:$0xff]  ;;  %v185_v62 = vld [vmem:[%s12344_s2 + $0x548] sm:$0xff] }
  0x5a   :  { %v1190_v12 = vmul.f32 %v4146_v1, %v164_v59  ;;  %3233 = vst [vmem:[%s12345_s3 + $0x468] sm:$0xff] %v2209_v4  ;;  %3234 = vst [vmem:[%s12345_s3 + $0x470] sm:$0xff] %v2210_v5  ;;  %v2212_v15 = vadd.f32 %v4151_v2, %v1186_v6  ;;  %v2213_v16 = vadd.f32 %v4151_v2, %v1187_v7  ;;  %v186_v5 = vld [vmem:[%s12344_s2 + $0x550] sm:$0xff]  ;;  %v187_v6 = vld [vmem:[%s12344_s2 + $0x558] sm:$0xff] }
  0x5b   :  { %v1191_v17 = vmul.f32 %v4146_v1, %v165_v0  ;;  %v1192_v18 = vmul.f32 %v4146_v1, %v166_v3  ;;  %3235 = vst [vmem:[%s12345_s3 + $0x478] sm:$0xff] %v2211_v9  ;;  %v2214_v22 = vadd.f32 %v4151_v2, %v1188_v10  ;;  %v2215_v23 = vadd.f32 %v4151_v2, %v1189_v11  ;;  %v188_v7 = vld [vmem:[%s12344_s2 + $0x560] sm:$0xff] }
  0x5c   :  { %v2216_v24 = vadd.f32 %v4151_v2, %v1190_v12  ;;  %v1193_v25 = vmul.f32 %v4146_v1, %v167_v8  ;;  %3236 = vst [vmem:[%s12345_s3 + $0x480] sm:$0xff] %v2212_v15  ;;  %3237 = vst [vmem:[%s12345_s3 + $0x488] sm:$0xff] %v2213_v16  ;;  %v1194_v30 = vmul.f32 %v4146_v1, %v168_v13  ;;  %v189_v12 = vld [vmem:[%s12344_s2 + $0x568] sm:$0xff]  ;;  %v190_v13 = vld [vmem:[%s12344_s2 + $0x570] sm:$0xff] }
  0x5d   :  { %v2217_v28 = vadd.f32 %v4151_v2, %v1191_v17  ;;  %v2218_v29 = vadd.f32 %v4151_v2, %v1192_v18  ;;  %v1195_v31 = vmul.f32 %v4146_v1, %v169_v14  ;;  %3238 = vst [vmem:[%s12345_s3 + $0x490] sm:$0xff] %v2214_v22  ;;  %3239 = vst [vmem:[%s12345_s3 + $0x498] sm:$0xff] %v2215_v23  ;;  %v191_v18 = vld [vmem:[%s12344_s2 + $0x578] sm:$0xff]  ;;  %v192_v23 = vld [vmem:[%s12344_s2 + $0x580] sm:$0xff] }
  0x5e   :  { %3240 = vst [vmem:[%s12345_s3 + $0x4a0] sm:$0xff] %v2216_v24  ;;  %v2219_v33 = vadd.f32 %v4151_v2, %v1193_v25  ;;  %v1196_v34 = vmul.f32 %v4146_v1, %v170_v19  ;;  %v1197_v35 = vmul.f32 %v4146_v1, %v171_v20  ;;  %v1198_v36 = vmul.f32 %v4146_v1, %v172_v21  ;;  %v193_v24 = vld [vmem:[%s12344_s2 + $0x588] sm:$0xff] }
  0x5f   :  { %3241 = vst [vmem:[%s12345_s3 + $0x4a8] sm:$0xff] %v2217_v28  ;;  %3242 = vst [vmem:[%s12345_s3 + $0x4b0] sm:$0xff] %v2218_v29  ;;  %v2220_v39 = vadd.f32 %v4151_v2, %v1194_v30  ;;  %v2221_v40 = vadd.f32 %v4151_v2, %v1195_v31  ;;  %v1199_v41 = vmul.f32 %v4146_v1, %v173_v26  ;;  %v194_v29 = vld [vmem:[%s12344_s2 + $0x590] sm:$0xff]  ;;  %v195_v30 = vld [vmem:[%s12344_s2 + $0x598] sm:$0xff] }
  0x60   :  { %v1200_v42 = vmul.f32 %v4146_v1, %v174_v27  ;;  %3243 = vst [vmem:[%s12345_s3 + $0x4b8] sm:$0xff] %v2219_v33  ;;  %v2222_v46 = vadd.f32 %v4151_v2, %v1196_v34  ;;  %v2223_v47 = vadd.f32 %v4151_v2, %v1197_v35  ;;  %v2224_v48 = vadd.f32 %v4151_v2, %v1198_v36  ;;  %v196_v31 = vld [vmem:[%s12344_s2 + $0x5a0] sm:$0xff]  ;;  %v197_v36 = vld [vmem:[%s12344_s2 + $0x5a8] sm:$0xff] }
  0x61   :  { %v1201_v49 = vmul.f32 %v4146_v1, %v175_v32  ;;  %3244 = vst [vmem:[%s12345_s3 + $0x4c0] sm:$0xff] %v2220_v39  ;;  %3245 = vst [vmem:[%s12345_s3 + $0x4c8] sm:$0xff] %v2221_v40  ;;  %v2225_v52 = vadd.f32 %v4151_v2, %v1199_v41  ;;  %v1202_v54 = vmul.f32 %v4146_v1, %v176_v37  ;;  %v198_v37 = vld [vmem:[%s12344_s2 + $0x5b0] sm:$0xff] }
  0x62   :  { %v2226_v53 = vadd.f32 %v4151_v2, %v1200_v42  ;;  %v1203_v55 = vmul.f32 %v4146_v1, %v177_v38  ;;  %3246 = vst [vmem:[%s12345_s3 + $0x4d0] sm:$0xff] %v2222_v46  ;;  %3247 = vst [vmem:[%s12345_s3 + $0x4d8] sm:$0xff] %v2223_v47  ;;  %v1204_v58 = vmul.f32 %v4146_v1, %v178_v43  ;;  %v199_v42 = vld [vmem:[%s12344_s2 + $0x5b8] sm:$0xff]  ;;  %v200_v47 = vld [vmem:[%s12344_s2 + $0x5c0] sm:$0xff] }
  0x63   :  { %3248 = vst [vmem:[%s12345_s3 + $0x4e0] sm:$0xff] %v2224_v48  ;;  %v2227_v57 = vadd.f32 %v4151_v2, %v1201_v49  ;;  %v1205_v59 = vmul.f32 %v4146_v1, %v179_v44  ;;  %v1206_v60 = vmul.f32 %v4146_v1, %v180_v45  ;;  %3249 = vst [vmem:[%s12345_s3 + $0x4e8] sm:$0xff] %v2225_v52  ;;  %v201_v48 = vld [vmem:[%s12344_s2 + $0x5c8] sm:$0xff] }
  0x64   :  { %3250 = vst [vmem:[%s12345_s3 + $0x4f0] sm:$0xff] %v2226_v53  ;;  %v2228_v63 = vadd.f32 %v4151_v2, %v1202_v54  ;;  %v2229_v0 = vadd.f32 %v4151_v2, %v1203_v55  ;;  %v1207_v3 = vmul.f32 %v4146_v1, %v181_v50  ;;  %v1208_v4 = vmul.f32 %v4146_v1, %v182_v51  ;;  %v202_v53 = vld [vmem:[%s12344_s2 + $0x5d0] sm:$0xff]  ;;  %v203_v54 = vld [vmem:[%s12344_s2 + $0x5d8] sm:$0xff]  ;;  %v204_v55 = vld [vmem:[%s12344_s2 + $0x5e0] sm:$0xff] }
  0x65   :  { %3251 = vst [vmem:[%s12345_s3 + $0x4f8] sm:$0xff] %v2227_v57  ;;  %v2230_v8 = vadd.f32 %v4151_v2, %v1204_v58  ;;  %v2231_v9 = vadd.f32 %v4151_v2, %v1205_v59  ;;  %v2232_v10 = vadd.f32 %v4151_v2, %v1206_v60  ;;  %v1209_v11 = vmul.f32 %v4146_v1, %v183_v56  ;;  %v205_v60 = vld [vmem:[%s12344_s2 + $0x5e8] sm:$0xff] }
  0x66   :  { %3252 = vst [vmem:[%s12345_s3 + $0x500] sm:$0xff] %v2228_v63  ;;  %3253 = vst [vmem:[%s12345_s3 + $0x508] sm:$0xff] %v2229_v0  ;;  %v2233_v14 = vadd.f32 %v4151_v2, %v1207_v3  ;;  %v2234_v15 = vadd.f32 %v4151_v2, %v1208_v4  ;;  %v1210_v16 = vmul.f32 %v4146_v1, %v184_v61  ;;  %v206_v61 = vld [vmem:[%s12344_s2 + $0x5f0] sm:$0xff]  ;;  %v207_v4 = vld [vmem:[%s12344_s2 + $0x5f8] sm:$0xff] }
  0x67   :  { %v1211_v17 = vmul.f32 %v4146_v1, %v185_v62  ;;  %3254 = vst [vmem:[%s12345_s3 + $0x510] sm:$0xff] %v2230_v8  ;;  %3255 = vst [vmem:[%s12345_s3 + $0x518] sm:$0xff] %v2231_v9  ;;  %v2235_v19 = vadd.f32 %v4151_v2, %v1209_v11  ;;  %v1212_v20 = vmul.f32 %v4146_v1, %v186_v5  ;;  %v208_v9 = vld [vmem:[%s12344_s2 + $0x600] sm:$0xff] }
  0x68   :  { %3256 = vst [vmem:[%s12345_s3 + $0x520] sm:$0xff] %v2232_v10  ;;  %v1213_v21 = vmul.f32 %v4146_v1, %v187_v6  ;;  %v1214_v22 = vmul.f32 %v4146_v1, %v188_v7  ;;  %3257 = vst [vmem:[%s12345_s3 + $0x528] sm:$0xff] %v2233_v14  ;;  %v2236_v25 = vadd.f32 %v4151_v2, %v1210_v16  ;;  %v209_v10 = vld [vmem:[%s12344_s2 + $0x608] sm:$0xff]  ;;  %v211_v16 = vld [vmem:[%s12344_s2 + $0x618] sm:$0xff] }
  0x69   :  { %3258 = vst [vmem:[%s12345_s3 + $0x530] sm:$0xff] %v2234_v15  ;;  %v2237_v26 = vadd.f32 %v4151_v2, %v1211_v17  ;;  %v1215_v27 = vmul.f32 %v4146_v1, %v189_v12  ;;  %v1216_v28 = vmul.f32 %v4146_v1, %v190_v13  ;;  %3259 = vst [vmem:[%s12345_s3 + $0x538] sm:$0xff] %v2235_v19  ;;  %v210_v15 = vld [vmem:[%s12344_s2 + $0x610] sm:$0xff]  ;;  %v212_v17 = vld [vmem:[%s12344_s2 + $0x620] sm:$0xff] }
  0x6a   :  { %v2238_v32 = vadd.f32 %v4151_v2, %v1212_v20  ;;  %v2239_v33 = vadd.f32 %v4151_v2, %v1213_v21  ;;  %v2240_v34 = vadd.f32 %v4151_v2, %v1214_v22  ;;  %v1217_v35 = vmul.f32 %v4146_v1, %v191_v18  ;;  %3260 = vst [vmem:[%s12345_s3 + $0x540] sm:$0xff] %v2236_v25  ;;  %v213_v22 = vld [vmem:[%s12344_s2 + $0x628] sm:$0xff] }
  0x6b   :  { %3261 = vst [vmem:[%s12345_s3 + $0x548] sm:$0xff] %v2237_v26  ;;  %v2241_v38 = vadd.f32 %v4151_v2, %v1215_v27  ;;  %v2242_v39 = vadd.f32 %v4151_v2, %v1216_v28  ;;  %v1218_v40 = vmul.f32 %v4146_v1, %v192_v23  ;;  %v1219_v41 = vmul.f32 %v4146_v1, %v193_v24  ;;  %v214_v23 = vld [vmem:[%s12344_s2 + $0x630] sm:$0xff]  ;;  %v215_v28 = vld [vmem:[%s12344_s2 + $0x638] sm:$0xff] }
  0x6c   :  { %3262 = vst [vmem:[%s12345_s3 + $0x550] sm:$0xff] %v2238_v32  ;;  %3263 = vst [vmem:[%s12345_s3 + $0x558] sm:$0xff] %v2239_v33  ;;  %v2243_v43 = vadd.f32 %v4151_v2, %v1217_v35  ;;  %v1220_v44 = vmul.f32 %v4146_v1, %v194_v29  ;;  %v1221_v45 = vmul.f32 %v4146_v1, %v195_v30  ;;  %v216_v33 = vld [vmem:[%s12344_s2 + $0x640] sm:$0xff] }
  0x6d   :  { %3264 = vst [vmem:[%s12345_s3 + $0x560] sm:$0xff] %v2240_v34  ;;  %v1222_v46 = vmul.f32 %v4146_v1, %v196_v31  ;;  %3265 = vst [vmem:[%s12345_s3 + $0x568] sm:$0xff] %v2241_v38  ;;  %v2244_v49 = vadd.f32 %v4151_v2, %v1218_v40  ;;  %v2245_v50 = vadd.f32 %v4151_v2, %v1219_v41  ;;  %v217_v34 = vld [vmem:[%s12344_s2 + $0x648] sm:$0xff]  ;;  %v219_v40 = vld [vmem:[%s12344_s2 + $0x658] sm:$0xff] }
  0x6e   :  { %3266 = vst [vmem:[%s12345_s3 + $0x570] sm:$0xff] %v2242_v39  ;;  %v1223_v51 = vmul.f32 %v4146_v1, %v197_v36  ;;  %v1224_v52 = vmul.f32 %v4146_v1, %v198_v37  ;;  %3267 = vst [vmem:[%s12345_s3 + $0x578] sm:$0xff] %v2243_v43  ;;  %v2246_v56 = vadd.f32 %v4151_v2, %v1220_v44  ;;  %v218_v39 = vld [vmem:[%s12344_s2 + $0x650] sm:$0xff]  ;;  %v220_v41 = vld [vmem:[%s12344_s2 + $0x660] sm:$0xff] }
  0x6f   :  { %v2247_v57 = vadd.f32 %v4151_v2, %v1221_v45  ;;  %v2248_v58 = vadd.f32 %v4151_v2, %v1222_v46  ;;  %v1225_v59 = vmul.f32 %v4146_v1, %v199_v42  ;;  %3268 = vst [vmem:[%s12345_s3 + $0x580] sm:$0xff] %v2244_v49  ;;  %3269 = vst [vmem:[%s12345_s3 + $0x588] sm:$0xff] %v2245_v50  ;;  %v221_v46 = vld [vmem:[%s12344_s2 + $0x668] sm:$0xff] }
  0x70   :  { %v2249_v62 = vadd.f32 %v4151_v2, %v1223_v51  ;;  %v2250_v63 = vadd.f32 %v4151_v2, %v1224_v52  ;;  %v1226_v0 = vmul.f32 %v4146_v1, %v200_v47  ;;  %v1227_v3 = vmul.f32 %v4146_v1, %v201_v48  ;;  %3270 = vst [vmem:[%s12345_s3 + $0x590] sm:$0xff] %v2246_v56  ;;  %v222_v47 = vld [vmem:[%s12344_s2 + $0x670] sm:$0xff]  ;;  %v223_v52 = vld [vmem:[%s12344_s2 + $0x678] sm:$0xff] }
  0x71   :  { %3271 = vst [vmem:[%s12345_s3 + $0x598] sm:$0xff] %v2247_v57  ;;  %3272 = vst [vmem:[%s12345_s3 + $0x5a0] sm:$0xff] %v2248_v58  ;;  %v2251_v5 = vadd.f32 %v4151_v2, %v1225_v59  ;;  %v1228_v6 = vmul.f32 %v4146_v1, %v202_v53  ;;  %v1229_v7 = vmul.f32 %v4146_v1, %v203_v54  ;;  %v224_v57 = vld [vmem:[%s12344_s2 + $0x680] sm:$0xff]  ;;  %v225_v58 = vld [vmem:[%s12344_s2 + $0x688] sm:$0xff] }
  0x72   :  { %v1230_v8 = vmul.f32 %v4146_v1, %v204_v55  ;;  %3273 = vst [vmem:[%s12345_s3 + $0x5a8] sm:$0xff] %v2249_v62  ;;  %3274 = vst [vmem:[%s12345_s3 + $0x5b0] sm:$0xff] %v2250_v63  ;;  %v2252_v11 = vadd.f32 %v4151_v2, %v1226_v0  ;;  %v2253_v12 = vadd.f32 %v4151_v2, %v1227_v3  ;;  %v226_v63 = vld [vmem:[%s12344_s2 + $0x690] sm:$0xff]  ;;  %v227_v0 = vld [vmem:[%s12344_s2 + $0x698] sm:$0xff] }
  0x73   :  { %v1231_v13 = vmul.f32 %v4146_v1, %v205_v60  ;;  %v1232_v14 = vmul.f32 %v4146_v1, %v206_v61  ;;  %3275 = vst [vmem:[%s12345_s3 + $0x5b8] sm:$0xff] %v2251_v5  ;;  %v2254_v18 = vadd.f32 %v4151_v2, %v1228_v6  ;;  %v2255_v19 = vadd.f32 %v4151_v2, %v1229_v7  ;;  %v228_v3 = vld [vmem:[%s12344_s2 + $0x6a0] sm:$0xff] }
  0x74   :  { %v2256_v20 = vadd.f32 %v4151_v2, %v1230_v8  ;;  %v1233_v21 = vmul.f32 %v4146_v1, %v207_v4  ;;  %3276 = vst [vmem:[%s12345_s3 + $0x5c0] sm:$0xff] %v2252_v11  ;;  %3277 = vst [vmem:[%s12345_s3 + $0x5c8] sm:$0xff] %v2253_v12  ;;  %v1234_v26 = vmul.f32 %v4146_v1, %v208_v9  ;;  %v229_v8 = vld [vmem:[%s12344_s2 + $0x6a8] sm:$0xff]  ;;  %v230_v9 = vld [vmem:[%s12344_s2 + $0x6b0] sm:$0xff] }
  0x75   :  { %v2257_v24 = vadd.f32 %v4151_v2, %v1231_v13  ;;  %v2258_v25 = vadd.f32 %v4151_v2, %v1232_v14  ;;  %v1235_v27 = vmul.f32 %v4146_v1, %v209_v10  ;;  %3278 = vst [vmem:[%s12345_s3 + $0x5d0] sm:$0xff] %v2254_v18  ;;  %3279 = vst [vmem:[%s12345_s3 + $0x5d8] sm:$0xff] %v2255_v19  ;;  %v231_v14 = vld [vmem:[%s12344_s2 + $0x6b8] sm:$0xff]  ;;  %v232_v19 = vld [vmem:[%s12344_s2 + $0x6c0] sm:$0xff] }
  0x76   :  { %3280 = vst [vmem:[%s12345_s3 + $0x5e0] sm:$0xff] %v2256_v20  ;;  %v2259_v29 = vadd.f32 %v4151_v2, %v1233_v21  ;;  %v1236_v30 = vmul.f32 %v4146_v1, %v210_v15  ;;  %v1237_v31 = vmul.f32 %v4146_v1, %v211_v16  ;;  %v1238_v32 = vmul.f32 %v4146_v1, %v212_v17  ;;  %v233_v20 = vld [vmem:[%s12344_s2 + $0x6c8] sm:$0xff] }
  0x77   :  { %3281 = vst [vmem:[%s12345_s3 + $0x5e8] sm:$0xff] %v2257_v24  ;;  %3282 = vst [vmem:[%s12345_s3 + $0x5f0] sm:$0xff] %v2258_v25  ;;  %v2260_v35 = vadd.f32 %v4151_v2, %v1234_v26  ;;  %v2261_v36 = vadd.f32 %v4151_v2, %v1235_v27  ;;  %v1239_v37 = vmul.f32 %v4146_v1, %v213_v22  ;;  %v234_v25 = vld [vmem:[%s12344_s2 + $0x6d0] sm:$0xff]  ;;  %v235_v26 = vld [vmem:[%s12344_s2 + $0x6d8] sm:$0xff] }
  0x78   :  { %v1240_v38 = vmul.f32 %v4146_v1, %v214_v23  ;;  %3283 = vst [vmem:[%s12345_s3 + $0x5f8] sm:$0xff] %v2259_v29  ;;  %v2262_v42 = vadd.f32 %v4151_v2, %v1236_v30  ;;  %v2263_v43 = vadd.f32 %v4151_v2, %v1237_v31  ;;  %v2264_v44 = vadd.f32 %v4151_v2, %v1238_v32  ;;  %v236_v27 = vld [vmem:[%s12344_s2 + $0x6e0] sm:$0xff]  ;;  %v237_v32 = vld [vmem:[%s12344_s2 + $0x6e8] sm:$0xff] }
  0x79   :  { %v1241_v45 = vmul.f32 %v4146_v1, %v215_v28  ;;  %3284 = vst [vmem:[%s12345_s3 + $0x600] sm:$0xff] %v2260_v35  ;;  %3285 = vst [vmem:[%s12345_s3 + $0x608] sm:$0xff] %v2261_v36  ;;  %v2265_v48 = vadd.f32 %v4151_v2, %v1239_v37  ;;  %v1242_v50 = vmul.f32 %v4146_v1, %v216_v33  ;;  %v238_v33 = vld [vmem:[%s12344_s2 + $0x6f0] sm:$0xff] }
  0x7a   :  { %v2266_v49 = vadd.f32 %v4151_v2, %v1240_v38  ;;  %v1243_v51 = vmul.f32 %v4146_v1, %v217_v34  ;;  %3286 = vst [vmem:[%s12345_s3 + $0x610] sm:$0xff] %v2262_v42  ;;  %3287 = vst [vmem:[%s12345_s3 + $0x618] sm:$0xff] %v2263_v43  ;;  %v1244_v54 = vmul.f32 %v4146_v1, %v218_v39  ;;  %v239_v38 = vld [vmem:[%s12344_s2 + $0x6f8] sm:$0xff]  ;;  %v240_v43 = vld [vmem:[%s12344_s2 + $0x700] sm:$0xff] }
  0x7b   :  { %3288 = vst [vmem:[%s12345_s3 + $0x620] sm:$0xff] %v2264_v44  ;;  %v2267_v53 = vadd.f32 %v4151_v2, %v1241_v45  ;;  %v1245_v55 = vmul.f32 %v4146_v1, %v219_v40  ;;  %v1246_v56 = vmul.f32 %v4146_v1, %v220_v41  ;;  %3289 = vst [vmem:[%s12345_s3 + $0x628] sm:$0xff] %v2265_v48  ;;  %v241_v44 = vld [vmem:[%s12344_s2 + $0x708] sm:$0xff] }
  0x7c   :  { %3290 = vst [vmem:[%s12345_s3 + $0x630] sm:$0xff] %v2266_v49  ;;  %v2268_v59 = vadd.f32 %v4151_v2, %v1242_v50  ;;  %v2269_v60 = vadd.f32 %v4151_v2, %v1243_v51  ;;  %v1247_v61 = vmul.f32 %v4146_v1, %v221_v46  ;;  %v1248_v62 = vmul.f32 %v4146_v1, %v222_v47  ;;  %v242_v49 = vld [vmem:[%s12344_s2 + $0x710] sm:$0xff]  ;;  %v243_v50 = vld [vmem:[%s12344_s2 + $0x718] sm:$0xff]  ;;  %v244_v51 = vld [vmem:[%s12344_s2 + $0x720] sm:$0xff] }
  0x7d   :  { %3291 = vst [vmem:[%s12345_s3 + $0x638] sm:$0xff] %v2267_v53  ;;  %v2270_v4 = vadd.f32 %v4151_v2, %v1244_v54  ;;  %v2271_v5 = vadd.f32 %v4151_v2, %v1245_v55  ;;  %v2272_v6 = vadd.f32 %v4151_v2, %v1246_v56  ;;  %v1249_v7 = vmul.f32 %v4146_v1, %v223_v52  ;;  %v245_v56 = vld [vmem:[%s12344_s2 + $0x728] sm:$0xff] }
  0x7e   :  { %3292 = vst [vmem:[%s12345_s3 + $0x640] sm:$0xff] %v2268_v59  ;;  %3293 = vst [vmem:[%s12345_s3 + $0x648] sm:$0xff] %v2269_v60  ;;  %v2273_v10 = vadd.f32 %v4151_v2, %v1247_v61  ;;  %v2274_v11 = vadd.f32 %v4151_v2, %v1248_v62  ;;  %v1250_v12 = vmul.f32 %v4146_v1, %v224_v57  ;;  %v246_v57 = vld [vmem:[%s12344_s2 + $0x730] sm:$0xff]  ;;  %v247_v62 = vld [vmem:[%s12344_s2 + $0x738] sm:$0xff] }
  0x7f   :  { %v1251_v13 = vmul.f32 %v4146_v1, %v225_v58  ;;  %3294 = vst [vmem:[%s12345_s3 + $0x650] sm:$0xff] %v2270_v4  ;;  %3295 = vst [vmem:[%s12345_s3 + $0x658] sm:$0xff] %v2271_v5  ;;  %v2275_v15 = vadd.f32 %v4151_v2, %v1249_v7  ;;  %v1252_v16 = vmul.f32 %v4146_v1, %v226_v63  ;;  %v248_v5 = vld [vmem:[%s12344_s2 + $0x740] sm:$0xff] }
  0x80   :  { %3296 = vst [vmem:[%s12345_s3 + $0x660] sm:$0xff] %v2272_v6  ;;  %v1253_v17 = vmul.f32 %v4146_v1, %v227_v0  ;;  %v1254_v18 = vmul.f32 %v4146_v1, %v228_v3  ;;  %3297 = vst [vmem:[%s12345_s3 + $0x668] sm:$0xff] %v2273_v10  ;;  %v2276_v21 = vadd.f32 %v4151_v2, %v1250_v12  ;;  %v249_v6 = vld [vmem:[%s12344_s2 + $0x748] sm:$0xff]  ;;  %v251_v12 = vld [vmem:[%s12344_s2 + $0x758] sm:$0xff] }
  0x81   :  { %3298 = vst [vmem:[%s12345_s3 + $0x670] sm:$0xff] %v2274_v11  ;;  %v2277_v22 = vadd.f32 %v4151_v2, %v1251_v13  ;;  %v1255_v23 = vmul.f32 %v4146_v1, %v229_v8  ;;  %v1256_v24 = vmul.f32 %v4146_v1, %v230_v9  ;;  %3299 = vst [vmem:[%s12345_s3 + $0x678] sm:$0xff] %v2275_v15  ;;  %v250_v11 = vld [vmem:[%s12344_s2 + $0x750] sm:$0xff]  ;;  %v252_v13 = vld [vmem:[%s12344_s2 + $0x760] sm:$0xff] }
  0x82   :  { %v2278_v28 = vadd.f32 %v4151_v2, %v1252_v16  ;;  %v2279_v29 = vadd.f32 %v4151_v2, %v1253_v17  ;;  %v2280_v30 = vadd.f32 %v4151_v2, %v1254_v18  ;;  %v1257_v31 = vmul.f32 %v4146_v1, %v231_v14  ;;  %3300 = vst [vmem:[%s12345_s3 + $0x680] sm:$0xff] %v2276_v21  ;;  %v253_v18 = vld [vmem:[%s12344_s2 + $0x768] sm:$0xff] }
  0x83   :  { %3301 = vst [vmem:[%s12345_s3 + $0x688] sm:$0xff] %v2277_v22  ;;  %v2281_v34 = vadd.f32 %v4151_v2, %v1255_v23  ;;  %v2282_v35 = vadd.f32 %v4151_v2, %v1256_v24  ;;  %v1258_v36 = vmul.f32 %v4146_v1, %v232_v19  ;;  %v1259_v37 = vmul.f32 %v4146_v1, %v233_v20  ;;  %v254_v19 = vld [vmem:[%s12344_s2 + $0x770] sm:$0xff]  ;;  %v255_v24 = vld [vmem:[%s12344_s2 + $0x778] sm:$0xff] }
  0x84   :  { %3302 = vst [vmem:[%s12345_s3 + $0x690] sm:$0xff] %v2278_v28  ;;  %3303 = vst [vmem:[%s12345_s3 + $0x698] sm:$0xff] %v2279_v29  ;;  %v2283_v39 = vadd.f32 %v4151_v2, %v1257_v31  ;;  %v1260_v40 = vmul.f32 %v4146_v1, %v234_v25  ;;  %v1261_v41 = vmul.f32 %v4146_v1, %v235_v26  ;;  %v256_v29 = vld [vmem:[%s12344_s2 + $0x780] sm:$0xff] }
  0x85   :  { %3304 = vst [vmem:[%s12345_s3 + $0x6a0] sm:$0xff] %v2280_v30  ;;  %v1262_v42 = vmul.f32 %v4146_v1, %v236_v27  ;;  %3305 = vst [vmem:[%s12345_s3 + $0x6a8] sm:$0xff] %v2281_v34  ;;  %v2284_v45 = vadd.f32 %v4151_v2, %v1258_v36  ;;  %v2285_v46 = vadd.f32 %v4151_v2, %v1259_v37  ;;  %v257_v30 = vld [vmem:[%s12344_s2 + $0x788] sm:$0xff]  ;;  %v259_v36 = vld [vmem:[%s12344_s2 + $0x798] sm:$0xff] }
  0x86   :  { %3306 = vst [vmem:[%s12345_s3 + $0x6b0] sm:$0xff] %v2282_v35  ;;  %v1263_v47 = vmul.f32 %v4146_v1, %v237_v32  ;;  %v1264_v48 = vmul.f32 %v4146_v1, %v238_v33  ;;  %3307 = vst [vmem:[%s12345_s3 + $0x6b8] sm:$0xff] %v2283_v39  ;;  %v2286_v52 = vadd.f32 %v4151_v2, %v1260_v40  ;;  %v258_v35 = vld [vmem:[%s12344_s2 + $0x790] sm:$0xff]  ;;  %v260_v37 = vld [vmem:[%s12344_s2 + $0x7a0] sm:$0xff] }
  0x87   :  { %v2287_v53 = vadd.f32 %v4151_v2, %v1261_v41  ;;  %v2288_v54 = vadd.f32 %v4151_v2, %v1262_v42  ;;  %v1265_v55 = vmul.f32 %v4146_v1, %v239_v38  ;;  %3308 = vst [vmem:[%s12345_s3 + $0x6c0] sm:$0xff] %v2284_v45  ;;  %3309 = vst [vmem:[%s12345_s3 + $0x6c8] sm:$0xff] %v2285_v46  ;;  %v261_v42 = vld [vmem:[%s12344_s2 + $0x7a8] sm:$0xff] }
  0x88   :  { %v2289_v58 = vadd.f32 %v4151_v2, %v1263_v47  ;;  %v2290_v59 = vadd.f32 %v4151_v2, %v1264_v48  ;;  %v1266_v60 = vmul.f32 %v4146_v1, %v240_v43  ;;  %v1267_v61 = vmul.f32 %v4146_v1, %v241_v44  ;;  %3310 = vst [vmem:[%s12345_s3 + $0x6d0] sm:$0xff] %v2286_v52  ;;  %v262_v43 = vld [vmem:[%s12344_s2 + $0x7b0] sm:$0xff]  ;;  %v263_v48 = vld [vmem:[%s12344_s2 + $0x7b8] sm:$0xff] }
  0x89   :  { %3311 = vst [vmem:[%s12345_s3 + $0x6d8] sm:$0xff] %v2287_v53  ;;  %3312 = vst [vmem:[%s12345_s3 + $0x6e0] sm:$0xff] %v2288_v54  ;;  %v2291_v63 = vadd.f32 %v4151_v2, %v1265_v55  ;;  %v1268_v0 = vmul.f32 %v4146_v1, %v242_v49  ;;  %v1269_v3 = vmul.f32 %v4146_v1, %v243_v50  ;;  %v264_v53 = vld [vmem:[%s12344_s2 + $0x7c0] sm:$0xff]  ;;  %v265_v54 = vld [vmem:[%s12344_s2 + $0x7c8] sm:$0xff] }
  0x8a   :  { %v1270_v4 = vmul.f32 %v4146_v1, %v244_v51  ;;  %3313 = vst [vmem:[%s12345_s3 + $0x6e8] sm:$0xff] %v2289_v58  ;;  %3314 = vst [vmem:[%s12345_s3 + $0x6f0] sm:$0xff] %v2290_v59  ;;  %v2292_v7 = vadd.f32 %v4151_v2, %v1266_v60  ;;  %v2293_v8 = vadd.f32 %v4151_v2, %v1267_v61  ;;  %v266_v59 = vld [vmem:[%s12344_s2 + $0x7d0] sm:$0xff]  ;;  %v267_v60 = vld [vmem:[%s12344_s2 + $0x7d8] sm:$0xff] }
  0x8b   :  { %v1271_v9 = vmul.f32 %v4146_v1, %v245_v56  ;;  %v1272_v10 = vmul.f32 %v4146_v1, %v246_v57  ;;  %3315 = vst [vmem:[%s12345_s3 + $0x6f8] sm:$0xff] %v2291_v63  ;;  %v2294_v14 = vadd.f32 %v4151_v2, %v1268_v0  ;;  %v2295_v15 = vadd.f32 %v4151_v2, %v1269_v3  ;;  %v268_v61 = vld [vmem:[%s12344_s2 + $0x7e0] sm:$0xff] }
  0x8c   :  { %v2296_v16 = vadd.f32 %v4151_v2, %v1270_v4  ;;  %v1273_v17 = vmul.f32 %v4146_v1, %v247_v62  ;;  %3316 = vst [vmem:[%s12345_s3 + $0x700] sm:$0xff] %v2292_v7  ;;  %3317 = vst [vmem:[%s12345_s3 + $0x708] sm:$0xff] %v2293_v8  ;;  %v1274_v22 = vmul.f32 %v4146_v1, %v248_v5  ;;  %v269_v4 = vld [vmem:[%s12344_s2 + $0x7e8] sm:$0xff]  ;;  %v270_v5 = vld [vmem:[%s12344_s2 + $0x7f0] sm:$0xff] }
  0x8d   :  { %v2297_v20 = vadd.f32 %v4151_v2, %v1271_v9  ;;  %v2298_v21 = vadd.f32 %v4151_v2, %v1272_v10  ;;  %v1275_v23 = vmul.f32 %v4146_v1, %v249_v6  ;;  %3318 = vst [vmem:[%s12345_s3 + $0x710] sm:$0xff] %v2294_v14  ;;  %3319 = vst [vmem:[%s12345_s3 + $0x718] sm:$0xff] %v2295_v15  ;;  %v271_v10 = vld [vmem:[%s12344_s2 + $0x7f8] sm:$0xff]  ;;  %v272_v15 = vld [vmem:[%s12344_s2 + $0x800] sm:$0xff] }
  0x8e   :  { %3320 = vst [vmem:[%s12345_s3 + $0x720] sm:$0xff] %v2296_v16  ;;  %v2299_v25 = vadd.f32 %v4151_v2, %v1273_v17  ;;  %v1276_v26 = vmul.f32 %v4146_v1, %v250_v11  ;;  %v1277_v27 = vmul.f32 %v4146_v1, %v251_v12  ;;  %v1278_v28 = vmul.f32 %v4146_v1, %v252_v13  ;;  %v273_v16 = vld [vmem:[%s12344_s2 + $0x808] sm:$0xff] }
  0x8f   :  { %3321 = vst [vmem:[%s12345_s3 + $0x728] sm:$0xff] %v2297_v20  ;;  %3322 = vst [vmem:[%s12345_s3 + $0x730] sm:$0xff] %v2298_v21  ;;  %v2300_v31 = vadd.f32 %v4151_v2, %v1274_v22  ;;  %v2301_v32 = vadd.f32 %v4151_v2, %v1275_v23  ;;  %v1279_v33 = vmul.f32 %v4146_v1, %v253_v18  ;;  %v274_v21 = vld [vmem:[%s12344_s2 + $0x810] sm:$0xff]  ;;  %v275_v22 = vld [vmem:[%s12344_s2 + $0x818] sm:$0xff] }
  0x90   :  { %v1280_v34 = vmul.f32 %v4146_v1, %v254_v19  ;;  %3323 = vst [vmem:[%s12345_s3 + $0x738] sm:$0xff] %v2299_v25  ;;  %v2302_v38 = vadd.f32 %v4151_v2, %v1276_v26  ;;  %v2303_v39 = vadd.f32 %v4151_v2, %v1277_v27  ;;  %v2304_v40 = vadd.f32 %v4151_v2, %v1278_v28  ;;  %v276_v23 = vld [vmem:[%s12344_s2 + $0x820] sm:$0xff]  ;;  %v277_v28 = vld [vmem:[%s12344_s2 + $0x828] sm:$0xff] }
  0x91   :  { %v1281_v41 = vmul.f32 %v4146_v1, %v255_v24  ;;  %3324 = vst [vmem:[%s12345_s3 + $0x740] sm:$0xff] %v2300_v31  ;;  %3325 = vst [vmem:[%s12345_s3 + $0x748] sm:$0xff] %v2301_v32  ;;  %v2305_v44 = vadd.f32 %v4151_v2, %v1279_v33  ;;  %v1282_v46 = vmul.f32 %v4146_v1, %v256_v29  ;;  %v278_v29 = vld [vmem:[%s12344_s2 + $0x830] sm:$0xff] }
  0x92   :  { %v2306_v45 = vadd.f32 %v4151_v2, %v1280_v34  ;;  %v1283_v47 = vmul.f32 %v4146_v1, %v257_v30  ;;  %3326 = vst [vmem:[%s12345_s3 + $0x750] sm:$0xff] %v2302_v38  ;;  %3327 = vst [vmem:[%s12345_s3 + $0x758] sm:$0xff] %v2303_v39  ;;  %v1284_v50 = vmul.f32 %v4146_v1, %v258_v35  ;;  %v279_v34 = vld [vmem:[%s12344_s2 + $0x838] sm:$0xff]  ;;  %v280_v39 = vld [vmem:[%s12344_s2 + $0x840] sm:$0xff] }
  0x93   :  { %3328 = vst [vmem:[%s12345_s3 + $0x760] sm:$0xff] %v2304_v40  ;;  %v2307_v49 = vadd.f32 %v4151_v2, %v1281_v41  ;;  %v1285_v51 = vmul.f32 %v4146_v1, %v259_v36  ;;  %v1286_v52 = vmul.f32 %v4146_v1, %v260_v37  ;;  %3329 = vst [vmem:[%s12345_s3 + $0x768] sm:$0xff] %v2305_v44  ;;  %v281_v40 = vld [vmem:[%s12344_s2 + $0x848] sm:$0xff] }
  0x94   :  { %3330 = vst [vmem:[%s12345_s3 + $0x770] sm:$0xff] %v2306_v45  ;;  %v2308_v55 = vadd.f32 %v4151_v2, %v1282_v46  ;;  %v2309_v56 = vadd.f32 %v4151_v2, %v1283_v47  ;;  %v1287_v57 = vmul.f32 %v4146_v1, %v261_v42  ;;  %v1288_v58 = vmul.f32 %v4146_v1, %v262_v43  ;;  %v282_v45 = vld [vmem:[%s12344_s2 + $0x850] sm:$0xff]  ;;  %v283_v46 = vld [vmem:[%s12344_s2 + $0x858] sm:$0xff]  ;;  %v284_v47 = vld [vmem:[%s12344_s2 + $0x860] sm:$0xff] }
  0x95   :  { %3331 = vst [vmem:[%s12345_s3 + $0x778] sm:$0xff] %v2307_v49  ;;  %v2310_v62 = vadd.f32 %v4151_v2, %v1284_v50  ;;  %v2311_v63 = vadd.f32 %v4151_v2, %v1285_v51  ;;  %v2312_v0 = vadd.f32 %v4151_v2, %v1286_v52  ;;  %v1289_v3 = vmul.f32 %v4146_v1, %v263_v48  ;;  %v285_v52 = vld [vmem:[%s12344_s2 + $0x868] sm:$0xff] }
  0x96   :  { %3332 = vst [vmem:[%s12345_s3 + $0x780] sm:$0xff] %v2308_v55  ;;  %3333 = vst [vmem:[%s12345_s3 + $0x788] sm:$0xff] %v2309_v56  ;;  %v2313_v6 = vadd.f32 %v4151_v2, %v1287_v57  ;;  %v2314_v7 = vadd.f32 %v4151_v2, %v1288_v58  ;;  %v1290_v8 = vmul.f32 %v4146_v1, %v264_v53  ;;  %v286_v53 = vld [vmem:[%s12344_s2 + $0x870] sm:$0xff]  ;;  %v287_v58 = vld [vmem:[%s12344_s2 + $0x878] sm:$0xff] }
  0x97   :  { %v1291_v9 = vmul.f32 %v4146_v1, %v265_v54  ;;  %3334 = vst [vmem:[%s12345_s3 + $0x790] sm:$0xff] %v2310_v62  ;;  %3335 = vst [vmem:[%s12345_s3 + $0x798] sm:$0xff] %v2311_v63  ;;  %v2315_v11 = vadd.f32 %v4151_v2, %v1289_v3  ;;  %v1292_v12 = vmul.f32 %v4146_v1, %v266_v59  ;;  %v288_v63 = vld [vmem:[%s12344_s2 + $0x880] sm:$0xff] }
  0x98   :  { %3336 = vst [vmem:[%s12345_s3 + $0x7a0] sm:$0xff] %v2312_v0  ;;  %v1293_v13 = vmul.f32 %v4146_v1, %v267_v60  ;;  %v1294_v14 = vmul.f32 %v4146_v1, %v268_v61  ;;  %3337 = vst [vmem:[%s12345_s3 + $0x7a8] sm:$0xff] %v2313_v6  ;;  %v2316_v17 = vadd.f32 %v4151_v2, %v1290_v8  ;;  %v289_v0 = vld [vmem:[%s12344_s2 + $0x888] sm:$0xff]  ;;  %v291_v8 = vld [vmem:[%s12344_s2 + $0x898] sm:$0xff] }
  0x99   :  { %3338 = vst [vmem:[%s12345_s3 + $0x7b0] sm:$0xff] %v2314_v7  ;;  %v2317_v18 = vadd.f32 %v4151_v2, %v1291_v9  ;;  %v1295_v19 = vmul.f32 %v4146_v1, %v269_v4  ;;  %v1296_v20 = vmul.f32 %v4146_v1, %v270_v5  ;;  %3339 = vst [vmem:[%s12345_s3 + $0x7b8] sm:$0xff] %v2315_v11  ;;  %v290_v7 = vld [vmem:[%s12344_s2 + $0x890] sm:$0xff]  ;;  %v292_v9 = vld [vmem:[%s12344_s2 + $0x8a0] sm:$0xff] }
  0x9a   :  { %v2318_v24 = vadd.f32 %v4151_v2, %v1292_v12  ;;  %v2319_v25 = vadd.f32 %v4151_v2, %v1293_v13  ;;  %v2320_v26 = vadd.f32 %v4151_v2, %v1294_v14  ;;  %v1297_v27 = vmul.f32 %v4146_v1, %v271_v10  ;;  %3340 = vst [vmem:[%s12345_s3 + $0x7c0] sm:$0xff] %v2316_v17  ;;  %v293_v14 = vld [vmem:[%s12344_s2 + $0x8a8] sm:$0xff] }
  0x9b   :  { %3341 = vst [vmem:[%s12345_s3 + $0x7c8] sm:$0xff] %v2317_v18  ;;  %v2321_v30 = vadd.f32 %v4151_v2, %v1295_v19  ;;  %v2322_v31 = vadd.f32 %v4151_v2, %v1296_v20  ;;  %v1298_v32 = vmul.f32 %v4146_v1, %v272_v15  ;;  %v1299_v33 = vmul.f32 %v4146_v1, %v273_v16  ;;  %v294_v15 = vld [vmem:[%s12344_s2 + $0x8b0] sm:$0xff]  ;;  %v295_v20 = vld [vmem:[%s12344_s2 + $0x8b8] sm:$0xff] }
  0x9c   :  { %3342 = vst [vmem:[%s12345_s3 + $0x7d0] sm:$0xff] %v2318_v24  ;;  %3343 = vst [vmem:[%s12345_s3 + $0x7d8] sm:$0xff] %v2319_v25  ;;  %v2323_v35 = vadd.f32 %v4151_v2, %v1297_v27  ;;  %v1300_v36 = vmul.f32 %v4146_v1, %v274_v21  ;;  %v1301_v37 = vmul.f32 %v4146_v1, %v275_v22  ;;  %v296_v25 = vld [vmem:[%s12344_s2 + $0x8c0] sm:$0xff] }
  0x9d   :  { %3344 = vst [vmem:[%s12345_s3 + $0x7e0] sm:$0xff] %v2320_v26  ;;  %v1302_v38 = vmul.f32 %v4146_v1, %v276_v23  ;;  %3345 = vst [vmem:[%s12345_s3 + $0x7e8] sm:$0xff] %v2321_v30  ;;  %v2324_v41 = vadd.f32 %v4151_v2, %v1298_v32  ;;  %v2325_v42 = vadd.f32 %v4151_v2, %v1299_v33  ;;  %v297_v26 = vld [vmem:[%s12344_s2 + $0x8c8] sm:$0xff]  ;;  %v299_v32 = vld [vmem:[%s12344_s2 + $0x8d8] sm:$0xff] }
  0x9e   :  { %3346 = vst [vmem:[%s12345_s3 + $0x7f0] sm:$0xff] %v2322_v31  ;;  %v1303_v43 = vmul.f32 %v4146_v1, %v277_v28  ;;  %v1304_v44 = vmul.f32 %v4146_v1, %v278_v29  ;;  %3347 = vst [vmem:[%s12345_s3 + $0x7f8] sm:$0xff] %v2323_v35  ;;  %v2326_v48 = vadd.f32 %v4151_v2, %v1300_v36  ;;  %v298_v31 = vld [vmem:[%s12344_s2 + $0x8d0] sm:$0xff]  ;;  %v300_v33 = vld [vmem:[%s12344_s2 + $0x8e0] sm:$0xff] }
  0x9f   :  { %v2327_v49 = vadd.f32 %v4151_v2, %v1301_v37  ;;  %v2328_v50 = vadd.f32 %v4151_v2, %v1302_v38  ;;  %v1305_v51 = vmul.f32 %v4146_v1, %v279_v34  ;;  %3348 = vst [vmem:[%s12345_s3 + $0x800] sm:$0xff] %v2324_v41  ;;  %3349 = vst [vmem:[%s12345_s3 + $0x808] sm:$0xff] %v2325_v42  ;;  %v301_v38 = vld [vmem:[%s12344_s2 + $0x8e8] sm:$0xff] }
  0xa0   :  { %v2329_v54 = vadd.f32 %v4151_v2, %v1303_v43  ;;  %v2330_v55 = vadd.f32 %v4151_v2, %v1304_v44  ;;  %v1306_v56 = vmul.f32 %v4146_v1, %v280_v39  ;;  %v1307_v57 = vmul.f32 %v4146_v1, %v281_v40  ;;  %3350 = vst [vmem:[%s12345_s3 + $0x810] sm:$0xff] %v2326_v48  ;;  %v302_v39 = vld [vmem:[%s12344_s2 + $0x8f0] sm:$0xff]  ;;  %v303_v44 = vld [vmem:[%s12344_s2 + $0x8f8] sm:$0xff] }
  0xa1   :  { %3351 = vst [vmem:[%s12345_s3 + $0x818] sm:$0xff] %v2327_v49  ;;  %3352 = vst [vmem:[%s12345_s3 + $0x820] sm:$0xff] %v2328_v50  ;;  %v2331_v59 = vadd.f32 %v4151_v2, %v1305_v51  ;;  %v1308_v60 = vmul.f32 %v4146_v1, %v282_v45  ;;  %v1309_v61 = vmul.f32 %v4146_v1, %v283_v46  ;;  %v304_v49 = vld [vmem:[%s12344_s2 + $0x900] sm:$0xff]  ;;  %v305_v50 = vld [vmem:[%s12344_s2 + $0x908] sm:$0xff] }
  0xa2   :  { %v1310_v62 = vmul.f32 %v4146_v1, %v284_v47  ;;  %3353 = vst [vmem:[%s12345_s3 + $0x828] sm:$0xff] %v2329_v54  ;;  %3354 = vst [vmem:[%s12345_s3 + $0x830] sm:$0xff] %v2330_v55  ;;  %v2332_v3 = vadd.f32 %v4151_v2, %v1306_v56  ;;  %v2333_v4 = vadd.f32 %v4151_v2, %v1307_v57  ;;  %v306_v55 = vld [vmem:[%s12344_s2 + $0x910] sm:$0xff]  ;;  %v307_v56 = vld [vmem:[%s12344_s2 + $0x918] sm:$0xff] }
  0xa3   :  { %v1311_v5 = vmul.f32 %v4146_v1, %v285_v52  ;;  %v1312_v6 = vmul.f32 %v4146_v1, %v286_v53  ;;  %3355 = vst [vmem:[%s12345_s3 + $0x838] sm:$0xff] %v2331_v59  ;;  %v2334_v10 = vadd.f32 %v4151_v2, %v1308_v60  ;;  %v2335_v11 = vadd.f32 %v4151_v2, %v1309_v61  ;;  %v308_v57 = vld [vmem:[%s12344_s2 + $0x920] sm:$0xff] }
  0xa4   :  { %v2336_v12 = vadd.f32 %v4151_v2, %v1310_v62  ;;  %v1313_v13 = vmul.f32 %v4146_v1, %v287_v58  ;;  %3356 = vst [vmem:[%s12345_s3 + $0x840] sm:$0xff] %v2332_v3  ;;  %3357 = vst [vmem:[%s12345_s3 + $0x848] sm:$0xff] %v2333_v4  ;;  %v1314_v18 = vmul.f32 %v4146_v1, %v288_v63  ;;  %v309_v62 = vld [vmem:[%s12344_s2 + $0x928] sm:$0xff]  ;;  %v310_v63 = vld [vmem:[%s12344_s2 + $0x930] sm:$0xff] }
  0xa5   :  { %v2337_v16 = vadd.f32 %v4151_v2, %v1311_v5  ;;  %v2338_v17 = vadd.f32 %v4151_v2, %v1312_v6  ;;  %v1315_v19 = vmul.f32 %v4146_v1, %v289_v0  ;;  %3358 = vst [vmem:[%s12345_s3 + $0x850] sm:$0xff] %v2334_v10  ;;  %3359 = vst [vmem:[%s12345_s3 + $0x858] sm:$0xff] %v2335_v11  ;;  %v311_v6 = vld [vmem:[%s12344_s2 + $0x938] sm:$0xff]  ;;  %v312_v11 = vld [vmem:[%s12344_s2 + $0x940] sm:$0xff] }
  0xa6   :  { %3360 = vst [vmem:[%s12345_s3 + $0x860] sm:$0xff] %v2336_v12  ;;  %v2339_v21 = vadd.f32 %v4151_v2, %v1313_v13  ;;  %v1316_v22 = vmul.f32 %v4146_v1, %v290_v7  ;;  %v1317_v23 = vmul.f32 %v4146_v1, %v291_v8  ;;  %v1318_v24 = vmul.f32 %v4146_v1, %v292_v9  ;;  %v313_v12 = vld [vmem:[%s12344_s2 + $0x948] sm:$0xff] }
  0xa7   :  { %3361 = vst [vmem:[%s12345_s3 + $0x868] sm:$0xff] %v2337_v16  ;;  %3362 = vst [vmem:[%s12345_s3 + $0x870] sm:$0xff] %v2338_v17  ;;  %v2340_v27 = vadd.f32 %v4151_v2, %v1314_v18  ;;  %v2341_v28 = vadd.f32 %v4151_v2, %v1315_v19  ;;  %v1319_v29 = vmul.f32 %v4146_v1, %v293_v14  ;;  %v314_v17 = vld [vmem:[%s12344_s2 + $0x950] sm:$0xff]  ;;  %v315_v18 = vld [vmem:[%s12344_s2 + $0x958] sm:$0xff] }
  0xa8   :  { %v1320_v30 = vmul.f32 %v4146_v1, %v294_v15  ;;  %3363 = vst [vmem:[%s12345_s3 + $0x878] sm:$0xff] %v2339_v21  ;;  %v2342_v34 = vadd.f32 %v4151_v2, %v1316_v22  ;;  %v2343_v35 = vadd.f32 %v4151_v2, %v1317_v23  ;;  %v2344_v36 = vadd.f32 %v4151_v2, %v1318_v24  ;;  %v316_v19 = vld [vmem:[%s12344_s2 + $0x960] sm:$0xff]  ;;  %v317_v24 = vld [vmem:[%s12344_s2 + $0x968] sm:$0xff] }
  0xa9   :  { %v1321_v37 = vmul.f32 %v4146_v1, %v295_v20  ;;  %3364 = vst [vmem:[%s12345_s3 + $0x880] sm:$0xff] %v2340_v27  ;;  %3365 = vst [vmem:[%s12345_s3 + $0x888] sm:$0xff] %v2341_v28  ;;  %v2345_v40 = vadd.f32 %v4151_v2, %v1319_v29  ;;  %v1322_v42 = vmul.f32 %v4146_v1, %v296_v25  ;;  %v318_v25 = vld [vmem:[%s12344_s2 + $0x970] sm:$0xff] }
  0xaa   :  { %v2346_v41 = vadd.f32 %v4151_v2, %v1320_v30  ;;  %v1323_v43 = vmul.f32 %v4146_v1, %v297_v26  ;;  %3366 = vst [vmem:[%s12345_s3 + $0x890] sm:$0xff] %v2342_v34  ;;  %3367 = vst [vmem:[%s12345_s3 + $0x898] sm:$0xff] %v2343_v35  ;;  %v1324_v46 = vmul.f32 %v4146_v1, %v298_v31  ;;  %v319_v30 = vld [vmem:[%s12344_s2 + $0x978] sm:$0xff]  ;;  %v320_v35 = vld [vmem:[%s12344_s2 + $0x980] sm:$0xff] }
  0xab   :  { %3368 = vst [vmem:[%s12345_s3 + $0x8a0] sm:$0xff] %v2344_v36  ;;  %v2347_v45 = vadd.f32 %v4151_v2, %v1321_v37  ;;  %v1325_v47 = vmul.f32 %v4146_v1, %v299_v32  ;;  %v1326_v48 = vmul.f32 %v4146_v1, %v300_v33  ;;  %3369 = vst [vmem:[%s12345_s3 + $0x8a8] sm:$0xff] %v2345_v40  ;;  %v321_v36 = vld [vmem:[%s12344_s2 + $0x988] sm:$0xff] }
  0xac   :  { %3370 = vst [vmem:[%s12345_s3 + $0x8b0] sm:$0xff] %v2346_v41  ;;  %v2348_v51 = vadd.f32 %v4151_v2, %v1322_v42  ;;  %v2349_v52 = vadd.f32 %v4151_v2, %v1323_v43  ;;  %v1327_v53 = vmul.f32 %v4146_v1, %v301_v38  ;;  %v1328_v54 = vmul.f32 %v4146_v1, %v302_v39  ;;  %v322_v41 = vld [vmem:[%s12344_s2 + $0x990] sm:$0xff]  ;;  %v323_v42 = vld [vmem:[%s12344_s2 + $0x998] sm:$0xff]  ;;  %v324_v43 = vld [vmem:[%s12344_s2 + $0x9a0] sm:$0xff] }
  0xad   :  { %3371 = vst [vmem:[%s12345_s3 + $0x8b8] sm:$0xff] %v2347_v45  ;;  %v2350_v58 = vadd.f32 %v4151_v2, %v1324_v46  ;;  %v2351_v59 = vadd.f32 %v4151_v2, %v1325_v47  ;;  %v2352_v60 = vadd.f32 %v4151_v2, %v1326_v48  ;;  %v1329_v61 = vmul.f32 %v4146_v1, %v303_v44  ;;  %v325_v48 = vld [vmem:[%s12344_s2 + $0x9a8] sm:$0xff] }
  0xae   :  { %3372 = vst [vmem:[%s12345_s3 + $0x8c0] sm:$0xff] %v2348_v51  ;;  %3373 = vst [vmem:[%s12345_s3 + $0x8c8] sm:$0xff] %v2349_v52  ;;  %v2353_v0 = vadd.f32 %v4151_v2, %v1327_v53  ;;  %v2354_v3 = vadd.f32 %v4151_v2, %v1328_v54  ;;  %v1330_v4 = vmul.f32 %v4146_v1, %v304_v49  ;;  %v326_v49 = vld [vmem:[%s12344_s2 + $0x9b0] sm:$0xff]  ;;  %v327_v54 = vld [vmem:[%s12344_s2 + $0x9b8] sm:$0xff] }
  0xaf   :  { %v1331_v5 = vmul.f32 %v4146_v1, %v305_v50  ;;  %3374 = vst [vmem:[%s12345_s3 + $0x8d0] sm:$0xff] %v2350_v58  ;;  %3375 = vst [vmem:[%s12345_s3 + $0x8d8] sm:$0xff] %v2351_v59  ;;  %v2355_v7 = vadd.f32 %v4151_v2, %v1329_v61  ;;  %v1332_v8 = vmul.f32 %v4146_v1, %v306_v55  ;;  %v328_v59 = vld [vmem:[%s12344_s2 + $0x9c0] sm:$0xff] }
  0xb0   :  { %3376 = vst [vmem:[%s12345_s3 + $0x8e0] sm:$0xff] %v2352_v60  ;;  %v1333_v9 = vmul.f32 %v4146_v1, %v307_v56  ;;  %v1334_v10 = vmul.f32 %v4146_v1, %v308_v57  ;;  %3377 = vst [vmem:[%s12345_s3 + $0x8e8] sm:$0xff] %v2353_v0  ;;  %v2356_v13 = vadd.f32 %v4151_v2, %v1330_v4  ;;  %v329_v60 = vld [vmem:[%s12344_s2 + $0x9c8] sm:$0xff]  ;;  %v331_v4 = vld [vmem:[%s12344_s2 + $0x9d8] sm:$0xff] }
  0xb1   :  { %3378 = vst [vmem:[%s12345_s3 + $0x8f0] sm:$0xff] %v2354_v3  ;;  %v2357_v14 = vadd.f32 %v4151_v2, %v1331_v5  ;;  %v1335_v15 = vmul.f32 %v4146_v1, %v309_v62  ;;  %v1336_v16 = vmul.f32 %v4146_v1, %v310_v63  ;;  %3379 = vst [vmem:[%s12345_s3 + $0x8f8] sm:$0xff] %v2355_v7  ;;  %v330_v3 = vld [vmem:[%s12344_s2 + $0x9d0] sm:$0xff]  ;;  %v332_v5 = vld [vmem:[%s12344_s2 + $0x9e0] sm:$0xff] }
  0xb2   :  { %v2358_v20 = vadd.f32 %v4151_v2, %v1332_v8  ;;  %v2359_v21 = vadd.f32 %v4151_v2, %v1333_v9  ;;  %v2360_v22 = vadd.f32 %v4151_v2, %v1334_v10  ;;  %v1337_v23 = vmul.f32 %v4146_v1, %v311_v6  ;;  %3380 = vst [vmem:[%s12345_s3 + $0x900] sm:$0xff] %v2356_v13  ;;  %v333_v10 = vld [vmem:[%s12344_s2 + $0x9e8] sm:$0xff] }
  0xb3   :  { %3381 = vst [vmem:[%s12345_s3 + $0x908] sm:$0xff] %v2357_v14  ;;  %v2361_v26 = vadd.f32 %v4151_v2, %v1335_v15  ;;  %v2362_v27 = vadd.f32 %v4151_v2, %v1336_v16  ;;  %v1338_v28 = vmul.f32 %v4146_v1, %v312_v11  ;;  %v1339_v29 = vmul.f32 %v4146_v1, %v313_v12  ;;  %v334_v11 = vld [vmem:[%s12344_s2 + $0x9f0] sm:$0xff]  ;;  %v335_v16 = vld [vmem:[%s12344_s2 + $0x9f8] sm:$0xff] }
  0xb4   :  { %3382 = vst [vmem:[%s12345_s3 + $0x910] sm:$0xff] %v2358_v20  ;;  %3383 = vst [vmem:[%s12345_s3 + $0x918] sm:$0xff] %v2359_v21  ;;  %v2363_v31 = vadd.f32 %v4151_v2, %v1337_v23  ;;  %v1340_v32 = vmul.f32 %v4146_v1, %v314_v17  ;;  %v1341_v33 = vmul.f32 %v4146_v1, %v315_v18  ;;  %v336_v21 = vld [vmem:[%s12344_s2 + $0xa00] sm:$0xff] }
  0xb5   :  { %3384 = vst [vmem:[%s12345_s3 + $0x920] sm:$0xff] %v2360_v22  ;;  %v1342_v34 = vmul.f32 %v4146_v1, %v316_v19  ;;  %3385 = vst [vmem:[%s12345_s3 + $0x928] sm:$0xff] %v2361_v26  ;;  %v2364_v37 = vadd.f32 %v4151_v2, %v1338_v28  ;;  %v2365_v38 = vadd.f32 %v4151_v2, %v1339_v29  ;;  %v337_v22 = vld [vmem:[%s12344_s2 + $0xa08] sm:$0xff]  ;;  %v339_v28 = vld [vmem:[%s12344_s2 + $0xa18] sm:$0xff] }
  0xb6   :  { %3386 = vst [vmem:[%s12345_s3 + $0x930] sm:$0xff] %v2362_v27  ;;  %v1343_v39 = vmul.f32 %v4146_v1, %v317_v24  ;;  %v1344_v40 = vmul.f32 %v4146_v1, %v318_v25  ;;  %3387 = vst [vmem:[%s12345_s3 + $0x938] sm:$0xff] %v2363_v31  ;;  %v2366_v44 = vadd.f32 %v4151_v2, %v1340_v32  ;;  %v338_v27 = vld [vmem:[%s12344_s2 + $0xa10] sm:$0xff]  ;;  %v340_v29 = vld [vmem:[%s12344_s2 + $0xa20] sm:$0xff] }
  0xb7   :  { %v2367_v45 = vadd.f32 %v4151_v2, %v1341_v33  ;;  %v2368_v46 = vadd.f32 %v4151_v2, %v1342_v34  ;;  %v1345_v47 = vmul.f32 %v4146_v1, %v319_v30  ;;  %3388 = vst [vmem:[%s12345_s3 + $0x940] sm:$0xff] %v2364_v37  ;;  %3389 = vst [vmem:[%s12345_s3 + $0x948] sm:$0xff] %v2365_v38  ;;  %v341_v34 = vld [vmem:[%s12344_s2 + $0xa28] sm:$0xff] }
  0xb8   :  { %v2369_v50 = vadd.f32 %v4151_v2, %v1343_v39  ;;  %v2370_v51 = vadd.f32 %v4151_v2, %v1344_v40  ;;  %v1346_v52 = vmul.f32 %v4146_v1, %v320_v35  ;;  %v1347_v53 = vmul.f32 %v4146_v1, %v321_v36  ;;  %3390 = vst [vmem:[%s12345_s3 + $0x950] sm:$0xff] %v2366_v44  ;;  %v342_v35 = vld [vmem:[%s12344_s2 + $0xa30] sm:$0xff]  ;;  %v343_v40 = vld [vmem:[%s12344_s2 + $0xa38] sm:$0xff] }
  0xb9   :  { %3391 = vst [vmem:[%s12345_s3 + $0x958] sm:$0xff] %v2367_v45  ;;  %3392 = vst [vmem:[%s12345_s3 + $0x960] sm:$0xff] %v2368_v46  ;;  %v2371_v55 = vadd.f32 %v4151_v2, %v1345_v47  ;;  %v1348_v56 = vmul.f32 %v4146_v1, %v322_v41  ;;  %v1349_v57 = vmul.f32 %v4146_v1, %v323_v42  ;;  %v344_v45 = vld [vmem:[%s12344_s2 + $0xa40] sm:$0xff]  ;;  %v345_v46 = vld [vmem:[%s12344_s2 + $0xa48] sm:$0xff] }
  0xba   :  { %v1350_v58 = vmul.f32 %v4146_v1, %v324_v43  ;;  %3393 = vst [vmem:[%s12345_s3 + $0x968] sm:$0xff] %v2369_v50  ;;  %3394 = vst [vmem:[%s12345_s3 + $0x970] sm:$0xff] %v2370_v51  ;;  %v2372_v61 = vadd.f32 %v4151_v2, %v1346_v52  ;;  %v2373_v62 = vadd.f32 %v4151_v2, %v1347_v53  ;;  %v346_v51 = vld [vmem:[%s12344_s2 + $0xa50] sm:$0xff]  ;;  %v347_v52 = vld [vmem:[%s12344_s2 + $0xa58] sm:$0xff] }
  0xbb   :  { %v1351_v63 = vmul.f32 %v4146_v1, %v325_v48  ;;  %v1352_v0 = vmul.f32 %v4146_v1, %v326_v49  ;;  %3395 = vst [vmem:[%s12345_s3 + $0x978] sm:$0xff] %v2371_v55  ;;  %v2374_v6 = vadd.f32 %v4151_v2, %v1348_v56  ;;  %v2375_v7 = vadd.f32 %v4151_v2, %v1349_v57  ;;  %v348_v53 = vld [vmem:[%s12344_s2 + $0xa60] sm:$0xff] }
  0xbc   :  { %v2376_v8 = vadd.f32 %v4151_v2, %v1350_v58  ;;  %v1353_v9 = vmul.f32 %v4146_v1, %v327_v54  ;;  %3396 = vst [vmem:[%s12345_s3 + $0x980] sm:$0xff] %v2372_v61  ;;  %3397 = vst [vmem:[%s12345_s3 + $0x988] sm:$0xff] %v2373_v62  ;;  %v1354_v14 = vmul.f32 %v4146_v1, %v328_v59  ;;  %v349_v58 = vld [vmem:[%s12344_s2 + $0xa68] sm:$0xff]  ;;  %v350_v59 = vld [vmem:[%s12344_s2 + $0xa70] sm:$0xff] }
  0xbd   :  { %v2377_v12 = vadd.f32 %v4151_v2, %v1351_v63  ;;  %v2378_v13 = vadd.f32 %v4151_v2, %v1352_v0  ;;  %v1355_v15 = vmul.f32 %v4146_v1, %v329_v60  ;;  %3398 = vst [vmem:[%s12345_s3 + $0x990] sm:$0xff] %v2374_v6  ;;  %3399 = vst [vmem:[%s12345_s3 + $0x998] sm:$0xff] %v2375_v7  ;;  %v351_v0 = vld [vmem:[%s12344_s2 + $0xa78] sm:$0xff]  ;;  %v352_v7 = vld [vmem:[%s12344_s2 + $0xa80] sm:$0xff] }
  0xbe   :  { %3400 = vst [vmem:[%s12345_s3 + $0x9a0] sm:$0xff] %v2376_v8  ;;  %v2379_v17 = vadd.f32 %v4151_v2, %v1353_v9  ;;  %v1356_v18 = vmul.f32 %v4146_v1, %v330_v3  ;;  %v1357_v19 = vmul.f32 %v4146_v1, %v331_v4  ;;  %v1358_v20 = vmul.f32 %v4146_v1, %v332_v5  ;;  %v353_v8 = vld [vmem:[%s12344_s2 + $0xa88] sm:$0xff] }
  0xbf   :  { %3401 = vst [vmem:[%s12345_s3 + $0x9a8] sm:$0xff] %v2377_v12  ;;  %3402 = vst [vmem:[%s12345_s3 + $0x9b0] sm:$0xff] %v2378_v13  ;;  %v2380_v23 = vadd.f32 %v4151_v2, %v1354_v14  ;;  %v2381_v24 = vadd.f32 %v4151_v2, %v1355_v15  ;;  %v1359_v25 = vmul.f32 %v4146_v1, %v333_v10  ;;  %v354_v13 = vld [vmem:[%s12344_s2 + $0xa90] sm:$0xff]  ;;  %v355_v14 = vld [vmem:[%s12344_s2 + $0xa98] sm:$0xff] }
  0xc0   :  { %v1360_v26 = vmul.f32 %v4146_v1, %v334_v11  ;;  %3403 = vst [vmem:[%s12345_s3 + $0x9b8] sm:$0xff] %v2379_v17  ;;  %v2382_v30 = vadd.f32 %v4151_v2, %v1356_v18  ;;  %v2383_v31 = vadd.f32 %v4151_v2, %v1357_v19  ;;  %v2384_v32 = vadd.f32 %v4151_v2, %v1358_v20  ;;  %v356_v15 = vld [vmem:[%s12344_s2 + $0xaa0] sm:$0xff]  ;;  %v357_v20 = vld [vmem:[%s12344_s2 + $0xaa8] sm:$0xff] }
  0xc1   :  { %v1361_v33 = vmul.f32 %v4146_v1, %v335_v16  ;;  %3404 = vst [vmem:[%s12345_s3 + $0x9c0] sm:$0xff] %v2380_v23  ;;  %3405 = vst [vmem:[%s12345_s3 + $0x9c8] sm:$0xff] %v2381_v24  ;;  %v2385_v36 = vadd.f32 %v4151_v2, %v1359_v25  ;;  %v1362_v38 = vmul.f32 %v4146_v1, %v336_v21  ;;  %v358_v21 = vld [vmem:[%s12344_s2 + $0xab0] sm:$0xff] }
  0xc2   :  { %v2386_v37 = vadd.f32 %v4151_v2, %v1360_v26  ;;  %v1363_v39 = vmul.f32 %v4146_v1, %v337_v22  ;;  %3406 = vst [vmem:[%s12345_s3 + $0x9d0] sm:$0xff] %v2382_v30  ;;  %3407 = vst [vmem:[%s12345_s3 + $0x9d8] sm:$0xff] %v2383_v31  ;;  %v1364_v42 = vmul.f32 %v4146_v1, %v338_v27  ;;  %v359_v26 = vld [vmem:[%s12344_s2 + $0xab8] sm:$0xff]  ;;  %v360_v31 = vld [vmem:[%s12344_s2 + $0xac0] sm:$0xff] }
  0xc3   :  { %3408 = vst [vmem:[%s12345_s3 + $0x9e0] sm:$0xff] %v2384_v32  ;;  %v2387_v41 = vadd.f32 %v4151_v2, %v1361_v33  ;;  %v1365_v43 = vmul.f32 %v4146_v1, %v339_v28  ;;  %v1366_v44 = vmul.f32 %v4146_v1, %v340_v29  ;;  %3409 = vst [vmem:[%s12345_s3 + $0x9e8] sm:$0xff] %v2385_v36  ;;  %v361_v32 = vld [vmem:[%s12344_s2 + $0xac8] sm:$0xff] }
  0xc4   :  { %3410 = vst [vmem:[%s12345_s3 + $0x9f0] sm:$0xff] %v2386_v37  ;;  %v2388_v47 = vadd.f32 %v4151_v2, %v1362_v38  ;;  %v2389_v48 = vadd.f32 %v4151_v2, %v1363_v39  ;;  %v1367_v49 = vmul.f32 %v4146_v1, %v341_v34  ;;  %v1368_v50 = vmul.f32 %v4146_v1, %v342_v35  ;;  %v362_v37 = vld [vmem:[%s12344_s2 + $0xad0] sm:$0xff]  ;;  %v363_v38 = vld [vmem:[%s12344_s2 + $0xad8] sm:$0xff]  ;;  %v364_v39 = vld [vmem:[%s12344_s2 + $0xae0] sm:$0xff] }
  0xc5   :  { %3411 = vst [vmem:[%s12345_s3 + $0x9f8] sm:$0xff] %v2387_v41  ;;  %v2390_v54 = vadd.f32 %v4151_v2, %v1364_v42  ;;  %v2391_v55 = vadd.f32 %v4151_v2, %v1365_v43  ;;  %v2392_v56 = vadd.f32 %v4151_v2, %v1366_v44  ;;  %v1369_v57 = vmul.f32 %v4146_v1, %v343_v40  ;;  %v365_v44 = vld [vmem:[%s12344_s2 + $0xae8] sm:$0xff] }
  0xc6   :  { %3412 = vst [vmem:[%s12345_s3 + $0xa00] sm:$0xff] %v2388_v47  ;;  %3413 = vst [vmem:[%s12345_s3 + $0xa08] sm:$0xff] %v2389_v48  ;;  %v2393_v60 = vadd.f32 %v4151_v2, %v1367_v49  ;;  %v2394_v61 = vadd.f32 %v4151_v2, %v1368_v50  ;;  %v1370_v62 = vmul.f32 %v4146_v1, %v344_v45  ;;  %v366_v45 = vld [vmem:[%s12344_s2 + $0xaf0] sm:$0xff]  ;;  %v367_v50 = vld [vmem:[%s12344_s2 + $0xaf8] sm:$0xff] }
  0xc7   :  { %v1371_v63 = vmul.f32 %v4146_v1, %v345_v46  ;;  %3414 = vst [vmem:[%s12345_s3 + $0xa10] sm:$0xff] %v2390_v54  ;;  %3415 = vst [vmem:[%s12345_s3 + $0xa18] sm:$0xff] %v2391_v55  ;;  %v2395_v3 = vadd.f32 %v4151_v2, %v1369_v57  ;;  %v1372_v4 = vmul.f32 %v4146_v1, %v346_v51  ;;  %v368_v55 = vld [vmem:[%s12344_s2 + $0xb00] sm:$0xff] }
  0xc8   :  { %3416 = vst [vmem:[%s12345_s3 + $0xa20] sm:$0xff] %v2392_v56  ;;  %v1373_v5 = vmul.f32 %v4146_v1, %v347_v52  ;;  %v1374_v6 = vmul.f32 %v4146_v1, %v348_v53  ;;  %3417 = vst [vmem:[%s12345_s3 + $0xa28] sm:$0xff] %v2393_v60  ;;  %v2396_v9 = vadd.f32 %v4151_v2, %v1370_v62  ;;  %v369_v56 = vld [vmem:[%s12344_s2 + $0xb08] sm:$0xff]  ;;  %v371_v62 = vld [vmem:[%s12344_s2 + $0xb18] sm:$0xff] }
  0xc9   :  { %3418 = vst [vmem:[%s12345_s3 + $0xa30] sm:$0xff] %v2394_v61  ;;  %v2397_v10 = vadd.f32 %v4151_v2, %v1371_v63  ;;  %v1375_v11 = vmul.f32 %v4146_v1, %v349_v58  ;;  %v1376_v12 = vmul.f32 %v4146_v1, %v350_v59  ;;  %3419 = vst [vmem:[%s12345_s3 + $0xa38] sm:$0xff] %v2395_v3  ;;  %v370_v61 = vld [vmem:[%s12344_s2 + $0xb10] sm:$0xff]  ;;  %v372_v63 = vld [vmem:[%s12344_s2 + $0xb20] sm:$0xff] }
  0xca   :  { %v2398_v16 = vadd.f32 %v4151_v2, %v1372_v4  ;;  %v2399_v17 = vadd.f32 %v4151_v2, %v1373_v5  ;;  %v2400_v18 = vadd.f32 %v4151_v2, %v1374_v6  ;;  %v1377_v19 = vmul.f32 %v4146_v1, %v351_v0  ;;  %3420 = vst [vmem:[%s12345_s3 + $0xa40] sm:$0xff] %v2396_v9  ;;  %v373_v6 = vld [vmem:[%s12344_s2 + $0xb28] sm:$0xff] }
  0xcb   :  { %3421 = vst [vmem:[%s12345_s3 + $0xa48] sm:$0xff] %v2397_v10  ;;  %v2401_v22 = vadd.f32 %v4151_v2, %v1375_v11  ;;  %v2402_v23 = vadd.f32 %v4151_v2, %v1376_v12  ;;  %v1378_v24 = vmul.f32 %v4146_v1, %v352_v7  ;;  %v1379_v25 = vmul.f32 %v4146_v1, %v353_v8  ;;  %v374_v7 = vld [vmem:[%s12344_s2 + $0xb30] sm:$0xff]  ;;  %v375_v12 = vld [vmem:[%s12344_s2 + $0xb38] sm:$0xff] }
  0xcc   :  { %3422 = vst [vmem:[%s12345_s3 + $0xa50] sm:$0xff] %v2398_v16  ;;  %3423 = vst [vmem:[%s12345_s3 + $0xa58] sm:$0xff] %v2399_v17  ;;  %v2403_v27 = vadd.f32 %v4151_v2, %v1377_v19  ;;  %v1380_v28 = vmul.f32 %v4146_v1, %v354_v13  ;;  %v1381_v29 = vmul.f32 %v4146_v1, %v355_v14  ;;  %v376_v17 = vld [vmem:[%s12344_s2 + $0xb40] sm:$0xff] }
  0xcd   :  { %3424 = vst [vmem:[%s12345_s3 + $0xa60] sm:$0xff] %v2400_v18  ;;  %v1382_v30 = vmul.f32 %v4146_v1, %v356_v15  ;;  %3425 = vst [vmem:[%s12345_s3 + $0xa68] sm:$0xff] %v2401_v22  ;;  %v2404_v33 = vadd.f32 %v4151_v2, %v1378_v24  ;;  %v2405_v34 = vadd.f32 %v4151_v2, %v1379_v25  ;;  %v377_v18 = vld [vmem:[%s12344_s2 + $0xb48] sm:$0xff]  ;;  %v379_v24 = vld [vmem:[%s12344_s2 + $0xb58] sm:$0xff] }
  0xce   :  { %3426 = vst [vmem:[%s12345_s3 + $0xa70] sm:$0xff] %v2402_v23  ;;  %v1383_v35 = vmul.f32 %v4146_v1, %v357_v20  ;;  %v1384_v36 = vmul.f32 %v4146_v1, %v358_v21  ;;  %3427 = vst [vmem:[%s12345_s3 + $0xa78] sm:$0xff] %v2403_v27  ;;  %v2406_v40 = vadd.f32 %v4151_v2, %v1380_v28  ;;  %v378_v23 = vld [vmem:[%s12344_s2 + $0xb50] sm:$0xff]  ;;  %v380_v25 = vld [vmem:[%s12344_s2 + $0xb60] sm:$0xff] }
  0xcf   :  { %v2407_v41 = vadd.f32 %v4151_v2, %v1381_v29  ;;  %v2408_v42 = vadd.f32 %v4151_v2, %v1382_v30  ;;  %v1385_v43 = vmul.f32 %v4146_v1, %v359_v26  ;;  %3428 = vst [vmem:[%s12345_s3 + $0xa80] sm:$0xff] %v2404_v33  ;;  %3429 = vst [vmem:[%s12345_s3 + $0xa88] sm:$0xff] %v2405_v34  ;;  %v381_v30 = vld [vmem:[%s12344_s2 + $0xb68] sm:$0xff] }
  0xd0   :  { %v2409_v46 = vadd.f32 %v4151_v2, %v1383_v35  ;;  %v2410_v47 = vadd.f32 %v4151_v2, %v1384_v36  ;;  %v1386_v48 = vmul.f32 %v4146_v1, %v360_v31  ;;  %v1387_v49 = vmul.f32 %v4146_v1, %v361_v32  ;;  %3430 = vst [vmem:[%s12345_s3 + $0xa90] sm:$0xff] %v2406_v40  ;;  %v382_v31 = vld [vmem:[%s12344_s2 + $0xb70] sm:$0xff]  ;;  %v383_v36 = vld [vmem:[%s12344_s2 + $0xb78] sm:$0xff] }
  0xd1   :  { %3431 = vst [vmem:[%s12345_s3 + $0xa98] sm:$0xff] %v2407_v41  ;;  %3432 = vst [vmem:[%s12345_s3 + $0xaa0] sm:$0xff] %v2408_v42  ;;  %v2411_v51 = vadd.f32 %v4151_v2, %v1385_v43  ;;  %v1388_v52 = vmul.f32 %v4146_v1, %v362_v37  ;;  %v1389_v53 = vmul.f32 %v4146_v1, %v363_v38  ;;  %v384_v41 = vld [vmem:[%s12344_s2 + $0xb80] sm:$0xff]  ;;  %v385_v42 = vld [vmem:[%s12344_s2 + $0xb88] sm:$0xff] }
  0xd2   :  { %v1390_v54 = vmul.f32 %v4146_v1, %v364_v39  ;;  %3433 = vst [vmem:[%s12345_s3 + $0xaa8] sm:$0xff] %v2409_v46  ;;  %3434 = vst [vmem:[%s12345_s3 + $0xab0] sm:$0xff] %v2410_v47  ;;  %v2412_v57 = vadd.f32 %v4151_v2, %v1386_v48  ;;  %v2413_v58 = vadd.f32 %v4151_v2, %v1387_v49  ;;  %v386_v47 = vld [vmem:[%s12344_s2 + $0xb90] sm:$0xff]  ;;  %v387_v48 = vld [vmem:[%s12344_s2 + $0xb98] sm:$0xff] }
  0xd3   :  { %v1391_v59 = vmul.f32 %v4146_v1, %v365_v44  ;;  %v1392_v60 = vmul.f32 %v4146_v1, %v366_v45  ;;  %3435 = vst [vmem:[%s12345_s3 + $0xab8] sm:$0xff] %v2411_v51  ;;  %v2414_v0 = vadd.f32 %v4151_v2, %v1388_v52  ;;  %v2415_v3 = vadd.f32 %v4151_v2, %v1389_v53  ;;  %v388_v49 = vld [vmem:[%s12344_s2 + $0xba0] sm:$0xff] }
  0xd4   :  { %v2416_v4 = vadd.f32 %v4151_v2, %v1390_v54  ;;  %v1393_v5 = vmul.f32 %v4146_v1, %v367_v50  ;;  %3436 = vst [vmem:[%s12345_s3 + $0xac0] sm:$0xff] %v2412_v57  ;;  %3437 = vst [vmem:[%s12345_s3 + $0xac8] sm:$0xff] %v2413_v58  ;;  %v1394_v10 = vmul.f32 %v4146_v1, %v368_v55  ;;  %v389_v54 = vld [vmem:[%s12344_s2 + $0xba8] sm:$0xff]  ;;  %v390_v55 = vld [vmem:[%s12344_s2 + $0xbb0] sm:$0xff] }
  0xd5   :  { %v2417_v8 = vadd.f32 %v4151_v2, %v1391_v59  ;;  %v2418_v9 = vadd.f32 %v4151_v2, %v1392_v60  ;;  %v1395_v11 = vmul.f32 %v4146_v1, %v369_v56  ;;  %3438 = vst [vmem:[%s12345_s3 + $0xad0] sm:$0xff] %v2414_v0  ;;  %3439 = vst [vmem:[%s12345_s3 + $0xad8] sm:$0xff] %v2415_v3  ;;  %v391_v60 = vld [vmem:[%s12344_s2 + $0xbb8] sm:$0xff]  ;;  %v392_v3 = vld [vmem:[%s12344_s2 + $0xbc0] sm:$0xff] }
  0xd6   :  { %3440 = vst [vmem:[%s12345_s3 + $0xae0] sm:$0xff] %v2416_v4  ;;  %v2419_v13 = vadd.f32 %v4151_v2, %v1393_v5  ;;  %v1396_v14 = vmul.f32 %v4146_v1, %v370_v61  ;;  %v1397_v15 = vmul.f32 %v4146_v1, %v371_v62  ;;  %v1398_v16 = vmul.f32 %v4146_v1, %v372_v63  ;;  %v393_v4 = vld [vmem:[%s12344_s2 + $0xbc8] sm:$0xff] }
  0xd7   :  { %3441 = vst [vmem:[%s12345_s3 + $0xae8] sm:$0xff] %v2417_v8  ;;  %3442 = vst [vmem:[%s12345_s3 + $0xaf0] sm:$0xff] %v2418_v9  ;;  %v2420_v19 = vadd.f32 %v4151_v2, %v1394_v10  ;;  %v2421_v20 = vadd.f32 %v4151_v2, %v1395_v11  ;;  %v1399_v21 = vmul.f32 %v4146_v1, %v373_v6  ;;  %v394_v9 = vld [vmem:[%s12344_s2 + $0xbd0] sm:$0xff]  ;;  %v395_v10 = vld [vmem:[%s12344_s2 + $0xbd8] sm:$0xff] }
  0xd8   :  { %v1400_v22 = vmul.f32 %v4146_v1, %v374_v7  ;;  %3443 = vst [vmem:[%s12345_s3 + $0xaf8] sm:$0xff] %v2419_v13  ;;  %v2422_v26 = vadd.f32 %v4151_v2, %v1396_v14  ;;  %v2423_v27 = vadd.f32 %v4151_v2, %v1397_v15  ;;  %v2424_v28 = vadd.f32 %v4151_v2, %v1398_v16  ;;  %v396_v11 = vld [vmem:[%s12344_s2 + $0xbe0] sm:$0xff]  ;;  %v397_v16 = vld [vmem:[%s12344_s2 + $0xbe8] sm:$0xff] }
  0xd9   :  { %v1401_v29 = vmul.f32 %v4146_v1, %v375_v12  ;;  %3444 = vst [vmem:[%s12345_s3 + $0xb00] sm:$0xff] %v2420_v19  ;;  %3445 = vst [vmem:[%s12345_s3 + $0xb08] sm:$0xff] %v2421_v20  ;;  %v2425_v32 = vadd.f32 %v4151_v2, %v1399_v21  ;;  %v1402_v34 = vmul.f32 %v4146_v1, %v376_v17  ;;  %v398_v17 = vld [vmem:[%s12344_s2 + $0xbf0] sm:$0xff] }
  0xda   :  { %v2426_v33 = vadd.f32 %v4151_v2, %v1400_v22  ;;  %v1403_v35 = vmul.f32 %v4146_v1, %v377_v18  ;;  %3446 = vst [vmem:[%s12345_s3 + $0xb10] sm:$0xff] %v2422_v26  ;;  %3447 = vst [vmem:[%s12345_s3 + $0xb18] sm:$0xff] %v2423_v27  ;;  %v1404_v38 = vmul.f32 %v4146_v1, %v378_v23  ;;  %v399_v22 = vld [vmem:[%s12344_s2 + $0xbf8] sm:$0xff]  ;;  %v400_v27 = vld [vmem:[%s12344_s2 + $0xc00] sm:$0xff] }
  0xdb   :  { %3448 = vst [vmem:[%s12345_s3 + $0xb20] sm:$0xff] %v2424_v28  ;;  %v2427_v37 = vadd.f32 %v4151_v2, %v1401_v29  ;;  %v1405_v39 = vmul.f32 %v4146_v1, %v379_v24  ;;  %v1406_v40 = vmul.f32 %v4146_v1, %v380_v25  ;;  %3449 = vst [vmem:[%s12345_s3 + $0xb28] sm:$0xff] %v2425_v32  ;;  %v401_v28 = vld [vmem:[%s12344_s2 + $0xc08] sm:$0xff] }
  0xdc   :  { %3450 = vst [vmem:[%s12345_s3 + $0xb30] sm:$0xff] %v2426_v33  ;;  %v2428_v43 = vadd.f32 %v4151_v2, %v1402_v34  ;;  %v2429_v44 = vadd.f32 %v4151_v2, %v1403_v35  ;;  %v1407_v45 = vmul.f32 %v4146_v1, %v381_v30  ;;  %v1408_v46 = vmul.f32 %v4146_v1, %v382_v31  ;;  %v402_v33 = vld [vmem:[%s12344_s2 + $0xc10] sm:$0xff]  ;;  %v403_v34 = vld [vmem:[%s12344_s2 + $0xc18] sm:$0xff]  ;;  %v404_v35 = vld [vmem:[%s12344_s2 + $0xc20] sm:$0xff] }
  0xdd   :  { %3451 = vst [vmem:[%s12345_s3 + $0xb38] sm:$0xff] %v2427_v37  ;;  %v2430_v50 = vadd.f32 %v4151_v2, %v1404_v38  ;;  %v2431_v51 = vadd.f32 %v4151_v2, %v1405_v39  ;;  %v2432_v52 = vadd.f32 %v4151_v2, %v1406_v40  ;;  %v1409_v53 = vmul.f32 %v4146_v1, %v383_v36  ;;  %v405_v40 = vld [vmem:[%s12344_s2 + $0xc28] sm:$0xff] }
  0xde   :  { %3452 = vst [vmem:[%s12345_s3 + $0xb40] sm:$0xff] %v2428_v43  ;;  %3453 = vst [vmem:[%s12345_s3 + $0xb48] sm:$0xff] %v2429_v44  ;;  %v2433_v56 = vadd.f32 %v4151_v2, %v1407_v45  ;;  %v2434_v57 = vadd.f32 %v4151_v2, %v1408_v46  ;;  %v1410_v58 = vmul.f32 %v4146_v1, %v384_v41  ;;  %v406_v41 = vld [vmem:[%s12344_s2 + $0xc30] sm:$0xff]  ;;  %v407_v46 = vld [vmem:[%s12344_s2 + $0xc38] sm:$0xff] }
  0xdf   :  { %v1411_v59 = vmul.f32 %v4146_v1, %v385_v42  ;;  %3454 = vst [vmem:[%s12345_s3 + $0xb50] sm:$0xff] %v2430_v50  ;;  %3455 = vst [vmem:[%s12345_s3 + $0xb58] sm:$0xff] %v2431_v51  ;;  %v2435_v61 = vadd.f32 %v4151_v2, %v1409_v53  ;;  %v1412_v62 = vmul.f32 %v4146_v1, %v386_v47  ;;  %v408_v51 = vld [vmem:[%s12344_s2 + $0xc40] sm:$0xff] }
  0xe0   :  { %3456 = vst [vmem:[%s12345_s3 + $0xb60] sm:$0xff] %v2432_v52  ;;  %v1413_v63 = vmul.f32 %v4146_v1, %v387_v48  ;;  %v1414_v0 = vmul.f32 %v4146_v1, %v388_v49  ;;  %3457 = vst [vmem:[%s12345_s3 + $0xb68] sm:$0xff] %v2433_v56  ;;  %v2436_v5 = vadd.f32 %v4151_v2, %v1410_v58  ;;  %v409_v52 = vld [vmem:[%s12344_s2 + $0xc48] sm:$0xff]  ;;  %v411_v58 = vld [vmem:[%s12344_s2 + $0xc58] sm:$0xff] }
  0xe1   :  { %3458 = vst [vmem:[%s12345_s3 + $0xb70] sm:$0xff] %v2434_v57  ;;  %v2437_v6 = vadd.f32 %v4151_v2, %v1411_v59  ;;  %v1415_v7 = vmul.f32 %v4146_v1, %v389_v54  ;;  %v1416_v8 = vmul.f32 %v4146_v1, %v390_v55  ;;  %3459 = vst [vmem:[%s12345_s3 + $0xb78] sm:$0xff] %v2435_v61  ;;  %v410_v57 = vld [vmem:[%s12344_s2 + $0xc50] sm:$0xff]  ;;  %v412_v59 = vld [vmem:[%s12344_s2 + $0xc60] sm:$0xff] }
  0xe2   :  { %v2438_v12 = vadd.f32 %v4151_v2, %v1412_v62  ;;  %v2439_v13 = vadd.f32 %v4151_v2, %v1413_v63  ;;  %v2440_v14 = vadd.f32 %v4151_v2, %v1414_v0  ;;  %v1417_v15 = vmul.f32 %v4146_v1, %v391_v60  ;;  %3460 = vst [vmem:[%s12345_s3 + $0xb80] sm:$0xff] %v2436_v5  ;;  %v413_v0 = vld [vmem:[%s12344_s2 + $0xc68] sm:$0xff] }
  0xe3   :  { %3461 = vst [vmem:[%s12345_s3 + $0xb88] sm:$0xff] %v2437_v6  ;;  %v2441_v18 = vadd.f32 %v4151_v2, %v1415_v7  ;;  %v2442_v19 = vadd.f32 %v4151_v2, %v1416_v8  ;;  %v1418_v20 = vmul.f32 %v4146_v1, %v392_v3  ;;  %v1419_v21 = vmul.f32 %v4146_v1, %v393_v4  ;;  %v414_v3 = vld [vmem:[%s12344_s2 + $0xc70] sm:$0xff]  ;;  %v415_v8 = vld [vmem:[%s12344_s2 + $0xc78] sm:$0xff] }
  0xe4   :  { %3462 = vst [vmem:[%s12345_s3 + $0xb90] sm:$0xff] %v2438_v12  ;;  %3463 = vst [vmem:[%s12345_s3 + $0xb98] sm:$0xff] %v2439_v13  ;;  %v2443_v23 = vadd.f32 %v4151_v2, %v1417_v15  ;;  %v1420_v24 = vmul.f32 %v4146_v1, %v394_v9  ;;  %v1421_v25 = vmul.f32 %v4146_v1, %v395_v10  ;;  %v416_v13 = vld [vmem:[%s12344_s2 + $0xc80] sm:$0xff] }
  0xe5   :  { %3464 = vst [vmem:[%s12345_s3 + $0xba0] sm:$0xff] %v2440_v14  ;;  %v1422_v26 = vmul.f32 %v4146_v1, %v396_v11  ;;  %3465 = vst [vmem:[%s12345_s3 + $0xba8] sm:$0xff] %v2441_v18  ;;  %v2444_v29 = vadd.f32 %v4151_v2, %v1418_v20  ;;  %v2445_v30 = vadd.f32 %v4151_v2, %v1419_v21  ;;  %v417_v14 = vld [vmem:[%s12344_s2 + $0xc88] sm:$0xff]  ;;  %v419_v20 = vld [vmem:[%s12344_s2 + $0xc98] sm:$0xff] }
  0xe6   :  { %3466 = vst [vmem:[%s12345_s3 + $0xbb0] sm:$0xff] %v2442_v19  ;;  %v1423_v31 = vmul.f32 %v4146_v1, %v397_v16  ;;  %v1424_v32 = vmul.f32 %v4146_v1, %v398_v17  ;;  %3467 = vst [vmem:[%s12345_s3 + $0xbb8] sm:$0xff] %v2443_v23  ;;  %v2446_v36 = vadd.f32 %v4151_v2, %v1420_v24  ;;  %v418_v19 = vld [vmem:[%s12344_s2 + $0xc90] sm:$0xff]  ;;  %v420_v21 = vld [vmem:[%s12344_s2 + $0xca0] sm:$0xff] }
  0xe7   :  { %v2447_v37 = vadd.f32 %v4151_v2, %v1421_v25  ;;  %v2448_v38 = vadd.f32 %v4151_v2, %v1422_v26  ;;  %v1425_v39 = vmul.f32 %v4146_v1, %v399_v22  ;;  %3468 = vst [vmem:[%s12345_s3 + $0xbc0] sm:$0xff] %v2444_v29  ;;  %3469 = vst [vmem:[%s12345_s3 + $0xbc8] sm:$0xff] %v2445_v30  ;;  %v421_v26 = vld [vmem:[%s12344_s2 + $0xca8] sm:$0xff] }
  0xe8   :  { %v2449_v42 = vadd.f32 %v4151_v2, %v1423_v31  ;;  %v2450_v43 = vadd.f32 %v4151_v2, %v1424_v32  ;;  %v1426_v44 = vmul.f32 %v4146_v1, %v400_v27  ;;  %v1427_v45 = vmul.f32 %v4146_v1, %v401_v28  ;;  %3470 = vst [vmem:[%s12345_s3 + $0xbd0] sm:$0xff] %v2446_v36  ;;  %v422_v27 = vld [vmem:[%s12344_s2 + $0xcb0] sm:$0xff]  ;;  %v423_v32 = vld [vmem:[%s12344_s2 + $0xcb8] sm:$0xff] }
  0xe9   :  { %3471 = vst [vmem:[%s12345_s3 + $0xbd8] sm:$0xff] %v2447_v37  ;;  %3472 = vst [vmem:[%s12345_s3 + $0xbe0] sm:$0xff] %v2448_v38  ;;  %v2451_v47 = vadd.f32 %v4151_v2, %v1425_v39  ;;  %v1428_v48 = vmul.f32 %v4146_v1, %v402_v33  ;;  %v1429_v49 = vmul.f32 %v4146_v1, %v403_v34  ;;  %v424_v37 = vld [vmem:[%s12344_s2 + $0xcc0] sm:$0xff]  ;;  %v425_v38 = vld [vmem:[%s12344_s2 + $0xcc8] sm:$0xff] }
  0xea   :  { %v1430_v50 = vmul.f32 %v4146_v1, %v404_v35  ;;  %3473 = vst [vmem:[%s12345_s3 + $0xbe8] sm:$0xff] %v2449_v42  ;;  %3474 = vst [vmem:[%s12345_s3 + $0xbf0] sm:$0xff] %v2450_v43  ;;  %v2452_v53 = vadd.f32 %v4151_v2, %v1426_v44  ;;  %v2453_v54 = vadd.f32 %v4151_v2, %v1427_v45  ;;  %v426_v43 = vld [vmem:[%s12344_s2 + $0xcd0] sm:$0xff]  ;;  %v427_v44 = vld [vmem:[%s12344_s2 + $0xcd8] sm:$0xff] }
  0xeb   :  { %v1431_v55 = vmul.f32 %v4146_v1, %v405_v40  ;;  %v1432_v56 = vmul.f32 %v4146_v1, %v406_v41  ;;  %3475 = vst [vmem:[%s12345_s3 + $0xbf8] sm:$0xff] %v2451_v47  ;;  %v2454_v60 = vadd.f32 %v4151_v2, %v1428_v48  ;;  %v2455_v61 = vadd.f32 %v4151_v2, %v1429_v49  ;;  %v428_v45 = vld [vmem:[%s12344_s2 + $0xce0] sm:$0xff] }
  0xec   :  { %v2456_v62 = vadd.f32 %v4151_v2, %v1430_v50  ;;  %v1433_v63 = vmul.f32 %v4146_v1, %v407_v46  ;;  %3476 = vst [vmem:[%s12345_s3 + $0xc00] sm:$0xff] %v2452_v53  ;;  %3477 = vst [vmem:[%s12345_s3 + $0xc08] sm:$0xff] %v2453_v54  ;;  %v1434_v6 = vmul.f32 %v4146_v1, %v408_v51  ;;  %v429_v50 = vld [vmem:[%s12344_s2 + $0xce8] sm:$0xff]  ;;  %v430_v51 = vld [vmem:[%s12344_s2 + $0xcf0] sm:$0xff] }
  0xed   :  { %v2457_v4 = vadd.f32 %v4151_v2, %v1431_v55  ;;  %v2458_v5 = vadd.f32 %v4151_v2, %v1432_v56  ;;  %v1435_v7 = vmul.f32 %v4146_v1, %v409_v52  ;;  %3478 = vst [vmem:[%s12345_s3 + $0xc10] sm:$0xff] %v2454_v60  ;;  %3479 = vst [vmem:[%s12345_s3 + $0xc18] sm:$0xff] %v2455_v61  ;;  %v431_v56 = vld [vmem:[%s12344_s2 + $0xcf8] sm:$0xff]  ;;  %v432_v61 = vld [vmem:[%s12344_s2 + $0xd00] sm:$0xff] }
  0xee   :  { %3480 = vst [vmem:[%s12345_s3 + $0xc20] sm:$0xff] %v2456_v62  ;;  %v2459_v9 = vadd.f32 %v4151_v2, %v1433_v63  ;;  %v1436_v10 = vmul.f32 %v4146_v1, %v410_v57  ;;  %v1437_v11 = vmul.f32 %v4146_v1, %v411_v58  ;;  %v1438_v12 = vmul.f32 %v4146_v1, %v412_v59  ;;  %v433_v62 = vld [vmem:[%s12344_s2 + $0xd08] sm:$0xff] }
  0xef   :  { %3481 = vst [vmem:[%s12345_s3 + $0xc28] sm:$0xff] %v2457_v4  ;;  %3482 = vst [vmem:[%s12345_s3 + $0xc30] sm:$0xff] %v2458_v5  ;;  %v2460_v15 = vadd.f32 %v4151_v2, %v1434_v6  ;;  %v2461_v16 = vadd.f32 %v4151_v2, %v1435_v7  ;;  %v1439_v17 = vmul.f32 %v4146_v1, %v413_v0  ;;  %v434_v5 = vld [vmem:[%s12344_s2 + $0xd10] sm:$0xff]  ;;  %v435_v6 = vld [vmem:[%s12344_s2 + $0xd18] sm:$0xff] }
  0xf0   :  { %v1440_v18 = vmul.f32 %v4146_v1, %v414_v3  ;;  %3483 = vst [vmem:[%s12345_s3 + $0xc38] sm:$0xff] %v2459_v9  ;;  %v2462_v22 = vadd.f32 %v4151_v2, %v1436_v10  ;;  %v2463_v23 = vadd.f32 %v4151_v2, %v1437_v11  ;;  %v2464_v24 = vadd.f32 %v4151_v2, %v1438_v12  ;;  %v436_v7 = vld [vmem:[%s12344_s2 + $0xd20] sm:$0xff]  ;;  %v437_v12 = vld [vmem:[%s12344_s2 + $0xd28] sm:$0xff] }
  0xf1   :  { %v1441_v25 = vmul.f32 %v4146_v1, %v415_v8  ;;  %3484 = vst [vmem:[%s12345_s3 + $0xc40] sm:$0xff] %v2460_v15  ;;  %3485 = vst [vmem:[%s12345_s3 + $0xc48] sm:$0xff] %v2461_v16  ;;  %v2465_v28 = vadd.f32 %v4151_v2, %v1439_v17  ;;  %v1442_v30 = vmul.f32 %v4146_v1, %v416_v13  ;;  %v438_v13 = vld [vmem:[%s12344_s2 + $0xd30] sm:$0xff] }
  0xf2   :  { %v2466_v29 = vadd.f32 %v4151_v2, %v1440_v18  ;;  %v1443_v31 = vmul.f32 %v4146_v1, %v417_v14  ;;  %3486 = vst [vmem:[%s12345_s3 + $0xc50] sm:$0xff] %v2462_v22  ;;  %3487 = vst [vmem:[%s12345_s3 + $0xc58] sm:$0xff] %v2463_v23  ;;  %v1444_v34 = vmul.f32 %v4146_v1, %v418_v19  ;;  %v439_v18 = vld [vmem:[%s12344_s2 + $0xd38] sm:$0xff]  ;;  %v440_v23 = vld [vmem:[%s12344_s2 + $0xd40] sm:$0xff] }
  0xf3   :  { %3488 = vst [vmem:[%s12345_s3 + $0xc60] sm:$0xff] %v2464_v24  ;;  %v2467_v33 = vadd.f32 %v4151_v2, %v1441_v25  ;;  %v1445_v35 = vmul.f32 %v4146_v1, %v419_v20  ;;  %v1446_v36 = vmul.f32 %v4146_v1, %v420_v21  ;;  %3489 = vst [vmem:[%s12345_s3 + $0xc68] sm:$0xff] %v2465_v28  ;;  %v441_v24 = vld [vmem:[%s12344_s2 + $0xd48] sm:$0xff] }
  0xf4   :  { %3490 = vst [vmem:[%s12345_s3 + $0xc70] sm:$0xff] %v2466_v29  ;;  %v2468_v39 = vadd.f32 %v4151_v2, %v1442_v30  ;;  %v2469_v40 = vadd.f32 %v4151_v2, %v1443_v31  ;;  %v1447_v41 = vmul.f32 %v4146_v1, %v421_v26  ;;  %v1448_v42 = vmul.f32 %v4146_v1, %v422_v27  ;;  %v442_v29 = vld [vmem:[%s12344_s2 + $0xd50] sm:$0xff]  ;;  %v443_v30 = vld [vmem:[%s12344_s2 + $0xd58] sm:$0xff]  ;;  %v444_v31 = vld [vmem:[%s12344_s2 + $0xd60] sm:$0xff] }
  0xf5   :  { %3491 = vst [vmem:[%s12345_s3 + $0xc78] sm:$0xff] %v2467_v33  ;;  %v2470_v46 = vadd.f32 %v4151_v2, %v1444_v34  ;;  %v2471_v47 = vadd.f32 %v4151_v2, %v1445_v35  ;;  %v2472_v48 = vadd.f32 %v4151_v2, %v1446_v36  ;;  %v1449_v49 = vmul.f32 %v4146_v1, %v423_v32  ;;  %v445_v36 = vld [vmem:[%s12344_s2 + $0xd68] sm:$0xff] }
  0xf6   :  { %3492 = vst [vmem:[%s12345_s3 + $0xc80] sm:$0xff] %v2468_v39  ;;  %3493 = vst [vmem:[%s12345_s3 + $0xc88] sm:$0xff] %v2469_v40  ;;  %v2473_v52 = vadd.f32 %v4151_v2, %v1447_v41  ;;  %v2474_v53 = vadd.f32 %v4151_v2, %v1448_v42  ;;  %v1450_v54 = vmul.f32 %v4146_v1, %v424_v37  ;;  %v446_v37 = vld [vmem:[%s12344_s2 + $0xd70] sm:$0xff]  ;;  %v447_v42 = vld [vmem:[%s12344_s2 + $0xd78] sm:$0xff] }
  0xf7   :  { %v1451_v55 = vmul.f32 %v4146_v1, %v425_v38  ;;  %3494 = vst [vmem:[%s12345_s3 + $0xc90] sm:$0xff] %v2470_v46  ;;  %3495 = vst [vmem:[%s12345_s3 + $0xc98] sm:$0xff] %v2471_v47  ;;  %v2475_v57 = vadd.f32 %v4151_v2, %v1449_v49  ;;  %v1452_v58 = vmul.f32 %v4146_v1, %v426_v43  ;;  %v448_v47 = vld [vmem:[%s12344_s2 + $0xd80] sm:$0xff] }
  0xf8   :  { %3496 = vst [vmem:[%s12345_s3 + $0xca0] sm:$0xff] %v2472_v48  ;;  %v1453_v59 = vmul.f32 %v4146_v1, %v427_v44  ;;  %v1454_v60 = vmul.f32 %v4146_v1, %v428_v45  ;;  %3497 = vst [vmem:[%s12345_s3 + $0xca8] sm:$0xff] %v2473_v52  ;;  %v2476_v63 = vadd.f32 %v4151_v2, %v1450_v54  ;;  %v449_v48 = vld [vmem:[%s12344_s2 + $0xd88] sm:$0xff]  ;;  %v451_v54 = vld [vmem:[%s12344_s2 + $0xd98] sm:$0xff] }
  0xf9   :  { %3498 = vst [vmem:[%s12345_s3 + $0xcb0] sm:$0xff] %v2474_v53  ;;  %v2477_v0 = vadd.f32 %v4151_v2, %v1451_v55  ;;  %v1455_v3 = vmul.f32 %v4146_v1, %v429_v50  ;;  %v1456_v4 = vmul.f32 %v4146_v1, %v430_v51  ;;  %3499 = vst [vmem:[%s12345_s3 + $0xcb8] sm:$0xff] %v2475_v57  ;;  %v450_v53 = vld [vmem:[%s12344_s2 + $0xd90] sm:$0xff]  ;;  %v452_v55 = vld [vmem:[%s12344_s2 + $0xda0] sm:$0xff] }
  0xfa   :  { %v2478_v8 = vadd.f32 %v4151_v2, %v1452_v58  ;;  %v2479_v9 = vadd.f32 %v4151_v2, %v1453_v59  ;;  %v2480_v10 = vadd.f32 %v4151_v2, %v1454_v60  ;;  %v1457_v11 = vmul.f32 %v4146_v1, %v431_v56  ;;  %3500 = vst [vmem:[%s12345_s3 + $0xcc0] sm:$0xff] %v2476_v63  ;;  %v453_v60 = vld [vmem:[%s12344_s2 + $0xda8] sm:$0xff] }
  0xfb   :  { %3501 = vst [vmem:[%s12345_s3 + $0xcc8] sm:$0xff] %v2477_v0  ;;  %v2481_v14 = vadd.f32 %v4151_v2, %v1455_v3  ;;  %v2482_v15 = vadd.f32 %v4151_v2, %v1456_v4  ;;  %v1458_v16 = vmul.f32 %v4146_v1, %v432_v61  ;;  %v1459_v17 = vmul.f32 %v4146_v1, %v433_v62  ;;  %v454_v61 = vld [vmem:[%s12344_s2 + $0xdb0] sm:$0xff]  ;;  %v455_v4 = vld [vmem:[%s12344_s2 + $0xdb8] sm:$0xff] }
  0xfc   :  { %3502 = vst [vmem:[%s12345_s3 + $0xcd0] sm:$0xff] %v2478_v8  ;;  %3503 = vst [vmem:[%s12345_s3 + $0xcd8] sm:$0xff] %v2479_v9  ;;  %v2483_v19 = vadd.f32 %v4151_v2, %v1457_v11  ;;  %v1460_v20 = vmul.f32 %v4146_v1, %v434_v5  ;;  %v1461_v21 = vmul.f32 %v4146_v1, %v435_v6  ;;  %v456_v9 = vld [vmem:[%s12344_s2 + $0xdc0] sm:$0xff] }
  0xfd   :  { %3504 = vst [vmem:[%s12345_s3 + $0xce0] sm:$0xff] %v2480_v10  ;;  %v1462_v22 = vmul.f32 %v4146_v1, %v436_v7  ;;  %3505 = vst [vmem:[%s12345_s3 + $0xce8] sm:$0xff] %v2481_v14  ;;  %v2484_v25 = vadd.f32 %v4151_v2, %v1458_v16  ;;  %v2485_v26 = vadd.f32 %v4151_v2, %v1459_v17  ;;  %v457_v10 = vld [vmem:[%s12344_s2 + $0xdc8] sm:$0xff]  ;;  %v459_v16 = vld [vmem:[%s12344_s2 + $0xdd8] sm:$0xff] }
  0xfe   :  { %3506 = vst [vmem:[%s12345_s3 + $0xcf0] sm:$0xff] %v2482_v15  ;;  %v1463_v27 = vmul.f32 %v4146_v1, %v437_v12  ;;  %v1464_v28 = vmul.f32 %v4146_v1, %v438_v13  ;;  %3507 = vst [vmem:[%s12345_s3 + $0xcf8] sm:$0xff] %v2483_v19  ;;  %v2486_v32 = vadd.f32 %v4151_v2, %v1460_v20  ;;  %v458_v15 = vld [vmem:[%s12344_s2 + $0xdd0] sm:$0xff]  ;;  %v460_v17 = vld [vmem:[%s12344_s2 + $0xde0] sm:$0xff] }
  0xff   :  { %v2487_v33 = vadd.f32 %v4151_v2, %v1461_v21  ;;  %v2488_v34 = vadd.f32 %v4151_v2, %v1462_v22  ;;  %v1465_v35 = vmul.f32 %v4146_v1, %v439_v18  ;;  %3508 = vst [vmem:[%s12345_s3 + $0xd00] sm:$0xff] %v2484_v25  ;;  %3509 = vst [vmem:[%s12345_s3 + $0xd08] sm:$0xff] %v2485_v26  ;;  %v461_v22 = vld [vmem:[%s12344_s2 + $0xde8] sm:$0xff] }
 0x100   :  { %v2489_v38 = vadd.f32 %v4151_v2, %v1463_v27  ;;  %v2490_v39 = vadd.f32 %v4151_v2, %v1464_v28  ;;  %v1466_v40 = vmul.f32 %v4146_v1, %v440_v23  ;;  %v1467_v41 = vmul.f32 %v4146_v1, %v441_v24  ;;  %3510 = vst [vmem:[%s12345_s3 + $0xd10] sm:$0xff] %v2486_v32  ;;  %v462_v23 = vld [vmem:[%s12344_s2 + $0xdf0] sm:$0xff]  ;;  %v463_v28 = vld [vmem:[%s12344_s2 + $0xdf8] sm:$0xff] }
 0x101   :  { %3511 = vst [vmem:[%s12345_s3 + $0xd18] sm:$0xff] %v2487_v33  ;;  %3512 = vst [vmem:[%s12345_s3 + $0xd20] sm:$0xff] %v2488_v34  ;;  %v2491_v43 = vadd.f32 %v4151_v2, %v1465_v35  ;;  %v1468_v44 = vmul.f32 %v4146_v1, %v442_v29  ;;  %v1469_v45 = vmul.f32 %v4146_v1, %v443_v30  ;;  %v464_v33 = vld [vmem:[%s12344_s2 + $0xe00] sm:$0xff]  ;;  %v465_v34 = vld [vmem:[%s12344_s2 + $0xe08] sm:$0xff] }
 0x102   :  { %v1470_v46 = vmul.f32 %v4146_v1, %v444_v31  ;;  %3513 = vst [vmem:[%s12345_s3 + $0xd28] sm:$0xff] %v2489_v38  ;;  %3514 = vst [vmem:[%s12345_s3 + $0xd30] sm:$0xff] %v2490_v39  ;;  %v2492_v49 = vadd.f32 %v4151_v2, %v1466_v40  ;;  %v2493_v50 = vadd.f32 %v4151_v2, %v1467_v41  ;;  %v466_v39 = vld [vmem:[%s12344_s2 + $0xe10] sm:$0xff]  ;;  %v467_v40 = vld [vmem:[%s12344_s2 + $0xe18] sm:$0xff] }
 0x103   :  { %v1471_v51 = vmul.f32 %v4146_v1, %v445_v36  ;;  %v1472_v52 = vmul.f32 %v4146_v1, %v446_v37  ;;  %3515 = vst [vmem:[%s12345_s3 + $0xd38] sm:$0xff] %v2491_v43  ;;  %v2494_v56 = vadd.f32 %v4151_v2, %v1468_v44  ;;  %v2495_v57 = vadd.f32 %v4151_v2, %v1469_v45  ;;  %v468_v41 = vld [vmem:[%s12344_s2 + $0xe20] sm:$0xff] }
 0x104   :  { %v2496_v58 = vadd.f32 %v4151_v2, %v1470_v46  ;;  %v1473_v59 = vmul.f32 %v4146_v1, %v447_v42  ;;  %3516 = vst [vmem:[%s12345_s3 + $0xd40] sm:$0xff] %v2492_v49  ;;  %3517 = vst [vmem:[%s12345_s3 + $0xd48] sm:$0xff] %v2493_v50  ;;  %v1474_v0 = vmul.f32 %v4146_v1, %v448_v47  ;;  %v469_v46 = vld [vmem:[%s12344_s2 + $0xe28] sm:$0xff]  ;;  %v470_v47 = vld [vmem:[%s12344_s2 + $0xe30] sm:$0xff] }
 0x105   :  { %v2497_v62 = vadd.f32 %v4151_v2, %v1471_v51  ;;  %v2498_v63 = vadd.f32 %v4151_v2, %v1472_v52  ;;  %v1475_v3 = vmul.f32 %v4146_v1, %v449_v48  ;;  %3518 = vst [vmem:[%s12345_s3 + $0xd50] sm:$0xff] %v2494_v56  ;;  %3519 = vst [vmem:[%s12345_s3 + $0xd58] sm:$0xff] %v2495_v57  ;;  %v471_v52 = vld [vmem:[%s12344_s2 + $0xe38] sm:$0xff]  ;;  %v472_v57 = vld [vmem:[%s12344_s2 + $0xe40] sm:$0xff] }
 0x106   :  { %3520 = vst [vmem:[%s12345_s3 + $0xd60] sm:$0xff] %v2496_v58  ;;  %v2499_v5 = vadd.f32 %v4151_v2, %v1473_v59  ;;  %v1476_v6 = vmul.f32 %v4146_v1, %v450_v53  ;;  %v1477_v7 = vmul.f32 %v4146_v1, %v451_v54  ;;  %v1478_v8 = vmul.f32 %v4146_v1, %v452_v55  ;;  %v473_v58 = vld [vmem:[%s12344_s2 + $0xe48] sm:$0xff] }
 0x107   :  { %3521 = vst [vmem:[%s12345_s3 + $0xd68] sm:$0xff] %v2497_v62  ;;  %3522 = vst [vmem:[%s12345_s3 + $0xd70] sm:$0xff] %v2498_v63  ;;  %v2500_v11 = vadd.f32 %v4151_v2, %v1474_v0  ;;  %v2501_v12 = vadd.f32 %v4151_v2, %v1475_v3  ;;  %v1479_v13 = vmul.f32 %v4146_v1, %v453_v60  ;;  %v474_v63 = vld [vmem:[%s12344_s2 + $0xe50] sm:$0xff]  ;;  %v475_v0 = vld [vmem:[%s12344_s2 + $0xe58] sm:$0xff] }
 0x108   :  { %v1480_v14 = vmul.f32 %v4146_v1, %v454_v61  ;;  %3523 = vst [vmem:[%s12345_s3 + $0xd78] sm:$0xff] %v2499_v5  ;;  %v2502_v18 = vadd.f32 %v4151_v2, %v1476_v6  ;;  %v2503_v19 = vadd.f32 %v4151_v2, %v1477_v7  ;;  %v2504_v20 = vadd.f32 %v4151_v2, %v1478_v8  ;;  %v476_v3 = vld [vmem:[%s12344_s2 + $0xe60] sm:$0xff]  ;;  %v477_v8 = vld [vmem:[%s12344_s2 + $0xe68] sm:$0xff] }
 0x109   :  { %v1481_v21 = vmul.f32 %v4146_v1, %v455_v4  ;;  %3524 = vst [vmem:[%s12345_s3 + $0xd80] sm:$0xff] %v2500_v11  ;;  %3525 = vst [vmem:[%s12345_s3 + $0xd88] sm:$0xff] %v2501_v12  ;;  %v2505_v24 = vadd.f32 %v4151_v2, %v1479_v13  ;;  %v1482_v26 = vmul.f32 %v4146_v1, %v456_v9  ;;  %v478_v9 = vld [vmem:[%s12344_s2 + $0xe70] sm:$0xff] }
 0x10a   :  { %v2506_v25 = vadd.f32 %v4151_v2, %v1480_v14  ;;  %v1483_v27 = vmul.f32 %v4146_v1, %v457_v10  ;;  %3526 = vst [vmem:[%s12345_s3 + $0xd90] sm:$0xff] %v2502_v18  ;;  %3527 = vst [vmem:[%s12345_s3 + $0xd98] sm:$0xff] %v2503_v19  ;;  %v1484_v30 = vmul.f32 %v4146_v1, %v458_v15  ;;  %v479_v14 = vld [vmem:[%s12344_s2 + $0xe78] sm:$0xff]  ;;  %v480_v19 = vld [vmem:[%s12344_s2 + $0xe80] sm:$0xff] }
 0x10b   :  { %3528 = vst [vmem:[%s12345_s3 + $0xda0] sm:$0xff] %v2504_v20  ;;  %v2507_v29 = vadd.f32 %v4151_v2, %v1481_v21  ;;  %v1485_v31 = vmul.f32 %v4146_v1, %v459_v16  ;;  %v1486_v32 = vmul.f32 %v4146_v1, %v460_v17  ;;  %3529 = vst [vmem:[%s12345_s3 + $0xda8] sm:$0xff] %v2505_v24  ;;  %v481_v20 = vld [vmem:[%s12344_s2 + $0xe88] sm:$0xff] }
 0x10c   :  { %3530 = vst [vmem:[%s12345_s3 + $0xdb0] sm:$0xff] %v2506_v25  ;;  %v2508_v35 = vadd.f32 %v4151_v2, %v1482_v26  ;;  %v2509_v36 = vadd.f32 %v4151_v2, %v1483_v27  ;;  %v1487_v37 = vmul.f32 %v4146_v1, %v461_v22  ;;  %v1488_v38 = vmul.f32 %v4146_v1, %v462_v23  ;;  %v482_v25 = vld [vmem:[%s12344_s2 + $0xe90] sm:$0xff]  ;;  %v483_v26 = vld [vmem:[%s12344_s2 + $0xe98] sm:$0xff]  ;;  %v484_v27 = vld [vmem:[%s12344_s2 + $0xea0] sm:$0xff] }
 0x10d   :  { %3531 = vst [vmem:[%s12345_s3 + $0xdb8] sm:$0xff] %v2507_v29  ;;  %v2510_v42 = vadd.f32 %v4151_v2, %v1484_v30  ;;  %v2511_v43 = vadd.f32 %v4151_v2, %v1485_v31  ;;  %v2512_v44 = vadd.f32 %v4151_v2, %v1486_v32  ;;  %v1489_v45 = vmul.f32 %v4146_v1, %v463_v28  ;;  %v485_v32 = vld [vmem:[%s12344_s2 + $0xea8] sm:$0xff] }
 0x10e   :  { %3532 = vst [vmem:[%s12345_s3 + $0xdc0] sm:$0xff] %v2508_v35  ;;  %3533 = vst [vmem:[%s12345_s3 + $0xdc8] sm:$0xff] %v2509_v36  ;;  %v2513_v48 = vadd.f32 %v4151_v2, %v1487_v37  ;;  %v2514_v49 = vadd.f32 %v4151_v2, %v1488_v38  ;;  %v1490_v50 = vmul.f32 %v4146_v1, %v464_v33  ;;  %v486_v33 = vld [vmem:[%s12344_s2 + $0xeb0] sm:$0xff]  ;;  %v487_v38 = vld [vmem:[%s12344_s2 + $0xeb8] sm:$0xff] }
 0x10f   :  { %v1491_v51 = vmul.f32 %v4146_v1, %v465_v34  ;;  %3534 = vst [vmem:[%s12345_s3 + $0xdd0] sm:$0xff] %v2510_v42  ;;  %3535 = vst [vmem:[%s12345_s3 + $0xdd8] sm:$0xff] %v2511_v43  ;;  %v2515_v53 = vadd.f32 %v4151_v2, %v1489_v45  ;;  %v1492_v54 = vmul.f32 %v4146_v1, %v466_v39  ;;  %v488_v43 = vld [vmem:[%s12344_s2 + $0xec0] sm:$0xff] }
 0x110   :  { %3536 = vst [vmem:[%s12345_s3 + $0xde0] sm:$0xff] %v2512_v44  ;;  %v1493_v55 = vmul.f32 %v4146_v1, %v467_v40  ;;  %v1494_v56 = vmul.f32 %v4146_v1, %v468_v41  ;;  %3537 = vst [vmem:[%s12345_s3 + $0xde8] sm:$0xff] %v2513_v48  ;;  %v2516_v59 = vadd.f32 %v4151_v2, %v1490_v50  ;;  %v489_v44 = vld [vmem:[%s12344_s2 + $0xec8] sm:$0xff]  ;;  %v491_v50 = vld [vmem:[%s12344_s2 + $0xed8] sm:$0xff] }
 0x111   :  { %3538 = vst [vmem:[%s12345_s3 + $0xdf0] sm:$0xff] %v2514_v49  ;;  %v2517_v60 = vadd.f32 %v4151_v2, %v1491_v51  ;;  %v1495_v61 = vmul.f32 %v4146_v1, %v469_v46  ;;  %v1496_v62 = vmul.f32 %v4146_v1, %v470_v47  ;;  %3539 = vst [vmem:[%s12345_s3 + $0xdf8] sm:$0xff] %v2515_v53  ;;  %v490_v49 = vld [vmem:[%s12344_s2 + $0xed0] sm:$0xff]  ;;  %v492_v51 = vld [vmem:[%s12344_s2 + $0xee0] sm:$0xff] }
 0x112   :  { %v2518_v4 = vadd.f32 %v4151_v2, %v1492_v54  ;;  %v2519_v5 = vadd.f32 %v4151_v2, %v1493_v55  ;;  %v2520_v6 = vadd.f32 %v4151_v2, %v1494_v56  ;;  %v1497_v7 = vmul.f32 %v4146_v1, %v471_v52  ;;  %3540 = vst [vmem:[%s12345_s3 + $0xe00] sm:$0xff] %v2516_v59  ;;  %v493_v56 = vld [vmem:[%s12344_s2 + $0xee8] sm:$0xff] }
 0x113   :  { %3541 = vst [vmem:[%s12345_s3 + $0xe08] sm:$0xff] %v2517_v60  ;;  %v2521_v10 = vadd.f32 %v4151_v2, %v1495_v61  ;;  %v2522_v11 = vadd.f32 %v4151_v2, %v1496_v62  ;;  %v1498_v12 = vmul.f32 %v4146_v1, %v472_v57  ;;  %v1499_v13 = vmul.f32 %v4146_v1, %v473_v58  ;;  %v494_v57 = vld [vmem:[%s12344_s2 + $0xef0] sm:$0xff]  ;;  %v495_v62 = vld [vmem:[%s12344_s2 + $0xef8] sm:$0xff] }
 0x114   :  { %3542 = vst [vmem:[%s12345_s3 + $0xe10] sm:$0xff] %v2518_v4  ;;  %3543 = vst [vmem:[%s12345_s3 + $0xe18] sm:$0xff] %v2519_v5  ;;  %v2523_v15 = vadd.f32 %v4151_v2, %v1497_v7  ;;  %v1500_v16 = vmul.f32 %v4146_v1, %v474_v63  ;;  %v1501_v17 = vmul.f32 %v4146_v1, %v475_v0  ;;  %v496_v5 = vld [vmem:[%s12344_s2 + $0xf00] sm:$0xff] }
 0x115   :  { %3544 = vst [vmem:[%s12345_s3 + $0xe20] sm:$0xff] %v2520_v6  ;;  %v1502_v18 = vmul.f32 %v4146_v1, %v476_v3  ;;  %3545 = vst [vmem:[%s12345_s3 + $0xe28] sm:$0xff] %v2521_v10  ;;  %v2524_v21 = vadd.f32 %v4151_v2, %v1498_v12  ;;  %v2525_v22 = vadd.f32 %v4151_v2, %v1499_v13  ;;  %v497_v6 = vld [vmem:[%s12344_s2 + $0xf08] sm:$0xff]  ;;  %v499_v12 = vld [vmem:[%s12344_s2 + $0xf18] sm:$0xff] }
 0x116   :  { %3546 = vst [vmem:[%s12345_s3 + $0xe30] sm:$0xff] %v2522_v11  ;;  %v1503_v23 = vmul.f32 %v4146_v1, %v477_v8  ;;  %v1504_v24 = vmul.f32 %v4146_v1, %v478_v9  ;;  %3547 = vst [vmem:[%s12345_s3 + $0xe38] sm:$0xff] %v2523_v15  ;;  %v2526_v28 = vadd.f32 %v4151_v2, %v1500_v16  ;;  %v498_v11 = vld [vmem:[%s12344_s2 + $0xf10] sm:$0xff]  ;;  %v500_v13 = vld [vmem:[%s12344_s2 + $0xf20] sm:$0xff] }
 0x117   :  { %v2527_v29 = vadd.f32 %v4151_v2, %v1501_v17  ;;  %v2528_v30 = vadd.f32 %v4151_v2, %v1502_v18  ;;  %v1505_v31 = vmul.f32 %v4146_v1, %v479_v14  ;;  %3548 = vst [vmem:[%s12345_s3 + $0xe40] sm:$0xff] %v2524_v21  ;;  %3549 = vst [vmem:[%s12345_s3 + $0xe48] sm:$0xff] %v2525_v22  ;;  %v501_v18 = vld [vmem:[%s12344_s2 + $0xf28] sm:$0xff] }
 0x118   :  { %v2529_v34 = vadd.f32 %v4151_v2, %v1503_v23  ;;  %v2530_v35 = vadd.f32 %v4151_v2, %v1504_v24  ;;  %v1506_v36 = vmul.f32 %v4146_v1, %v480_v19  ;;  %v1507_v37 = vmul.f32 %v4146_v1, %v481_v20  ;;  %3550 = vst [vmem:[%s12345_s3 + $0xe50] sm:$0xff] %v2526_v28  ;;  %v502_v19 = vld [vmem:[%s12344_s2 + $0xf30] sm:$0xff]  ;;  %v503_v24 = vld [vmem:[%s12344_s2 + $0xf38] sm:$0xff] }
 0x119   :  { %3551 = vst [vmem:[%s12345_s3 + $0xe58] sm:$0xff] %v2527_v29  ;;  %3552 = vst [vmem:[%s12345_s3 + $0xe60] sm:$0xff] %v2528_v30  ;;  %v2531_v39 = vadd.f32 %v4151_v2, %v1505_v31  ;;  %v1508_v40 = vmul.f32 %v4146_v1, %v482_v25  ;;  %v1509_v41 = vmul.f32 %v4146_v1, %v483_v26  ;;  %v504_v29 = vld [vmem:[%s12344_s2 + $0xf40] sm:$0xff]  ;;  %v505_v30 = vld [vmem:[%s12344_s2 + $0xf48] sm:$0xff] }
 0x11a   :  { %v1510_v42 = vmul.f32 %v4146_v1, %v484_v27  ;;  %3553 = vst [vmem:[%s12345_s3 + $0xe68] sm:$0xff] %v2529_v34  ;;  %3554 = vst [vmem:[%s12345_s3 + $0xe70] sm:$0xff] %v2530_v35  ;;  %v2532_v45 = vadd.f32 %v4151_v2, %v1506_v36  ;;  %v2533_v46 = vadd.f32 %v4151_v2, %v1507_v37  ;;  %v506_v35 = vld [vmem:[%s12344_s2 + $0xf50] sm:$0xff]  ;;  %v507_v36 = vld [vmem:[%s12344_s2 + $0xf58] sm:$0xff] }
 0x11b   :  { %v1511_v47 = vmul.f32 %v4146_v1, %v485_v32  ;;  %v1512_v48 = vmul.f32 %v4146_v1, %v486_v33  ;;  %3555 = vst [vmem:[%s12345_s3 + $0xe78] sm:$0xff] %v2531_v39  ;;  %v2534_v52 = vadd.f32 %v4151_v2, %v1508_v40  ;;  %v2535_v53 = vadd.f32 %v4151_v2, %v1509_v41  ;;  %v508_v37 = vld [vmem:[%s12344_s2 + $0xf60] sm:$0xff] }
 0x11c   :  { %v2536_v54 = vadd.f32 %v4151_v2, %v1510_v42  ;;  %v1513_v55 = vmul.f32 %v4146_v1, %v487_v38  ;;  %3556 = vst [vmem:[%s12345_s3 + $0xe80] sm:$0xff] %v2532_v45  ;;  %3557 = vst [vmem:[%s12345_s3 + $0xe88] sm:$0xff] %v2533_v46  ;;  %v1514_v60 = vmul.f32 %v4146_v1, %v488_v43  ;;  %v509_v42 = vld [vmem:[%s12344_s2 + $0xf68] sm:$0xff]  ;;  %v510_v43 = vld [vmem:[%s12344_s2 + $0xf70] sm:$0xff] }
 0x11d   :  { %v2537_v58 = vadd.f32 %v4151_v2, %v1511_v47  ;;  %v2538_v59 = vadd.f32 %v4151_v2, %v1512_v48  ;;  %v1515_v61 = vmul.f32 %v4146_v1, %v489_v44  ;;  %3558 = vst [vmem:[%s12345_s3 + $0xe90] sm:$0xff] %v2534_v52  ;;  %3559 = vst [vmem:[%s12345_s3 + $0xe98] sm:$0xff] %v2535_v53  ;;  %v511_v48 = vld [vmem:[%s12344_s2 + $0xf78] sm:$0xff]  ;;  %v512_v53 = vld [vmem:[%s12344_s2 + $0xf80] sm:$0xff] }
 0x11e   :  { %3560 = vst [vmem:[%s12345_s3 + $0xea0] sm:$0xff] %v2536_v54  ;;  %v2539_v63 = vadd.f32 %v4151_v2, %v1513_v55  ;;  %v1516_v0 = vmul.f32 %v4146_v1, %v490_v49  ;;  %v1517_v3 = vmul.f32 %v4146_v1, %v491_v50  ;;  %v1518_v4 = vmul.f32 %v4146_v1, %v492_v51  ;;  %v513_v54 = vld [vmem:[%s12344_s2 + $0xf88] sm:$0xff] }
 0x11f   :  { %3561 = vst [vmem:[%s12345_s3 + $0xea8] sm:$0xff] %v2537_v58  ;;  %3562 = vst [vmem:[%s12345_s3 + $0xeb0] sm:$0xff] %v2538_v59  ;;  %v2540_v7 = vadd.f32 %v4151_v2, %v1514_v60  ;;  %v2541_v8 = vadd.f32 %v4151_v2, %v1515_v61  ;;  %v1519_v9 = vmul.f32 %v4146_v1, %v493_v56  ;;  %v514_v59 = vld [vmem:[%s12344_s2 + $0xf90] sm:$0xff]  ;;  %v515_v60 = vld [vmem:[%s12344_s2 + $0xf98] sm:$0xff] }
 0x120   :  { %v1520_v10 = vmul.f32 %v4146_v1, %v494_v57  ;;  %3563 = vst [vmem:[%s12345_s3 + $0xeb8] sm:$0xff] %v2539_v63  ;;  %v2542_v14 = vadd.f32 %v4151_v2, %v1516_v0  ;;  %v2543_v15 = vadd.f32 %v4151_v2, %v1517_v3  ;;  %v2544_v16 = vadd.f32 %v4151_v2, %v1518_v4  ;;  %v516_v61 = vld [vmem:[%s12344_s2 + $0xfa0] sm:$0xff]  ;;  %v517_v4 = vld [vmem:[%s12344_s2 + $0xfa8] sm:$0xff] }
 0x121   :  { %v1521_v17 = vmul.f32 %v4146_v1, %v495_v62  ;;  %3564 = vst [vmem:[%s12345_s3 + $0xec0] sm:$0xff] %v2540_v7  ;;  %3565 = vst [vmem:[%s12345_s3 + $0xec8] sm:$0xff] %v2541_v8  ;;  %v2545_v20 = vadd.f32 %v4151_v2, %v1519_v9  ;;  %v1522_v22 = vmul.f32 %v4146_v1, %v496_v5  ;;  %v518_v5 = vld [vmem:[%s12344_s2 + $0xfb0] sm:$0xff] }
 0x122   :  { %v2546_v21 = vadd.f32 %v4151_v2, %v1520_v10  ;;  %v1523_v23 = vmul.f32 %v4146_v1, %v497_v6  ;;  %3566 = vst [vmem:[%s12345_s3 + $0xed0] sm:$0xff] %v2542_v14  ;;  %3567 = vst [vmem:[%s12345_s3 + $0xed8] sm:$0xff] %v2543_v15  ;;  %v1524_v26 = vmul.f32 %v4146_v1, %v498_v11  ;;  %v519_v10 = vld [vmem:[%s12344_s2 + $0xfb8] sm:$0xff]  ;;  %v520_v15 = vld [vmem:[%s12344_s2 + $0xfc0] sm:$0xff] }
 0x123   :  { %3568 = vst [vmem:[%s12345_s3 + $0xee0] sm:$0xff] %v2544_v16  ;;  %v2547_v25 = vadd.f32 %v4151_v2, %v1521_v17  ;;  %v1525_v27 = vmul.f32 %v4146_v1, %v499_v12  ;;  %v1526_v28 = vmul.f32 %v4146_v1, %v500_v13  ;;  %3569 = vst [vmem:[%s12345_s3 + $0xee8] sm:$0xff] %v2545_v20  ;;  %v521_v16 = vld [vmem:[%s12344_s2 + $0xfc8] sm:$0xff] }
 0x124   :  { %3570 = vst [vmem:[%s12345_s3 + $0xef0] sm:$0xff] %v2546_v21  ;;  %v2548_v31 = vadd.f32 %v4151_v2, %v1522_v22  ;;  %v2549_v32 = vadd.f32 %v4151_v2, %v1523_v23  ;;  %v1527_v33 = vmul.f32 %v4146_v1, %v501_v18  ;;  %v1528_v34 = vmul.f32 %v4146_v1, %v502_v19  ;;  %v522_v21 = vld [vmem:[%s12344_s2 + $0xfd0] sm:$0xff]  ;;  %v523_v22 = vld [vmem:[%s12344_s2 + $0xfd8] sm:$0xff]  ;;  %v524_v23 = vld [vmem:[%s12344_s2 + $0xfe0] sm:$0xff] }
 0x125   :  { %3571 = vst [vmem:[%s12345_s3 + $0xef8] sm:$0xff] %v2547_v25  ;;  %v2550_v38 = vadd.f32 %v4151_v2, %v1524_v26  ;;  %v2551_v39 = vadd.f32 %v4151_v2, %v1525_v27  ;;  %v2552_v40 = vadd.f32 %v4151_v2, %v1526_v28  ;;  %v1529_v41 = vmul.f32 %v4146_v1, %v503_v24  ;;  %v525_v28 = vld [vmem:[%s12344_s2 + $0xfe8] sm:$0xff] }
 0x126   :  { %3572 = vst [vmem:[%s12345_s3 + $0xf00] sm:$0xff] %v2548_v31  ;;  %3573 = vst [vmem:[%s12345_s3 + $0xf08] sm:$0xff] %v2549_v32  ;;  %v2553_v44 = vadd.f32 %v4151_v2, %v1527_v33  ;;  %v2554_v45 = vadd.f32 %v4151_v2, %v1528_v34  ;;  %v1530_v46 = vmul.f32 %v4146_v1, %v504_v29  ;;  %v526_v29 = vld [vmem:[%s12344_s2 + $0xff0] sm:$0xff]  ;;  %v527_v34 = vld [vmem:[%s12344_s2 + $0xff8] sm:$0xff] }
 0x127   :  { %v1531_v47 = vmul.f32 %v4146_v1, %v505_v30  ;;  %3574 = vst [vmem:[%s12345_s3 + $0xf10] sm:$0xff] %v2550_v38  ;;  %3575 = vst [vmem:[%s12345_s3 + $0xf18] sm:$0xff] %v2551_v39  ;;  %v2555_v49 = vadd.f32 %v4151_v2, %v1529_v41  ;;  %v1532_v50 = vmul.f32 %v4146_v1, %v506_v35  ;;  %v528_v39 = vld [vmem:[%s12344_s2 + $0x1000] sm:$0xff] }
 0x128   :  { %3576 = vst [vmem:[%s12345_s3 + $0xf20] sm:$0xff] %v2552_v40  ;;  %v1533_v51 = vmul.f32 %v4146_v1, %v507_v36  ;;  %v1534_v52 = vmul.f32 %v4146_v1, %v508_v37  ;;  %3577 = vst [vmem:[%s12345_s3 + $0xf28] sm:$0xff] %v2553_v44  ;;  %v2556_v55 = vadd.f32 %v4151_v2, %v1530_v46  ;;  %v529_v40 = vld [vmem:[%s12344_s2 + $0x1008] sm:$0xff]  ;;  %v531_v46 = vld [vmem:[%s12344_s2 + $0x1018] sm:$0xff] }
 0x129   :  { %3578 = vst [vmem:[%s12345_s3 + $0xf30] sm:$0xff] %v2554_v45  ;;  %v2557_v56 = vadd.f32 %v4151_v2, %v1531_v47  ;;  %v1535_v57 = vmul.f32 %v4146_v1, %v509_v42  ;;  %v1536_v58 = vmul.f32 %v4146_v1, %v510_v43  ;;  %3579 = vst [vmem:[%s12345_s3 + $0xf38] sm:$0xff] %v2555_v49  ;;  %v530_v45 = vld [vmem:[%s12344_s2 + $0x1010] sm:$0xff]  ;;  %v532_v47 = vld [vmem:[%s12344_s2 + $0x1020] sm:$0xff] }
 0x12a   :  { %v2558_v62 = vadd.f32 %v4151_v2, %v1532_v50  ;;  %v2559_v63 = vadd.f32 %v4151_v2, %v1533_v51  ;;  %v2560_v0 = vadd.f32 %v4151_v2, %v1534_v52  ;;  %v1537_v3 = vmul.f32 %v4146_v1, %v511_v48  ;;  %3580 = vst [vmem:[%s12345_s3 + $0xf40] sm:$0xff] %v2556_v55  ;;  %v533_v52 = vld [vmem:[%s12344_s2 + $0x1028] sm:$0xff] }
 0x12b   :  { %3581 = vst [vmem:[%s12345_s3 + $0xf48] sm:$0xff] %v2557_v56  ;;  %v2561_v6 = vadd.f32 %v4151_v2, %v1535_v57  ;;  %v2562_v7 = vadd.f32 %v4151_v2, %v1536_v58  ;;  %v1538_v8 = vmul.f32 %v4146_v1, %v512_v53  ;;  %v1539_v9 = vmul.f32 %v4146_v1, %v513_v54  ;;  %v534_v53 = vld [vmem:[%s12344_s2 + $0x1030] sm:$0xff]  ;;  %v535_v58 = vld [vmem:[%s12344_s2 + $0x1038] sm:$0xff] }
 0x12c   :  { %3582 = vst [vmem:[%s12345_s3 + $0xf50] sm:$0xff] %v2558_v62  ;;  %3583 = vst [vmem:[%s12345_s3 + $0xf58] sm:$0xff] %v2559_v63  ;;  %v2563_v11 = vadd.f32 %v4151_v2, %v1537_v3  ;;  %v1540_v12 = vmul.f32 %v4146_v1, %v514_v59  ;;  %v1541_v13 = vmul.f32 %v4146_v1, %v515_v60  ;;  %v536_v63 = vld [vmem:[%s12344_s2 + $0x1040] sm:$0xff] }
 0x12d   :  { %3584 = vst [vmem:[%s12345_s3 + $0xf60] sm:$0xff] %v2560_v0  ;;  %v1542_v14 = vmul.f32 %v4146_v1, %v516_v61  ;;  %3585 = vst [vmem:[%s12345_s3 + $0xf68] sm:$0xff] %v2561_v6  ;;  %v2564_v17 = vadd.f32 %v4151_v2, %v1538_v8  ;;  %v2565_v18 = vadd.f32 %v4151_v2, %v1539_v9  ;;  %v537_v0 = vld [vmem:[%s12344_s2 + $0x1048] sm:$0xff]  ;;  %v539_v8 = vld [vmem:[%s12344_s2 + $0x1058] sm:$0xff] }
 0x12e   :  { %3586 = vst [vmem:[%s12345_s3 + $0xf70] sm:$0xff] %v2562_v7  ;;  %v1543_v19 = vmul.f32 %v4146_v1, %v517_v4  ;;  %v1544_v20 = vmul.f32 %v4146_v1, %v518_v5  ;;  %3587 = vst [vmem:[%s12345_s3 + $0xf78] sm:$0xff] %v2563_v11  ;;  %v2566_v24 = vadd.f32 %v4151_v2, %v1540_v12  ;;  %v538_v7 = vld [vmem:[%s12344_s2 + $0x1050] sm:$0xff]  ;;  %v540_v9 = vld [vmem:[%s12344_s2 + $0x1060] sm:$0xff] }
 0x12f   :  { %v2567_v25 = vadd.f32 %v4151_v2, %v1541_v13  ;;  %v2568_v26 = vadd.f32 %v4151_v2, %v1542_v14  ;;  %v1545_v27 = vmul.f32 %v4146_v1, %v519_v10  ;;  %3588 = vst [vmem:[%s12345_s3 + $0xf80] sm:$0xff] %v2564_v17  ;;  %3589 = vst [vmem:[%s12345_s3 + $0xf88] sm:$0xff] %v2565_v18  ;;  %v541_v14 = vld [vmem:[%s12344_s2 + $0x1068] sm:$0xff] }
 0x130   :  { %v2569_v30 = vadd.f32 %v4151_v2, %v1543_v19  ;;  %v2570_v31 = vadd.f32 %v4151_v2, %v1544_v20  ;;  %v1546_v32 = vmul.f32 %v4146_v1, %v520_v15  ;;  %v1547_v33 = vmul.f32 %v4146_v1, %v521_v16  ;;  %3590 = vst [vmem:[%s12345_s3 + $0xf90] sm:$0xff] %v2566_v24  ;;  %v542_v15 = vld [vmem:[%s12344_s2 + $0x1070] sm:$0xff]  ;;  %v543_v20 = vld [vmem:[%s12344_s2 + $0x1078] sm:$0xff] }
 0x131   :  { %3591 = vst [vmem:[%s12345_s3 + $0xf98] sm:$0xff] %v2567_v25  ;;  %3592 = vst [vmem:[%s12345_s3 + $0xfa0] sm:$0xff] %v2568_v26  ;;  %v2571_v35 = vadd.f32 %v4151_v2, %v1545_v27  ;;  %v1548_v36 = vmul.f32 %v4146_v1, %v522_v21  ;;  %v1549_v37 = vmul.f32 %v4146_v1, %v523_v22  ;;  %v544_v25 = vld [vmem:[%s12344_s2 + $0x1080] sm:$0xff]  ;;  %v545_v26 = vld [vmem:[%s12344_s2 + $0x1088] sm:$0xff] }
 0x132   :  { %v1550_v38 = vmul.f32 %v4146_v1, %v524_v23  ;;  %3593 = vst [vmem:[%s12345_s3 + $0xfa8] sm:$0xff] %v2569_v30  ;;  %3594 = vst [vmem:[%s12345_s3 + $0xfb0] sm:$0xff] %v2570_v31  ;;  %v2572_v41 = vadd.f32 %v4151_v2, %v1546_v32  ;;  %v2573_v42 = vadd.f32 %v4151_v2, %v1547_v33  ;;  %v546_v31 = vld [vmem:[%s12344_s2 + $0x1090] sm:$0xff]  ;;  %v547_v32 = vld [vmem:[%s12344_s2 + $0x1098] sm:$0xff] }
 0x133   :  { %v1551_v43 = vmul.f32 %v4146_v1, %v525_v28  ;;  %v1552_v44 = vmul.f32 %v4146_v1, %v526_v29  ;;  %3595 = vst [vmem:[%s12345_s3 + $0xfb8] sm:$0xff] %v2571_v35  ;;  %v2574_v48 = vadd.f32 %v4151_v2, %v1548_v36  ;;  %v2575_v49 = vadd.f32 %v4151_v2, %v1549_v37  ;;  %v548_v33 = vld [vmem:[%s12344_s2 + $0x10a0] sm:$0xff] }
 0x134   :  { %v2576_v50 = vadd.f32 %v4151_v2, %v1550_v38  ;;  %v1553_v51 = vmul.f32 %v4146_v1, %v527_v34  ;;  %3596 = vst [vmem:[%s12345_s3 + $0xfc0] sm:$0xff] %v2572_v41  ;;  %3597 = vst [vmem:[%s12345_s3 + $0xfc8] sm:$0xff] %v2573_v42  ;;  %v1554_v56 = vmul.f32 %v4146_v1, %v528_v39  ;;  %v549_v38 = vld [vmem:[%s12344_s2 + $0x10a8] sm:$0xff]  ;;  %v550_v39 = vld [vmem:[%s12344_s2 + $0x10b0] sm:$0xff] }
 0x135   :  { %v2577_v54 = vadd.f32 %v4151_v2, %v1551_v43  ;;  %v2578_v55 = vadd.f32 %v4151_v2, %v1552_v44  ;;  %v1555_v57 = vmul.f32 %v4146_v1, %v529_v40  ;;  %3598 = vst [vmem:[%s12345_s3 + $0xfd0] sm:$0xff] %v2574_v48  ;;  %3599 = vst [vmem:[%s12345_s3 + $0xfd8] sm:$0xff] %v2575_v49  ;;  %v551_v44 = vld [vmem:[%s12344_s2 + $0x10b8] sm:$0xff]  ;;  %v552_v49 = vld [vmem:[%s12344_s2 + $0x10c0] sm:$0xff] }
 0x136   :  { %3600 = vst [vmem:[%s12345_s3 + $0xfe0] sm:$0xff] %v2576_v50  ;;  %v2579_v59 = vadd.f32 %v4151_v2, %v1553_v51  ;;  %v1556_v60 = vmul.f32 %v4146_v1, %v530_v45  ;;  %v1557_v61 = vmul.f32 %v4146_v1, %v531_v46  ;;  %v1558_v62 = vmul.f32 %v4146_v1, %v532_v47  ;;  %v553_v50 = vld [vmem:[%s12344_s2 + $0x10c8] sm:$0xff] }
 0x137   :  { %3601 = vst [vmem:[%s12345_s3 + $0xfe8] sm:$0xff] %v2577_v54  ;;  %3602 = vst [vmem:[%s12345_s3 + $0xff0] sm:$0xff] %v2578_v55  ;;  %v2580_v3 = vadd.f32 %v4151_v2, %v1554_v56  ;;  %v2581_v4 = vadd.f32 %v4151_v2, %v1555_v57  ;;  %v1559_v5 = vmul.f32 %v4146_v1, %v533_v52  ;;  %v554_v55 = vld [vmem:[%s12344_s2 + $0x10d0] sm:$0xff]  ;;  %v555_v56 = vld [vmem:[%s12344_s2 + $0x10d8] sm:$0xff] }
 0x138   :  { %v1560_v6 = vmul.f32 %v4146_v1, %v534_v53  ;;  %3603 = vst [vmem:[%s12345_s3 + $0xff8] sm:$0xff] %v2579_v59  ;;  %v2582_v10 = vadd.f32 %v4151_v2, %v1556_v60  ;;  %v2583_v11 = vadd.f32 %v4151_v2, %v1557_v61  ;;  %v2584_v12 = vadd.f32 %v4151_v2, %v1558_v62  ;;  %v556_v57 = vld [vmem:[%s12344_s2 + $0x10e0] sm:$0xff]  ;;  %v557_v62 = vld [vmem:[%s12344_s2 + $0x10e8] sm:$0xff] }
 0x139   :  { %v1561_v13 = vmul.f32 %v4146_v1, %v535_v58  ;;  %3604 = vst [vmem:[%s12345_s3 + $0x1000] sm:$0xff] %v2580_v3  ;;  %3605 = vst [vmem:[%s12345_s3 + $0x1008] sm:$0xff] %v2581_v4  ;;  %v2585_v16 = vadd.f32 %v4151_v2, %v1559_v5  ;;  %v1562_v18 = vmul.f32 %v4146_v1, %v536_v63  ;;  %v558_v63 = vld [vmem:[%s12344_s2 + $0x10f0] sm:$0xff] }
 0x13a   :  { %v2586_v17 = vadd.f32 %v4151_v2, %v1560_v6  ;;  %v1563_v19 = vmul.f32 %v4146_v1, %v537_v0  ;;  %3606 = vst [vmem:[%s12345_s3 + $0x1010] sm:$0xff] %v2582_v10  ;;  %3607 = vst [vmem:[%s12345_s3 + $0x1018] sm:$0xff] %v2583_v11  ;;  %v1564_v22 = vmul.f32 %v4146_v1, %v538_v7  ;;  %v559_v6 = vld [vmem:[%s12344_s2 + $0x10f8] sm:$0xff]  ;;  %v560_v11 = vld [vmem:[%s12344_s2 + $0x1100] sm:$0xff] }
 0x13b   :  { %3608 = vst [vmem:[%s12345_s3 + $0x1020] sm:$0xff] %v2584_v12  ;;  %v2587_v21 = vadd.f32 %v4151_v2, %v1561_v13  ;;  %v1565_v23 = vmul.f32 %v4146_v1, %v539_v8  ;;  %v1566_v24 = vmul.f32 %v4146_v1, %v540_v9  ;;  %3609 = vst [vmem:[%s12345_s3 + $0x1028] sm:$0xff] %v2585_v16  ;;  %v561_v12 = vld [vmem:[%s12344_s2 + $0x1108] sm:$0xff] }
 0x13c   :  { %3610 = vst [vmem:[%s12345_s3 + $0x1030] sm:$0xff] %v2586_v17  ;;  %v2588_v27 = vadd.f32 %v4151_v2, %v1562_v18  ;;  %v2589_v28 = vadd.f32 %v4151_v2, %v1563_v19  ;;  %v1567_v29 = vmul.f32 %v4146_v1, %v541_v14  ;;  %v1568_v30 = vmul.f32 %v4146_v1, %v542_v15  ;;  %v562_v17 = vld [vmem:[%s12344_s2 + $0x1110] sm:$0xff]  ;;  %v563_v18 = vld [vmem:[%s12344_s2 + $0x1118] sm:$0xff]  ;;  %v564_v19 = vld [vmem:[%s12344_s2 + $0x1120] sm:$0xff] }
 0x13d   :  { %3611 = vst [vmem:[%s12345_s3 + $0x1038] sm:$0xff] %v2587_v21  ;;  %v2590_v34 = vadd.f32 %v4151_v2, %v1564_v22  ;;  %v2591_v35 = vadd.f32 %v4151_v2, %v1565_v23  ;;  %v2592_v36 = vadd.f32 %v4151_v2, %v1566_v24  ;;  %v1569_v37 = vmul.f32 %v4146_v1, %v543_v20  ;;  %v565_v24 = vld [vmem:[%s12344_s2 + $0x1128] sm:$0xff] }
 0x13e   :  { %3612 = vst [vmem:[%s12345_s3 + $0x1040] sm:$0xff] %v2588_v27  ;;  %3613 = vst [vmem:[%s12345_s3 + $0x1048] sm:$0xff] %v2589_v28  ;;  %v2593_v40 = vadd.f32 %v4151_v2, %v1567_v29  ;;  %v2594_v41 = vadd.f32 %v4151_v2, %v1568_v30  ;;  %v1570_v42 = vmul.f32 %v4146_v1, %v544_v25  ;;  %v566_v25 = vld [vmem:[%s12344_s2 + $0x1130] sm:$0xff]  ;;  %v567_v30 = vld [vmem:[%s12344_s2 + $0x1138] sm:$0xff] }
 0x13f   :  { %v1571_v43 = vmul.f32 %v4146_v1, %v545_v26  ;;  %3614 = vst [vmem:[%s12345_s3 + $0x1050] sm:$0xff] %v2590_v34  ;;  %3615 = vst [vmem:[%s12345_s3 + $0x1058] sm:$0xff] %v2591_v35  ;;  %v2595_v45 = vadd.f32 %v4151_v2, %v1569_v37  ;;  %v1572_v46 = vmul.f32 %v4146_v1, %v546_v31  ;;  %v568_v35 = vld [vmem:[%s12344_s2 + $0x1140] sm:$0xff] }
 0x140   :  { %3616 = vst [vmem:[%s12345_s3 + $0x1060] sm:$0xff] %v2592_v36  ;;  %v1573_v47 = vmul.f32 %v4146_v1, %v547_v32  ;;  %v1574_v48 = vmul.f32 %v4146_v1, %v548_v33  ;;  %3617 = vst [vmem:[%s12345_s3 + $0x1068] sm:$0xff] %v2593_v40  ;;  %v2596_v51 = vadd.f32 %v4151_v2, %v1570_v42  ;;  %v569_v36 = vld [vmem:[%s12344_s2 + $0x1148] sm:$0xff]  ;;  %v571_v42 = vld [vmem:[%s12344_s2 + $0x1158] sm:$0xff] }
 0x141   :  { %3618 = vst [vmem:[%s12345_s3 + $0x1070] sm:$0xff] %v2594_v41  ;;  %v2597_v52 = vadd.f32 %v4151_v2, %v1571_v43  ;;  %v1575_v53 = vmul.f32 %v4146_v1, %v549_v38  ;;  %v1576_v54 = vmul.f32 %v4146_v1, %v550_v39  ;;  %3619 = vst [vmem:[%s12345_s3 + $0x1078] sm:$0xff] %v2595_v45  ;;  %v570_v41 = vld [vmem:[%s12344_s2 + $0x1150] sm:$0xff]  ;;  %v572_v43 = vld [vmem:[%s12344_s2 + $0x1160] sm:$0xff] }
 0x142   :  { %v2598_v58 = vadd.f32 %v4151_v2, %v1572_v46  ;;  %v2599_v59 = vadd.f32 %v4151_v2, %v1573_v47  ;;  %v2600_v60 = vadd.f32 %v4151_v2, %v1574_v48  ;;  %v1577_v61 = vmul.f32 %v4146_v1, %v551_v44  ;;  %3620 = vst [vmem:[%s12345_s3 + $0x1080] sm:$0xff] %v2596_v51  ;;  %v573_v48 = vld [vmem:[%s12344_s2 + $0x1168] sm:$0xff] }
 0x143   :  { %3621 = vst [vmem:[%s12345_s3 + $0x1088] sm:$0xff] %v2597_v52  ;;  %v2601_v0 = vadd.f32 %v4151_v2, %v1575_v53  ;;  %v2602_v3 = vadd.f32 %v4151_v2, %v1576_v54  ;;  %v1578_v4 = vmul.f32 %v4146_v1, %v552_v49  ;;  %v1579_v5 = vmul.f32 %v4146_v1, %v553_v50  ;;  %v574_v49 = vld [vmem:[%s12344_s2 + $0x1170] sm:$0xff]  ;;  %v575_v54 = vld [vmem:[%s12344_s2 + $0x1178] sm:$0xff] }
 0x144   :  { %3622 = vst [vmem:[%s12345_s3 + $0x1090] sm:$0xff] %v2598_v58  ;;  %3623 = vst [vmem:[%s12345_s3 + $0x1098] sm:$0xff] %v2599_v59  ;;  %v2603_v7 = vadd.f32 %v4151_v2, %v1577_v61  ;;  %v1580_v8 = vmul.f32 %v4146_v1, %v554_v55  ;;  %v1581_v9 = vmul.f32 %v4146_v1, %v555_v56  ;;  %v576_v59 = vld [vmem:[%s12344_s2 + $0x1180] sm:$0xff] }
 0x145   :  { %3624 = vst [vmem:[%s12345_s3 + $0x10a0] sm:$0xff] %v2600_v60  ;;  %v1582_v10 = vmul.f32 %v4146_v1, %v556_v57  ;;  %3625 = vst [vmem:[%s12345_s3 + $0x10a8] sm:$0xff] %v2601_v0  ;;  %v2604_v13 = vadd.f32 %v4151_v2, %v1578_v4  ;;  %v2605_v14 = vadd.f32 %v4151_v2, %v1579_v5  ;;  %v577_v60 = vld [vmem:[%s12344_s2 + $0x1188] sm:$0xff]  ;;  %v579_v4 = vld [vmem:[%s12344_s2 + $0x1198] sm:$0xff] }
 0x146   :  { %3626 = vst [vmem:[%s12345_s3 + $0x10b0] sm:$0xff] %v2602_v3  ;;  %v1583_v15 = vmul.f32 %v4146_v1, %v557_v62  ;;  %v1584_v16 = vmul.f32 %v4146_v1, %v558_v63  ;;  %3627 = vst [vmem:[%s12345_s3 + $0x10b8] sm:$0xff] %v2603_v7  ;;  %v2606_v20 = vadd.f32 %v4151_v2, %v1580_v8  ;;  %v578_v3 = vld [vmem:[%s12344_s2 + $0x1190] sm:$0xff]  ;;  %v580_v5 = vld [vmem:[%s12344_s2 + $0x11a0] sm:$0xff] }
 0x147   :  { %v2607_v21 = vadd.f32 %v4151_v2, %v1581_v9  ;;  %v2608_v22 = vadd.f32 %v4151_v2, %v1582_v10  ;;  %v1585_v23 = vmul.f32 %v4146_v1, %v559_v6  ;;  %3628 = vst [vmem:[%s12345_s3 + $0x10c0] sm:$0xff] %v2604_v13  ;;  %3629 = vst [vmem:[%s12345_s3 + $0x10c8] sm:$0xff] %v2605_v14  ;;  %v581_v10 = vld [vmem:[%s12344_s2 + $0x11a8] sm:$0xff] }
 0x148   :  { %v2609_v26 = vadd.f32 %v4151_v2, %v1583_v15  ;;  %v2610_v27 = vadd.f32 %v4151_v2, %v1584_v16  ;;  %v1586_v28 = vmul.f32 %v4146_v1, %v560_v11  ;;  %v1587_v29 = vmul.f32 %v4146_v1, %v561_v12  ;;  %3630 = vst [vmem:[%s12345_s3 + $0x10d0] sm:$0xff] %v2606_v20  ;;  %v582_v11 = vld [vmem:[%s12344_s2 + $0x11b0] sm:$0xff]  ;;  %v583_v16 = vld [vmem:[%s12344_s2 + $0x11b8] sm:$0xff] }
 0x149   :  { %3631 = vst [vmem:[%s12345_s3 + $0x10d8] sm:$0xff] %v2607_v21  ;;  %3632 = vst [vmem:[%s12345_s3 + $0x10e0] sm:$0xff] %v2608_v22  ;;  %v2611_v31 = vadd.f32 %v4151_v2, %v1585_v23  ;;  %v1588_v32 = vmul.f32 %v4146_v1, %v562_v17  ;;  %v1589_v33 = vmul.f32 %v4146_v1, %v563_v18  ;;  %v584_v21 = vld [vmem:[%s12344_s2 + $0x11c0] sm:$0xff]  ;;  %v585_v22 = vld [vmem:[%s12344_s2 + $0x11c8] sm:$0xff] }
 0x14a   :  { %v1590_v34 = vmul.f32 %v4146_v1, %v564_v19  ;;  %3633 = vst [vmem:[%s12345_s3 + $0x10e8] sm:$0xff] %v2609_v26  ;;  %3634 = vst [vmem:[%s12345_s3 + $0x10f0] sm:$0xff] %v2610_v27  ;;  %v2612_v37 = vadd.f32 %v4151_v2, %v1586_v28  ;;  %v2613_v38 = vadd.f32 %v4151_v2, %v1587_v29  ;;  %v586_v27 = vld [vmem:[%s12344_s2 + $0x11d0] sm:$0xff]  ;;  %v587_v28 = vld [vmem:[%s12344_s2 + $0x11d8] sm:$0xff] }
 0x14b   :  { %v1591_v39 = vmul.f32 %v4146_v1, %v565_v24  ;;  %v1592_v40 = vmul.f32 %v4146_v1, %v566_v25  ;;  %3635 = vst [vmem:[%s12345_s3 + $0x10f8] sm:$0xff] %v2611_v31  ;;  %v2614_v44 = vadd.f32 %v4151_v2, %v1588_v32  ;;  %v2615_v45 = vadd.f32 %v4151_v2, %v1589_v33  ;;  %v588_v29 = vld [vmem:[%s12344_s2 + $0x11e0] sm:$0xff] }
 0x14c   :  { %v2616_v46 = vadd.f32 %v4151_v2, %v1590_v34  ;;  %v1593_v47 = vmul.f32 %v4146_v1, %v567_v30  ;;  %3636 = vst [vmem:[%s12345_s3 + $0x1100] sm:$0xff] %v2612_v37  ;;  %3637 = vst [vmem:[%s12345_s3 + $0x1108] sm:$0xff] %v2613_v38  ;;  %v1594_v52 = vmul.f32 %v4146_v1, %v568_v35  ;;  %v589_v34 = vld [vmem:[%s12344_s2 + $0x11e8] sm:$0xff]  ;;  %v590_v35 = vld [vmem:[%s12344_s2 + $0x11f0] sm:$0xff] }
 0x14d   :  { %v2617_v50 = vadd.f32 %v4151_v2, %v1591_v39  ;;  %v2618_v51 = vadd.f32 %v4151_v2, %v1592_v40  ;;  %v1595_v53 = vmul.f32 %v4146_v1, %v569_v36  ;;  %3638 = vst [vmem:[%s12345_s3 + $0x1110] sm:$0xff] %v2614_v44  ;;  %3639 = vst [vmem:[%s12345_s3 + $0x1118] sm:$0xff] %v2615_v45  ;;  %v591_v40 = vld [vmem:[%s12344_s2 + $0x11f8] sm:$0xff]  ;;  %v592_v45 = vld [vmem:[%s12344_s2 + $0x1200] sm:$0xff] }
 0x14e   :  { %3640 = vst [vmem:[%s12345_s3 + $0x1120] sm:$0xff] %v2616_v46  ;;  %v2619_v55 = vadd.f32 %v4151_v2, %v1593_v47  ;;  %v1596_v56 = vmul.f32 %v4146_v1, %v570_v41  ;;  %v1597_v57 = vmul.f32 %v4146_v1, %v571_v42  ;;  %v1598_v58 = vmul.f32 %v4146_v1, %v572_v43  ;;  %v593_v46 = vld [vmem:[%s12344_s2 + $0x1208] sm:$0xff] }
 0x14f   :  { %3641 = vst [vmem:[%s12345_s3 + $0x1128] sm:$0xff] %v2617_v50  ;;  %3642 = vst [vmem:[%s12345_s3 + $0x1130] sm:$0xff] %v2618_v51  ;;  %v2620_v61 = vadd.f32 %v4151_v2, %v1594_v52  ;;  %v2621_v62 = vadd.f32 %v4151_v2, %v1595_v53  ;;  %v1599_v63 = vmul.f32 %v4146_v1, %v573_v48  ;;  %v594_v51 = vld [vmem:[%s12344_s2 + $0x1210] sm:$0xff]  ;;  %v595_v52 = vld [vmem:[%s12344_s2 + $0x1218] sm:$0xff] }
 0x150   :  { %v1600_v0 = vmul.f32 %v4146_v1, %v574_v49  ;;  %3643 = vst [vmem:[%s12345_s3 + $0x1138] sm:$0xff] %v2619_v55  ;;  %v2622_v6 = vadd.f32 %v4151_v2, %v1596_v56  ;;  %v2623_v7 = vadd.f32 %v4151_v2, %v1597_v57  ;;  %v2624_v8 = vadd.f32 %v4151_v2, %v1598_v58  ;;  %v596_v53 = vld [vmem:[%s12344_s2 + $0x1220] sm:$0xff]  ;;  %v597_v58 = vld [vmem:[%s12344_s2 + $0x1228] sm:$0xff] }
 0x151   :  { %v1601_v9 = vmul.f32 %v4146_v1, %v575_v54  ;;  %3644 = vst [vmem:[%s12345_s3 + $0x1140] sm:$0xff] %v2620_v61  ;;  %3645 = vst [vmem:[%s12345_s3 + $0x1148] sm:$0xff] %v2621_v62  ;;  %v2625_v12 = vadd.f32 %v4151_v2, %v1599_v63  ;;  %v1602_v14 = vmul.f32 %v4146_v1, %v576_v59  ;;  %v598_v59 = vld [vmem:[%s12344_s2 + $0x1230] sm:$0xff] }
 0x152   :  { %v2626_v13 = vadd.f32 %v4151_v2, %v1600_v0  ;;  %v1603_v15 = vmul.f32 %v4146_v1, %v577_v60  ;;  %3646 = vst [vmem:[%s12345_s3 + $0x1150] sm:$0xff] %v2622_v6  ;;  %3647 = vst [vmem:[%s12345_s3 + $0x1158] sm:$0xff] %v2623_v7  ;;  %v1604_v18 = vmul.f32 %v4146_v1, %v578_v3  ;;  %v599_v0 = vld [vmem:[%s12344_s2 + $0x1238] sm:$0xff]  ;;  %v600_v7 = vld [vmem:[%s12344_s2 + $0x1240] sm:$0xff] }
 0x153   :  { %3648 = vst [vmem:[%s12345_s3 + $0x1160] sm:$0xff] %v2624_v8  ;;  %v2627_v17 = vadd.f32 %v4151_v2, %v1601_v9  ;;  %v1605_v19 = vmul.f32 %v4146_v1, %v579_v4  ;;  %v1606_v20 = vmul.f32 %v4146_v1, %v580_v5  ;;  %3649 = vst [vmem:[%s12345_s3 + $0x1168] sm:$0xff] %v2625_v12  ;;  %v601_v8 = vld [vmem:[%s12344_s2 + $0x1248] sm:$0xff] }
 0x154   :  { %3650 = vst [vmem:[%s12345_s3 + $0x1170] sm:$0xff] %v2626_v13  ;;  %v2628_v23 = vadd.f32 %v4151_v2, %v1602_v14  ;;  %v2629_v24 = vadd.f32 %v4151_v2, %v1603_v15  ;;  %v1607_v25 = vmul.f32 %v4146_v1, %v581_v10  ;;  %v1608_v26 = vmul.f32 %v4146_v1, %v582_v11  ;;  %v602_v13 = vld [vmem:[%s12344_s2 + $0x1250] sm:$0xff]  ;;  %v603_v14 = vld [vmem:[%s12344_s2 + $0x1258] sm:$0xff]  ;;  %v604_v15 = vld [vmem:[%s12344_s2 + $0x1260] sm:$0xff] }
 0x155   :  { %3651 = vst [vmem:[%s12345_s3 + $0x1178] sm:$0xff] %v2627_v17  ;;  %v2630_v30 = vadd.f32 %v4151_v2, %v1604_v18  ;;  %v2631_v31 = vadd.f32 %v4151_v2, %v1605_v19  ;;  %v2632_v32 = vadd.f32 %v4151_v2, %v1606_v20  ;;  %v1609_v33 = vmul.f32 %v4146_v1, %v583_v16  ;;  %v605_v20 = vld [vmem:[%s12344_s2 + $0x1268] sm:$0xff] }
 0x156   :  { %3652 = vst [vmem:[%s12345_s3 + $0x1180] sm:$0xff] %v2628_v23  ;;  %3653 = vst [vmem:[%s12345_s3 + $0x1188] sm:$0xff] %v2629_v24  ;;  %v2633_v36 = vadd.f32 %v4151_v2, %v1607_v25  ;;  %v2634_v37 = vadd.f32 %v4151_v2, %v1608_v26  ;;  %v1610_v38 = vmul.f32 %v4146_v1, %v584_v21  ;;  %v606_v21 = vld [vmem:[%s12344_s2 + $0x1270] sm:$0xff]  ;;  %v607_v26 = vld [vmem:[%s12344_s2 + $0x1278] sm:$0xff] }
 0x157   :  { %v1611_v39 = vmul.f32 %v4146_v1, %v585_v22  ;;  %3654 = vst [vmem:[%s12345_s3 + $0x1190] sm:$0xff] %v2630_v30  ;;  %3655 = vst [vmem:[%s12345_s3 + $0x1198] sm:$0xff] %v2631_v31  ;;  %v2635_v41 = vadd.f32 %v4151_v2, %v1609_v33  ;;  %v1612_v42 = vmul.f32 %v4146_v1, %v586_v27  ;;  %v608_v31 = vld [vmem:[%s12344_s2 + $0x1280] sm:$0xff] }
 0x158   :  { %3656 = vst [vmem:[%s12345_s3 + $0x11a0] sm:$0xff] %v2632_v32  ;;  %v1613_v43 = vmul.f32 %v4146_v1, %v587_v28  ;;  %v1614_v44 = vmul.f32 %v4146_v1, %v588_v29  ;;  %3657 = vst [vmem:[%s12345_s3 + $0x11a8] sm:$0xff] %v2633_v36  ;;  %v2636_v47 = vadd.f32 %v4151_v2, %v1610_v38  ;;  %v609_v32 = vld [vmem:[%s12344_s2 + $0x1288] sm:$0xff]  ;;  %v611_v38 = vld [vmem:[%s12344_s2 + $0x1298] sm:$0xff] }
 0x159   :  { %3658 = vst [vmem:[%s12345_s3 + $0x11b0] sm:$0xff] %v2634_v37  ;;  %v2637_v48 = vadd.f32 %v4151_v2, %v1611_v39  ;;  %v1615_v49 = vmul.f32 %v4146_v1, %v589_v34  ;;  %v1616_v50 = vmul.f32 %v4146_v1, %v590_v35  ;;  %3659 = vst [vmem:[%s12345_s3 + $0x11b8] sm:$0xff] %v2635_v41  ;;  %v610_v37 = vld [vmem:[%s12344_s2 + $0x1290] sm:$0xff]  ;;  %v612_v39 = vld [vmem:[%s12344_s2 + $0x12a0] sm:$0xff] }
 0x15a   :  { %v2638_v54 = vadd.f32 %v4151_v2, %v1612_v42  ;;  %v2639_v55 = vadd.f32 %v4151_v2, %v1613_v43  ;;  %v2640_v56 = vadd.f32 %v4151_v2, %v1614_v44  ;;  %v1617_v57 = vmul.f32 %v4146_v1, %v591_v40  ;;  %3660 = vst [vmem:[%s12345_s3 + $0x11c0] sm:$0xff] %v2636_v47  ;;  %v613_v44 = vld [vmem:[%s12344_s2 + $0x12a8] sm:$0xff] }
 0x15b   :  { %3661 = vst [vmem:[%s12345_s3 + $0x11c8] sm:$0xff] %v2637_v48  ;;  %v2641_v60 = vadd.f32 %v4151_v2, %v1615_v49  ;;  %v2642_v61 = vadd.f32 %v4151_v2, %v1616_v50  ;;  %v1618_v62 = vmul.f32 %v4146_v1, %v592_v45  ;;  %v1619_v63 = vmul.f32 %v4146_v1, %v593_v46  ;;  %v614_v45 = vld [vmem:[%s12344_s2 + $0x12b0] sm:$0xff]  ;;  %v615_v50 = vld [vmem:[%s12344_s2 + $0x12b8] sm:$0xff] }
 0x15c   :  { %3662 = vst [vmem:[%s12345_s3 + $0x11d0] sm:$0xff] %v2638_v54  ;;  %3663 = vst [vmem:[%s12345_s3 + $0x11d8] sm:$0xff] %v2639_v55  ;;  %v2643_v3 = vadd.f32 %v4151_v2, %v1617_v57  ;;  %v1620_v4 = vmul.f32 %v4146_v1, %v594_v51  ;;  %v1621_v5 = vmul.f32 %v4146_v1, %v595_v52  ;;  %v616_v55 = vld [vmem:[%s12344_s2 + $0x12c0] sm:$0xff] }
 0x15d   :  { %3664 = vst [vmem:[%s12345_s3 + $0x11e0] sm:$0xff] %v2640_v56  ;;  %v1622_v6 = vmul.f32 %v4146_v1, %v596_v53  ;;  %3665 = vst [vmem:[%s12345_s3 + $0x11e8] sm:$0xff] %v2641_v60  ;;  %v2644_v9 = vadd.f32 %v4151_v2, %v1618_v62  ;;  %v2645_v10 = vadd.f32 %v4151_v2, %v1619_v63  ;;  %v617_v56 = vld [vmem:[%s12344_s2 + $0x12c8] sm:$0xff]  ;;  %v619_v62 = vld [vmem:[%s12344_s2 + $0x12d8] sm:$0xff] }
 0x15e   :  { %3666 = vst [vmem:[%s12345_s3 + $0x11f0] sm:$0xff] %v2642_v61  ;;  %v1623_v11 = vmul.f32 %v4146_v1, %v597_v58  ;;  %v1624_v12 = vmul.f32 %v4146_v1, %v598_v59  ;;  %3667 = vst [vmem:[%s12345_s3 + $0x11f8] sm:$0xff] %v2643_v3  ;;  %v2646_v16 = vadd.f32 %v4151_v2, %v1620_v4  ;;  %v618_v61 = vld [vmem:[%s12344_s2 + $0x12d0] sm:$0xff]  ;;  %v620_v63 = vld [vmem:[%s12344_s2 + $0x12e0] sm:$0xff] }
 0x15f   :  { %v2647_v17 = vadd.f32 %v4151_v2, %v1621_v5  ;;  %v2648_v18 = vadd.f32 %v4151_v2, %v1622_v6  ;;  %v1625_v19 = vmul.f32 %v4146_v1, %v599_v0  ;;  %3668 = vst [vmem:[%s12345_s3 + $0x1200] sm:$0xff] %v2644_v9  ;;  %3669 = vst [vmem:[%s12345_s3 + $0x1208] sm:$0xff] %v2645_v10  ;;  %v621_v6 = vld [vmem:[%s12344_s2 + $0x12e8] sm:$0xff] }
 0x160   :  { %v2649_v22 = vadd.f32 %v4151_v2, %v1623_v11  ;;  %v2650_v23 = vadd.f32 %v4151_v2, %v1624_v12  ;;  %v1626_v24 = vmul.f32 %v4146_v1, %v600_v7  ;;  %v1627_v25 = vmul.f32 %v4146_v1, %v601_v8  ;;  %3670 = vst [vmem:[%s12345_s3 + $0x1210] sm:$0xff] %v2646_v16  ;;  %v622_v7 = vld [vmem:[%s12344_s2 + $0x12f0] sm:$0xff]  ;;  %v623_v12 = vld [vmem:[%s12344_s2 + $0x12f8] sm:$0xff] }
 0x161   :  { %3671 = vst [vmem:[%s12345_s3 + $0x1218] sm:$0xff] %v2647_v17  ;;  %3672 = vst [vmem:[%s12345_s3 + $0x1220] sm:$0xff] %v2648_v18  ;;  %v2651_v27 = vadd.f32 %v4151_v2, %v1625_v19  ;;  %v1628_v28 = vmul.f32 %v4146_v1, %v602_v13  ;;  %v1629_v29 = vmul.f32 %v4146_v1, %v603_v14  ;;  %v624_v17 = vld [vmem:[%s12344_s2 + $0x1300] sm:$0xff]  ;;  %v625_v18 = vld [vmem:[%s12344_s2 + $0x1308] sm:$0xff] }
 0x162   :  { %v1630_v30 = vmul.f32 %v4146_v1, %v604_v15  ;;  %3673 = vst [vmem:[%s12345_s3 + $0x1228] sm:$0xff] %v2649_v22  ;;  %3674 = vst [vmem:[%s12345_s3 + $0x1230] sm:$0xff] %v2650_v23  ;;  %v2652_v33 = vadd.f32 %v4151_v2, %v1626_v24  ;;  %v2653_v34 = vadd.f32 %v4151_v2, %v1627_v25  ;;  %v626_v23 = vld [vmem:[%s12344_s2 + $0x1310] sm:$0xff]  ;;  %v627_v24 = vld [vmem:[%s12344_s2 + $0x1318] sm:$0xff] }
 0x163   :  { %v1631_v35 = vmul.f32 %v4146_v1, %v605_v20  ;;  %v1632_v36 = vmul.f32 %v4146_v1, %v606_v21  ;;  %3675 = vst [vmem:[%s12345_s3 + $0x1238] sm:$0xff] %v2651_v27  ;;  %v2654_v40 = vadd.f32 %v4151_v2, %v1628_v28  ;;  %v2655_v41 = vadd.f32 %v4151_v2, %v1629_v29  ;;  %v628_v25 = vld [vmem:[%s12344_s2 + $0x1320] sm:$0xff] }
 0x164   :  { %v2656_v42 = vadd.f32 %v4151_v2, %v1630_v30  ;;  %v1633_v43 = vmul.f32 %v4146_v1, %v607_v26  ;;  %3676 = vst [vmem:[%s12345_s3 + $0x1240] sm:$0xff] %v2652_v33  ;;  %3677 = vst [vmem:[%s12345_s3 + $0x1248] sm:$0xff] %v2653_v34  ;;  %v1634_v48 = vmul.f32 %v4146_v1, %v608_v31  ;;  %v629_v30 = vld [vmem:[%s12344_s2 + $0x1328] sm:$0xff]  ;;  %v630_v31 = vld [vmem:[%s12344_s2 + $0x1330] sm:$0xff] }
 0x165   :  { %v2657_v46 = vadd.f32 %v4151_v2, %v1631_v35  ;;  %v2658_v47 = vadd.f32 %v4151_v2, %v1632_v36  ;;  %v1635_v49 = vmul.f32 %v4146_v1, %v609_v32  ;;  %3678 = vst [vmem:[%s12345_s3 + $0x1250] sm:$0xff] %v2654_v40  ;;  %3679 = vst [vmem:[%s12345_s3 + $0x1258] sm:$0xff] %v2655_v41  ;;  %v631_v36 = vld [vmem:[%s12344_s2 + $0x1338] sm:$0xff]  ;;  %v632_v41 = vld [vmem:[%s12344_s2 + $0x1340] sm:$0xff] }
 0x166   :  { %3680 = vst [vmem:[%s12345_s3 + $0x1260] sm:$0xff] %v2656_v42  ;;  %v2659_v51 = vadd.f32 %v4151_v2, %v1633_v43  ;;  %v1636_v52 = vmul.f32 %v4146_v1, %v610_v37  ;;  %v1637_v53 = vmul.f32 %v4146_v1, %v611_v38  ;;  %v1638_v54 = vmul.f32 %v4146_v1, %v612_v39  ;;  %v633_v42 = vld [vmem:[%s12344_s2 + $0x1348] sm:$0xff] }
 0x167   :  { %3681 = vst [vmem:[%s12345_s3 + $0x1268] sm:$0xff] %v2657_v46  ;;  %3682 = vst [vmem:[%s12345_s3 + $0x1270] sm:$0xff] %v2658_v47  ;;  %v2660_v57 = vadd.f32 %v4151_v2, %v1634_v48  ;;  %v2661_v58 = vadd.f32 %v4151_v2, %v1635_v49  ;;  %v1639_v59 = vmul.f32 %v4146_v1, %v613_v44  ;;  %v634_v47 = vld [vmem:[%s12344_s2 + $0x1350] sm:$0xff]  ;;  %v635_v48 = vld [vmem:[%s12344_s2 + $0x1358] sm:$0xff] }
 0x168   :  { %v1640_v60 = vmul.f32 %v4146_v1, %v614_v45  ;;  %3683 = vst [vmem:[%s12345_s3 + $0x1278] sm:$0xff] %v2659_v51  ;;  %v2662_v0 = vadd.f32 %v4151_v2, %v1636_v52  ;;  %v2663_v3 = vadd.f32 %v4151_v2, %v1637_v53  ;;  %v2664_v4 = vadd.f32 %v4151_v2, %v1638_v54  ;;  %v636_v49 = vld [vmem:[%s12344_s2 + $0x1360] sm:$0xff]  ;;  %v637_v54 = vld [vmem:[%s12344_s2 + $0x1368] sm:$0xff] }
 0x169   :  { %v1641_v5 = vmul.f32 %v4146_v1, %v615_v50  ;;  %3684 = vst [vmem:[%s12345_s3 + $0x1280] sm:$0xff] %v2660_v57  ;;  %3685 = vst [vmem:[%s12345_s3 + $0x1288] sm:$0xff] %v2661_v58  ;;  %v2665_v8 = vadd.f32 %v4151_v2, %v1639_v59  ;;  %v1642_v10 = vmul.f32 %v4146_v1, %v616_v55  ;;  %v638_v55 = vld [vmem:[%s12344_s2 + $0x1370] sm:$0xff] }
 0x16a   :  { %v2666_v9 = vadd.f32 %v4151_v2, %v1640_v60  ;;  %v1643_v11 = vmul.f32 %v4146_v1, %v617_v56  ;;  %3686 = vst [vmem:[%s12345_s3 + $0x1290] sm:$0xff] %v2662_v0  ;;  %3687 = vst [vmem:[%s12345_s3 + $0x1298] sm:$0xff] %v2663_v3  ;;  %v1644_v14 = vmul.f32 %v4146_v1, %v618_v61  ;;  %v639_v60 = vld [vmem:[%s12344_s2 + $0x1378] sm:$0xff]  ;;  %v640_v3 = vld [vmem:[%s12344_s2 + $0x1380] sm:$0xff] }
 0x16b   :  { %3688 = vst [vmem:[%s12345_s3 + $0x12a0] sm:$0xff] %v2664_v4  ;;  %v2667_v13 = vadd.f32 %v4151_v2, %v1641_v5  ;;  %v1645_v15 = vmul.f32 %v4146_v1, %v619_v62  ;;  %v1646_v16 = vmul.f32 %v4146_v1, %v620_v63  ;;  %3689 = vst [vmem:[%s12345_s3 + $0x12a8] sm:$0xff] %v2665_v8  ;;  %v641_v4 = vld [vmem:[%s12344_s2 + $0x1388] sm:$0xff] }
 0x16c   :  { %3690 = vst [vmem:[%s12345_s3 + $0x12b0] sm:$0xff] %v2666_v9  ;;  %v2668_v19 = vadd.f32 %v4151_v2, %v1642_v10  ;;  %v2669_v20 = vadd.f32 %v4151_v2, %v1643_v11  ;;  %v1647_v21 = vmul.f32 %v4146_v1, %v621_v6  ;;  %v1648_v22 = vmul.f32 %v4146_v1, %v622_v7  ;;  %v642_v9 = vld [vmem:[%s12344_s2 + $0x1390] sm:$0xff]  ;;  %v643_v10 = vld [vmem:[%s12344_s2 + $0x1398] sm:$0xff]  ;;  %v644_v11 = vld [vmem:[%s12344_s2 + $0x13a0] sm:$0xff] }
 0x16d   :  { %3691 = vst [vmem:[%s12345_s3 + $0x12b8] sm:$0xff] %v2667_v13  ;;  %v2670_v26 = vadd.f32 %v4151_v2, %v1644_v14  ;;  %v2671_v27 = vadd.f32 %v4151_v2, %v1645_v15  ;;  %v2672_v28 = vadd.f32 %v4151_v2, %v1646_v16  ;;  %v1649_v29 = vmul.f32 %v4146_v1, %v623_v12  ;;  %v645_v16 = vld [vmem:[%s12344_s2 + $0x13a8] sm:$0xff] }
 0x16e   :  { %3692 = vst [vmem:[%s12345_s3 + $0x12c0] sm:$0xff] %v2668_v19  ;;  %3693 = vst [vmem:[%s12345_s3 + $0x12c8] sm:$0xff] %v2669_v20  ;;  %v2673_v32 = vadd.f32 %v4151_v2, %v1647_v21  ;;  %v2674_v33 = vadd.f32 %v4151_v2, %v1648_v22  ;;  %v1650_v34 = vmul.f32 %v4146_v1, %v624_v17  ;;  %v646_v17 = vld [vmem:[%s12344_s2 + $0x13b0] sm:$0xff]  ;;  %v647_v22 = vld [vmem:[%s12344_s2 + $0x13b8] sm:$0xff] }
 0x16f   :  { %v1651_v35 = vmul.f32 %v4146_v1, %v625_v18  ;;  %3694 = vst [vmem:[%s12345_s3 + $0x12d0] sm:$0xff] %v2670_v26  ;;  %3695 = vst [vmem:[%s12345_s3 + $0x12d8] sm:$0xff] %v2671_v27  ;;  %v2675_v37 = vadd.f32 %v4151_v2, %v1649_v29  ;;  %v1652_v38 = vmul.f32 %v4146_v1, %v626_v23  ;;  %v648_v27 = vld [vmem:[%s12344_s2 + $0x13c0] sm:$0xff] }
 0x170   :  { %3696 = vst [vmem:[%s12345_s3 + $0x12e0] sm:$0xff] %v2672_v28  ;;  %v1653_v39 = vmul.f32 %v4146_v1, %v627_v24  ;;  %v1654_v40 = vmul.f32 %v4146_v1, %v628_v25  ;;  %3697 = vst [vmem:[%s12345_s3 + $0x12e8] sm:$0xff] %v2673_v32  ;;  %v2676_v43 = vadd.f32 %v4151_v2, %v1650_v34  ;;  %v649_v28 = vld [vmem:[%s12344_s2 + $0x13c8] sm:$0xff]  ;;  %v651_v34 = vld [vmem:[%s12344_s2 + $0x13d8] sm:$0xff] }
 0x171   :  { %3698 = vst [vmem:[%s12345_s3 + $0x12f0] sm:$0xff] %v2674_v33  ;;  %v2677_v44 = vadd.f32 %v4151_v2, %v1651_v35  ;;  %v1655_v45 = vmul.f32 %v4146_v1, %v629_v30  ;;  %v1656_v46 = vmul.f32 %v4146_v1, %v630_v31  ;;  %3699 = vst [vmem:[%s12345_s3 + $0x12f8] sm:$0xff] %v2675_v37  ;;  %v650_v33 = vld [vmem:[%s12344_s2 + $0x13d0] sm:$0xff]  ;;  %v652_v35 = vld [vmem:[%s12344_s2 + $0x13e0] sm:$0xff] }
 0x172   :  { %v2678_v50 = vadd.f32 %v4151_v2, %v1652_v38  ;;  %v2679_v51 = vadd.f32 %v4151_v2, %v1653_v39  ;;  %v2680_v52 = vadd.f32 %v4151_v2, %v1654_v40  ;;  %v1657_v53 = vmul.f32 %v4146_v1, %v631_v36  ;;  %3700 = vst [vmem:[%s12345_s3 + $0x1300] sm:$0xff] %v2676_v43  ;;  %v653_v40 = vld [vmem:[%s12344_s2 + $0x13e8] sm:$0xff] }
 0x173   :  { %3701 = vst [vmem:[%s12345_s3 + $0x1308] sm:$0xff] %v2677_v44  ;;  %v2681_v56 = vadd.f32 %v4151_v2, %v1655_v45  ;;  %v2682_v57 = vadd.f32 %v4151_v2, %v1656_v46  ;;  %v1658_v58 = vmul.f32 %v4146_v1, %v632_v41  ;;  %v1659_v59 = vmul.f32 %v4146_v1, %v633_v42  ;;  %v654_v41 = vld [vmem:[%s12344_s2 + $0x13f0] sm:$0xff]  ;;  %v655_v46 = vld [vmem:[%s12344_s2 + $0x13f8] sm:$0xff] }
 0x174   :  { %3702 = vst [vmem:[%s12345_s3 + $0x1310] sm:$0xff] %v2678_v50  ;;  %3703 = vst [vmem:[%s12345_s3 + $0x1318] sm:$0xff] %v2679_v51  ;;  %v2683_v61 = vadd.f32 %v4151_v2, %v1657_v53  ;;  %v1660_v62 = vmul.f32 %v4146_v1, %v634_v47  ;;  %v1661_v63 = vmul.f32 %v4146_v1, %v635_v48  ;;  %v656_v51 = vld [vmem:[%s12344_s2 + $0x1400] sm:$0xff] }
 0x175   :  { %3704 = vst [vmem:[%s12345_s3 + $0x1320] sm:$0xff] %v2680_v52  ;;  %v1662_v0 = vmul.f32 %v4146_v1, %v636_v49  ;;  %3705 = vst [vmem:[%s12345_s3 + $0x1328] sm:$0xff] %v2681_v56  ;;  %v2684_v5 = vadd.f32 %v4151_v2, %v1658_v58  ;;  %v2685_v6 = vadd.f32 %v4151_v2, %v1659_v59  ;;  %v657_v52 = vld [vmem:[%s12344_s2 + $0x1408] sm:$0xff]  ;;  %v659_v58 = vld [vmem:[%s12344_s2 + $0x1418] sm:$0xff] }
 0x176   :  { %3706 = vst [vmem:[%s12345_s3 + $0x1330] sm:$0xff] %v2682_v57  ;;  %v1663_v7 = vmul.f32 %v4146_v1, %v637_v54  ;;  %v1664_v8 = vmul.f32 %v4146_v1, %v638_v55  ;;  %3707 = vst [vmem:[%s12345_s3 + $0x1338] sm:$0xff] %v2683_v61  ;;  %v2686_v12 = vadd.f32 %v4151_v2, %v1660_v62  ;;  %v658_v57 = vld [vmem:[%s12344_s2 + $0x1410] sm:$0xff]  ;;  %v660_v59 = vld [vmem:[%s12344_s2 + $0x1420] sm:$0xff] }
 0x177   :  { %v2687_v13 = vadd.f32 %v4151_v2, %v1661_v63  ;;  %v2688_v14 = vadd.f32 %v4151_v2, %v1662_v0  ;;  %v1665_v15 = vmul.f32 %v4146_v1, %v639_v60  ;;  %3708 = vst [vmem:[%s12345_s3 + $0x1340] sm:$0xff] %v2684_v5  ;;  %3709 = vst [vmem:[%s12345_s3 + $0x1348] sm:$0xff] %v2685_v6  ;;  %v661_v0 = vld [vmem:[%s12344_s2 + $0x1428] sm:$0xff] }
 0x178   :  { %v2689_v18 = vadd.f32 %v4151_v2, %v1663_v7  ;;  %v2690_v19 = vadd.f32 %v4151_v2, %v1664_v8  ;;  %v1666_v20 = vmul.f32 %v4146_v1, %v640_v3  ;;  %v1667_v21 = vmul.f32 %v4146_v1, %v641_v4  ;;  %3710 = vst [vmem:[%s12345_s3 + $0x1350] sm:$0xff] %v2686_v12  ;;  %v662_v3 = vld [vmem:[%s12344_s2 + $0x1430] sm:$0xff]  ;;  %v663_v8 = vld [vmem:[%s12344_s2 + $0x1438] sm:$0xff] }
 0x179   :  { %3711 = vst [vmem:[%s12345_s3 + $0x1358] sm:$0xff] %v2687_v13  ;;  %3712 = vst [vmem:[%s12345_s3 + $0x1360] sm:$0xff] %v2688_v14  ;;  %v2691_v23 = vadd.f32 %v4151_v2, %v1665_v15  ;;  %v1668_v24 = vmul.f32 %v4146_v1, %v642_v9  ;;  %v1669_v25 = vmul.f32 %v4146_v1, %v643_v10  ;;  %v664_v13 = vld [vmem:[%s12344_s2 + $0x1440] sm:$0xff]  ;;  %v665_v14 = vld [vmem:[%s12344_s2 + $0x1448] sm:$0xff] }
 0x17a   :  { %v1670_v26 = vmul.f32 %v4146_v1, %v644_v11  ;;  %3713 = vst [vmem:[%s12345_s3 + $0x1368] sm:$0xff] %v2689_v18  ;;  %3714 = vst [vmem:[%s12345_s3 + $0x1370] sm:$0xff] %v2690_v19  ;;  %v2692_v29 = vadd.f32 %v4151_v2, %v1666_v20  ;;  %v2693_v30 = vadd.f32 %v4151_v2, %v1667_v21  ;;  %v666_v19 = vld [vmem:[%s12344_s2 + $0x1450] sm:$0xff]  ;;  %v667_v20 = vld [vmem:[%s12344_s2 + $0x1458] sm:$0xff] }
 0x17b   :  { %v1671_v31 = vmul.f32 %v4146_v1, %v645_v16  ;;  %v1672_v32 = vmul.f32 %v4146_v1, %v646_v17  ;;  %3715 = vst [vmem:[%s12345_s3 + $0x1378] sm:$0xff] %v2691_v23  ;;  %v2694_v36 = vadd.f32 %v4151_v2, %v1668_v24  ;;  %v2695_v37 = vadd.f32 %v4151_v2, %v1669_v25  ;;  %v668_v21 = vld [vmem:[%s12344_s2 + $0x1460] sm:$0xff] }
 0x17c   :  { %v2696_v38 = vadd.f32 %v4151_v2, %v1670_v26  ;;  %v1673_v39 = vmul.f32 %v4146_v1, %v647_v22  ;;  %3716 = vst [vmem:[%s12345_s3 + $0x1380] sm:$0xff] %v2692_v29  ;;  %3717 = vst [vmem:[%s12345_s3 + $0x1388] sm:$0xff] %v2693_v30  ;;  %v1674_v44 = vmul.f32 %v4146_v1, %v648_v27  ;;  %v669_v26 = vld [vmem:[%s12344_s2 + $0x1468] sm:$0xff]  ;;  %v670_v27 = vld [vmem:[%s12344_s2 + $0x1470] sm:$0xff] }
 0x17d   :  { %v2697_v42 = vadd.f32 %v4151_v2, %v1671_v31  ;;  %v2698_v43 = vadd.f32 %v4151_v2, %v1672_v32  ;;  %v1675_v45 = vmul.f32 %v4146_v1, %v649_v28  ;;  %3718 = vst [vmem:[%s12345_s3 + $0x1390] sm:$0xff] %v2694_v36  ;;  %3719 = vst [vmem:[%s12345_s3 + $0x1398] sm:$0xff] %v2695_v37  ;;  %v671_v32 = vld [vmem:[%s12344_s2 + $0x1478] sm:$0xff]  ;;  %v672_v37 = vld [vmem:[%s12344_s2 + $0x1480] sm:$0xff] }
 0x17e   :  { %3720 = vst [vmem:[%s12345_s3 + $0x13a0] sm:$0xff] %v2696_v38  ;;  %v2699_v47 = vadd.f32 %v4151_v2, %v1673_v39  ;;  %v1676_v48 = vmul.f32 %v4146_v1, %v650_v33  ;;  %v1677_v49 = vmul.f32 %v4146_v1, %v651_v34  ;;  %v1678_v50 = vmul.f32 %v4146_v1, %v652_v35  ;;  %v673_v38 = vld [vmem:[%s12344_s2 + $0x1488] sm:$0xff] }
 0x17f   :  { %3721 = vst [vmem:[%s12345_s3 + $0x13a8] sm:$0xff] %v2697_v42  ;;  %3722 = vst [vmem:[%s12345_s3 + $0x13b0] sm:$0xff] %v2698_v43  ;;  %v2700_v53 = vadd.f32 %v4151_v2, %v1674_v44  ;;  %v2701_v54 = vadd.f32 %v4151_v2, %v1675_v45  ;;  %v1679_v55 = vmul.f32 %v4146_v1, %v653_v40  ;;  %v674_v43 = vld [vmem:[%s12344_s2 + $0x1490] sm:$0xff]  ;;  %v675_v44 = vld [vmem:[%s12344_s2 + $0x1498] sm:$0xff] }
 0x180   :  { %v1680_v56 = vmul.f32 %v4146_v1, %v654_v41  ;;  %3723 = vst [vmem:[%s12345_s3 + $0x13b8] sm:$0xff] %v2699_v47  ;;  %v2702_v60 = vadd.f32 %v4151_v2, %v1676_v48  ;;  %v2703_v61 = vadd.f32 %v4151_v2, %v1677_v49  ;;  %v2704_v62 = vadd.f32 %v4151_v2, %v1678_v50  ;;  %v676_v45 = vld [vmem:[%s12344_s2 + $0x14a0] sm:$0xff]  ;;  %v677_v50 = vld [vmem:[%s12344_s2 + $0x14a8] sm:$0xff] }
 0x181   :  { %v1681_v63 = vmul.f32 %v4146_v1, %v655_v46  ;;  %3724 = vst [vmem:[%s12345_s3 + $0x13c0] sm:$0xff] %v2700_v53  ;;  %3725 = vst [vmem:[%s12345_s3 + $0x13c8] sm:$0xff] %v2701_v54  ;;  %v2705_v4 = vadd.f32 %v4151_v2, %v1679_v55  ;;  %v1682_v6 = vmul.f32 %v4146_v1, %v656_v51  ;;  %v678_v51 = vld [vmem:[%s12344_s2 + $0x14b0] sm:$0xff] }
 0x182   :  { %v2706_v5 = vadd.f32 %v4151_v2, %v1680_v56  ;;  %v1683_v7 = vmul.f32 %v4146_v1, %v657_v52  ;;  %3726 = vst [vmem:[%s12345_s3 + $0x13d0] sm:$0xff] %v2702_v60  ;;  %3727 = vst [vmem:[%s12345_s3 + $0x13d8] sm:$0xff] %v2703_v61  ;;  %v1684_v10 = vmul.f32 %v4146_v1, %v658_v57  ;;  %v679_v56 = vld [vmem:[%s12344_s2 + $0x14b8] sm:$0xff]  ;;  %v680_v61 = vld [vmem:[%s12344_s2 + $0x14c0] sm:$0xff] }
 0x183   :  { %3728 = vst [vmem:[%s12345_s3 + $0x13e0] sm:$0xff] %v2704_v62  ;;  %v2707_v9 = vadd.f32 %v4151_v2, %v1681_v63  ;;  %v1685_v11 = vmul.f32 %v4146_v1, %v659_v58  ;;  %v1686_v12 = vmul.f32 %v4146_v1, %v660_v59  ;;  %3729 = vst [vmem:[%s12345_s3 + $0x13e8] sm:$0xff] %v2705_v4  ;;  %v681_v62 = vld [vmem:[%s12344_s2 + $0x14c8] sm:$0xff] }
 0x184   :  { %3730 = vst [vmem:[%s12345_s3 + $0x13f0] sm:$0xff] %v2706_v5  ;;  %v2708_v15 = vadd.f32 %v4151_v2, %v1682_v6  ;;  %v2709_v16 = vadd.f32 %v4151_v2, %v1683_v7  ;;  %v1687_v17 = vmul.f32 %v4146_v1, %v661_v0  ;;  %v1688_v18 = vmul.f32 %v4146_v1, %v662_v3  ;;  %v682_v5 = vld [vmem:[%s12344_s2 + $0x14d0] sm:$0xff]  ;;  %v683_v6 = vld [vmem:[%s12344_s2 + $0x14d8] sm:$0xff]  ;;  %v684_v7 = vld [vmem:[%s12344_s2 + $0x14e0] sm:$0xff] }
 0x185   :  { %3731 = vst [vmem:[%s12345_s3 + $0x13f8] sm:$0xff] %v2707_v9  ;;  %v2710_v22 = vadd.f32 %v4151_v2, %v1684_v10  ;;  %v2711_v23 = vadd.f32 %v4151_v2, %v1685_v11  ;;  %v2712_v24 = vadd.f32 %v4151_v2, %v1686_v12  ;;  %v1689_v25 = vmul.f32 %v4146_v1, %v663_v8  ;;  %v685_v12 = vld [vmem:[%s12344_s2 + $0x14e8] sm:$0xff] }
 0x186   :  { %3732 = vst [vmem:[%s12345_s3 + $0x1400] sm:$0xff] %v2708_v15  ;;  %3733 = vst [vmem:[%s12345_s3 + $0x1408] sm:$0xff] %v2709_v16  ;;  %v2713_v28 = vadd.f32 %v4151_v2, %v1687_v17  ;;  %v2714_v29 = vadd.f32 %v4151_v2, %v1688_v18  ;;  %v1690_v30 = vmul.f32 %v4146_v1, %v664_v13  ;;  %v686_v13 = vld [vmem:[%s12344_s2 + $0x14f0] sm:$0xff]  ;;  %v687_v18 = vld [vmem:[%s12344_s2 + $0x14f8] sm:$0xff] }
 0x187   :  { %v1691_v31 = vmul.f32 %v4146_v1, %v665_v14  ;;  %3734 = vst [vmem:[%s12345_s3 + $0x1410] sm:$0xff] %v2710_v22  ;;  %3735 = vst [vmem:[%s12345_s3 + $0x1418] sm:$0xff] %v2711_v23  ;;  %v2715_v33 = vadd.f32 %v4151_v2, %v1689_v25  ;;  %v1692_v34 = vmul.f32 %v4146_v1, %v666_v19  ;;  %v688_v23 = vld [vmem:[%s12344_s2 + $0x1500] sm:$0xff] }
 0x188   :  { %3736 = vst [vmem:[%s12345_s3 + $0x1420] sm:$0xff] %v2712_v24  ;;  %v1693_v35 = vmul.f32 %v4146_v1, %v667_v20  ;;  %v1694_v36 = vmul.f32 %v4146_v1, %v668_v21  ;;  %3737 = vst [vmem:[%s12345_s3 + $0x1428] sm:$0xff] %v2713_v28  ;;  %v2716_v39 = vadd.f32 %v4151_v2, %v1690_v30  ;;  %v689_v24 = vld [vmem:[%s12344_s2 + $0x1508] sm:$0xff]  ;;  %v691_v30 = vld [vmem:[%s12344_s2 + $0x1518] sm:$0xff] }
 0x189   :  { %3738 = vst [vmem:[%s12345_s3 + $0x1430] sm:$0xff] %v2714_v29  ;;  %v2717_v40 = vadd.f32 %v4151_v2, %v1691_v31  ;;  %v1695_v41 = vmul.f32 %v4146_v1, %v669_v26  ;;  %v1696_v42 = vmul.f32 %v4146_v1, %v670_v27  ;;  %3739 = vst [vmem:[%s12345_s3 + $0x1438] sm:$0xff] %v2715_v33  ;;  %v690_v29 = vld [vmem:[%s12344_s2 + $0x1510] sm:$0xff]  ;;  %v692_v31 = vld [vmem:[%s12344_s2 + $0x1520] sm:$0xff] }
 0x18a   :  { %v2718_v46 = vadd.f32 %v4151_v2, %v1692_v34  ;;  %v2719_v47 = vadd.f32 %v4151_v2, %v1693_v35  ;;  %v2720_v48 = vadd.f32 %v4151_v2, %v1694_v36  ;;  %v1697_v49 = vmul.f32 %v4146_v1, %v671_v32  ;;  %3740 = vst [vmem:[%s12345_s3 + $0x1440] sm:$0xff] %v2716_v39  ;;  %v693_v36 = vld [vmem:[%s12344_s2 + $0x1528] sm:$0xff] }
 0x18b   :  { %3741 = vst [vmem:[%s12345_s3 + $0x1448] sm:$0xff] %v2717_v40  ;;  %v2721_v52 = vadd.f32 %v4151_v2, %v1695_v41  ;;  %v2722_v53 = vadd.f32 %v4151_v2, %v1696_v42  ;;  %v1698_v54 = vmul.f32 %v4146_v1, %v672_v37  ;;  %v1699_v55 = vmul.f32 %v4146_v1, %v673_v38  ;;  %v694_v37 = vld [vmem:[%s12344_s2 + $0x1530] sm:$0xff]  ;;  %v695_v42 = vld [vmem:[%s12344_s2 + $0x1538] sm:$0xff] }
 0x18c   :  { %3742 = vst [vmem:[%s12345_s3 + $0x1450] sm:$0xff] %v2718_v46  ;;  %3743 = vst [vmem:[%s12345_s3 + $0x1458] sm:$0xff] %v2719_v47  ;;  %v2723_v57 = vadd.f32 %v4151_v2, %v1697_v49  ;;  %v1700_v58 = vmul.f32 %v4146_v1, %v674_v43  ;;  %v1701_v59 = vmul.f32 %v4146_v1, %v675_v44  ;;  %v696_v47 = vld [vmem:[%s12344_s2 + $0x1540] sm:$0xff] }
 0x18d   :  { %3744 = vst [vmem:[%s12345_s3 + $0x1460] sm:$0xff] %v2720_v48  ;;  %v1702_v60 = vmul.f32 %v4146_v1, %v676_v45  ;;  %3745 = vst [vmem:[%s12345_s3 + $0x1468] sm:$0xff] %v2721_v52  ;;  %v2724_v63 = vadd.f32 %v4151_v2, %v1698_v54  ;;  %v2725_v0 = vadd.f32 %v4151_v2, %v1699_v55  ;;  %v697_v48 = vld [vmem:[%s12344_s2 + $0x1548] sm:$0xff]  ;;  %v699_v54 = vld [vmem:[%s12344_s2 + $0x1558] sm:$0xff] }
 0x18e   :  { %3746 = vst [vmem:[%s12345_s3 + $0x1470] sm:$0xff] %v2722_v53  ;;  %v1703_v3 = vmul.f32 %v4146_v1, %v677_v50  ;;  %v1704_v4 = vmul.f32 %v4146_v1, %v678_v51  ;;  %3747 = vst [vmem:[%s12345_s3 + $0x1478] sm:$0xff] %v2723_v57  ;;  %v2726_v8 = vadd.f32 %v4151_v2, %v1700_v58  ;;  %v698_v53 = vld [vmem:[%s12344_s2 + $0x1550] sm:$0xff]  ;;  %v700_v55 = vld [vmem:[%s12344_s2 + $0x1560] sm:$0xff] }
 0x18f   :  { %v2727_v9 = vadd.f32 %v4151_v2, %v1701_v59  ;;  %v2728_v10 = vadd.f32 %v4151_v2, %v1702_v60  ;;  %v1705_v11 = vmul.f32 %v4146_v1, %v679_v56  ;;  %3748 = vst [vmem:[%s12345_s3 + $0x1480] sm:$0xff] %v2724_v63  ;;  %3749 = vst [vmem:[%s12345_s3 + $0x1488] sm:$0xff] %v2725_v0  ;;  %v701_v60 = vld [vmem:[%s12344_s2 + $0x1568] sm:$0xff] }
 0x190   :  { %v2729_v14 = vadd.f32 %v4151_v2, %v1703_v3  ;;  %v2730_v15 = vadd.f32 %v4151_v2, %v1704_v4  ;;  %v1706_v16 = vmul.f32 %v4146_v1, %v680_v61  ;;  %v1707_v17 = vmul.f32 %v4146_v1, %v681_v62  ;;  %3750 = vst [vmem:[%s12345_s3 + $0x1490] sm:$0xff] %v2726_v8  ;;  %v702_v61 = vld [vmem:[%s12344_s2 + $0x1570] sm:$0xff]  ;;  %v703_v4 = vld [vmem:[%s12344_s2 + $0x1578] sm:$0xff] }
 0x191   :  { %3751 = vst [vmem:[%s12345_s3 + $0x1498] sm:$0xff] %v2727_v9  ;;  %3752 = vst [vmem:[%s12345_s3 + $0x14a0] sm:$0xff] %v2728_v10  ;;  %v2731_v19 = vadd.f32 %v4151_v2, %v1705_v11  ;;  %v1708_v20 = vmul.f32 %v4146_v1, %v682_v5  ;;  %v1709_v21 = vmul.f32 %v4146_v1, %v683_v6  ;;  %v704_v9 = vld [vmem:[%s12344_s2 + $0x1580] sm:$0xff]  ;;  %v705_v10 = vld [vmem:[%s12344_s2 + $0x1588] sm:$0xff] }
 0x192   :  { %v1710_v22 = vmul.f32 %v4146_v1, %v684_v7  ;;  %3753 = vst [vmem:[%s12345_s3 + $0x14a8] sm:$0xff] %v2729_v14  ;;  %3754 = vst [vmem:[%s12345_s3 + $0x14b0] sm:$0xff] %v2730_v15  ;;  %v2732_v25 = vadd.f32 %v4151_v2, %v1706_v16  ;;  %v2733_v26 = vadd.f32 %v4151_v2, %v1707_v17  ;;  %v706_v15 = vld [vmem:[%s12344_s2 + $0x1590] sm:$0xff]  ;;  %v707_v16 = vld [vmem:[%s12344_s2 + $0x1598] sm:$0xff] }
 0x193   :  { %v1711_v27 = vmul.f32 %v4146_v1, %v685_v12  ;;  %v1712_v28 = vmul.f32 %v4146_v1, %v686_v13  ;;  %3755 = vst [vmem:[%s12345_s3 + $0x14b8] sm:$0xff] %v2731_v19  ;;  %v2734_v32 = vadd.f32 %v4151_v2, %v1708_v20  ;;  %v2735_v33 = vadd.f32 %v4151_v2, %v1709_v21  ;;  %v708_v17 = vld [vmem:[%s12344_s2 + $0x15a0] sm:$0xff] }
 0x194   :  { %v2736_v34 = vadd.f32 %v4151_v2, %v1710_v22  ;;  %v1713_v35 = vmul.f32 %v4146_v1, %v687_v18  ;;  %3756 = vst [vmem:[%s12345_s3 + $0x14c0] sm:$0xff] %v2732_v25  ;;  %3757 = vst [vmem:[%s12345_s3 + $0x14c8] sm:$0xff] %v2733_v26  ;;  %v1714_v40 = vmul.f32 %v4146_v1, %v688_v23  ;;  %v709_v22 = vld [vmem:[%s12344_s2 + $0x15a8] sm:$0xff]  ;;  %v710_v23 = vld [vmem:[%s12344_s2 + $0x15b0] sm:$0xff] }
 0x195   :  { %v2737_v38 = vadd.f32 %v4151_v2, %v1711_v27  ;;  %v2738_v39 = vadd.f32 %v4151_v2, %v1712_v28  ;;  %v1715_v41 = vmul.f32 %v4146_v1, %v689_v24  ;;  %3758 = vst [vmem:[%s12345_s3 + $0x14d0] sm:$0xff] %v2734_v32  ;;  %3759 = vst [vmem:[%s12345_s3 + $0x14d8] sm:$0xff] %v2735_v33  ;;  %v711_v28 = vld [vmem:[%s12344_s2 + $0x15b8] sm:$0xff]  ;;  %v712_v33 = vld [vmem:[%s12344_s2 + $0x15c0] sm:$0xff] }
 0x196   :  { %3760 = vst [vmem:[%s12345_s3 + $0x14e0] sm:$0xff] %v2736_v34  ;;  %v2739_v43 = vadd.f32 %v4151_v2, %v1713_v35  ;;  %v1716_v44 = vmul.f32 %v4146_v1, %v690_v29  ;;  %v1717_v45 = vmul.f32 %v4146_v1, %v691_v30  ;;  %v1718_v46 = vmul.f32 %v4146_v1, %v692_v31  ;;  %v713_v34 = vld [vmem:[%s12344_s2 + $0x15c8] sm:$0xff] }
 0x197   :  { %3761 = vst [vmem:[%s12345_s3 + $0x14e8] sm:$0xff] %v2737_v38  ;;  %3762 = vst [vmem:[%s12345_s3 + $0x14f0] sm:$0xff] %v2738_v39  ;;  %v2740_v49 = vadd.f32 %v4151_v2, %v1714_v40  ;;  %v2741_v50 = vadd.f32 %v4151_v2, %v1715_v41  ;;  %v1719_v51 = vmul.f32 %v4146_v1, %v693_v36  ;;  %v714_v39 = vld [vmem:[%s12344_s2 + $0x15d0] sm:$0xff]  ;;  %v715_v40 = vld [vmem:[%s12344_s2 + $0x15d8] sm:$0xff] }
 0x198   :  { %v1720_v52 = vmul.f32 %v4146_v1, %v694_v37  ;;  %3763 = vst [vmem:[%s12345_s3 + $0x14f8] sm:$0xff] %v2739_v43  ;;  %v2742_v56 = vadd.f32 %v4151_v2, %v1716_v44  ;;  %v2743_v57 = vadd.f32 %v4151_v2, %v1717_v45  ;;  %v2744_v58 = vadd.f32 %v4151_v2, %v1718_v46  ;;  %v716_v41 = vld [vmem:[%s12344_s2 + $0x15e0] sm:$0xff]  ;;  %v717_v46 = vld [vmem:[%s12344_s2 + $0x15e8] sm:$0xff] }
 0x199   :  { %v1721_v59 = vmul.f32 %v4146_v1, %v695_v42  ;;  %3764 = vst [vmem:[%s12345_s3 + $0x1500] sm:$0xff] %v2740_v49  ;;  %3765 = vst [vmem:[%s12345_s3 + $0x1508] sm:$0xff] %v2741_v50  ;;  %v2745_v62 = vadd.f32 %v4151_v2, %v1719_v51  ;;  %v1722_v0 = vmul.f32 %v4146_v1, %v696_v47  ;;  %v718_v47 = vld [vmem:[%s12344_s2 + $0x15f0] sm:$0xff] }
 0x19a   :  { %v2746_v63 = vadd.f32 %v4151_v2, %v1720_v52  ;;  %v1723_v3 = vmul.f32 %v4146_v1, %v697_v48  ;;  %3766 = vst [vmem:[%s12345_s3 + $0x1510] sm:$0xff] %v2742_v56  ;;  %3767 = vst [vmem:[%s12345_s3 + $0x1518] sm:$0xff] %v2743_v57  ;;  %v1724_v6 = vmul.f32 %v4146_v1, %v698_v53  ;;  %v719_v52 = vld [vmem:[%s12344_s2 + $0x15f8] sm:$0xff]  ;;  %v720_v57 = vld [vmem:[%s12344_s2 + $0x1600] sm:$0xff] }
 0x19b   :  { %3768 = vst [vmem:[%s12345_s3 + $0x1520] sm:$0xff] %v2744_v58  ;;  %v2747_v5 = vadd.f32 %v4151_v2, %v1721_v59  ;;  %v1725_v7 = vmul.f32 %v4146_v1, %v699_v54  ;;  %v1726_v8 = vmul.f32 %v4146_v1, %v700_v55  ;;  %3769 = vst [vmem:[%s12345_s3 + $0x1528] sm:$0xff] %v2745_v62  ;;  %v721_v58 = vld [vmem:[%s12344_s2 + $0x1608] sm:$0xff] }
 0x19c   :  { %3770 = vst [vmem:[%s12345_s3 + $0x1530] sm:$0xff] %v2746_v63  ;;  %v2748_v11 = vadd.f32 %v4151_v2, %v1722_v0  ;;  %v2749_v12 = vadd.f32 %v4151_v2, %v1723_v3  ;;  %v1727_v13 = vmul.f32 %v4146_v1, %v701_v60  ;;  %v1728_v14 = vmul.f32 %v4146_v1, %v702_v61  ;;  %v722_v63 = vld [vmem:[%s12344_s2 + $0x1610] sm:$0xff]  ;;  %v723_v0 = vld [vmem:[%s12344_s2 + $0x1618] sm:$0xff]  ;;  %v724_v3 = vld [vmem:[%s12344_s2 + $0x1620] sm:$0xff] }
 0x19d   :  { %3771 = vst [vmem:[%s12345_s3 + $0x1538] sm:$0xff] %v2747_v5  ;;  %v2750_v18 = vadd.f32 %v4151_v2, %v1724_v6  ;;  %v2751_v19 = vadd.f32 %v4151_v2, %v1725_v7  ;;  %v2752_v20 = vadd.f32 %v4151_v2, %v1726_v8  ;;  %v1729_v21 = vmul.f32 %v4146_v1, %v703_v4  ;;  %v725_v8 = vld [vmem:[%s12344_s2 + $0x1628] sm:$0xff] }
 0x19e   :  { %3772 = vst [vmem:[%s12345_s3 + $0x1540] sm:$0xff] %v2748_v11  ;;  %3773 = vst [vmem:[%s12345_s3 + $0x1548] sm:$0xff] %v2749_v12  ;;  %v2753_v24 = vadd.f32 %v4151_v2, %v1727_v13  ;;  %v2754_v25 = vadd.f32 %v4151_v2, %v1728_v14  ;;  %v1730_v26 = vmul.f32 %v4146_v1, %v704_v9  ;;  %v726_v9 = vld [vmem:[%s12344_s2 + $0x1630] sm:$0xff]  ;;  %v727_v14 = vld [vmem:[%s12344_s2 + $0x1638] sm:$0xff] }
 0x19f   :  { %v1731_v27 = vmul.f32 %v4146_v1, %v705_v10  ;;  %3774 = vst [vmem:[%s12345_s3 + $0x1550] sm:$0xff] %v2750_v18  ;;  %3775 = vst [vmem:[%s12345_s3 + $0x1558] sm:$0xff] %v2751_v19  ;;  %v2755_v29 = vadd.f32 %v4151_v2, %v1729_v21  ;;  %v1732_v30 = vmul.f32 %v4146_v1, %v706_v15  ;;  %v728_v19 = vld [vmem:[%s12344_s2 + $0x1640] sm:$0xff] }
 0x1a0   :  { %3776 = vst [vmem:[%s12345_s3 + $0x1560] sm:$0xff] %v2752_v20  ;;  %v1733_v31 = vmul.f32 %v4146_v1, %v707_v16  ;;  %v1734_v32 = vmul.f32 %v4146_v1, %v708_v17  ;;  %3777 = vst [vmem:[%s12345_s3 + $0x1568] sm:$0xff] %v2753_v24  ;;  %v2756_v35 = vadd.f32 %v4151_v2, %v1730_v26  ;;  %v729_v20 = vld [vmem:[%s12344_s2 + $0x1648] sm:$0xff]  ;;  %v731_v26 = vld [vmem:[%s12344_s2 + $0x1658] sm:$0xff] }
 0x1a1   :  { %3778 = vst [vmem:[%s12345_s3 + $0x1570] sm:$0xff] %v2754_v25  ;;  %v2757_v36 = vadd.f32 %v4151_v2, %v1731_v27  ;;  %v1735_v37 = vmul.f32 %v4146_v1, %v709_v22  ;;  %v1736_v38 = vmul.f32 %v4146_v1, %v710_v23  ;;  %3779 = vst [vmem:[%s12345_s3 + $0x1578] sm:$0xff] %v2755_v29  ;;  %v730_v25 = vld [vmem:[%s12344_s2 + $0x1650] sm:$0xff]  ;;  %v732_v27 = vld [vmem:[%s12344_s2 + $0x1660] sm:$0xff] }
 0x1a2   :  { %v2758_v42 = vadd.f32 %v4151_v2, %v1732_v30  ;;  %v2759_v43 = vadd.f32 %v4151_v2, %v1733_v31  ;;  %v2760_v44 = vadd.f32 %v4151_v2, %v1734_v32  ;;  %v1737_v45 = vmul.f32 %v4146_v1, %v711_v28  ;;  %3780 = vst [vmem:[%s12345_s3 + $0x1580] sm:$0xff] %v2756_v35  ;;  %v733_v32 = vld [vmem:[%s12344_s2 + $0x1668] sm:$0xff] }
 0x1a3   :  { %3781 = vst [vmem:[%s12345_s3 + $0x1588] sm:$0xff] %v2757_v36  ;;  %v2761_v48 = vadd.f32 %v4151_v2, %v1735_v37  ;;  %v2762_v49 = vadd.f32 %v4151_v2, %v1736_v38  ;;  %v1738_v50 = vmul.f32 %v4146_v1, %v712_v33  ;;  %v1739_v51 = vmul.f32 %v4146_v1, %v713_v34  ;;  %v734_v33 = vld [vmem:[%s12344_s2 + $0x1670] sm:$0xff]  ;;  %v735_v38 = vld [vmem:[%s12344_s2 + $0x1678] sm:$0xff] }
 0x1a4   :  { %3782 = vst [vmem:[%s12345_s3 + $0x1590] sm:$0xff] %v2758_v42  ;;  %3783 = vst [vmem:[%s12345_s3 + $0x1598] sm:$0xff] %v2759_v43  ;;  %v2763_v53 = vadd.f32 %v4151_v2, %v1737_v45  ;;  %v1740_v54 = vmul.f32 %v4146_v1, %v714_v39  ;;  %v1741_v55 = vmul.f32 %v4146_v1, %v715_v40  ;;  %v736_v43 = vld [vmem:[%s12344_s2 + $0x1680] sm:$0xff] }
 0x1a5   :  { %3784 = vst [vmem:[%s12345_s3 + $0x15a0] sm:$0xff] %v2760_v44  ;;  %v1742_v56 = vmul.f32 %v4146_v1, %v716_v41  ;;  %3785 = vst [vmem:[%s12345_s3 + $0x15a8] sm:$0xff] %v2761_v48  ;;  %v2764_v59 = vadd.f32 %v4151_v2, %v1738_v50  ;;  %v2765_v60 = vadd.f32 %v4151_v2, %v1739_v51  ;;  %v737_v44 = vld [vmem:[%s12344_s2 + $0x1688] sm:$0xff]  ;;  %v739_v50 = vld [vmem:[%s12344_s2 + $0x1698] sm:$0xff] }
 0x1a6   :  { %3786 = vst [vmem:[%s12345_s3 + $0x15b0] sm:$0xff] %v2762_v49  ;;  %v1743_v61 = vmul.f32 %v4146_v1, %v717_v46  ;;  %v1744_v62 = vmul.f32 %v4146_v1, %v718_v47  ;;  %3787 = vst [vmem:[%s12345_s3 + $0x15b8] sm:$0xff] %v2763_v53  ;;  %v2766_v4 = vadd.f32 %v4151_v2, %v1740_v54  ;;  %v738_v49 = vld [vmem:[%s12344_s2 + $0x1690] sm:$0xff]  ;;  %v740_v51 = vld [vmem:[%s12344_s2 + $0x16a0] sm:$0xff] }
 0x1a7   :  { %v2767_v5 = vadd.f32 %v4151_v2, %v1741_v55  ;;  %v2768_v6 = vadd.f32 %v4151_v2, %v1742_v56  ;;  %v1745_v7 = vmul.f32 %v4146_v1, %v719_v52  ;;  %3788 = vst [vmem:[%s12345_s3 + $0x15c0] sm:$0xff] %v2764_v59  ;;  %3789 = vst [vmem:[%s12345_s3 + $0x15c8] sm:$0xff] %v2765_v60  ;;  %v741_v56 = vld [vmem:[%s12344_s2 + $0x16a8] sm:$0xff] }
 0x1a8   :  { %v2769_v10 = vadd.f32 %v4151_v2, %v1743_v61  ;;  %v2770_v11 = vadd.f32 %v4151_v2, %v1744_v62  ;;  %v1746_v12 = vmul.f32 %v4146_v1, %v720_v57  ;;  %v1747_v13 = vmul.f32 %v4146_v1, %v721_v58  ;;  %3790 = vst [vmem:[%s12345_s3 + $0x15d0] sm:$0xff] %v2766_v4  ;;  %v742_v57 = vld [vmem:[%s12344_s2 + $0x16b0] sm:$0xff]  ;;  %v743_v62 = vld [vmem:[%s12344_s2 + $0x16b8] sm:$0xff] }
 0x1a9   :  { %3791 = vst [vmem:[%s12345_s3 + $0x15d8] sm:$0xff] %v2767_v5  ;;  %3792 = vst [vmem:[%s12345_s3 + $0x15e0] sm:$0xff] %v2768_v6  ;;  %v2771_v15 = vadd.f32 %v4151_v2, %v1745_v7  ;;  %v1748_v16 = vmul.f32 %v4146_v1, %v722_v63  ;;  %v1749_v17 = vmul.f32 %v4146_v1, %v723_v0  ;;  %v744_v5 = vld [vmem:[%s12344_s2 + $0x16c0] sm:$0xff]  ;;  %v745_v6 = vld [vmem:[%s12344_s2 + $0x16c8] sm:$0xff] }
 0x1aa   :  { %v1750_v18 = vmul.f32 %v4146_v1, %v724_v3  ;;  %3793 = vst [vmem:[%s12345_s3 + $0x15e8] sm:$0xff] %v2769_v10  ;;  %3794 = vst [vmem:[%s12345_s3 + $0x15f0] sm:$0xff] %v2770_v11  ;;  %v2772_v21 = vadd.f32 %v4151_v2, %v1746_v12  ;;  %v2773_v22 = vadd.f32 %v4151_v2, %v1747_v13  ;;  %v746_v11 = vld [vmem:[%s12344_s2 + $0x16d0] sm:$0xff]  ;;  %v747_v12 = vld [vmem:[%s12344_s2 + $0x16d8] sm:$0xff] }
 0x1ab   :  { %v1751_v23 = vmul.f32 %v4146_v1, %v725_v8  ;;  %v1752_v24 = vmul.f32 %v4146_v1, %v726_v9  ;;  %3795 = vst [vmem:[%s12345_s3 + $0x15f8] sm:$0xff] %v2771_v15  ;;  %v2774_v28 = vadd.f32 %v4151_v2, %v1748_v16  ;;  %v2775_v29 = vadd.f32 %v4151_v2, %v1749_v17  ;;  %v748_v13 = vld [vmem:[%s12344_s2 + $0x16e0] sm:$0xff] }
 0x1ac   :  { %v2776_v30 = vadd.f32 %v4151_v2, %v1750_v18  ;;  %v1753_v31 = vmul.f32 %v4146_v1, %v727_v14  ;;  %3796 = vst [vmem:[%s12345_s3 + $0x1600] sm:$0xff] %v2772_v21  ;;  %3797 = vst [vmem:[%s12345_s3 + $0x1608] sm:$0xff] %v2773_v22  ;;  %v1754_v36 = vmul.f32 %v4146_v1, %v728_v19  ;;  %v749_v18 = vld [vmem:[%s12344_s2 + $0x16e8] sm:$0xff]  ;;  %v750_v19 = vld [vmem:[%s12344_s2 + $0x16f0] sm:$0xff] }
 0x1ad   :  { %v2777_v34 = vadd.f32 %v4151_v2, %v1751_v23  ;;  %v2778_v35 = vadd.f32 %v4151_v2, %v1752_v24  ;;  %v1755_v37 = vmul.f32 %v4146_v1, %v729_v20  ;;  %3798 = vst [vmem:[%s12345_s3 + $0x1610] sm:$0xff] %v2774_v28  ;;  %3799 = vst [vmem:[%s12345_s3 + $0x1618] sm:$0xff] %v2775_v29  ;;  %v751_v24 = vld [vmem:[%s12344_s2 + $0x16f8] sm:$0xff]  ;;  %v752_v29 = vld [vmem:[%s12344_s2 + $0x1700] sm:$0xff] }
 0x1ae   :  { %3800 = vst [vmem:[%s12345_s3 + $0x1620] sm:$0xff] %v2776_v30  ;;  %v2779_v39 = vadd.f32 %v4151_v2, %v1753_v31  ;;  %v1756_v40 = vmul.f32 %v4146_v1, %v730_v25  ;;  %v1757_v41 = vmul.f32 %v4146_v1, %v731_v26  ;;  %v1758_v42 = vmul.f32 %v4146_v1, %v732_v27  ;;  %v753_v30 = vld [vmem:[%s12344_s2 + $0x1708] sm:$0xff] }
 0x1af   :  { %3801 = vst [vmem:[%s12345_s3 + $0x1628] sm:$0xff] %v2777_v34  ;;  %3802 = vst [vmem:[%s12345_s3 + $0x1630] sm:$0xff] %v2778_v35  ;;  %v2780_v45 = vadd.f32 %v4151_v2, %v1754_v36  ;;  %v2781_v46 = vadd.f32 %v4151_v2, %v1755_v37  ;;  %v1759_v47 = vmul.f32 %v4146_v1, %v733_v32  ;;  %v754_v35 = vld [vmem:[%s12344_s2 + $0x1710] sm:$0xff]  ;;  %v755_v36 = vld [vmem:[%s12344_s2 + $0x1718] sm:$0xff] }
 0x1b0   :  { %v1760_v48 = vmul.f32 %v4146_v1, %v734_v33  ;;  %3803 = vst [vmem:[%s12345_s3 + $0x1638] sm:$0xff] %v2779_v39  ;;  %v2782_v52 = vadd.f32 %v4151_v2, %v1756_v40  ;;  %v2783_v53 = vadd.f32 %v4151_v2, %v1757_v41  ;;  %v2784_v54 = vadd.f32 %v4151_v2, %v1758_v42  ;;  %v756_v37 = vld [vmem:[%s12344_s2 + $0x1720] sm:$0xff]  ;;  %v757_v42 = vld [vmem:[%s12344_s2 + $0x1728] sm:$0xff] }
 0x1b1   :  { %v1761_v55 = vmul.f32 %v4146_v1, %v735_v38  ;;  %3804 = vst [vmem:[%s12345_s3 + $0x1640] sm:$0xff] %v2780_v45  ;;  %3805 = vst [vmem:[%s12345_s3 + $0x1648] sm:$0xff] %v2781_v46  ;;  %v2785_v58 = vadd.f32 %v4151_v2, %v1759_v47  ;;  %v1762_v60 = vmul.f32 %v4146_v1, %v736_v43  ;;  %v758_v43 = vld [vmem:[%s12344_s2 + $0x1730] sm:$0xff] }
 0x1b2   :  { %v2786_v59 = vadd.f32 %v4151_v2, %v1760_v48  ;;  %v1763_v61 = vmul.f32 %v4146_v1, %v737_v44  ;;  %3806 = vst [vmem:[%s12345_s3 + $0x1650] sm:$0xff] %v2782_v52  ;;  %3807 = vst [vmem:[%s12345_s3 + $0x1658] sm:$0xff] %v2783_v53  ;;  %v1764_v0 = vmul.f32 %v4146_v1, %v738_v49  ;;  %v759_v48 = vld [vmem:[%s12344_s2 + $0x1738] sm:$0xff]  ;;  %v760_v53 = vld [vmem:[%s12344_s2 + $0x1740] sm:$0xff] }
 0x1b3   :  { %3808 = vst [vmem:[%s12345_s3 + $0x1660] sm:$0xff] %v2784_v54  ;;  %v2787_v63 = vadd.f32 %v4151_v2, %v1761_v55  ;;  %v1765_v3 = vmul.f32 %v4146_v1, %v739_v50  ;;  %v1766_v4 = vmul.f32 %v4146_v1, %v740_v51  ;;  %3809 = vst [vmem:[%s12345_s3 + $0x1668] sm:$0xff] %v2785_v58  ;;  %v761_v54 = vld [vmem:[%s12344_s2 + $0x1748] sm:$0xff] }
 0x1b4   :  { %3810 = vst [vmem:[%s12345_s3 + $0x1670] sm:$0xff] %v2786_v59  ;;  %v2788_v7 = vadd.f32 %v4151_v2, %v1762_v60  ;;  %v2789_v8 = vadd.f32 %v4151_v2, %v1763_v61  ;;  %v1767_v9 = vmul.f32 %v4146_v1, %v741_v56  ;;  %v1768_v10 = vmul.f32 %v4146_v1, %v742_v57  ;;  %v762_v59 = vld [vmem:[%s12344_s2 + $0x1750] sm:$0xff]  ;;  %v763_v60 = vld [vmem:[%s12344_s2 + $0x1758] sm:$0xff]  ;;  %v764_v61 = vld [vmem:[%s12344_s2 + $0x1760] sm:$0xff] }
 0x1b5   :  { %3811 = vst [vmem:[%s12345_s3 + $0x1678] sm:$0xff] %v2787_v63  ;;  %v2790_v14 = vadd.f32 %v4151_v2, %v1764_v0  ;;  %v2791_v15 = vadd.f32 %v4151_v2, %v1765_v3  ;;  %v2792_v16 = vadd.f32 %v4151_v2, %v1766_v4  ;;  %v1769_v17 = vmul.f32 %v4146_v1, %v743_v62  ;;  %v765_v4 = vld [vmem:[%s12344_s2 + $0x1768] sm:$0xff] }
 0x1b6   :  { %3812 = vst [vmem:[%s12345_s3 + $0x1680] sm:$0xff] %v2788_v7  ;;  %3813 = vst [vmem:[%s12345_s3 + $0x1688] sm:$0xff] %v2789_v8  ;;  %v2793_v20 = vadd.f32 %v4151_v2, %v1767_v9  ;;  %v2794_v21 = vadd.f32 %v4151_v2, %v1768_v10  ;;  %v1770_v22 = vmul.f32 %v4146_v1, %v744_v5  ;;  %v766_v5 = vld [vmem:[%s12344_s2 + $0x1770] sm:$0xff]  ;;  %v767_v10 = vld [vmem:[%s12344_s2 + $0x1778] sm:$0xff] }
 0x1b7   :  { %v1771_v23 = vmul.f32 %v4146_v1, %v745_v6  ;;  %3814 = vst [vmem:[%s12345_s3 + $0x1690] sm:$0xff] %v2790_v14  ;;  %3815 = vst [vmem:[%s12345_s3 + $0x1698] sm:$0xff] %v2791_v15  ;;  %v2795_v25 = vadd.f32 %v4151_v2, %v1769_v17  ;;  %v1772_v26 = vmul.f32 %v4146_v1, %v746_v11  ;;  %v768_v15 = vld [vmem:[%s12344_s2 + $0x1780] sm:$0xff] }
 0x1b8   :  { %3816 = vst [vmem:[%s12345_s3 + $0x16a0] sm:$0xff] %v2792_v16  ;;  %v1773_v27 = vmul.f32 %v4146_v1, %v747_v12  ;;  %v1774_v28 = vmul.f32 %v4146_v1, %v748_v13  ;;  %3817 = vst [vmem:[%s12345_s3 + $0x16a8] sm:$0xff] %v2793_v20  ;;  %v2796_v31 = vadd.f32 %v4151_v2, %v1770_v22  ;;  %v769_v16 = vld [vmem:[%s12344_s2 + $0x1788] sm:$0xff]  ;;  %v771_v22 = vld [vmem:[%s12344_s2 + $0x1798] sm:$0xff] }
 0x1b9   :  { %3818 = vst [vmem:[%s12345_s3 + $0x16b0] sm:$0xff] %v2794_v21  ;;  %v2797_v32 = vadd.f32 %v4151_v2, %v1771_v23  ;;  %v1775_v33 = vmul.f32 %v4146_v1, %v749_v18  ;;  %v1776_v34 = vmul.f32 %v4146_v1, %v750_v19  ;;  %3819 = vst [vmem:[%s12345_s3 + $0x16b8] sm:$0xff] %v2795_v25  ;;  %v770_v21 = vld [vmem:[%s12344_s2 + $0x1790] sm:$0xff]  ;;  %v772_v23 = vld [vmem:[%s12344_s2 + $0x17a0] sm:$0xff] }
 0x1ba   :  { %v2798_v38 = vadd.f32 %v4151_v2, %v1772_v26  ;;  %v2799_v39 = vadd.f32 %v4151_v2, %v1773_v27  ;;  %v2800_v40 = vadd.f32 %v4151_v2, %v1774_v28  ;;  %v1777_v41 = vmul.f32 %v4146_v1, %v751_v24  ;;  %3820 = vst [vmem:[%s12345_s3 + $0x16c0] sm:$0xff] %v2796_v31  ;;  %v773_v28 = vld [vmem:[%s12344_s2 + $0x17a8] sm:$0xff] }
 0x1bb   :  { %3821 = vst [vmem:[%s12345_s3 + $0x16c8] sm:$0xff] %v2797_v32  ;;  %v2801_v44 = vadd.f32 %v4151_v2, %v1775_v33  ;;  %v2802_v45 = vadd.f32 %v4151_v2, %v1776_v34  ;;  %v1778_v46 = vmul.f32 %v4146_v1, %v752_v29  ;;  %v1779_v47 = vmul.f32 %v4146_v1, %v753_v30  ;;  %v774_v29 = vld [vmem:[%s12344_s2 + $0x17b0] sm:$0xff]  ;;  %v775_v34 = vld [vmem:[%s12344_s2 + $0x17b8] sm:$0xff] }
 0x1bc   :  { %3822 = vst [vmem:[%s12345_s3 + $0x16d0] sm:$0xff] %v2798_v38  ;;  %3823 = vst [vmem:[%s12345_s3 + $0x16d8] sm:$0xff] %v2799_v39  ;;  %v2803_v49 = vadd.f32 %v4151_v2, %v1777_v41  ;;  %v1780_v50 = vmul.f32 %v4146_v1, %v754_v35  ;;  %v1781_v51 = vmul.f32 %v4146_v1, %v755_v36  ;;  %v776_v39 = vld [vmem:[%s12344_s2 + $0x17c0] sm:$0xff] }
 0x1bd   :  { %3824 = vst [vmem:[%s12345_s3 + $0x16e0] sm:$0xff] %v2800_v40  ;;  %v1782_v52 = vmul.f32 %v4146_v1, %v756_v37  ;;  %3825 = vst [vmem:[%s12345_s3 + $0x16e8] sm:$0xff] %v2801_v44  ;;  %v2804_v55 = vadd.f32 %v4151_v2, %v1778_v46  ;;  %v2805_v56 = vadd.f32 %v4151_v2, %v1779_v47  ;;  %v777_v40 = vld [vmem:[%s12344_s2 + $0x17c8] sm:$0xff]  ;;  %v779_v46 = vld [vmem:[%s12344_s2 + $0x17d8] sm:$0xff] }
 0x1be   :  { %3826 = vst [vmem:[%s12345_s3 + $0x16f0] sm:$0xff] %v2802_v45  ;;  %v1783_v57 = vmul.f32 %v4146_v1, %v757_v42  ;;  %v1784_v58 = vmul.f32 %v4146_v1, %v758_v43  ;;  %3827 = vst [vmem:[%s12345_s3 + $0x16f8] sm:$0xff] %v2803_v49  ;;  %v2806_v62 = vadd.f32 %v4151_v2, %v1780_v50  ;;  %v778_v45 = vld [vmem:[%s12344_s2 + $0x17d0] sm:$0xff]  ;;  %v780_v47 = vld [vmem:[%s12344_s2 + $0x17e0] sm:$0xff] }
 0x1bf   :  { %v2807_v63 = vadd.f32 %v4151_v2, %v1781_v51  ;;  %v2808_v0 = vadd.f32 %v4151_v2, %v1782_v52  ;;  %v1785_v3 = vmul.f32 %v4146_v1, %v759_v48  ;;  %3828 = vst [vmem:[%s12345_s3 + $0x1700] sm:$0xff] %v2804_v55  ;;  %3829 = vst [vmem:[%s12345_s3 + $0x1708] sm:$0xff] %v2805_v56  ;;  %v781_v52 = vld [vmem:[%s12344_s2 + $0x17e8] sm:$0xff] }
 0x1c0   :  { %v2809_v6 = vadd.f32 %v4151_v2, %v1783_v57  ;;  %v2810_v7 = vadd.f32 %v4151_v2, %v1784_v58  ;;  %v1786_v8 = vmul.f32 %v4146_v1, %v760_v53  ;;  %v1787_v9 = vmul.f32 %v4146_v1, %v761_v54  ;;  %3830 = vst [vmem:[%s12345_s3 + $0x1710] sm:$0xff] %v2806_v62  ;;  %v782_v53 = vld [vmem:[%s12344_s2 + $0x17f0] sm:$0xff]  ;;  %v783_v58 = vld [vmem:[%s12344_s2 + $0x17f8] sm:$0xff] }
 0x1c1   :  { %3831 = vst [vmem:[%s12345_s3 + $0x1718] sm:$0xff] %v2807_v63  ;;  %3832 = vst [vmem:[%s12345_s3 + $0x1720] sm:$0xff] %v2808_v0  ;;  %v2811_v11 = vadd.f32 %v4151_v2, %v1785_v3  ;;  %v1788_v12 = vmul.f32 %v4146_v1, %v762_v59  ;;  %v1789_v13 = vmul.f32 %v4146_v1, %v763_v60  ;;  %v784_v63 = vld [vmem:[%s12344_s2 + $0x1800] sm:$0xff]  ;;  %v785_v0 = vld [vmem:[%s12344_s2 + $0x1808] sm:$0xff] }
 0x1c2   :  { %v1790_v14 = vmul.f32 %v4146_v1, %v764_v61  ;;  %3833 = vst [vmem:[%s12345_s3 + $0x1728] sm:$0xff] %v2809_v6  ;;  %3834 = vst [vmem:[%s12345_s3 + $0x1730] sm:$0xff] %v2810_v7  ;;  %v2812_v17 = vadd.f32 %v4151_v2, %v1786_v8  ;;  %v2813_v18 = vadd.f32 %v4151_v2, %v1787_v9  ;;  %v786_v7 = vld [vmem:[%s12344_s2 + $0x1810] sm:$0xff]  ;;  %v787_v8 = vld [vmem:[%s12344_s2 + $0x1818] sm:$0xff] }
 0x1c3   :  { %v1791_v19 = vmul.f32 %v4146_v1, %v765_v4  ;;  %v1792_v20 = vmul.f32 %v4146_v1, %v766_v5  ;;  %3835 = vst [vmem:[%s12345_s3 + $0x1738] sm:$0xff] %v2811_v11  ;;  %v2814_v24 = vadd.f32 %v4151_v2, %v1788_v12  ;;  %v2815_v25 = vadd.f32 %v4151_v2, %v1789_v13  ;;  %v788_v9 = vld [vmem:[%s12344_s2 + $0x1820] sm:$0xff] }
 0x1c4   :  { %v2816_v26 = vadd.f32 %v4151_v2, %v1790_v14  ;;  %v1793_v27 = vmul.f32 %v4146_v1, %v767_v10  ;;  %3836 = vst [vmem:[%s12345_s3 + $0x1740] sm:$0xff] %v2812_v17  ;;  %3837 = vst [vmem:[%s12345_s3 + $0x1748] sm:$0xff] %v2813_v18  ;;  %v1794_v32 = vmul.f32 %v4146_v1, %v768_v15  ;;  %v789_v14 = vld [vmem:[%s12344_s2 + $0x1828] sm:$0xff]  ;;  %v790_v15 = vld [vmem:[%s12344_s2 + $0x1830] sm:$0xff] }
 0x1c5   :  { %v2817_v30 = vadd.f32 %v4151_v2, %v1791_v19  ;;  %v2818_v31 = vadd.f32 %v4151_v2, %v1792_v20  ;;  %v1795_v33 = vmul.f32 %v4146_v1, %v769_v16  ;;  %3838 = vst [vmem:[%s12345_s3 + $0x1750] sm:$0xff] %v2814_v24  ;;  %3839 = vst [vmem:[%s12345_s3 + $0x1758] sm:$0xff] %v2815_v25  ;;  %v791_v20 = vld [vmem:[%s12344_s2 + $0x1838] sm:$0xff]  ;;  %v792_v25 = vld [vmem:[%s12344_s2 + $0x1840] sm:$0xff] }
 0x1c6   :  { %3840 = vst [vmem:[%s12345_s3 + $0x1760] sm:$0xff] %v2816_v26  ;;  %v2819_v35 = vadd.f32 %v4151_v2, %v1793_v27  ;;  %v1796_v36 = vmul.f32 %v4146_v1, %v770_v21  ;;  %v1797_v37 = vmul.f32 %v4146_v1, %v771_v22  ;;  %v1798_v38 = vmul.f32 %v4146_v1, %v772_v23  ;;  %v793_v26 = vld [vmem:[%s12344_s2 + $0x1848] sm:$0xff] }
 0x1c7   :  { %3841 = vst [vmem:[%s12345_s3 + $0x1768] sm:$0xff] %v2817_v30  ;;  %3842 = vst [vmem:[%s12345_s3 + $0x1770] sm:$0xff] %v2818_v31  ;;  %v2820_v41 = vadd.f32 %v4151_v2, %v1794_v32  ;;  %v2821_v42 = vadd.f32 %v4151_v2, %v1795_v33  ;;  %v1799_v43 = vmul.f32 %v4146_v1, %v773_v28  ;;  %v794_v31 = vld [vmem:[%s12344_s2 + $0x1850] sm:$0xff]  ;;  %v795_v32 = vld [vmem:[%s12344_s2 + $0x1858] sm:$0xff] }
 0x1c8   :  { %v1800_v44 = vmul.f32 %v4146_v1, %v774_v29  ;;  %3843 = vst [vmem:[%s12345_s3 + $0x1778] sm:$0xff] %v2819_v35  ;;  %v2822_v48 = vadd.f32 %v4151_v2, %v1796_v36  ;;  %v2823_v49 = vadd.f32 %v4151_v2, %v1797_v37  ;;  %v2824_v50 = vadd.f32 %v4151_v2, %v1798_v38  ;;  %v796_v33 = vld [vmem:[%s12344_s2 + $0x1860] sm:$0xff]  ;;  %v797_v38 = vld [vmem:[%s12344_s2 + $0x1868] sm:$0xff] }
 0x1c9   :  { %v1801_v51 = vmul.f32 %v4146_v1, %v775_v34  ;;  %3844 = vst [vmem:[%s12345_s3 + $0x1780] sm:$0xff] %v2820_v41  ;;  %3845 = vst [vmem:[%s12345_s3 + $0x1788] sm:$0xff] %v2821_v42  ;;  %v2825_v54 = vadd.f32 %v4151_v2, %v1799_v43  ;;  %v1802_v56 = vmul.f32 %v4146_v1, %v776_v39  ;;  %v798_v39 = vld [vmem:[%s12344_s2 + $0x1870] sm:$0xff] }
 0x1ca   :  { %v2826_v55 = vadd.f32 %v4151_v2, %v1800_v44  ;;  %v1803_v57 = vmul.f32 %v4146_v1, %v777_v40  ;;  %3846 = vst [vmem:[%s12345_s3 + $0x1790] sm:$0xff] %v2822_v48  ;;  %3847 = vst [vmem:[%s12345_s3 + $0x1798] sm:$0xff] %v2823_v49  ;;  %v1804_v60 = vmul.f32 %v4146_v1, %v778_v45  ;;  %v799_v44 = vld [vmem:[%s12344_s2 + $0x1878] sm:$0xff]  ;;  %v800_v49 = vld [vmem:[%s12344_s2 + $0x1880] sm:$0xff] }
 0x1cb   :  { %3848 = vst [vmem:[%s12345_s3 + $0x17a0] sm:$0xff] %v2824_v50  ;;  %v2827_v59 = vadd.f32 %v4151_v2, %v1801_v51  ;;  %v1805_v61 = vmul.f32 %v4146_v1, %v779_v46  ;;  %v1806_v62 = vmul.f32 %v4146_v1, %v780_v47  ;;  %3849 = vst [vmem:[%s12345_s3 + $0x17a8] sm:$0xff] %v2825_v54  ;;  %v801_v50 = vld [vmem:[%s12344_s2 + $0x1888] sm:$0xff] }
 0x1cc   :  { %3850 = vst [vmem:[%s12345_s3 + $0x17b0] sm:$0xff] %v2826_v55  ;;  %v2828_v3 = vadd.f32 %v4151_v2, %v1802_v56  ;;  %v2829_v4 = vadd.f32 %v4151_v2, %v1803_v57  ;;  %v1807_v5 = vmul.f32 %v4146_v1, %v781_v52  ;;  %v1808_v6 = vmul.f32 %v4146_v1, %v782_v53  ;;  %v802_v55 = vld [vmem:[%s12344_s2 + $0x1890] sm:$0xff]  ;;  %v803_v56 = vld [vmem:[%s12344_s2 + $0x1898] sm:$0xff]  ;;  %v804_v57 = vld [vmem:[%s12344_s2 + $0x18a0] sm:$0xff] }
 0x1cd   :  { %3851 = vst [vmem:[%s12345_s3 + $0x17b8] sm:$0xff] %v2827_v59  ;;  %v2830_v10 = vadd.f32 %v4151_v2, %v1804_v60  ;;  %v2831_v11 = vadd.f32 %v4151_v2, %v1805_v61  ;;  %v2832_v12 = vadd.f32 %v4151_v2, %v1806_v62  ;;  %v1809_v13 = vmul.f32 %v4146_v1, %v783_v58  ;;  %v805_v62 = vld [vmem:[%s12344_s2 + $0x18a8] sm:$0xff] }
 0x1ce   :  { %3852 = vst [vmem:[%s12345_s3 + $0x17c0] sm:$0xff] %v2828_v3  ;;  %3853 = vst [vmem:[%s12345_s3 + $0x17c8] sm:$0xff] %v2829_v4  ;;  %v2833_v16 = vadd.f32 %v4151_v2, %v1807_v5  ;;  %v2834_v17 = vadd.f32 %v4151_v2, %v1808_v6  ;;  %v1810_v18 = vmul.f32 %v4146_v1, %v784_v63  ;;  %v806_v63 = vld [vmem:[%s12344_s2 + $0x18b0] sm:$0xff]  ;;  %v807_v6 = vld [vmem:[%s12344_s2 + $0x18b8] sm:$0xff] }
 0x1cf   :  { %v1811_v19 = vmul.f32 %v4146_v1, %v785_v0  ;;  %3854 = vst [vmem:[%s12345_s3 + $0x17d0] sm:$0xff] %v2830_v10  ;;  %3855 = vst [vmem:[%s12345_s3 + $0x17d8] sm:$0xff] %v2831_v11  ;;  %v2835_v21 = vadd.f32 %v4151_v2, %v1809_v13  ;;  %v1812_v22 = vmul.f32 %v4146_v1, %v786_v7  ;;  %v808_v11 = vld [vmem:[%s12344_s2 + $0x18c0] sm:$0xff] }
 0x1d0   :  { %3856 = vst [vmem:[%s12345_s3 + $0x17e0] sm:$0xff] %v2832_v12  ;;  %v1813_v23 = vmul.f32 %v4146_v1, %v787_v8  ;;  %v1814_v24 = vmul.f32 %v4146_v1, %v788_v9  ;;  %3857 = vst [vmem:[%s12345_s3 + $0x17e8] sm:$0xff] %v2833_v16  ;;  %v2836_v27 = vadd.f32 %v4151_v2, %v1810_v18  ;;  %v809_v12 = vld [vmem:[%s12344_s2 + $0x18c8] sm:$0xff]  ;;  %v811_v18 = vld [vmem:[%s12344_s2 + $0x18d8] sm:$0xff] }
 0x1d1   :  { %3858 = vst [vmem:[%s12345_s3 + $0x17f0] sm:$0xff] %v2834_v17  ;;  %v2837_v28 = vadd.f32 %v4151_v2, %v1811_v19  ;;  %v1815_v29 = vmul.f32 %v4146_v1, %v789_v14  ;;  %v1816_v30 = vmul.f32 %v4146_v1, %v790_v15  ;;  %3859 = vst [vmem:[%s12345_s3 + $0x17f8] sm:$0xff] %v2835_v21  ;;  %v810_v17 = vld [vmem:[%s12344_s2 + $0x18d0] sm:$0xff]  ;;  %v812_v19 = vld [vmem:[%s12344_s2 + $0x18e0] sm:$0xff] }
 0x1d2   :  { %v2838_v34 = vadd.f32 %v4151_v2, %v1812_v22  ;;  %v2839_v35 = vadd.f32 %v4151_v2, %v1813_v23  ;;  %v2840_v36 = vadd.f32 %v4151_v2, %v1814_v24  ;;  %v1817_v37 = vmul.f32 %v4146_v1, %v791_v20  ;;  %3860 = vst [vmem:[%s12345_s3 + $0x1800] sm:$0xff] %v2836_v27  ;;  %v813_v24 = vld [vmem:[%s12344_s2 + $0x18e8] sm:$0xff] }
 0x1d3   :  { %3861 = vst [vmem:[%s12345_s3 + $0x1808] sm:$0xff] %v2837_v28  ;;  %v2841_v40 = vadd.f32 %v4151_v2, %v1815_v29  ;;  %v2842_v41 = vadd.f32 %v4151_v2, %v1816_v30  ;;  %v1818_v42 = vmul.f32 %v4146_v1, %v792_v25  ;;  %v1819_v43 = vmul.f32 %v4146_v1, %v793_v26  ;;  %v814_v25 = vld [vmem:[%s12344_s2 + $0x18f0] sm:$0xff]  ;;  %v815_v30 = vld [vmem:[%s12344_s2 + $0x18f8] sm:$0xff] }
 0x1d4   :  { %3862 = vst [vmem:[%s12345_s3 + $0x1810] sm:$0xff] %v2838_v34  ;;  %3863 = vst [vmem:[%s12345_s3 + $0x1818] sm:$0xff] %v2839_v35  ;;  %v2843_v45 = vadd.f32 %v4151_v2, %v1817_v37  ;;  %v1820_v46 = vmul.f32 %v4146_v1, %v794_v31  ;;  %v1821_v47 = vmul.f32 %v4146_v1, %v795_v32  ;;  %v816_v35 = vld [vmem:[%s12344_s2 + $0x1900] sm:$0xff] }
 0x1d5   :  { %3864 = vst [vmem:[%s12345_s3 + $0x1820] sm:$0xff] %v2840_v36  ;;  %v1822_v48 = vmul.f32 %v4146_v1, %v796_v33  ;;  %3865 = vst [vmem:[%s12345_s3 + $0x1828] sm:$0xff] %v2841_v40  ;;  %v2844_v51 = vadd.f32 %v4151_v2, %v1818_v42  ;;  %v2845_v52 = vadd.f32 %v4151_v2, %v1819_v43  ;;  %v817_v36 = vld [vmem:[%s12344_s2 + $0x1908] sm:$0xff]  ;;  %v819_v42 = vld [vmem:[%s12344_s2 + $0x1918] sm:$0xff] }
 0x1d6   :  { %3866 = vst [vmem:[%s12345_s3 + $0x1830] sm:$0xff] %v2842_v41  ;;  %v1823_v53 = vmul.f32 %v4146_v1, %v797_v38  ;;  %v1824_v54 = vmul.f32 %v4146_v1, %v798_v39  ;;  %3867 = vst [vmem:[%s12345_s3 + $0x1838] sm:$0xff] %v2843_v45  ;;  %v2846_v58 = vadd.f32 %v4151_v2, %v1820_v46  ;;  %v818_v41 = vld [vmem:[%s12344_s2 + $0x1910] sm:$0xff]  ;;  %v820_v43 = vld [vmem:[%s12344_s2 + $0x1920] sm:$0xff] }
 0x1d7   :  { %v2847_v59 = vadd.f32 %v4151_v2, %v1821_v47  ;;  %v2848_v60 = vadd.f32 %v4151_v2, %v1822_v48  ;;  %v1825_v61 = vmul.f32 %v4146_v1, %v799_v44  ;;  %3868 = vst [vmem:[%s12345_s3 + $0x1840] sm:$0xff] %v2844_v51  ;;  %3869 = vst [vmem:[%s12345_s3 + $0x1848] sm:$0xff] %v2845_v52  ;;  %v821_v48 = vld [vmem:[%s12344_s2 + $0x1928] sm:$0xff] }
 0x1d8   :  { %v2849_v0 = vadd.f32 %v4151_v2, %v1823_v53  ;;  %v2850_v3 = vadd.f32 %v4151_v2, %v1824_v54  ;;  %v1826_v4 = vmul.f32 %v4146_v1, %v800_v49  ;;  %v1827_v5 = vmul.f32 %v4146_v1, %v801_v50  ;;  %3870 = vst [vmem:[%s12345_s3 + $0x1850] sm:$0xff] %v2846_v58  ;;  %v822_v49 = vld [vmem:[%s12344_s2 + $0x1930] sm:$0xff]  ;;  %v823_v54 = vld [vmem:[%s12344_s2 + $0x1938] sm:$0xff] }
 0x1d9   :  { %3871 = vst [vmem:[%s12345_s3 + $0x1858] sm:$0xff] %v2847_v59  ;;  %3872 = vst [vmem:[%s12345_s3 + $0x1860] sm:$0xff] %v2848_v60  ;;  %v2851_v7 = vadd.f32 %v4151_v2, %v1825_v61  ;;  %v1828_v8 = vmul.f32 %v4146_v1, %v802_v55  ;;  %v1829_v9 = vmul.f32 %v4146_v1, %v803_v56  ;;  %v824_v59 = vld [vmem:[%s12344_s2 + $0x1940] sm:$0xff]  ;;  %v825_v60 = vld [vmem:[%s12344_s2 + $0x1948] sm:$0xff] }
 0x1da   :  { %v1830_v10 = vmul.f32 %v4146_v1, %v804_v57  ;;  %3873 = vst [vmem:[%s12345_s3 + $0x1868] sm:$0xff] %v2849_v0  ;;  %3874 = vst [vmem:[%s12345_s3 + $0x1870] sm:$0xff] %v2850_v3  ;;  %v2852_v13 = vadd.f32 %v4151_v2, %v1826_v4  ;;  %v2853_v14 = vadd.f32 %v4151_v2, %v1827_v5  ;;  %v826_v3 = vld [vmem:[%s12344_s2 + $0x1950] sm:$0xff]  ;;  %v827_v4 = vld [vmem:[%s12344_s2 + $0x1958] sm:$0xff] }
 0x1db   :  { %v1831_v15 = vmul.f32 %v4146_v1, %v805_v62  ;;  %v1832_v16 = vmul.f32 %v4146_v1, %v806_v63  ;;  %3875 = vst [vmem:[%s12345_s3 + $0x1878] sm:$0xff] %v2851_v7  ;;  %v2854_v20 = vadd.f32 %v4151_v2, %v1828_v8  ;;  %v2855_v21 = vadd.f32 %v4151_v2, %v1829_v9  ;;  %v828_v5 = vld [vmem:[%s12344_s2 + $0x1960] sm:$0xff] }
 0x1dc   :  { %v2856_v22 = vadd.f32 %v4151_v2, %v1830_v10  ;;  %v1833_v23 = vmul.f32 %v4146_v1, %v807_v6  ;;  %3876 = vst [vmem:[%s12345_s3 + $0x1880] sm:$0xff] %v2852_v13  ;;  %3877 = vst [vmem:[%s12345_s3 + $0x1888] sm:$0xff] %v2853_v14  ;;  %v1834_v28 = vmul.f32 %v4146_v1, %v808_v11  ;;  %v829_v10 = vld [vmem:[%s12344_s2 + $0x1968] sm:$0xff]  ;;  %v830_v11 = vld [vmem:[%s12344_s2 + $0x1970] sm:$0xff] }
 0x1dd   :  { %v2857_v26 = vadd.f32 %v4151_v2, %v1831_v15  ;;  %v2858_v27 = vadd.f32 %v4151_v2, %v1832_v16  ;;  %v1835_v29 = vmul.f32 %v4146_v1, %v809_v12  ;;  %3878 = vst [vmem:[%s12345_s3 + $0x1890] sm:$0xff] %v2854_v20  ;;  %3879 = vst [vmem:[%s12345_s3 + $0x1898] sm:$0xff] %v2855_v21  ;;  %v831_v16 = vld [vmem:[%s12344_s2 + $0x1978] sm:$0xff]  ;;  %v832_v21 = vld [vmem:[%s12344_s2 + $0x1980] sm:$0xff] }
 0x1de   :  { %3880 = vst [vmem:[%s12345_s3 + $0x18a0] sm:$0xff] %v2856_v22  ;;  %v2859_v31 = vadd.f32 %v4151_v2, %v1833_v23  ;;  %v1836_v32 = vmul.f32 %v4146_v1, %v810_v17  ;;  %v1837_v33 = vmul.f32 %v4146_v1, %v811_v18  ;;  %v1838_v34 = vmul.f32 %v4146_v1, %v812_v19  ;;  %v833_v22 = vld [vmem:[%s12344_s2 + $0x1988] sm:$0xff] }
 0x1df   :  { %3881 = vst [vmem:[%s12345_s3 + $0x18a8] sm:$0xff] %v2857_v26  ;;  %3882 = vst [vmem:[%s12345_s3 + $0x18b0] sm:$0xff] %v2858_v27  ;;  %v2860_v37 = vadd.f32 %v4151_v2, %v1834_v28  ;;  %v2861_v38 = vadd.f32 %v4151_v2, %v1835_v29  ;;  %v1839_v39 = vmul.f32 %v4146_v1, %v813_v24  ;;  %v834_v27 = vld [vmem:[%s12344_s2 + $0x1990] sm:$0xff]  ;;  %v835_v28 = vld [vmem:[%s12344_s2 + $0x1998] sm:$0xff] }
 0x1e0   :  { %v1840_v40 = vmul.f32 %v4146_v1, %v814_v25  ;;  %3883 = vst [vmem:[%s12345_s3 + $0x18b8] sm:$0xff] %v2859_v31  ;;  %v2862_v44 = vadd.f32 %v4151_v2, %v1836_v32  ;;  %v2863_v45 = vadd.f32 %v4151_v2, %v1837_v33  ;;  %v2864_v46 = vadd.f32 %v4151_v2, %v1838_v34  ;;  %v836_v29 = vld [vmem:[%s12344_s2 + $0x19a0] sm:$0xff]  ;;  %v837_v34 = vld [vmem:[%s12344_s2 + $0x19a8] sm:$0xff] }
 0x1e1   :  { %v1841_v47 = vmul.f32 %v4146_v1, %v815_v30  ;;  %3884 = vst [vmem:[%s12345_s3 + $0x18c0] sm:$0xff] %v2860_v37  ;;  %3885 = vst [vmem:[%s12345_s3 + $0x18c8] sm:$0xff] %v2861_v38  ;;  %v2865_v50 = vadd.f32 %v4151_v2, %v1839_v39  ;;  %v1842_v52 = vmul.f32 %v4146_v1, %v816_v35  ;;  %v838_v35 = vld [vmem:[%s12344_s2 + $0x19b0] sm:$0xff] }
 0x1e2   :  { %v2866_v51 = vadd.f32 %v4151_v2, %v1840_v40  ;;  %v1843_v53 = vmul.f32 %v4146_v1, %v817_v36  ;;  %3886 = vst [vmem:[%s12345_s3 + $0x18d0] sm:$0xff] %v2862_v44  ;;  %3887 = vst [vmem:[%s12345_s3 + $0x18d8] sm:$0xff] %v2863_v45  ;;  %v1844_v56 = vmul.f32 %v4146_v1, %v818_v41  ;;  %v839_v40 = vld [vmem:[%s12344_s2 + $0x19b8] sm:$0xff]  ;;  %v840_v45 = vld [vmem:[%s12344_s2 + $0x19c0] sm:$0xff] }
 0x1e3   :  { %3888 = vst [vmem:[%s12345_s3 + $0x18e0] sm:$0xff] %v2864_v46  ;;  %v2867_v55 = vadd.f32 %v4151_v2, %v1841_v47  ;;  %v1845_v57 = vmul.f32 %v4146_v1, %v819_v42  ;;  %v1846_v58 = vmul.f32 %v4146_v1, %v820_v43  ;;  %3889 = vst [vmem:[%s12345_s3 + $0x18e8] sm:$0xff] %v2865_v50  ;;  %v841_v46 = vld [vmem:[%s12344_s2 + $0x19c8] sm:$0xff] }
 0x1e4   :  { %3890 = vst [vmem:[%s12345_s3 + $0x18f0] sm:$0xff] %v2866_v51  ;;  %v2868_v61 = vadd.f32 %v4151_v2, %v1842_v52  ;;  %v2869_v62 = vadd.f32 %v4151_v2, %v1843_v53  ;;  %v1847_v63 = vmul.f32 %v4146_v1, %v821_v48  ;;  %v1848_v0 = vmul.f32 %v4146_v1, %v822_v49  ;;  %v842_v51 = vld [vmem:[%s12344_s2 + $0x19d0] sm:$0xff]  ;;  %v843_v52 = vld [vmem:[%s12344_s2 + $0x19d8] sm:$0xff]  ;;  %v844_v53 = vld [vmem:[%s12344_s2 + $0x19e0] sm:$0xff] }
 0x1e5   :  { %3891 = vst [vmem:[%s12345_s3 + $0x18f8] sm:$0xff] %v2867_v55  ;;  %v2870_v6 = vadd.f32 %v4151_v2, %v1844_v56  ;;  %v2871_v7 = vadd.f32 %v4151_v2, %v1845_v57  ;;  %v2872_v8 = vadd.f32 %v4151_v2, %v1846_v58  ;;  %v1849_v9 = vmul.f32 %v4146_v1, %v823_v54  ;;  %v845_v58 = vld [vmem:[%s12344_s2 + $0x19e8] sm:$0xff] }
 0x1e6   :  { %3892 = vst [vmem:[%s12345_s3 + $0x1900] sm:$0xff] %v2868_v61  ;;  %3893 = vst [vmem:[%s12345_s3 + $0x1908] sm:$0xff] %v2869_v62  ;;  %v2873_v12 = vadd.f32 %v4151_v2, %v1847_v63  ;;  %v2874_v13 = vadd.f32 %v4151_v2, %v1848_v0  ;;  %v1850_v14 = vmul.f32 %v4146_v1, %v824_v59  ;;  %v846_v59 = vld [vmem:[%s12344_s2 + $0x19f0] sm:$0xff]  ;;  %v847_v0 = vld [vmem:[%s12344_s2 + $0x19f8] sm:$0xff] }
 0x1e7   :  { %v1851_v15 = vmul.f32 %v4146_v1, %v825_v60  ;;  %3894 = vst [vmem:[%s12345_s3 + $0x1910] sm:$0xff] %v2870_v6  ;;  %3895 = vst [vmem:[%s12345_s3 + $0x1918] sm:$0xff] %v2871_v7  ;;  %v2875_v17 = vadd.f32 %v4151_v2, %v1849_v9  ;;  %v1852_v18 = vmul.f32 %v4146_v1, %v826_v3  ;;  %v848_v7 = vld [vmem:[%s12344_s2 + $0x1a00] sm:$0xff] }
 0x1e8   :  { %3896 = vst [vmem:[%s12345_s3 + $0x1920] sm:$0xff] %v2872_v8  ;;  %v1853_v19 = vmul.f32 %v4146_v1, %v827_v4  ;;  %v1854_v20 = vmul.f32 %v4146_v1, %v828_v5  ;;  %3897 = vst [vmem:[%s12345_s3 + $0x1928] sm:$0xff] %v2873_v12  ;;  %v2876_v23 = vadd.f32 %v4151_v2, %v1850_v14  ;;  %v849_v8 = vld [vmem:[%s12344_s2 + $0x1a08] sm:$0xff]  ;;  %v851_v14 = vld [vmem:[%s12344_s2 + $0x1a18] sm:$0xff] }
 0x1e9   :  { %3898 = vst [vmem:[%s12345_s3 + $0x1930] sm:$0xff] %v2874_v13  ;;  %v2877_v24 = vadd.f32 %v4151_v2, %v1851_v15  ;;  %v1855_v25 = vmul.f32 %v4146_v1, %v829_v10  ;;  %v1856_v26 = vmul.f32 %v4146_v1, %v830_v11  ;;  %3899 = vst [vmem:[%s12345_s3 + $0x1938] sm:$0xff] %v2875_v17  ;;  %v850_v13 = vld [vmem:[%s12344_s2 + $0x1a10] sm:$0xff]  ;;  %v852_v15 = vld [vmem:[%s12344_s2 + $0x1a20] sm:$0xff] }
 0x1ea   :  { %v2878_v30 = vadd.f32 %v4151_v2, %v1852_v18  ;;  %v2879_v31 = vadd.f32 %v4151_v2, %v1853_v19  ;;  %v2880_v32 = vadd.f32 %v4151_v2, %v1854_v20  ;;  %v1857_v33 = vmul.f32 %v4146_v1, %v831_v16  ;;  %3900 = vst [vmem:[%s12345_s3 + $0x1940] sm:$0xff] %v2876_v23  ;;  %v853_v20 = vld [vmem:[%s12344_s2 + $0x1a28] sm:$0xff] }
 0x1eb   :  { %3901 = vst [vmem:[%s12345_s3 + $0x1948] sm:$0xff] %v2877_v24  ;;  %v2881_v36 = vadd.f32 %v4151_v2, %v1855_v25  ;;  %v2882_v37 = vadd.f32 %v4151_v2, %v1856_v26  ;;  %v1858_v38 = vmul.f32 %v4146_v1, %v832_v21  ;;  %v1859_v39 = vmul.f32 %v4146_v1, %v833_v22  ;;  %v854_v21 = vld [vmem:[%s12344_s2 + $0x1a30] sm:$0xff]  ;;  %v855_v26 = vld [vmem:[%s12344_s2 + $0x1a38] sm:$0xff] }
 0x1ec   :  { %3902 = vst [vmem:[%s12345_s3 + $0x1950] sm:$0xff] %v2878_v30  ;;  %3903 = vst [vmem:[%s12345_s3 + $0x1958] sm:$0xff] %v2879_v31  ;;  %v2883_v41 = vadd.f32 %v4151_v2, %v1857_v33  ;;  %v1860_v42 = vmul.f32 %v4146_v1, %v834_v27  ;;  %v1861_v43 = vmul.f32 %v4146_v1, %v835_v28  ;;  %v856_v31 = vld [vmem:[%s12344_s2 + $0x1a40] sm:$0xff] }
 0x1ed   :  { %3904 = vst [vmem:[%s12345_s3 + $0x1960] sm:$0xff] %v2880_v32  ;;  %v1862_v44 = vmul.f32 %v4146_v1, %v836_v29  ;;  %3905 = vst [vmem:[%s12345_s3 + $0x1968] sm:$0xff] %v2881_v36  ;;  %v2884_v47 = vadd.f32 %v4151_v2, %v1858_v38  ;;  %v2885_v48 = vadd.f32 %v4151_v2, %v1859_v39  ;;  %v857_v32 = vld [vmem:[%s12344_s2 + $0x1a48] sm:$0xff]  ;;  %v859_v38 = vld [vmem:[%s12344_s2 + $0x1a58] sm:$0xff] }
 0x1ee   :  { %3906 = vst [vmem:[%s12345_s3 + $0x1970] sm:$0xff] %v2882_v37  ;;  %v1863_v49 = vmul.f32 %v4146_v1, %v837_v34  ;;  %v1864_v50 = vmul.f32 %v4146_v1, %v838_v35  ;;  %3907 = vst [vmem:[%s12345_s3 + $0x1978] sm:$0xff] %v2883_v41  ;;  %v2886_v54 = vadd.f32 %v4151_v2, %v1860_v42  ;;  %v858_v37 = vld [vmem:[%s12344_s2 + $0x1a50] sm:$0xff]  ;;  %v860_v39 = vld [vmem:[%s12344_s2 + $0x1a60] sm:$0xff] }
 0x1ef   :  { %v2887_v55 = vadd.f32 %v4151_v2, %v1861_v43  ;;  %v2888_v56 = vadd.f32 %v4151_v2, %v1862_v44  ;;  %v1865_v57 = vmul.f32 %v4146_v1, %v839_v40  ;;  %3908 = vst [vmem:[%s12345_s3 + $0x1980] sm:$0xff] %v2884_v47  ;;  %3909 = vst [vmem:[%s12345_s3 + $0x1988] sm:$0xff] %v2885_v48  ;;  %v861_v44 = vld [vmem:[%s12344_s2 + $0x1a68] sm:$0xff] }
 0x1f0   :  { %v2889_v60 = vadd.f32 %v4151_v2, %v1863_v49  ;;  %v2890_v61 = vadd.f32 %v4151_v2, %v1864_v50  ;;  %v1866_v62 = vmul.f32 %v4146_v1, %v840_v45  ;;  %v1867_v63 = vmul.f32 %v4146_v1, %v841_v46  ;;  %3910 = vst [vmem:[%s12345_s3 + $0x1990] sm:$0xff] %v2886_v54  ;;  %v862_v45 = vld [vmem:[%s12344_s2 + $0x1a70] sm:$0xff]  ;;  %v863_v50 = vld [vmem:[%s12344_s2 + $0x1a78] sm:$0xff] }
 0x1f1   :  { %3911 = vst [vmem:[%s12345_s3 + $0x1998] sm:$0xff] %v2887_v55  ;;  %3912 = vst [vmem:[%s12345_s3 + $0x19a0] sm:$0xff] %v2888_v56  ;;  %v2891_v3 = vadd.f32 %v4151_v2, %v1865_v57  ;;  %v1868_v4 = vmul.f32 %v4146_v1, %v842_v51  ;;  %v1869_v5 = vmul.f32 %v4146_v1, %v843_v52  ;;  %v864_v55 = vld [vmem:[%s12344_s2 + $0x1a80] sm:$0xff]  ;;  %v865_v56 = vld [vmem:[%s12344_s2 + $0x1a88] sm:$0xff] }
 0x1f2   :  { %v1870_v6 = vmul.f32 %v4146_v1, %v844_v53  ;;  %3913 = vst [vmem:[%s12345_s3 + $0x19a8] sm:$0xff] %v2889_v60  ;;  %3914 = vst [vmem:[%s12345_s3 + $0x19b0] sm:$0xff] %v2890_v61  ;;  %v2892_v9 = vadd.f32 %v4151_v2, %v1866_v62  ;;  %v2893_v10 = vadd.f32 %v4151_v2, %v1867_v63  ;;  %v866_v61 = vld [vmem:[%s12344_s2 + $0x1a90] sm:$0xff]  ;;  %v867_v62 = vld [vmem:[%s12344_s2 + $0x1a98] sm:$0xff] }
 0x1f3   :  { %v1871_v11 = vmul.f32 %v4146_v1, %v845_v58  ;;  %v1872_v12 = vmul.f32 %v4146_v1, %v846_v59  ;;  %3915 = vst [vmem:[%s12345_s3 + $0x19b8] sm:$0xff] %v2891_v3  ;;  %v2894_v16 = vadd.f32 %v4151_v2, %v1868_v4  ;;  %v2895_v17 = vadd.f32 %v4151_v2, %v1869_v5  ;;  %v868_v63 = vld [vmem:[%s12344_s2 + $0x1aa0] sm:$0xff] }
 0x1f4   :  { %v2896_v18 = vadd.f32 %v4151_v2, %v1870_v6  ;;  %v1873_v19 = vmul.f32 %v4146_v1, %v847_v0  ;;  %3916 = vst [vmem:[%s12345_s3 + $0x19c0] sm:$0xff] %v2892_v9  ;;  %3917 = vst [vmem:[%s12345_s3 + $0x19c8] sm:$0xff] %v2893_v10  ;;  %v1874_v24 = vmul.f32 %v4146_v1, %v848_v7  ;;  %v869_v6 = vld [vmem:[%s12344_s2 + $0x1aa8] sm:$0xff]  ;;  %v870_v7 = vld [vmem:[%s12344_s2 + $0x1ab0] sm:$0xff] }
 0x1f5   :  { %v2897_v22 = vadd.f32 %v4151_v2, %v1871_v11  ;;  %v2898_v23 = vadd.f32 %v4151_v2, %v1872_v12  ;;  %v1875_v25 = vmul.f32 %v4146_v1, %v849_v8  ;;  %3918 = vst [vmem:[%s12345_s3 + $0x19d0] sm:$0xff] %v2894_v16  ;;  %3919 = vst [vmem:[%s12345_s3 + $0x19d8] sm:$0xff] %v2895_v17  ;;  %v871_v12 = vld [vmem:[%s12344_s2 + $0x1ab8] sm:$0xff]  ;;  %v872_v17 = vld [vmem:[%s12344_s2 + $0x1ac0] sm:$0xff] }
 0x1f6   :  { %3920 = vst [vmem:[%s12345_s3 + $0x19e0] sm:$0xff] %v2896_v18  ;;  %v2899_v27 = vadd.f32 %v4151_v2, %v1873_v19  ;;  %v1876_v28 = vmul.f32 %v4146_v1, %v850_v13  ;;  %v1877_v29 = vmul.f32 %v4146_v1, %v851_v14  ;;  %v1878_v30 = vmul.f32 %v4146_v1, %v852_v15  ;;  %v873_v18 = vld [vmem:[%s12344_s2 + $0x1ac8] sm:$0xff] }
 0x1f7   :  { %3921 = vst [vmem:[%s12345_s3 + $0x19e8] sm:$0xff] %v2897_v22  ;;  %3922 = vst [vmem:[%s12345_s3 + $0x19f0] sm:$0xff] %v2898_v23  ;;  %v2900_v33 = vadd.f32 %v4151_v2, %v1874_v24  ;;  %v2901_v34 = vadd.f32 %v4151_v2, %v1875_v25  ;;  %v1879_v35 = vmul.f32 %v4146_v1, %v853_v20  ;;  %v874_v23 = vld [vmem:[%s12344_s2 + $0x1ad0] sm:$0xff]  ;;  %v875_v24 = vld [vmem:[%s12344_s2 + $0x1ad8] sm:$0xff] }
 0x1f8   :  { %v1880_v36 = vmul.f32 %v4146_v1, %v854_v21  ;;  %3923 = vst [vmem:[%s12345_s3 + $0x19f8] sm:$0xff] %v2899_v27  ;;  %v2902_v40 = vadd.f32 %v4151_v2, %v1876_v28  ;;  %v2903_v41 = vadd.f32 %v4151_v2, %v1877_v29  ;;  %v2904_v42 = vadd.f32 %v4151_v2, %v1878_v30  ;;  %v876_v25 = vld [vmem:[%s12344_s2 + $0x1ae0] sm:$0xff]  ;;  %v877_v30 = vld [vmem:[%s12344_s2 + $0x1ae8] sm:$0xff] }
 0x1f9   :  { %v1881_v43 = vmul.f32 %v4146_v1, %v855_v26  ;;  %3924 = vst [vmem:[%s12345_s3 + $0x1a00] sm:$0xff] %v2900_v33  ;;  %3925 = vst [vmem:[%s12345_s3 + $0x1a08] sm:$0xff] %v2901_v34  ;;  %v2905_v46 = vadd.f32 %v4151_v2, %v1879_v35  ;;  %v1882_v48 = vmul.f32 %v4146_v1, %v856_v31  ;;  %v878_v31 = vld [vmem:[%s12344_s2 + $0x1af0] sm:$0xff] }
 0x1fa   :  { %v2906_v47 = vadd.f32 %v4151_v2, %v1880_v36  ;;  %v1883_v49 = vmul.f32 %v4146_v1, %v857_v32  ;;  %3926 = vst [vmem:[%s12345_s3 + $0x1a10] sm:$0xff] %v2902_v40  ;;  %3927 = vst [vmem:[%s12345_s3 + $0x1a18] sm:$0xff] %v2903_v41  ;;  %v1884_v52 = vmul.f32 %v4146_v1, %v858_v37  ;;  %v879_v36 = vld [vmem:[%s12344_s2 + $0x1af8] sm:$0xff]  ;;  %v880_v41 = vld [vmem:[%s12344_s2 + $0x1b00] sm:$0xff] }
 0x1fb   :  { %3928 = vst [vmem:[%s12345_s3 + $0x1a20] sm:$0xff] %v2904_v42  ;;  %v2907_v51 = vadd.f32 %v4151_v2, %v1881_v43  ;;  %v1885_v53 = vmul.f32 %v4146_v1, %v859_v38  ;;  %v1886_v54 = vmul.f32 %v4146_v1, %v860_v39  ;;  %3929 = vst [vmem:[%s12345_s3 + $0x1a28] sm:$0xff] %v2905_v46  ;;  %v881_v42 = vld [vmem:[%s12344_s2 + $0x1b08] sm:$0xff] }
 0x1fc   :  { %3930 = vst [vmem:[%s12345_s3 + $0x1a30] sm:$0xff] %v2906_v47  ;;  %v2908_v57 = vadd.f32 %v4151_v2, %v1882_v48  ;;  %v2909_v58 = vadd.f32 %v4151_v2, %v1883_v49  ;;  %v1887_v59 = vmul.f32 %v4146_v1, %v861_v44  ;;  %v1888_v60 = vmul.f32 %v4146_v1, %v862_v45  ;;  %v882_v47 = vld [vmem:[%s12344_s2 + $0x1b10] sm:$0xff]  ;;  %v883_v48 = vld [vmem:[%s12344_s2 + $0x1b18] sm:$0xff]  ;;  %v884_v49 = vld [vmem:[%s12344_s2 + $0x1b20] sm:$0xff] }
 0x1fd   :  { %3931 = vst [vmem:[%s12345_s3 + $0x1a38] sm:$0xff] %v2907_v51  ;;  %v2910_v0 = vadd.f32 %v4151_v2, %v1884_v52  ;;  %v2911_v3 = vadd.f32 %v4151_v2, %v1885_v53  ;;  %v2912_v4 = vadd.f32 %v4151_v2, %v1886_v54  ;;  %v1889_v5 = vmul.f32 %v4146_v1, %v863_v50  ;;  %v885_v54 = vld [vmem:[%s12344_s2 + $0x1b28] sm:$0xff] }
 0x1fe   :  { %3932 = vst [vmem:[%s12345_s3 + $0x1a40] sm:$0xff] %v2908_v57  ;;  %3933 = vst [vmem:[%s12345_s3 + $0x1a48] sm:$0xff] %v2909_v58  ;;  %v2913_v8 = vadd.f32 %v4151_v2, %v1887_v59  ;;  %v2914_v9 = vadd.f32 %v4151_v2, %v1888_v60  ;;  %v1890_v10 = vmul.f32 %v4146_v1, %v864_v55  ;;  %v886_v55 = vld [vmem:[%s12344_s2 + $0x1b30] sm:$0xff]  ;;  %v887_v60 = vld [vmem:[%s12344_s2 + $0x1b38] sm:$0xff] }
 0x1ff   :  { %v1891_v11 = vmul.f32 %v4146_v1, %v865_v56  ;;  %3934 = vst [vmem:[%s12345_s3 + $0x1a50] sm:$0xff] %v2910_v0  ;;  %3935 = vst [vmem:[%s12345_s3 + $0x1a58] sm:$0xff] %v2911_v3  ;;  %v2915_v13 = vadd.f32 %v4151_v2, %v1889_v5  ;;  %v1892_v14 = vmul.f32 %v4146_v1, %v866_v61  ;;  %v888_v3 = vld [vmem:[%s12344_s2 + $0x1b40] sm:$0xff] }
 0x200   :  { %3936 = vst [vmem:[%s12345_s3 + $0x1a60] sm:$0xff] %v2912_v4  ;;  %v1893_v15 = vmul.f32 %v4146_v1, %v867_v62  ;;  %v1894_v16 = vmul.f32 %v4146_v1, %v868_v63  ;;  %3937 = vst [vmem:[%s12345_s3 + $0x1a68] sm:$0xff] %v2913_v8  ;;  %v2916_v19 = vadd.f32 %v4151_v2, %v1890_v10  ;;  %v889_v4 = vld [vmem:[%s12344_s2 + $0x1b48] sm:$0xff]  ;;  %v891_v10 = vld [vmem:[%s12344_s2 + $0x1b58] sm:$0xff] }
 0x201   :  { %3938 = vst [vmem:[%s12345_s3 + $0x1a70] sm:$0xff] %v2914_v9  ;;  %v2917_v20 = vadd.f32 %v4151_v2, %v1891_v11  ;;  %v1895_v21 = vmul.f32 %v4146_v1, %v869_v6  ;;  %v1896_v22 = vmul.f32 %v4146_v1, %v870_v7  ;;  %3939 = vst [vmem:[%s12345_s3 + $0x1a78] sm:$0xff] %v2915_v13  ;;  %v890_v9 = vld [vmem:[%s12344_s2 + $0x1b50] sm:$0xff]  ;;  %v892_v11 = vld [vmem:[%s12344_s2 + $0x1b60] sm:$0xff] }
 0x202   :  { %v2918_v26 = vadd.f32 %v4151_v2, %v1892_v14  ;;  %v2919_v27 = vadd.f32 %v4151_v2, %v1893_v15  ;;  %v2920_v28 = vadd.f32 %v4151_v2, %v1894_v16  ;;  %v1897_v29 = vmul.f32 %v4146_v1, %v871_v12  ;;  %3940 = vst [vmem:[%s12345_s3 + $0x1a80] sm:$0xff] %v2916_v19  ;;  %v893_v16 = vld [vmem:[%s12344_s2 + $0x1b68] sm:$0xff] }
 0x203   :  { %3941 = vst [vmem:[%s12345_s3 + $0x1a88] sm:$0xff] %v2917_v20  ;;  %v2921_v32 = vadd.f32 %v4151_v2, %v1895_v21  ;;  %v2922_v33 = vadd.f32 %v4151_v2, %v1896_v22  ;;  %v1898_v34 = vmul.f32 %v4146_v1, %v872_v17  ;;  %v1899_v35 = vmul.f32 %v4146_v1, %v873_v18  ;;  %v894_v17 = vld [vmem:[%s12344_s2 + $0x1b70] sm:$0xff]  ;;  %v895_v22 = vld [vmem:[%s12344_s2 + $0x1b78] sm:$0xff] }
 0x204   :  { %3942 = vst [vmem:[%s12345_s3 + $0x1a90] sm:$0xff] %v2918_v26  ;;  %3943 = vst [vmem:[%s12345_s3 + $0x1a98] sm:$0xff] %v2919_v27  ;;  %v2923_v37 = vadd.f32 %v4151_v2, %v1897_v29  ;;  %v1900_v38 = vmul.f32 %v4146_v1, %v874_v23  ;;  %v1901_v39 = vmul.f32 %v4146_v1, %v875_v24  ;;  %v896_v27 = vld [vmem:[%s12344_s2 + $0x1b80] sm:$0xff] }
 0x205   :  { %3944 = vst [vmem:[%s12345_s3 + $0x1aa0] sm:$0xff] %v2920_v28  ;;  %v1902_v40 = vmul.f32 %v4146_v1, %v876_v25  ;;  %3945 = vst [vmem:[%s12345_s3 + $0x1aa8] sm:$0xff] %v2921_v32  ;;  %v2924_v43 = vadd.f32 %v4151_v2, %v1898_v34  ;;  %v2925_v44 = vadd.f32 %v4151_v2, %v1899_v35  ;;  %v897_v28 = vld [vmem:[%s12344_s2 + $0x1b88] sm:$0xff]  ;;  %v899_v34 = vld [vmem:[%s12344_s2 + $0x1b98] sm:$0xff] }
 0x206   :  { %3946 = vst [vmem:[%s12345_s3 + $0x1ab0] sm:$0xff] %v2922_v33  ;;  %v1903_v45 = vmul.f32 %v4146_v1, %v877_v30  ;;  %v1904_v46 = vmul.f32 %v4146_v1, %v878_v31  ;;  %3947 = vst [vmem:[%s12345_s3 + $0x1ab8] sm:$0xff] %v2923_v37  ;;  %v2926_v50 = vadd.f32 %v4151_v2, %v1900_v38  ;;  %v898_v33 = vld [vmem:[%s12344_s2 + $0x1b90] sm:$0xff]  ;;  %v900_v35 = vld [vmem:[%s12344_s2 + $0x1ba0] sm:$0xff] }
 0x207   :  { %v2927_v51 = vadd.f32 %v4151_v2, %v1901_v39  ;;  %v2928_v52 = vadd.f32 %v4151_v2, %v1902_v40  ;;  %v1905_v53 = vmul.f32 %v4146_v1, %v879_v36  ;;  %3948 = vst [vmem:[%s12345_s3 + $0x1ac0] sm:$0xff] %v2924_v43  ;;  %3949 = vst [vmem:[%s12345_s3 + $0x1ac8] sm:$0xff] %v2925_v44  ;;  %v901_v40 = vld [vmem:[%s12344_s2 + $0x1ba8] sm:$0xff] }
 0x208   :  { %v2929_v56 = vadd.f32 %v4151_v2, %v1903_v45  ;;  %v2930_v57 = vadd.f32 %v4151_v2, %v1904_v46  ;;  %v1906_v58 = vmul.f32 %v4146_v1, %v880_v41  ;;  %v1907_v59 = vmul.f32 %v4146_v1, %v881_v42  ;;  %3950 = vst [vmem:[%s12345_s3 + $0x1ad0] sm:$0xff] %v2926_v50  ;;  %v902_v41 = vld [vmem:[%s12344_s2 + $0x1bb0] sm:$0xff]  ;;  %v903_v46 = vld [vmem:[%s12344_s2 + $0x1bb8] sm:$0xff] }
 0x209   :  { %3951 = vst [vmem:[%s12345_s3 + $0x1ad8] sm:$0xff] %v2927_v51  ;;  %3952 = vst [vmem:[%s12345_s3 + $0x1ae0] sm:$0xff] %v2928_v52  ;;  %v2931_v61 = vadd.f32 %v4151_v2, %v1905_v53  ;;  %v1908_v62 = vmul.f32 %v4146_v1, %v882_v47  ;;  %v1909_v63 = vmul.f32 %v4146_v1, %v883_v48  ;;  %v904_v51 = vld [vmem:[%s12344_s2 + $0x1bc0] sm:$0xff]  ;;  %v905_v52 = vld [vmem:[%s12344_s2 + $0x1bc8] sm:$0xff] }
 0x20a   :  { %v1910_v0 = vmul.f32 %v4146_v1, %v884_v49  ;;  %3953 = vst [vmem:[%s12345_s3 + $0x1ae8] sm:$0xff] %v2929_v56  ;;  %3954 = vst [vmem:[%s12345_s3 + $0x1af0] sm:$0xff] %v2930_v57  ;;  %v2932_v5 = vadd.f32 %v4151_v2, %v1906_v58  ;;  %v2933_v6 = vadd.f32 %v4151_v2, %v1907_v59  ;;  %v906_v57 = vld [vmem:[%s12344_s2 + $0x1bd0] sm:$0xff]  ;;  %v907_v58 = vld [vmem:[%s12344_s2 + $0x1bd8] sm:$0xff] }
 0x20b   :  { %v1911_v7 = vmul.f32 %v4146_v1, %v885_v54  ;;  %v1912_v8 = vmul.f32 %v4146_v1, %v886_v55  ;;  %3955 = vst [vmem:[%s12345_s3 + $0x1af8] sm:$0xff] %v2931_v61  ;;  %v2934_v12 = vadd.f32 %v4151_v2, %v1908_v62  ;;  %v2935_v13 = vadd.f32 %v4151_v2, %v1909_v63  ;;  %v908_v59 = vld [vmem:[%s12344_s2 + $0x1be0] sm:$0xff] }
 0x20c   :  { %v2936_v14 = vadd.f32 %v4151_v2, %v1910_v0  ;;  %v1913_v15 = vmul.f32 %v4146_v1, %v887_v60  ;;  %3956 = vst [vmem:[%s12345_s3 + $0x1b00] sm:$0xff] %v2932_v5  ;;  %3957 = vst [vmem:[%s12345_s3 + $0x1b08] sm:$0xff] %v2933_v6  ;;  %v1914_v20 = vmul.f32 %v4146_v1, %v888_v3  ;;  %v909_v0 = vld [vmem:[%s12344_s2 + $0x1be8] sm:$0xff]  ;;  %v910_v3 = vld [vmem:[%s12344_s2 + $0x1bf0] sm:$0xff] }
 0x20d   :  { %v2937_v18 = vadd.f32 %v4151_v2, %v1911_v7  ;;  %v2938_v19 = vadd.f32 %v4151_v2, %v1912_v8  ;;  %v1915_v21 = vmul.f32 %v4146_v1, %v889_v4  ;;  %3958 = vst [vmem:[%s12345_s3 + $0x1b10] sm:$0xff] %v2934_v12  ;;  %3959 = vst [vmem:[%s12345_s3 + $0x1b18] sm:$0xff] %v2935_v13  ;;  %v911_v8 = vld [vmem:[%s12344_s2 + $0x1bf8] sm:$0xff]  ;;  %v912_v13 = vld [vmem:[%s12344_s2 + $0x1c00] sm:$0xff] }
 0x20e   :  { %3960 = vst [vmem:[%s12345_s3 + $0x1b20] sm:$0xff] %v2936_v14  ;;  %v2939_v23 = vadd.f32 %v4151_v2, %v1913_v15  ;;  %v1916_v24 = vmul.f32 %v4146_v1, %v890_v9  ;;  %v1917_v25 = vmul.f32 %v4146_v1, %v891_v10  ;;  %v1918_v26 = vmul.f32 %v4146_v1, %v892_v11  ;;  %v913_v14 = vld [vmem:[%s12344_s2 + $0x1c08] sm:$0xff] }
 0x20f   :  { %3961 = vst [vmem:[%s12345_s3 + $0x1b28] sm:$0xff] %v2937_v18  ;;  %3962 = vst [vmem:[%s12345_s3 + $0x1b30] sm:$0xff] %v2938_v19  ;;  %v2940_v29 = vadd.f32 %v4151_v2, %v1914_v20  ;;  %v2941_v30 = vadd.f32 %v4151_v2, %v1915_v21  ;;  %v1919_v31 = vmul.f32 %v4146_v1, %v893_v16  ;;  %v914_v19 = vld [vmem:[%s12344_s2 + $0x1c10] sm:$0xff]  ;;  %v915_v20 = vld [vmem:[%s12344_s2 + $0x1c18] sm:$0xff] }
 0x210   :  { %v1920_v32 = vmul.f32 %v4146_v1, %v894_v17  ;;  %3963 = vst [vmem:[%s12345_s3 + $0x1b38] sm:$0xff] %v2939_v23  ;;  %v2942_v36 = vadd.f32 %v4151_v2, %v1916_v24  ;;  %v2943_v37 = vadd.f32 %v4151_v2, %v1917_v25  ;;  %v2944_v38 = vadd.f32 %v4151_v2, %v1918_v26  ;;  %v916_v21 = vld [vmem:[%s12344_s2 + $0x1c20] sm:$0xff]  ;;  %v917_v26 = vld [vmem:[%s12344_s2 + $0x1c28] sm:$0xff] }
 0x211   :  { %v1921_v39 = vmul.f32 %v4146_v1, %v895_v22  ;;  %3964 = vst [vmem:[%s12345_s3 + $0x1b40] sm:$0xff] %v2940_v29  ;;  %3965 = vst [vmem:[%s12345_s3 + $0x1b48] sm:$0xff] %v2941_v30  ;;  %v2945_v42 = vadd.f32 %v4151_v2, %v1919_v31  ;;  %v1922_v44 = vmul.f32 %v4146_v1, %v896_v27  ;;  %v918_v27 = vld [vmem:[%s12344_s2 + $0x1c30] sm:$0xff] }
 0x212   :  { %v2946_v43 = vadd.f32 %v4151_v2, %v1920_v32  ;;  %v1923_v45 = vmul.f32 %v4146_v1, %v897_v28  ;;  %3966 = vst [vmem:[%s12345_s3 + $0x1b50] sm:$0xff] %v2942_v36  ;;  %3967 = vst [vmem:[%s12345_s3 + $0x1b58] sm:$0xff] %v2943_v37  ;;  %v1924_v48 = vmul.f32 %v4146_v1, %v898_v33  ;;  %v919_v32 = vld [vmem:[%s12344_s2 + $0x1c38] sm:$0xff]  ;;  %v920_v37 = vld [vmem:[%s12344_s2 + $0x1c40] sm:$0xff] }
 0x213   :  { %3968 = vst [vmem:[%s12345_s3 + $0x1b60] sm:$0xff] %v2944_v38  ;;  %v2947_v47 = vadd.f32 %v4151_v2, %v1921_v39  ;;  %v1925_v49 = vmul.f32 %v4146_v1, %v899_v34  ;;  %v1926_v50 = vmul.f32 %v4146_v1, %v900_v35  ;;  %3969 = vst [vmem:[%s12345_s3 + $0x1b68] sm:$0xff] %v2945_v42  ;;  %v921_v38 = vld [vmem:[%s12344_s2 + $0x1c48] sm:$0xff] }
 0x214   :  { %3970 = vst [vmem:[%s12345_s3 + $0x1b70] sm:$0xff] %v2946_v43  ;;  %v2948_v53 = vadd.f32 %v4151_v2, %v1922_v44  ;;  %v2949_v54 = vadd.f32 %v4151_v2, %v1923_v45  ;;  %v1927_v55 = vmul.f32 %v4146_v1, %v901_v40  ;;  %v1928_v56 = vmul.f32 %v4146_v1, %v902_v41  ;;  %v922_v43 = vld [vmem:[%s12344_s2 + $0x1c50] sm:$0xff]  ;;  %v923_v44 = vld [vmem:[%s12344_s2 + $0x1c58] sm:$0xff]  ;;  %v924_v45 = vld [vmem:[%s12344_s2 + $0x1c60] sm:$0xff] }
 0x215   :  { %3971 = vst [vmem:[%s12345_s3 + $0x1b78] sm:$0xff] %v2947_v47  ;;  %v2950_v60 = vadd.f32 %v4151_v2, %v1924_v48  ;;  %v2951_v61 = vadd.f32 %v4151_v2, %v1925_v49  ;;  %v2952_v62 = vadd.f32 %v4151_v2, %v1926_v50  ;;  %v1929_v63 = vmul.f32 %v4146_v1, %v903_v46  ;;  %v925_v50 = vld [vmem:[%s12344_s2 + $0x1c68] sm:$0xff] }
 0x216   :  { %3972 = vst [vmem:[%s12345_s3 + $0x1b80] sm:$0xff] %v2948_v53  ;;  %3973 = vst [vmem:[%s12345_s3 + $0x1b88] sm:$0xff] %v2949_v54  ;;  %v2953_v4 = vadd.f32 %v4151_v2, %v1927_v55  ;;  %v2954_v5 = vadd.f32 %v4151_v2, %v1928_v56  ;;  %v1930_v6 = vmul.f32 %v4146_v1, %v904_v51  ;;  %v926_v51 = vld [vmem:[%s12344_s2 + $0x1c70] sm:$0xff]  ;;  %v927_v56 = vld [vmem:[%s12344_s2 + $0x1c78] sm:$0xff] }
 0x217   :  { %v1931_v7 = vmul.f32 %v4146_v1, %v905_v52  ;;  %3974 = vst [vmem:[%s12345_s3 + $0x1b90] sm:$0xff] %v2950_v60  ;;  %3975 = vst [vmem:[%s12345_s3 + $0x1b98] sm:$0xff] %v2951_v61  ;;  %v2955_v9 = vadd.f32 %v4151_v2, %v1929_v63  ;;  %v1932_v10 = vmul.f32 %v4146_v1, %v906_v57  ;;  %v928_v61 = vld [vmem:[%s12344_s2 + $0x1c80] sm:$0xff] }
 0x218   :  { %3976 = vst [vmem:[%s12345_s3 + $0x1ba0] sm:$0xff] %v2952_v62  ;;  %v1933_v11 = vmul.f32 %v4146_v1, %v907_v58  ;;  %v1934_v12 = vmul.f32 %v4146_v1, %v908_v59  ;;  %3977 = vst [vmem:[%s12345_s3 + $0x1ba8] sm:$0xff] %v2953_v4  ;;  %v2956_v15 = vadd.f32 %v4151_v2, %v1930_v6  ;;  %v929_v62 = vld [vmem:[%s12344_s2 + $0x1c88] sm:$0xff]  ;;  %v931_v6 = vld [vmem:[%s12344_s2 + $0x1c98] sm:$0xff] }
 0x219   :  { %3978 = vst [vmem:[%s12345_s3 + $0x1bb0] sm:$0xff] %v2954_v5  ;;  %v2957_v16 = vadd.f32 %v4151_v2, %v1931_v7  ;;  %v1935_v17 = vmul.f32 %v4146_v1, %v909_v0  ;;  %v1936_v18 = vmul.f32 %v4146_v1, %v910_v3  ;;  %3979 = vst [vmem:[%s12345_s3 + $0x1bb8] sm:$0xff] %v2955_v9  ;;  %v930_v5 = vld [vmem:[%s12344_s2 + $0x1c90] sm:$0xff]  ;;  %v932_v7 = vld [vmem:[%s12344_s2 + $0x1ca0] sm:$0xff] }
 0x21a   :  { %v2958_v22 = vadd.f32 %v4151_v2, %v1932_v10  ;;  %v2959_v23 = vadd.f32 %v4151_v2, %v1933_v11  ;;  %v2960_v24 = vadd.f32 %v4151_v2, %v1934_v12  ;;  %v1937_v25 = vmul.f32 %v4146_v1, %v911_v8  ;;  %3980 = vst [vmem:[%s12345_s3 + $0x1bc0] sm:$0xff] %v2956_v15  ;;  %v933_v12 = vld [vmem:[%s12344_s2 + $0x1ca8] sm:$0xff] }
 0x21b   :  { %3981 = vst [vmem:[%s12345_s3 + $0x1bc8] sm:$0xff] %v2957_v16  ;;  %v2961_v28 = vadd.f32 %v4151_v2, %v1935_v17  ;;  %v2962_v29 = vadd.f32 %v4151_v2, %v1936_v18  ;;  %v1938_v30 = vmul.f32 %v4146_v1, %v912_v13  ;;  %v1939_v31 = vmul.f32 %v4146_v1, %v913_v14  ;;  %v934_v13 = vld [vmem:[%s12344_s2 + $0x1cb0] sm:$0xff]  ;;  %v935_v18 = vld [vmem:[%s12344_s2 + $0x1cb8] sm:$0xff] }
 0x21c   :  { %3982 = vst [vmem:[%s12345_s3 + $0x1bd0] sm:$0xff] %v2958_v22  ;;  %3983 = vst [vmem:[%s12345_s3 + $0x1bd8] sm:$0xff] %v2959_v23  ;;  %v2963_v33 = vadd.f32 %v4151_v2, %v1937_v25  ;;  %v1940_v34 = vmul.f32 %v4146_v1, %v914_v19  ;;  %v1941_v35 = vmul.f32 %v4146_v1, %v915_v20  ;;  %v936_v23 = vld [vmem:[%s12344_s2 + $0x1cc0] sm:$0xff] }
 0x21d   :  { %3984 = vst [vmem:[%s12345_s3 + $0x1be0] sm:$0xff] %v2960_v24  ;;  %v1942_v36 = vmul.f32 %v4146_v1, %v916_v21  ;;  %3985 = vst [vmem:[%s12345_s3 + $0x1be8] sm:$0xff] %v2961_v28  ;;  %v2964_v39 = vadd.f32 %v4151_v2, %v1938_v30  ;;  %v2965_v40 = vadd.f32 %v4151_v2, %v1939_v31  ;;  %v937_v24 = vld [vmem:[%s12344_s2 + $0x1cc8] sm:$0xff]  ;;  %v939_v30 = vld [vmem:[%s12344_s2 + $0x1cd8] sm:$0xff] }
 0x21e   :  { %3986 = vst [vmem:[%s12345_s3 + $0x1bf0] sm:$0xff] %v2962_v29  ;;  %v1943_v41 = vmul.f32 %v4146_v1, %v917_v26  ;;  %v1944_v42 = vmul.f32 %v4146_v1, %v918_v27  ;;  %3987 = vst [vmem:[%s12345_s3 + $0x1bf8] sm:$0xff] %v2963_v33  ;;  %v2966_v46 = vadd.f32 %v4151_v2, %v1940_v34  ;;  %v938_v29 = vld [vmem:[%s12344_s2 + $0x1cd0] sm:$0xff]  ;;  %v940_v31 = vld [vmem:[%s12344_s2 + $0x1ce0] sm:$0xff] }
 0x21f   :  { %v2967_v47 = vadd.f32 %v4151_v2, %v1941_v35  ;;  %v2968_v48 = vadd.f32 %v4151_v2, %v1942_v36  ;;  %v1945_v49 = vmul.f32 %v4146_v1, %v919_v32  ;;  %3988 = vst [vmem:[%s12345_s3 + $0x1c00] sm:$0xff] %v2964_v39  ;;  %3989 = vst [vmem:[%s12345_s3 + $0x1c08] sm:$0xff] %v2965_v40  ;;  %v941_v36 = vld [vmem:[%s12344_s2 + $0x1ce8] sm:$0xff] }
 0x220   :  { %v2969_v52 = vadd.f32 %v4151_v2, %v1943_v41  ;;  %v2970_v53 = vadd.f32 %v4151_v2, %v1944_v42  ;;  %v1946_v54 = vmul.f32 %v4146_v1, %v920_v37  ;;  %v1947_v55 = vmul.f32 %v4146_v1, %v921_v38  ;;  %3990 = vst [vmem:[%s12345_s3 + $0x1c10] sm:$0xff] %v2966_v46  ;;  %v942_v37 = vld [vmem:[%s12344_s2 + $0x1cf0] sm:$0xff]  ;;  %v943_v42 = vld [vmem:[%s12344_s2 + $0x1cf8] sm:$0xff] }
 0x221   :  { %3991 = vst [vmem:[%s12345_s3 + $0x1c18] sm:$0xff] %v2967_v47  ;;  %3992 = vst [vmem:[%s12345_s3 + $0x1c20] sm:$0xff] %v2968_v48  ;;  %v2971_v57 = vadd.f32 %v4151_v2, %v1945_v49  ;;  %v1948_v58 = vmul.f32 %v4146_v1, %v922_v43  ;;  %v1949_v59 = vmul.f32 %v4146_v1, %v923_v44  ;;  %v944_v47 = vld [vmem:[%s12344_s2 + $0x1d00] sm:$0xff]  ;;  %v945_v48 = vld [vmem:[%s12344_s2 + $0x1d08] sm:$0xff] }
 0x222   :  { %v1950_v60 = vmul.f32 %v4146_v1, %v924_v45  ;;  %3993 = vst [vmem:[%s12345_s3 + $0x1c28] sm:$0xff] %v2969_v52  ;;  %3994 = vst [vmem:[%s12345_s3 + $0x1c30] sm:$0xff] %v2970_v53  ;;  %v2972_v63 = vadd.f32 %v4151_v2, %v1946_v54  ;;  %v2973_v0 = vadd.f32 %v4151_v2, %v1947_v55  ;;  %v946_v53 = vld [vmem:[%s12344_s2 + $0x1d10] sm:$0xff]  ;;  %v947_v54 = vld [vmem:[%s12344_s2 + $0x1d18] sm:$0xff] }
 0x223   :  { %v1951_v3 = vmul.f32 %v4146_v1, %v925_v50  ;;  %v1952_v4 = vmul.f32 %v4146_v1, %v926_v51  ;;  %3995 = vst [vmem:[%s12345_s3 + $0x1c38] sm:$0xff] %v2971_v57  ;;  %v2974_v8 = vadd.f32 %v4151_v2, %v1948_v58  ;;  %v2975_v9 = vadd.f32 %v4151_v2, %v1949_v59  ;;  %v948_v55 = vld [vmem:[%s12344_s2 + $0x1d20] sm:$0xff] }
 0x224   :  { %v2976_v10 = vadd.f32 %v4151_v2, %v1950_v60  ;;  %v1953_v11 = vmul.f32 %v4146_v1, %v927_v56  ;;  %3996 = vst [vmem:[%s12345_s3 + $0x1c40] sm:$0xff] %v2972_v63  ;;  %3997 = vst [vmem:[%s12345_s3 + $0x1c48] sm:$0xff] %v2973_v0  ;;  %v1954_v16 = vmul.f32 %v4146_v1, %v928_v61  ;;  %v949_v60 = vld [vmem:[%s12344_s2 + $0x1d28] sm:$0xff]  ;;  %v950_v61 = vld [vmem:[%s12344_s2 + $0x1d30] sm:$0xff] }
 0x225   :  { %v2977_v14 = vadd.f32 %v4151_v2, %v1951_v3  ;;  %v2978_v15 = vadd.f32 %v4151_v2, %v1952_v4  ;;  %v1955_v17 = vmul.f32 %v4146_v1, %v929_v62  ;;  %3998 = vst [vmem:[%s12345_s3 + $0x1c50] sm:$0xff] %v2974_v8  ;;  %3999 = vst [vmem:[%s12345_s3 + $0x1c58] sm:$0xff] %v2975_v9  ;;  %v951_v4 = vld [vmem:[%s12344_s2 + $0x1d38] sm:$0xff]  ;;  %v952_v9 = vld [vmem:[%s12344_s2 + $0x1d40] sm:$0xff] }
 0x226   :  { %4000 = vst [vmem:[%s12345_s3 + $0x1c60] sm:$0xff] %v2976_v10  ;;  %v2979_v19 = vadd.f32 %v4151_v2, %v1953_v11  ;;  %v1956_v20 = vmul.f32 %v4146_v1, %v930_v5  ;;  %v1957_v21 = vmul.f32 %v4146_v1, %v931_v6  ;;  %v1958_v22 = vmul.f32 %v4146_v1, %v932_v7  ;;  %v953_v10 = vld [vmem:[%s12344_s2 + $0x1d48] sm:$0xff] }
 0x227   :  { %4001 = vst [vmem:[%s12345_s3 + $0x1c68] sm:$0xff] %v2977_v14  ;;  %4002 = vst [vmem:[%s12345_s3 + $0x1c70] sm:$0xff] %v2978_v15  ;;  %v2980_v25 = vadd.f32 %v4151_v2, %v1954_v16  ;;  %v2981_v26 = vadd.f32 %v4151_v2, %v1955_v17  ;;  %v1959_v27 = vmul.f32 %v4146_v1, %v933_v12  ;;  %v954_v15 = vld [vmem:[%s12344_s2 + $0x1d50] sm:$0xff]  ;;  %v955_v16 = vld [vmem:[%s12344_s2 + $0x1d58] sm:$0xff] }
 0x228   :  { %v1960_v28 = vmul.f32 %v4146_v1, %v934_v13  ;;  %4003 = vst [vmem:[%s12345_s3 + $0x1c78] sm:$0xff] %v2979_v19  ;;  %v2982_v32 = vadd.f32 %v4151_v2, %v1956_v20  ;;  %v2983_v33 = vadd.f32 %v4151_v2, %v1957_v21  ;;  %v2984_v34 = vadd.f32 %v4151_v2, %v1958_v22  ;;  %v956_v17 = vld [vmem:[%s12344_s2 + $0x1d60] sm:$0xff]  ;;  %v957_v22 = vld [vmem:[%s12344_s2 + $0x1d68] sm:$0xff] }
 0x229   :  { %v1961_v35 = vmul.f32 %v4146_v1, %v935_v18  ;;  %4004 = vst [vmem:[%s12345_s3 + $0x1c80] sm:$0xff] %v2980_v25  ;;  %4005 = vst [vmem:[%s12345_s3 + $0x1c88] sm:$0xff] %v2981_v26  ;;  %v2985_v38 = vadd.f32 %v4151_v2, %v1959_v27  ;;  %v1962_v40 = vmul.f32 %v4146_v1, %v936_v23  ;;  %v958_v23 = vld [vmem:[%s12344_s2 + $0x1d70] sm:$0xff] }
 0x22a   :  { %v2986_v39 = vadd.f32 %v4151_v2, %v1960_v28  ;;  %v1963_v41 = vmul.f32 %v4146_v1, %v937_v24  ;;  %4006 = vst [vmem:[%s12345_s3 + $0x1c90] sm:$0xff] %v2982_v32  ;;  %4007 = vst [vmem:[%s12345_s3 + $0x1c98] sm:$0xff] %v2983_v33  ;;  %v1964_v44 = vmul.f32 %v4146_v1, %v938_v29  ;;  %v959_v28 = vld [vmem:[%s12344_s2 + $0x1d78] sm:$0xff]  ;;  %v960_v33 = vld [vmem:[%s12344_s2 + $0x1d80] sm:$0xff] }
 0x22b   :  { %4008 = vst [vmem:[%s12345_s3 + $0x1ca0] sm:$0xff] %v2984_v34  ;;  %v2987_v43 = vadd.f32 %v4151_v2, %v1961_v35  ;;  %v1965_v45 = vmul.f32 %v4146_v1, %v939_v30  ;;  %v1966_v46 = vmul.f32 %v4146_v1, %v940_v31  ;;  %4009 = vst [vmem:[%s12345_s3 + $0x1ca8] sm:$0xff] %v2985_v38  ;;  %v961_v34 = vld [vmem:[%s12344_s2 + $0x1d88] sm:$0xff] }
 0x22c   :  { %4010 = vst [vmem:[%s12345_s3 + $0x1cb0] sm:$0xff] %v2986_v39  ;;  %v2988_v49 = vadd.f32 %v4151_v2, %v1962_v40  ;;  %v2989_v50 = vadd.f32 %v4151_v2, %v1963_v41  ;;  %v1967_v51 = vmul.f32 %v4146_v1, %v941_v36  ;;  %v1968_v52 = vmul.f32 %v4146_v1, %v942_v37  ;;  %v962_v39 = vld [vmem:[%s12344_s2 + $0x1d90] sm:$0xff]  ;;  %v963_v40 = vld [vmem:[%s12344_s2 + $0x1d98] sm:$0xff]  ;;  %v964_v41 = vld [vmem:[%s12344_s2 + $0x1da0] sm:$0xff] }
 0x22d   :  { %4011 = vst [vmem:[%s12345_s3 + $0x1cb8] sm:$0xff] %v2987_v43  ;;  %v2990_v56 = vadd.f32 %v4151_v2, %v1964_v44  ;;  %v2991_v57 = vadd.f32 %v4151_v2, %v1965_v45  ;;  %v2992_v58 = vadd.f32 %v4151_v2, %v1966_v46  ;;  %v1969_v59 = vmul.f32 %v4146_v1, %v943_v42  ;;  %v965_v46 = vld [vmem:[%s12344_s2 + $0x1da8] sm:$0xff] }
 0x22e   :  { %4012 = vst [vmem:[%s12345_s3 + $0x1cc0] sm:$0xff] %v2988_v49  ;;  %4013 = vst [vmem:[%s12345_s3 + $0x1cc8] sm:$0xff] %v2989_v50  ;;  %v2993_v62 = vadd.f32 %v4151_v2, %v1967_v51  ;;  %v2994_v63 = vadd.f32 %v4151_v2, %v1968_v52  ;;  %v1970_v0 = vmul.f32 %v4146_v1, %v944_v47  ;;  %v966_v47 = vld [vmem:[%s12344_s2 + $0x1db0] sm:$0xff]  ;;  %v967_v52 = vld [vmem:[%s12344_s2 + $0x1db8] sm:$0xff] }
 0x22f   :  { %v1971_v3 = vmul.f32 %v4146_v1, %v945_v48  ;;  %4014 = vst [vmem:[%s12345_s3 + $0x1cd0] sm:$0xff] %v2990_v56  ;;  %4015 = vst [vmem:[%s12345_s3 + $0x1cd8] sm:$0xff] %v2991_v57  ;;  %v2995_v5 = vadd.f32 %v4151_v2, %v1969_v59  ;;  %v1972_v6 = vmul.f32 %v4146_v1, %v946_v53  ;;  %v968_v57 = vld [vmem:[%s12344_s2 + $0x1dc0] sm:$0xff] }
 0x230   :  { %4016 = vst [vmem:[%s12345_s3 + $0x1ce0] sm:$0xff] %v2992_v58  ;;  %v1973_v7 = vmul.f32 %v4146_v1, %v947_v54  ;;  %v1974_v8 = vmul.f32 %v4146_v1, %v948_v55  ;;  %4017 = vst [vmem:[%s12345_s3 + $0x1ce8] sm:$0xff] %v2993_v62  ;;  %v2996_v11 = vadd.f32 %v4151_v2, %v1970_v0  ;;  %v969_v58 = vld [vmem:[%s12344_s2 + $0x1dc8] sm:$0xff]  ;;  %v971_v0 = vld [vmem:[%s12344_s2 + $0x1dd8] sm:$0xff] }
 0x231   :  { %4018 = vst [vmem:[%s12345_s3 + $0x1cf0] sm:$0xff] %v2994_v63  ;;  %v2997_v12 = vadd.f32 %v4151_v2, %v1971_v3  ;;  %v1975_v13 = vmul.f32 %v4146_v1, %v949_v60  ;;  %v1976_v14 = vmul.f32 %v4146_v1, %v950_v61  ;;  %4019 = vst [vmem:[%s12345_s3 + $0x1cf8] sm:$0xff] %v2995_v5  ;;  %v970_v63 = vld [vmem:[%s12344_s2 + $0x1dd0] sm:$0xff]  ;;  %v972_v3 = vld [vmem:[%s12344_s2 + $0x1de0] sm:$0xff] }
 0x232   :  { %v2998_v18 = vadd.f32 %v4151_v2, %v1972_v6  ;;  %v2999_v19 = vadd.f32 %v4151_v2, %v1973_v7  ;;  %v3000_v20 = vadd.f32 %v4151_v2, %v1974_v8  ;;  %v1977_v21 = vmul.f32 %v4146_v1, %v951_v4  ;;  %4020 = vst [vmem:[%s12345_s3 + $0x1d00] sm:$0xff] %v2996_v11  ;;  %v973_v8 = vld [vmem:[%s12344_s2 + $0x1de8] sm:$0xff] }
 0x233   :  { %4021 = vst [vmem:[%s12345_s3 + $0x1d08] sm:$0xff] %v2997_v12  ;;  %v3001_v24 = vadd.f32 %v4151_v2, %v1975_v13  ;;  %v3002_v25 = vadd.f32 %v4151_v2, %v1976_v14  ;;  %v1978_v26 = vmul.f32 %v4146_v1, %v952_v9  ;;  %v1979_v27 = vmul.f32 %v4146_v1, %v953_v10  ;;  %v974_v9 = vld [vmem:[%s12344_s2 + $0x1df0] sm:$0xff]  ;;  %v975_v14 = vld [vmem:[%s12344_s2 + $0x1df8] sm:$0xff] }
 0x234   :  { %4022 = vst [vmem:[%s12345_s3 + $0x1d10] sm:$0xff] %v2998_v18  ;;  %4023 = vst [vmem:[%s12345_s3 + $0x1d18] sm:$0xff] %v2999_v19  ;;  %v3003_v29 = vadd.f32 %v4151_v2, %v1977_v21  ;;  %v1980_v30 = vmul.f32 %v4146_v1, %v954_v15  ;;  %v1981_v31 = vmul.f32 %v4146_v1, %v955_v16  ;;  %v976_v19 = vld [vmem:[%s12344_s2 + $0x1e00] sm:$0xff] }
 0x235   :  { %4024 = vst [vmem:[%s12345_s3 + $0x1d20] sm:$0xff] %v3000_v20  ;;  %v1982_v32 = vmul.f32 %v4146_v1, %v956_v17  ;;  %4025 = vst [vmem:[%s12345_s3 + $0x1d28] sm:$0xff] %v3001_v24  ;;  %v3004_v35 = vadd.f32 %v4151_v2, %v1978_v26  ;;  %v3005_v36 = vadd.f32 %v4151_v2, %v1979_v27  ;;  %v977_v20 = vld [vmem:[%s12344_s2 + $0x1e08] sm:$0xff]  ;;  %v979_v26 = vld [vmem:[%s12344_s2 + $0x1e18] sm:$0xff] }
 0x236   :  { %4026 = vst [vmem:[%s12345_s3 + $0x1d30] sm:$0xff] %v3002_v25  ;;  %v1983_v37 = vmul.f32 %v4146_v1, %v957_v22  ;;  %v1984_v38 = vmul.f32 %v4146_v1, %v958_v23  ;;  %4027 = vst [vmem:[%s12345_s3 + $0x1d38] sm:$0xff] %v3003_v29  ;;  %v3006_v42 = vadd.f32 %v4151_v2, %v1980_v30  ;;  %v978_v25 = vld [vmem:[%s12344_s2 + $0x1e10] sm:$0xff]  ;;  %v980_v27 = vld [vmem:[%s12344_s2 + $0x1e20] sm:$0xff] }
 0x237   :  { %v3007_v43 = vadd.f32 %v4151_v2, %v1981_v31  ;;  %v3008_v44 = vadd.f32 %v4151_v2, %v1982_v32  ;;  %v1985_v45 = vmul.f32 %v4146_v1, %v959_v28  ;;  %4028 = vst [vmem:[%s12345_s3 + $0x1d40] sm:$0xff] %v3004_v35  ;;  %4029 = vst [vmem:[%s12345_s3 + $0x1d48] sm:$0xff] %v3005_v36  ;;  %v981_v32 = vld [vmem:[%s12344_s2 + $0x1e28] sm:$0xff] }
 0x238   :  { %v3009_v48 = vadd.f32 %v4151_v2, %v1983_v37  ;;  %v3010_v49 = vadd.f32 %v4151_v2, %v1984_v38  ;;  %v1986_v50 = vmul.f32 %v4146_v1, %v960_v33  ;;  %v1987_v51 = vmul.f32 %v4146_v1, %v961_v34  ;;  %4030 = vst [vmem:[%s12345_s3 + $0x1d50] sm:$0xff] %v3006_v42  ;;  %v982_v33 = vld [vmem:[%s12344_s2 + $0x1e30] sm:$0xff]  ;;  %v983_v38 = vld [vmem:[%s12344_s2 + $0x1e38] sm:$0xff] }
 0x239   :  { %4031 = vst [vmem:[%s12345_s3 + $0x1d58] sm:$0xff] %v3007_v43  ;;  %4032 = vst [vmem:[%s12345_s3 + $0x1d60] sm:$0xff] %v3008_v44  ;;  %v3011_v53 = vadd.f32 %v4151_v2, %v1985_v45  ;;  %v1988_v54 = vmul.f32 %v4146_v1, %v962_v39  ;;  %v1989_v55 = vmul.f32 %v4146_v1, %v963_v40  ;;  %v984_v43 = vld [vmem:[%s12344_s2 + $0x1e40] sm:$0xff]  ;;  %v985_v44 = vld [vmem:[%s12344_s2 + $0x1e48] sm:$0xff] }
 0x23a   :  { %v1990_v56 = vmul.f32 %v4146_v1, %v964_v41  ;;  %4033 = vst [vmem:[%s12345_s3 + $0x1d68] sm:$0xff] %v3009_v48  ;;  %4034 = vst [vmem:[%s12345_s3 + $0x1d70] sm:$0xff] %v3010_v49  ;;  %v3012_v59 = vadd.f32 %v4151_v2, %v1986_v50  ;;  %v3013_v60 = vadd.f32 %v4151_v2, %v1987_v51  ;;  %v986_v49 = vld [vmem:[%s12344_s2 + $0x1e50] sm:$0xff]  ;;  %v987_v50 = vld [vmem:[%s12344_s2 + $0x1e58] sm:$0xff] }
 0x23b   :  { %v1991_v61 = vmul.f32 %v4146_v1, %v965_v46  ;;  %v1992_v62 = vmul.f32 %v4146_v1, %v966_v47  ;;  %4035 = vst [vmem:[%s12345_s3 + $0x1d78] sm:$0xff] %v3011_v53  ;;  %v3014_v4 = vadd.f32 %v4151_v2, %v1988_v54  ;;  %v3015_v5 = vadd.f32 %v4151_v2, %v1989_v55  ;;  %v988_v51 = vld [vmem:[%s12344_s2 + $0x1e60] sm:$0xff] }
 0x23c   :  { %v3016_v6 = vadd.f32 %v4151_v2, %v1990_v56  ;;  %v1993_v7 = vmul.f32 %v4146_v1, %v967_v52  ;;  %4036 = vst [vmem:[%s12345_s3 + $0x1d80] sm:$0xff] %v3012_v59  ;;  %4037 = vst [vmem:[%s12345_s3 + $0x1d88] sm:$0xff] %v3013_v60  ;;  %v1994_v12 = vmul.f32 %v4146_v1, %v968_v57  ;;  %v989_v56 = vld [vmem:[%s12344_s2 + $0x1e68] sm:$0xff]  ;;  %v990_v57 = vld [vmem:[%s12344_s2 + $0x1e70] sm:$0xff] }
 0x23d   :  { %v3017_v10 = vadd.f32 %v4151_v2, %v1991_v61  ;;  %v3018_v11 = vadd.f32 %v4151_v2, %v1992_v62  ;;  %v1995_v13 = vmul.f32 %v4146_v1, %v969_v58  ;;  %4038 = vst [vmem:[%s12345_s3 + $0x1d90] sm:$0xff] %v3014_v4  ;;  %4039 = vst [vmem:[%s12345_s3 + $0x1d98] sm:$0xff] %v3015_v5  ;;  %v991_v62 = vld [vmem:[%s12344_s2 + $0x1e78] sm:$0xff]  ;;  %v992_v5 = vld [vmem:[%s12344_s2 + $0x1e80] sm:$0xff] }
 0x23e   :  { %4040 = vst [vmem:[%s12345_s3 + $0x1da0] sm:$0xff] %v3016_v6  ;;  %v3019_v15 = vadd.f32 %v4151_v2, %v1993_v7  ;;  %v1996_v16 = vmul.f32 %v4146_v1, %v970_v63  ;;  %v1997_v17 = vmul.f32 %v4146_v1, %v971_v0  ;;  %v1998_v18 = vmul.f32 %v4146_v1, %v972_v3  ;;  %v993_v6 = vld [vmem:[%s12344_s2 + $0x1e88] sm:$0xff] }
 0x23f   :  { %4041 = vst [vmem:[%s12345_s3 + $0x1da8] sm:$0xff] %v3017_v10  ;;  %4042 = vst [vmem:[%s12345_s3 + $0x1db0] sm:$0xff] %v3018_v11  ;;  %v3020_v21 = vadd.f32 %v4151_v2, %v1994_v12  ;;  %v3021_v22 = vadd.f32 %v4151_v2, %v1995_v13  ;;  %v1999_v23 = vmul.f32 %v4146_v1, %v973_v8  ;;  %v994_v11 = vld [vmem:[%s12344_s2 + $0x1e90] sm:$0xff]  ;;  %v995_v12 = vld [vmem:[%s12344_s2 + $0x1e98] sm:$0xff] }
 0x240   :  { %v2000_v24 = vmul.f32 %v4146_v1, %v974_v9  ;;  %4043 = vst [vmem:[%s12345_s3 + $0x1db8] sm:$0xff] %v3019_v15  ;;  %v3022_v28 = vadd.f32 %v4151_v2, %v1996_v16  ;;  %v3023_v29 = vadd.f32 %v4151_v2, %v1997_v17  ;;  %v3024_v30 = vadd.f32 %v4151_v2, %v1998_v18  ;;  %v996_v13 = vld [vmem:[%s12344_s2 + $0x1ea0] sm:$0xff]  ;;  %v997_v18 = vld [vmem:[%s12344_s2 + $0x1ea8] sm:$0xff] }
 0x241   :  { %v2001_v31 = vmul.f32 %v4146_v1, %v975_v14  ;;  %4044 = vst [vmem:[%s12345_s3 + $0x1dc0] sm:$0xff] %v3020_v21  ;;  %4045 = vst [vmem:[%s12345_s3 + $0x1dc8] sm:$0xff] %v3021_v22  ;;  %v3025_v34 = vadd.f32 %v4151_v2, %v1999_v23  ;;  %v2002_v36 = vmul.f32 %v4146_v1, %v976_v19  ;;  %v998_v19 = vld [vmem:[%s12344_s2 + $0x1eb0] sm:$0xff] }
 0x242   :  { %v3026_v35 = vadd.f32 %v4151_v2, %v2000_v24  ;;  %v2003_v37 = vmul.f32 %v4146_v1, %v977_v20  ;;  %4046 = vst [vmem:[%s12345_s3 + $0x1dd0] sm:$0xff] %v3022_v28  ;;  %4047 = vst [vmem:[%s12345_s3 + $0x1dd8] sm:$0xff] %v3023_v29  ;;  %v2004_v40 = vmul.f32 %v4146_v1, %v978_v25  ;;  %v999_v24 = vld [vmem:[%s12344_s2 + $0x1eb8] sm:$0xff]  ;;  %v1000_v29 = vld [vmem:[%s12344_s2 + $0x1ec0] sm:$0xff] }
 0x243   :  { %4048 = vst [vmem:[%s12345_s3 + $0x1de0] sm:$0xff] %v3024_v30  ;;  %v3027_v39 = vadd.f32 %v4151_v2, %v2001_v31  ;;  %v2005_v41 = vmul.f32 %v4146_v1, %v979_v26  ;;  %v2006_v42 = vmul.f32 %v4146_v1, %v980_v27  ;;  %4049 = vst [vmem:[%s12345_s3 + $0x1de8] sm:$0xff] %v3025_v34  ;;  %v1001_v30 = vld [vmem:[%s12344_s2 + $0x1ec8] sm:$0xff] }
 0x244   :  { %4050 = vst [vmem:[%s12345_s3 + $0x1df0] sm:$0xff] %v3026_v35  ;;  %v3028_v45 = vadd.f32 %v4151_v2, %v2002_v36  ;;  %v3029_v46 = vadd.f32 %v4151_v2, %v2003_v37  ;;  %v2007_v47 = vmul.f32 %v4146_v1, %v981_v32  ;;  %v2008_v48 = vmul.f32 %v4146_v1, %v982_v33  ;;  %v1002_v35 = vld [vmem:[%s12344_s2 + $0x1ed0] sm:$0xff]  ;;  %v1003_v36 = vld [vmem:[%s12344_s2 + $0x1ed8] sm:$0xff]  ;;  %v1004_v37 = vld [vmem:[%s12344_s2 + $0x1ee0] sm:$0xff] }
 0x245   :  { %4051 = vst [vmem:[%s12345_s3 + $0x1df8] sm:$0xff] %v3027_v39  ;;  %v3030_v52 = vadd.f32 %v4151_v2, %v2004_v40  ;;  %v3031_v53 = vadd.f32 %v4151_v2, %v2005_v41  ;;  %v3032_v54 = vadd.f32 %v4151_v2, %v2006_v42  ;;  %v2009_v55 = vmul.f32 %v4146_v1, %v983_v38  ;;  %v1005_v42 = vld [vmem:[%s12344_s2 + $0x1ee8] sm:$0xff] }
 0x246   :  { %4052 = vst [vmem:[%s12345_s3 + $0x1e00] sm:$0xff] %v3028_v45  ;;  %4053 = vst [vmem:[%s12345_s3 + $0x1e08] sm:$0xff] %v3029_v46  ;;  %v3033_v58 = vadd.f32 %v4151_v2, %v2007_v47  ;;  %v3034_v59 = vadd.f32 %v4151_v2, %v2008_v48  ;;  %v2010_v60 = vmul.f32 %v4146_v1, %v984_v43  ;;  %v1006_v43 = vld [vmem:[%s12344_s2 + $0x1ef0] sm:$0xff]  ;;  %v1007_v48 = vld [vmem:[%s12344_s2 + $0x1ef8] sm:$0xff] }
 0x247   :  { %v2011_v61 = vmul.f32 %v4146_v1, %v985_v44  ;;  %4054 = vst [vmem:[%s12345_s3 + $0x1e10] sm:$0xff] %v3030_v52  ;;  %4055 = vst [vmem:[%s12345_s3 + $0x1e18] sm:$0xff] %v3031_v53  ;;  %v3035_v63 = vadd.f32 %v4151_v2, %v2009_v55  ;;  %v2012_v0 = vmul.f32 %v4146_v1, %v986_v49  ;;  %v1008_v53 = vld [vmem:[%s12344_s2 + $0x1f00] sm:$0xff] }
 0x248   :  { %4056 = vst [vmem:[%s12345_s3 + $0x1e20] sm:$0xff] %v3032_v54  ;;  %v2013_v3 = vmul.f32 %v4146_v1, %v987_v50  ;;  %v2014_v4 = vmul.f32 %v4146_v1, %v988_v51  ;;  %4057 = vst [vmem:[%s12345_s3 + $0x1e28] sm:$0xff] %v3033_v58  ;;  %v3036_v7 = vadd.f32 %v4151_v2, %v2010_v60  ;;  %v1009_v54 = vld [vmem:[%s12344_s2 + $0x1f08] sm:$0xff]  ;;  %v1011_v60 = vld [vmem:[%s12344_s2 + $0x1f18] sm:$0xff] }
 0x249   :  { %4058 = vst [vmem:[%s12345_s3 + $0x1e30] sm:$0xff] %v3034_v59  ;;  %v3037_v8 = vadd.f32 %v4151_v2, %v2011_v61  ;;  %v2015_v9 = vmul.f32 %v4146_v1, %v989_v56  ;;  %v2016_v10 = vmul.f32 %v4146_v1, %v990_v57  ;;  %4059 = vst [vmem:[%s12345_s3 + $0x1e38] sm:$0xff] %v3035_v63  ;;  %v1010_v59 = vld [vmem:[%s12344_s2 + $0x1f10] sm:$0xff]  ;;  %v1012_v61 = vld [vmem:[%s12344_s2 + $0x1f20] sm:$0xff] }
 0x24a   :  { %v3038_v14 = vadd.f32 %v4151_v2, %v2012_v0  ;;  %v3039_v15 = vadd.f32 %v4151_v2, %v2013_v3  ;;  %v3040_v16 = vadd.f32 %v4151_v2, %v2014_v4  ;;  %v2017_v17 = vmul.f32 %v4146_v1, %v991_v62  ;;  %4060 = vst [vmem:[%s12345_s3 + $0x1e40] sm:$0xff] %v3036_v7  ;;  %v1013_v4 = vld [vmem:[%s12344_s2 + $0x1f28] sm:$0xff] }
 0x24b   :  { %4061 = vst [vmem:[%s12345_s3 + $0x1e48] sm:$0xff] %v3037_v8  ;;  %v3041_v20 = vadd.f32 %v4151_v2, %v2015_v9  ;;  %v3042_v21 = vadd.f32 %v4151_v2, %v2016_v10  ;;  %v2018_v22 = vmul.f32 %v4146_v1, %v992_v5  ;;  %v2019_v23 = vmul.f32 %v4146_v1, %v993_v6  ;;  %v1014_v5 = vld [vmem:[%s12344_s2 + $0x1f30] sm:$0xff]  ;;  %v1015_v10 = vld [vmem:[%s12344_s2 + $0x1f38] sm:$0xff] }
 0x24c   :  { %4062 = vst [vmem:[%s12345_s3 + $0x1e50] sm:$0xff] %v3038_v14  ;;  %4063 = vst [vmem:[%s12345_s3 + $0x1e58] sm:$0xff] %v3039_v15  ;;  %v3043_v25 = vadd.f32 %v4151_v2, %v2017_v17  ;;  %v2020_v26 = vmul.f32 %v4146_v1, %v994_v11  ;;  %v2021_v27 = vmul.f32 %v4146_v1, %v995_v12  ;;  %v1016_v15 = vld [vmem:[%s12344_s2 + $0x1f40] sm:$0xff] }
 0x24d   :  { %4064 = vst [vmem:[%s12345_s3 + $0x1e60] sm:$0xff] %v3040_v16  ;;  %v2022_v28 = vmul.f32 %v4146_v1, %v996_v13  ;;  %4065 = vst [vmem:[%s12345_s3 + $0x1e68] sm:$0xff] %v3041_v20  ;;  %v3044_v31 = vadd.f32 %v4151_v2, %v2018_v22  ;;  %v3045_v32 = vadd.f32 %v4151_v2, %v2019_v23  ;;  %v1017_v16 = vld [vmem:[%s12344_s2 + $0x1f48] sm:$0xff]  ;;  %v1019_v22 = vld [vmem:[%s12344_s2 + $0x1f58] sm:$0xff] }
 0x24e   :  { %4066 = vst [vmem:[%s12345_s3 + $0x1e70] sm:$0xff] %v3042_v21  ;;  %v2023_v33 = vmul.f32 %v4146_v1, %v997_v18  ;;  %v2024_v34 = vmul.f32 %v4146_v1, %v998_v19  ;;  %4067 = vst [vmem:[%s12345_s3 + $0x1e78] sm:$0xff] %v3043_v25  ;;  %v3046_v38 = vadd.f32 %v4151_v2, %v2020_v26  ;;  %v1018_v21 = vld [vmem:[%s12344_s2 + $0x1f50] sm:$0xff]  ;;  %v1020_v23 = vld [vmem:[%s12344_s2 + $0x1f60] sm:$0xff] }
 0x24f   :  { %v3047_v39 = vadd.f32 %v4151_v2, %v2021_v27  ;;  %v3048_v40 = vadd.f32 %v4151_v2, %v2022_v28  ;;  %v2025_v41 = vmul.f32 %v4146_v1, %v999_v24  ;;  %4068 = vst [vmem:[%s12345_s3 + $0x1e80] sm:$0xff] %v3044_v31  ;;  %4069 = vst [vmem:[%s12345_s3 + $0x1e88] sm:$0xff] %v3045_v32  ;;  %v1021_v28 = vld [vmem:[%s12344_s2 + $0x1f68] sm:$0xff] }
 0x250   :  { %v3049_v44 = vadd.f32 %v4151_v2, %v2023_v33  ;;  %v3050_v45 = vadd.f32 %v4151_v2, %v2024_v34  ;;  %v2026_v46 = vmul.f32 %v4146_v1, %v1000_v29  ;;  %v2027_v47 = vmul.f32 %v4146_v1, %v1001_v30  ;;  %4070 = vst [vmem:[%s12345_s3 + $0x1e90] sm:$0xff] %v3046_v38  ;;  %v1022_v29 = vld [vmem:[%s12344_s2 + $0x1f70] sm:$0xff]  ;;  %v1023_v34 = vld [vmem:[%s12344_s2 + $0x1f78] sm:$0xff] }
 0x251   :  { %4071 = vst [vmem:[%s12345_s3 + $0x1e98] sm:$0xff] %v3047_v39  ;;  %4072 = vst [vmem:[%s12345_s3 + $0x1ea0] sm:$0xff] %v3048_v40  ;;  %v3051_v49 = vadd.f32 %v4151_v2, %v2025_v41  ;;  %v2028_v50 = vmul.f32 %v4146_v1, %v1002_v35  ;;  %v2029_v51 = vmul.f32 %v4146_v1, %v1003_v36  ;;  %v1024_v39 = vld [vmem:[%s12344_s2 + $0x1f80] sm:$0xff]  ;;  %v1025_v40 = vld [vmem:[%s12344_s2 + $0x1f88] sm:$0xff] }
 0x252   :  { %v2030_v52 = vmul.f32 %v4146_v1, %v1004_v37  ;;  %4073 = vst [vmem:[%s12345_s3 + $0x1ea8] sm:$0xff] %v3049_v44  ;;  %4074 = vst [vmem:[%s12345_s3 + $0x1eb0] sm:$0xff] %v3050_v45  ;;  %v3052_v55 = vadd.f32 %v4151_v2, %v2026_v46  ;;  %v3053_v56 = vadd.f32 %v4151_v2, %v2027_v47  ;;  %v1026_v45 = vld [vmem:[%s12344_s2 + $0x1f90] sm:$0xff]  ;;  %v1027_v46 = vld [vmem:[%s12344_s2 + $0x1f98] sm:$0xff] }
 0x253   :  { %v2031_v57 = vmul.f32 %v4146_v1, %v1005_v42  ;;  %v2032_v58 = vmul.f32 %v4146_v1, %v1006_v43  ;;  %4075 = vst [vmem:[%s12345_s3 + $0x1eb8] sm:$0xff] %v3051_v49  ;;  %v3054_v62 = vadd.f32 %v4151_v2, %v2028_v50  ;;  %v3055_v63 = vadd.f32 %v4151_v2, %v2029_v51  ;;  %v1028_v47 = vld [vmem:[%s12344_s2 + $0x1fa0] sm:$0xff] }
 0x254   :  { %v3056_v0 = vadd.f32 %v4151_v2, %v2030_v52  ;;  %v2033_v3 = vmul.f32 %v4146_v1, %v1007_v48  ;;  %4076 = vst [vmem:[%s12345_s3 + $0x1ec0] sm:$0xff] %v3052_v55  ;;  %4077 = vst [vmem:[%s12345_s3 + $0x1ec8] sm:$0xff] %v3053_v56  ;;  %v2034_v8 = vmul.f32 %v4146_v1, %v1008_v53  ;;  %v1029_v52 = vld [vmem:[%s12344_s2 + $0x1fa8] sm:$0xff]  ;;  %v1030_v53 = vld [vmem:[%s12344_s2 + $0x1fb0] sm:$0xff] }
 0x255   :  { %v3057_v6 = vadd.f32 %v4151_v2, %v2031_v57  ;;  %v3058_v7 = vadd.f32 %v4151_v2, %v2032_v58  ;;  %v2035_v9 = vmul.f32 %v4146_v1, %v1009_v54  ;;  %4078 = vst [vmem:[%s12345_s3 + $0x1ed0] sm:$0xff] %v3054_v62  ;;  %4079 = vst [vmem:[%s12345_s3 + $0x1ed8] sm:$0xff] %v3055_v63  ;;  %v1031_v58 = vld [vmem:[%s12344_s2 + $0x1fb8] sm:$0xff]  ;;  %v1032_v63 = vld [vmem:[%s12344_s2 + $0x1fc0] sm:$0xff] }
 0x256   :  { %4080 = vst [vmem:[%s12345_s3 + $0x1ee0] sm:$0xff] %v3056_v0  ;;  %v3059_v11 = vadd.f32 %v4151_v2, %v2033_v3  ;;  %v2036_v12 = vmul.f32 %v4146_v1, %v1010_v59  ;;  %v2037_v13 = vmul.f32 %v4146_v1, %v1011_v60  ;;  %v2038_v14 = vmul.f32 %v4146_v1, %v1012_v61  ;;  %v1033_v0 = vld [vmem:[%s12344_s2 + $0x1fc8] sm:$0xff] }
 0x257   :  { %4081 = vst [vmem:[%s12345_s3 + $0x1ee8] sm:$0xff] %v3057_v6  ;;  %4082 = vst [vmem:[%s12345_s3 + $0x1ef0] sm:$0xff] %v3058_v7  ;;  %v3060_v17 = vadd.f32 %v4151_v2, %v2034_v8  ;;  %v3061_v18 = vadd.f32 %v4151_v2, %v2035_v9  ;;  %v2039_v19 = vmul.f32 %v4146_v1, %v1013_v4  ;;  %v1034_v7 = vld [vmem:[%s12344_s2 + $0x1fd0] sm:$0xff]  ;;  %v1035_v8 = vld [vmem:[%s12344_s2 + $0x1fd8] sm:$0xff] }
 0x258   :  { %v2040_v20 = vmul.f32 %v4146_v1, %v1014_v5  ;;  %4083 = vst [vmem:[%s12345_s3 + $0x1ef8] sm:$0xff] %v3059_v11  ;;  %v3062_v24 = vadd.f32 %v4151_v2, %v2036_v12  ;;  %v3063_v25 = vadd.f32 %v4151_v2, %v2037_v13  ;;  %v3064_v26 = vadd.f32 %v4151_v2, %v2038_v14  ;;  %v1036_v9 = vld [vmem:[%s12344_s2 + $0x1fe0] sm:$0xff]  ;;  %v1037_v14 = vld [vmem:[%s12344_s2 + $0x1fe8] sm:$0xff] }
 0x259   :  { %v2041_v27 = vmul.f32 %v4146_v1, %v1015_v10  ;;  %4084 = vst [vmem:[%s12345_s3 + $0x1f00] sm:$0xff] %v3060_v17  ;;  %4085 = vst [vmem:[%s12345_s3 + $0x1f08] sm:$0xff] %v3061_v18  ;;  %v3065_v30 = vadd.f32 %v4151_v2, %v2039_v19  ;;  %v2042_v32 = vmul.f32 %v4146_v1, %v1016_v15  ;;  %v1038_v15 = vld [vmem:[%s12344_s2 + $0x1ff0] sm:$0xff] }
 0x25a   :  { %v3066_v31 = vadd.f32 %v4151_v2, %v2040_v20  ;;  %v2043_v33 = vmul.f32 %v4146_v1, %v1017_v16  ;;  %4086 = vst [vmem:[%s12345_s3 + $0x1f10] sm:$0xff] %v3062_v24  ;;  %4087 = vst [vmem:[%s12345_s3 + $0x1f18] sm:$0xff] %v3063_v25  ;;  %v2044_v36 = vmul.f32 %v4146_v1, %v1018_v21  ;;  %v1039_v20 = vld [vmem:[%s12344_s2 + $0x1ff8] sm:$0xff] }
 0x25b   :  { %4088 = vst [vmem:[%s12345_s3 + $0x1f20] sm:$0xff] %v3064_v26  ;;  %v3067_v35 = vadd.f32 %v4151_v2, %v2041_v27  ;;  %v2045_v37 = vmul.f32 %v4146_v1, %v1019_v22  ;;  %v2046_v38 = vmul.f32 %v4146_v1, %v1020_v23  ;;  %4089 = vst [vmem:[%s12345_s3 + $0x1f28] sm:$0xff] %v3065_v30 }
 0x25c   :  { %4090 = vst [vmem:[%s12345_s3 + $0x1f30] sm:$0xff] %v3066_v31  ;;  %v3068_v41 = vadd.f32 %v4151_v2, %v2042_v32  ;;  %v3069_v42 = vadd.f32 %v4151_v2, %v2043_v33  ;;  %v2047_v43 = vmul.f32 %v4146_v1, %v1021_v28  ;;  %v2048_v44 = vmul.f32 %v4146_v1, %v1022_v29 }
 0x25d   :  { %4091 = vst [vmem:[%s12345_s3 + $0x1f38] sm:$0xff] %v3067_v35  ;;  %v3070_v48 = vadd.f32 %v4151_v2, %v2044_v36  ;;  %v3071_v49 = vadd.f32 %v4151_v2, %v2045_v37  ;;  %v3072_v50 = vadd.f32 %v4151_v2, %v2046_v38  ;;  %v2049_v51 = vmul.f32 %v4146_v1, %v1023_v34 }
 0x25e   :  { %4092 = vst [vmem:[%s12345_s3 + $0x1f40] sm:$0xff] %v3068_v41  ;;  %4093 = vst [vmem:[%s12345_s3 + $0x1f48] sm:$0xff] %v3069_v42  ;;  %v3073_v54 = vadd.f32 %v4151_v2, %v2047_v43  ;;  %v3074_v55 = vadd.f32 %v4151_v2, %v2048_v44  ;;  %v2050_v56 = vmul.f32 %v4146_v1, %v1024_v39 }
 0x25f   :  { %v2051_v57 = vmul.f32 %v4146_v1, %v1025_v40  ;;  %4094 = vst [vmem:[%s12345_s3 + $0x1f50] sm:$0xff] %v3070_v48  ;;  %4095 = vst [vmem:[%s12345_s3 + $0x1f58] sm:$0xff] %v3071_v49  ;;  %v3075_v59 = vadd.f32 %v4151_v2, %v2049_v51  ;;  %v2052_v60 = vmul.f32 %v4146_v1, %v1026_v45 }
 0x260   :  { %4096 = vst [vmem:[%s12345_s3 + $0x1f60] sm:$0xff] %v3072_v50  ;;  %v2053_v61 = vmul.f32 %v4146_v1, %v1027_v46  ;;  %v2054_v62 = vmul.f32 %v4146_v1, %v1028_v47  ;;  %4097 = vst [vmem:[%s12345_s3 + $0x1f68] sm:$0xff] %v3073_v54  ;;  %v3076_v3 = vadd.f32 %v4151_v2, %v2050_v56 }
 0x261   :  { %4098 = vst [vmem:[%s12345_s3 + $0x1f70] sm:$0xff] %v3074_v55  ;;  %v3077_v4 = vadd.f32 %v4151_v2, %v2051_v57  ;;  %v2055_v5 = vmul.f32 %v4146_v1, %v1029_v52  ;;  %v2056_v6 = vmul.f32 %v4146_v1, %v1030_v53  ;;  %4099 = vst [vmem:[%s12345_s3 + $0x1f78] sm:$0xff] %v3075_v59 }
 0x262   :  { %v3078_v10 = vadd.f32 %v4151_v2, %v2052_v60  ;;  %v3079_v11 = vadd.f32 %v4151_v2, %v2053_v61  ;;  %v3080_v12 = vadd.f32 %v4151_v2, %v2054_v62  ;;  %v2057_v13 = vmul.f32 %v4146_v1, %v1031_v58  ;;  %4100 = vst [vmem:[%s12345_s3 + $0x1f80] sm:$0xff] %v3076_v3 }
 0x263   :  { %4101 = vst [vmem:[%s12345_s3 + $0x1f88] sm:$0xff] %v3077_v4  ;;  %v3081_v16 = vadd.f32 %v4151_v2, %v2055_v5  ;;  %v3082_v17 = vadd.f32 %v4151_v2, %v2056_v6  ;;  %v2058_v18 = vmul.f32 %v4146_v1, %v1032_v63  ;;  %v2059_v19 = vmul.f32 %v4146_v1, %v1033_v0 }
 0x264   :  { %4102 = vst [vmem:[%s12345_s3 + $0x1f90] sm:$0xff] %v3078_v10  ;;  %4103 = vst [vmem:[%s12345_s3 + $0x1f98] sm:$0xff] %v3079_v11  ;;  %v3083_v21 = vadd.f32 %v4151_v2, %v2057_v13  ;;  %v2060_v22 = vmul.f32 %v4146_v1, %v1034_v7  ;;  %v2061_v23 = vmul.f32 %v4146_v1, %v1035_v8 }
 0x265   :  { %4104 = vst [vmem:[%s12345_s3 + $0x1fa0] sm:$0xff] %v3080_v12  ;;  %v2062_v24 = vmul.f32 %v4146_v1, %v1036_v9  ;;  %4105 = vst [vmem:[%s12345_s3 + $0x1fa8] sm:$0xff] %v3081_v16  ;;  %v3084_v25 = vadd.f32 %v4151_v2, %v2058_v18  ;;  %v3085_v26 = vadd.f32 %v4151_v2, %v2059_v19 }
 0x266   :  { %4106 = vst [vmem:[%s12345_s3 + $0x1fb0] sm:$0xff] %v3082_v17  ;;  %v2063_v27 = vmul.f32 %v4146_v1, %v1037_v14  ;;  %v2064_v28 = vmul.f32 %v4146_v1, %v1038_v15  ;;  %4107 = vst [vmem:[%s12345_s3 + $0x1fb8] sm:$0xff] %v3083_v21  ;;  %v3086_v29 = vadd.f32 %v4151_v2, %v2060_v22 }
 0x267   :  { %v3087_v30 = vadd.f32 %v4151_v2, %v2061_v23  ;;  %v3088_v31 = vadd.f32 %v4151_v2, %v2062_v24  ;;  %v2065_v32 = vmul.f32 %v4146_v1, %v1039_v20  ;;  %4108 = vst [vmem:[%s12345_s3 + $0x1fc0] sm:$0xff] %v3084_v25  ;;  %4109 = vst [vmem:[%s12345_s3 + $0x1fc8] sm:$0xff] %v3085_v26 }
 0x268   :  { %v3089_v33 = vadd.f32 %v4151_v2, %v2063_v27  ;;  %v3090_v34 = vadd.f32 %v4151_v2, %v2064_v28  ;;  %4110 = vst [vmem:[%s12345_s3 + $0x1fd0] sm:$0xff] %v3086_v29 }
 0x269   :  { %4111 = vst [vmem:[%s12345_s3 + $0x1fd8] sm:$0xff] %v3087_v30  ;;  %4112 = vst [vmem:[%s12345_s3 + $0x1fe0] sm:$0xff] %v3088_v31  ;;  %v3091_v1 = vadd.f32 %v4151_v2, %v2065_v32 }
 0x26a   :  { %4113 = vst [vmem:[%s12345_s3 + $0x1fe8] sm:$0xff] %v3089_v33  ;;  %4114 = vst [vmem:[%s12345_s3 + $0x1ff0] sm:$0xff] %v3090_v34 }
 0x26b   :  { %4115 = vst [vmem:[%s12345_s3 + $0x1ff8] sm:$0xff] %v3091_v1 }

</bundles_post_ra>
